<compile_context>
chip_gen: v5e
topology: v5e:2x2
jax: 0.10.0
libtpu: 0.0.40
codegen_flags: <defaults>
</compile_context>

<pallas_src>
import functools

import numpy as np
import jax
import jax.numpy as jnp
from jax.experimental import pallas as pl
from jax.experimental.pallas import tpu as pltpu


# ---------------------------------------------------------------------------
# Fused encoder kernel: conv1 matmul + 3 tap-accumulated convs + FC, all VMEM
# ---------------------------------------------------------------------------
def _encoder_kernel(p1_ref, w1_ref, b1_ref,
                    s2_ref, w2_ref, b2_ref,
                    s3_ref, w3_ref, b3_ref,
                    s4_ref, w4_ref, b4_ref,
                    wfc_ref, bfc_ref,
                    out_ref, *, batch, n_pix):
    f32 = jnp.float32

    def conv_taps(a_in, s_ref, w_ref, b_ref, relu):
        # out = sum_t  S_t @ a_in @ W_t  (+ bias);  S_t is a constant 0/1
        # matrix encoding tap offset, stride-2 and the padding=1 halo.
        acc = None
        for t in range(9):
            rows = jnp.dot(s_ref[t], a_in, preferred_element_type=f32)
            contrib = jnp.dot(rows, w_ref[t], preferred_element_type=f32)
            acc = contrib if acc is None else acc + contrib
        acc = acc + b_ref[...]                      # (M, Cout) + (1, Cout)
        if relu:
            acc = jnp.maximum(acc, 0.0)
        return acc

    # conv1 (stride 1): one matmul on the externally built im2col patches.
    a = jnp.dot(p1_ref[...], w1_ref[...], preferred_element_type=f32) + b1_ref[...]
    a = jnp.maximum(a, 0.0)                         # (B*H*W, 32)

    a = conv_taps(a, s2_ref, w2_ref, b2_ref, relu=True)    # (B*H*W/4,  64)
    a = conv_taps(a, s3_ref, w3_ref, b3_ref, relu=True)    # (B*H*W/16, 128)
    a = conv_taps(a, s4_ref, w4_ref, b4_ref, relu=False)   # (n_pix*B,  256), rows (p, b)

    # FC: the PyTorch NCHW flatten is absorbed by the spatial-major (p, b) row
    # order of `a` and the permuted weight wfc_ref[p, c, :] = w_fc[c*n_pix + p].
    z = None
    for p in range(n_pix):
        rows = a[p * batch:(p + 1) * batch, :]              # (B, 256)
        contrib = jnp.dot(rows, wfc_ref[p], preferred_element_type=f32)
        z = contrib if z is None else z + contrib
    out_ref[...] = z + bfc_ref[...]


# ---------------------------------------------------------------------------
# Constant 0/1 tap-selection matrices (shape-only -> baked as constants)
# ---------------------------------------------------------------------------
def _tap_selectors(batch, h_in, w_in, stride, spatial_major_out):
    """(9, M_out, M_in) matrices: S[t] @ flat_act picks, for 3x3 tap t, the
    input pixel feeding each output pixel (rows are all-zero where the tap
    falls into the padding=1 halo).  Input rows are (b, h, w) row-major;
    output rows are (b, ho, wo) row-major, or spatial-major ((ho, wo), b) for
    the last conv so the FC consumes contiguous per-pixel row blocks."""
    h_out = (h_in + 2 - 3) // stride + 1
    w_out = (w_in + 2 - 3) // stride + 1
    m_in = batch * h_in * w_in
    m_out = batch * h_out * w_out
    sel = np.zeros((9, m_out, m_in), np.float32)
    for ky in range(3):
        for kx in range(3):
            t = ky * 3 + kx
            for b in range(batch):
                for ho in range(h_out):
                    for wo in range(w_out):
                        hi = stride * ho + ky - 1
                        wi = stride * wo + kx - 1
                        if 0 <= hi < h_in and 0 <= wi < w_in:
                            if spatial_major_out:
                                orow = (ho * w_out + wo) * batch + b
                            else:
                                orow = (b * h_out + ho) * w_out + wo
                            irow = (b * h_in + hi) * w_in + wi
                            sel[t, orow, irow] = 1.0
    return sel


# ---------------------------------------------------------------------------
# Encoder forward: tiny JAX glue + ONE fused pallas_call
# ---------------------------------------------------------------------------
def encoder_forward(x_nchw, params):
    B, C, H, W = x_nchw.shape
    assert H % 8 == 0 and W % 8 == 0, (H, W)
    latent = params["b_fc"].shape[0]
    n_pix = (H // 8) * (W // 8)
    c4 = params["w4"].shape[-1]                       # 256

    # NCHW -> NHWC and im2col of the 3-channel input (tiny; stride-1, pad-1).
    x = jnp.transpose(x_nchw, (0, 2, 3, 1))
    xp = jnp.pad(x, ((0, 0), (1, 1), (1, 1), (0, 0)))
    taps = [xp[:, ky:ky + H, kx:kx + W, :] for ky in range(3) for kx in range(3)]
    p1 = jnp.stack(taps, axis=3).reshape(B * H * W, 9 * C)   # (B*H*W, 27)

    # Constant selection matrices for the three stride-2 convs.
    s2 = _tap_selectors(B, H, W, 2, spatial_major_out=False)
    s3 = _tap_selectors(B, H // 2, W // 2, 2, spatial_major_out=False)
    s4 = _tap_selectors(B, H // 4, W // 4, 2, spatial_major_out=True)

    # Weights in kernel-friendly layouts (trace-time reshapes only).
    w1 = params["w1"].reshape(9 * C, -1)                          # (27, 32)
    w2 = params["w2"].reshape((9,) + params["w2"].shape[2:])      # (9, 32, 64)
    w3 = params["w3"].reshape((9,) + params["w3"].shape[2:])      # (9, 64, 128)
    w4 = params["w4"].reshape((9,) + params["w4"].shape[2:])      # (9, 128, 256)
    # FC weight permuted so wfc_r[p, c, :] == w_fc[c * n_pix + p, :]
    wfc_r = params["w_fc"].reshape(c4, n_pix, latent).transpose(1, 0, 2)

    def row(b):
        return b.reshape(1, -1)

    kernel = functools.partial(_encoder_kernel, batch=B, n_pix=n_pix)
    return pl.pallas_call(
        kernel,
        out_shape=jax.ShapeDtypeStruct((B, latent), jnp.float32),
        compiler_params=pltpu.CompilerParams(vmem_limit_bytes=32 * 1024 * 1024),
    )(p1, w1, row(params["b1"]),
      s2, w2, row(params["b2"]),
      s3, w3, row(params["b3"]),
      s4, w4, row(params["b4"]),
      wfc_r, row(params["b_fc"]))


# ---------------------------------------------------------------------------
# Pure-JAX reference (correctness checking only)
# ---------------------------------------------------------------------------
def encoder_reference(x_nchw, params):
    x = jnp.transpose(x_nchw, (0, 2, 3, 1))
    defs = [("w1", "b1", 1, True), ("w2", "b2", 2, True),
            ("w3", "b3", 2, True), ("w4", "b4", 2, False)]
    for wn, bn, s, relu in defs:
        x = jax.lax.conv_general_dilated(
            x, params[wn], window_strides=(s, s), padding=((1, 1), (1, 1)),
            dimension_numbers=("NHWC", "HWIO", "NHWC"),
        ) + params[bn]
        if relu:
            x = jnp.maximum(x, 0.0)
    B = x.shape[0]
    x = jnp.transpose(x, (0, 3, 1, 2)).reshape(B, -1)   # PyTorch NCHW flatten
    return x @ params["w_fc"] + params["b_fc"]


# ---------------------------------------------------------------------------
# Deterministic parameter init (PyTorch-style uniform bounds)
# ---------------------------------------------------------------------------
def init_encoder_params(key, input_shape=(3, 16, 16), latent_dim=32):
    C, H, W = input_shape
    conv_defs = [(C, 32), (32, 64), (64, 128), (128, 256)]
    keys = jax.random.split(key, 2 * len(conv_defs) + 2)
    params = {}
    for idx, (cin, cout) in enumerate(conv_defs):
        fan_in = cin * 3 * 3
        bound = fan_in ** -0.5
        params[f"w{idx + 1}"] = jax.random.uniform(
            keys[2 * idx], (3, 3, cin, cout), jnp.float32, -bound, bound)
        params[f"b{idx + 1}"] = jax.random.uniform(
            keys[2 * idx + 1], (cout,), jnp.float32, -bound, bound)
    fc_in = (H // 8) * (W // 8) * 256
    bound = fc_in ** -0.5
    params["w_fc"] = jax.random.uniform(
        keys[-2], (fc_in, latent_dim), jnp.float32, -bound, bound)
    params["b_fc"] = jax.random.uniform(
        keys[-1], (latent_dim,), jnp.float32, -bound, bound)
    return params


if __name__ == "__main__":
    input_shape = (3, 16, 16)   # (C, H, W) — module requires 3 input channels
    latent_dim = 32
    batch = 2

    key = jax.random.PRNGKey(0)
    k_params, k_x = jax.random.split(key)
    params = init_encoder_params(k_params, input_shape, latent_dim)
    x = jax.random.normal(k_x, (batch, *input_shape), jnp.float32)   # NCHW

    out = jax.block_until_ready(jax.jit(encoder_forward)(x, params))
    ref = jax.block_until_ready(encoder_reference(x, params))

    assert out.shape == (batch, latent_dim), out.shape
    assert out.dtype == jnp.float32
    assert jnp.allclose(out, ref, atol=1e-3, rtol=1e-3), \
        float(jnp.max(jnp.abs(out - ref)))

    print("KERNEL_OK")
</pallas_src>

<mosaic_0001>
module attributes {stable_mosaic.version = 11 : i64} {
  func.func @_encoder_kernel(%arg0: memref<512x27xf32, #tpu.memory_space<vmem>>, %arg1: memref<27x32xf32, #tpu.memory_space<vmem>>, %arg2: memref<1x32xf32, #tpu.memory_space<vmem>>, %arg3: memref<9x128x512xf32, #tpu.memory_space<vmem>>, %arg4: memref<9x32x64xf32, #tpu.memory_space<vmem>>, %arg5: memref<1x64xf32, #tpu.memory_space<vmem>>, %arg6: memref<9x32x128xf32, #tpu.memory_space<vmem>>, %arg7: memref<9x64x128xf32, #tpu.memory_space<vmem>>, %arg8: memref<1x128xf32, #tpu.memory_space<vmem>>, %arg9: memref<9x8x32xf32, #tpu.memory_space<vmem>>, %arg10: memref<9x128x256xf32, #tpu.memory_space<vmem>>, %arg11: memref<1x256xf32, #tpu.memory_space<vmem>>, %arg12: memref<4x256x32xf32, #tpu.memory_space<vmem>>, %arg13: memref<1x32xf32, #tpu.memory_space<vmem>>, %arg14: memref<2x32xf32, #tpu.memory_space<vmem>>) attributes {dimension_semantics = [], scalar_prefetch = 0 : i64, scratch_operands = 0 : i64, tpu.core_type = #tpu.core_type<tc>} {
    %c0 = arith.constant 0 : index
    %c0_0 = arith.constant 0 : index
    %0 = vector.load %arg0[%c0, %c0_0] : memref<512x27xf32, #tpu.memory_space<vmem>>, vector<512x27xf32>
    %c0_1 = arith.constant 0 : index
    %c0_2 = arith.constant 0 : index
    %1 = vector.load %arg1[%c0_1, %c0_2] : memref<27x32xf32, #tpu.memory_space<vmem>>, vector<27x32xf32>
    %cst = arith.constant dense<0.000000e+00> : vector<512x32xf32>
    %2 = tpu.matmul %0, %1, %cst {dimension_numbers = #tpu.dot_dimension_numbers<[1], [0], [0], [1], [0, 0, 1, 1], [], []>} : vector<512x27xf32>, vector<27x32xf32>, vector<512x32xf32> -> vector<512x32xf32>
    %c0_3 = arith.constant 0 : index
    %c0_4 = arith.constant 0 : index
    %3 = vector.load %arg2[%c0_3, %c0_4] : memref<1x32xf32, #tpu.memory_space<vmem>>, vector<1x32xf32>
    %4 = vector.broadcast %3 : vector<1x32xf32> to vector<512x32xf32>
    %5 = arith.addf %2, %4 : vector<512x32xf32>
    %cst_5 = arith.constant 0.000000e+00 : f32
    %6 = vector.broadcast %cst_5 : f32 to vector<512x32xf32>
    %7 = arith.maximumf %5, %6 : vector<512x32xf32>
    %c0_6 = arith.constant 0 : index
    %c0_7 = arith.constant 0 : index
    %c0_8 = arith.constant 0 : index
    %8 = vector.load %arg3[%c0_6, %c0_7, %c0_8] : memref<9x128x512xf32, #tpu.memory_space<vmem>>, vector<1x128x512xf32>
    %9 = vector.shape_cast %8 : vector<1x128x512xf32> to vector<128x512xf32>
    %cst_9 = arith.constant dense<0.000000e+00> : vector<128x32xf32>
    %10 = tpu.matmul %9, %7, %cst_9 {dimension_numbers = #tpu.dot_dimension_numbers<[1], [0], [0], [1], [0, 0, 1, 1], [], []>} : vector<128x512xf32>, vector<512x32xf32>, vector<128x32xf32> -> vector<128x32xf32>
    %c0_10 = arith.constant 0 : index
    %c0_11 = arith.constant 0 : index
    %c0_12 = arith.constant 0 : index
    %11 = vector.load %arg4[%c0_10, %c0_11, %c0_12] : memref<9x32x64xf32, #tpu.memory_space<vmem>>, vector<1x32x64xf32>
    %12 = vector.shape_cast %11 : vector<1x32x64xf32> to vector<32x64xf32>
    %cst_13 = arith.constant dense<0.000000e+00> : vector<128x64xf32>
    %13 = tpu.matmul %10, %12, %cst_13 {dimension_numbers = #tpu.dot_dimension_numbers<[1], [0], [0], [1], [0, 0, 1, 1], [], []>} : vector<128x32xf32>, vector<32x64xf32>, vector<128x64xf32> -> vector<128x64xf32>
    %c1 = arith.constant 1 : index
    %c0_14 = arith.constant 0 : index
    %c0_15 = arith.constant 0 : index
    %14 = vector.load %arg3[%c1, %c0_14, %c0_15] : memref<9x128x512xf32, #tpu.memory_space<vmem>>, vector<1x128x512xf32>
    %15 = vector.shape_cast %14 : vector<1x128x512xf32> to vector<128x512xf32>
    %cst_16 = arith.constant dense<0.000000e+00> : vector<128x32xf32>
    %16 = tpu.matmul %15, %7, %cst_16 {dimension_numbers = #tpu.dot_dimension_numbers<[1], [0], [0], [1], [0, 0, 1, 1], [], []>} : vector<128x512xf32>, vector<512x32xf32>, vector<128x32xf32> -> vector<128x32xf32>
    %c1_17 = arith.constant 1 : index
    %c0_18 = arith.constant 0 : index
    %c0_19 = arith.constant 0 : index
    %17 = vector.load %arg4[%c1_17, %c0_18, %c0_19] : memref<9x32x64xf32, #tpu.memory_space<vmem>>, vector<1x32x64xf32>
    %18 = vector.shape_cast %17 : vector<1x32x64xf32> to vector<32x64xf32>
    %cst_20 = arith.constant dense<0.000000e+00> : vector<128x64xf32>
    %19 = tpu.matmul %16, %18, %cst_20 {dimension_numbers = #tpu.dot_dimension_numbers<[1], [0], [0], [1], [0, 0, 1, 1], [], []>} : vector<128x32xf32>, vector<32x64xf32>, vector<128x64xf32> -> vector<128x64xf32>
    %20 = arith.addf %13, %19 : vector<128x64xf32>
    %c2 = arith.constant 2 : index
    %c0_21 = arith.constant 0 : index
    %c0_22 = arith.constant 0 : index
    %21 = vector.load %arg3[%c2, %c0_21, %c0_22] : memref<9x128x512xf32, #tpu.memory_space<vmem>>, vector<1x128x512xf32>
    %22 = vector.shape_cast %21 : vector<1x128x512xf32> to vector<128x512xf32>
    %cst_23 = arith.constant dense<0.000000e+00> : vector<128x32xf32>
    %23 = tpu.matmul %22, %7, %cst_23 {dimension_numbers = #tpu.dot_dimension_numbers<[1], [0], [0], [1], [0, 0, 1, 1], [], []>} : vector<128x512xf32>, vector<512x32xf32>, vector<128x32xf32> -> vector<128x32xf32>
    %c2_24 = arith.constant 2 : index
    %c0_25 = arith.constant 0 : index
    %c0_26 = arith.constant 0 : index
    %24 = vector.load %arg4[%c2_24, %c0_25, %c0_26] : memref<9x32x64xf32, #tpu.memory_space<vmem>>, vector<1x32x64xf32>
    %25 = vector.shape_cast %24 : vector<1x32x64xf32> to vector<32x64xf32>
    %cst_27 = arith.constant dense<0.000000e+00> : vector<128x64xf32>
    %26 = tpu.matmul %23, %25, %cst_27 {dimension_numbers = #tpu.dot_dimension_numbers<[1], [0], [0], [1], [0, 0, 1, 1], [], []>} : vector<128x32xf32>, vector<32x64xf32>, vector<128x64xf32> -> vector<128x64xf32>
    %27 = arith.addf %20, %26 : vector<128x64xf32>
    %c3 = arith.constant 3 : index
    %c0_28 = arith.constant 0 : index
    %c0_29 = arith.constant 0 : index
    %28 = vector.load %arg3[%c3, %c0_28, %c0_29] : memref<9x128x512xf32, #tpu.memory_space<vmem>>, vector<1x128x512xf32>
    %29 = vector.shape_cast %28 : vector<1x128x512xf32> to vector<128x512xf32>
    %cst_30 = arith.constant dense<0.000000e+00> : vector<128x32xf32>
    %30 = tpu.matmul %29, %7, %cst_30 {dimension_numbers = #tpu.dot_dimension_numbers<[1], [0], [0], [1], [0, 0, 1, 1], [], []>} : vector<128x512xf32>, vector<512x32xf32>, vector<128x32xf32> -> vector<128x32xf32>
    %c3_31 = arith.constant 3 : index
    %c0_32 = arith.constant 0 : index
    %c0_33 = arith.constant 0 : index
    %31 = vector.load %arg4[%c3_31, %c0_32, %c0_33] : memref<9x32x64xf32, #tpu.memory_space<vmem>>, vector<1x32x64xf32>
    %32 = vector.shape_cast %31 : vector<1x32x64xf32> to vector<32x64xf32>
    %cst_34 = arith.constant dense<0.000000e+00> : vector<128x64xf32>
    %33 = tpu.matmul %30, %32, %cst_34 {dimension_numbers = #tpu.dot_dimension_numbers<[1], [0], [0], [1], [0, 0, 1, 1], [], []>} : vector<128x32xf32>, vector<32x64xf32>, vector<128x64xf32> -> vector<128x64xf32>
    %34 = arith.addf %27, %33 : vector<128x64xf32>
    %c4 = arith.constant 4 : index
    %c0_35 = arith.constant 0 : index
    %c0_36 = arith.constant 0 : index
    %35 = vector.load %arg3[%c4, %c0_35, %c0_36] : memref<9x128x512xf32, #tpu.memory_space<vmem>>, vector<1x128x512xf32>
    %36 = vector.shape_cast %35 : vector<1x128x512xf32> to vector<128x512xf32>
    %cst_37 = arith.constant dense<0.000000e+00> : vector<128x32xf32>
    %37 = tpu.matmul %36, %7, %cst_37 {dimension_numbers = #tpu.dot_dimension_numbers<[1], [0], [0], [1], [0, 0, 1, 1], [], []>} : vector<128x512xf32>, vector<512x32xf32>, vector<128x32xf32> -> vector<128x32xf32>
    %c4_38 = arith.constant 4 : index
    %c0_39 = arith.constant 0 : index
    %c0_40 = arith.constant 0 : index
    %38 = vector.load %arg4[%c4_38, %c0_39, %c0_40] : memref<9x32x64xf32, #tpu.memory_space<vmem>>, vector<1x32x64xf32>
    %39 = vector.shape_cast %38 : vector<1x32x64xf32> to vector<32x64xf32>
    %cst_41 = arith.constant dense<0.000000e+00> : vector<128x64xf32>
    %40 = tpu.matmul %37, %39, %cst_41 {dimension_numbers = #tpu.dot_dimension_numbers<[1], [0], [0], [1], [0, 0, 1, 1], [], []>} : vector<128x32xf32>, vector<32x64xf32>, vector<128x64xf32> -> vector<128x64xf32>
    %41 = arith.addf %34, %40 : vector<128x64xf32>
    %c5 = arith.constant 5 : index
    %c0_42 = arith.constant 0 : index
    %c0_43 = arith.constant 0 : index
    %42 = vector.load %arg3[%c5, %c0_42, %c0_43] : memref<9x128x512xf32, #tpu.memory_space<vmem>>, vector<1x128x512xf32>
    %43 = vector.shape_cast %42 : vector<1x128x512xf32> to vector<128x512xf32>
    %cst_44 = arith.constant dense<0.000000e+00> : vector<128x32xf32>
    %44 = tpu.matmul %43, %7, %cst_44 {dimension_numbers = #tpu.dot_dimension_numbers<[1], [0], [0], [1], [0, 0, 1, 1], [], []>} : vector<128x512xf32>, vector<512x32xf32>, vector<128x32xf32> -> vector<128x32xf32>
    %c5_45 = arith.constant 5 : index
    %c0_46 = arith.constant 0 : index
    %c0_47 = arith.constant 0 : index
    %45 = vector.load %arg4[%c5_45, %c0_46, %c0_47] : memref<9x32x64xf32, #tpu.memory_space<vmem>>, vector<1x32x64xf32>
    %46 = vector.shape_cast %45 : vector<1x32x64xf32> to vector<32x64xf32>
    %cst_48 = arith.constant dense<0.000000e+00> : vector<128x64xf32>
    %47 = tpu.matmul %44, %46, %cst_48 {dimension_numbers = #tpu.dot_dimension_numbers<[1], [0], [0], [1], [0, 0, 1, 1], [], []>} : vector<128x32xf32>, vector<32x64xf32>, vector<128x64xf32> -> vector<128x64xf32>
    %48 = arith.addf %41, %47 : vector<128x64xf32>
    %c6 = arith.constant 6 : index
    %c0_49 = arith.constant 0 : index
    %c0_50 = arith.constant 0 : index
    %49 = vector.load %arg3[%c6, %c0_49, %c0_50] : memref<9x128x512xf32, #tpu.memory_space<vmem>>, vector<1x128x512xf32>
    %50 = vector.shape_cast %49 : vector<1x128x512xf32> to vector<128x512xf32>
    %cst_51 = arith.constant dense<0.000000e+00> : vector<128x32xf32>
    %51 = tpu.matmul %50, %7, %cst_51 {dimension_numbers = #tpu.dot_dimension_numbers<[1], [0], [0], [1], [0, 0, 1, 1], [], []>} : vector<128x512xf32>, vector<512x32xf32>, vector<128x32xf32> -> vector<128x32xf32>
    %c6_52 = arith.constant 6 : index
    %c0_53 = arith.constant 0 : index
    %c0_54 = arith.constant 0 : index
    %52 = vector.load %arg4[%c6_52, %c0_53, %c0_54] : memref<9x32x64xf32, #tpu.memory_space<vmem>>, vector<1x32x64xf32>
    %53 = vector.shape_cast %52 : vector<1x32x64xf32> to vector<32x64xf32>
    %cst_55 = arith.constant dense<0.000000e+00> : vector<128x64xf32>
    %54 = tpu.matmul %51, %53, %cst_55 {dimension_numbers = #tpu.dot_dimension_numbers<[1], [0], [0], [1], [0, 0, 1, 1], [], []>} : vector<128x32xf32>, vector<32x64xf32>, vector<128x64xf32> -> vector<128x64xf32>
    %55 = arith.addf %48, %54 : vector<128x64xf32>
    %c7 = arith.constant 7 : index
    %c0_56 = arith.constant 0 : index
    %c0_57 = arith.constant 0 : index
    %56 = vector.load %arg3[%c7, %c0_56, %c0_57] : memref<9x128x512xf32, #tpu.memory_space<vmem>>, vector<1x128x512xf32>
    %57 = vector.shape_cast %56 : vector<1x128x512xf32> to vector<128x512xf32>
    %cst_58 = arith.constant dense<0.000000e+00> : vector<128x32xf32>
    %58 = tpu.matmul %57, %7, %cst_58 {dimension_numbers = #tpu.dot_dimension_numbers<[1], [0], [0], [1], [0, 0, 1, 1], [], []>} : vector<128x512xf32>, vector<512x32xf32>, vector<128x32xf32> -> vector<128x32xf32>
    %c7_59 = arith.constant 7 : index
    %c0_60 = arith.constant 0 : index
    %c0_61 = arith.constant 0 : index
    %59 = vector.load %arg4[%c7_59, %c0_60, %c0_61] : memref<9x32x64xf32, #tpu.memory_space<vmem>>, vector<1x32x64xf32>
    %60 = vector.shape_cast %59 : vector<1x32x64xf32> to vector<32x64xf32>
    %cst_62 = arith.constant dense<0.000000e+00> : vector<128x64xf32>
    %61 = tpu.matmul %58, %60, %cst_62 {dimension_numbers = #tpu.dot_dimension_numbers<[1], [0], [0], [1], [0, 0, 1, 1], [], []>} : vector<128x32xf32>, vector<32x64xf32>, vector<128x64xf32> -> vector<128x64xf32>
    %62 = arith.addf %55, %61 : vector<128x64xf32>
    %c8 = arith.constant 8 : index
    %c0_63 = arith.constant 0 : index
    %c0_64 = arith.constant 0 : index
    %63 = vector.load %arg3[%c8, %c0_63, %c0_64] : memref<9x128x512xf32, #tpu.memory_space<vmem>>, vector<1x128x512xf32>
    %64 = vector.shape_cast %63 : vector<1x128x512xf32> to vector<128x512xf32>
    %cst_65 = arith.constant dense<0.000000e+00> : vector<128x32xf32>
    %65 = tpu.matmul %64, %7, %cst_65 {dimension_numbers = #tpu.dot_dimension_numbers<[1], [0], [0], [1], [0, 0, 1, 1], [], []>} : vector<128x512xf32>, vector<512x32xf32>, vector<128x32xf32> -> vector<128x32xf32>
    %c8_66 = arith.constant 8 : index
    %c0_67 = arith.constant 0 : index
    %c0_68 = arith.constant 0 : index
    %66 = vector.load %arg4[%c8_66, %c0_67, %c0_68] : memref<9x32x64xf32, #tpu.memory_space<vmem>>, vector<1x32x64xf32>
    %67 = vector.shape_cast %66 : vector<1x32x64xf32> to vector<32x64xf32>
    %cst_69 = arith.constant dense<0.000000e+00> : vector<128x64xf32>
    %68 = tpu.matmul %65, %67, %cst_69 {dimension_numbers = #tpu.dot_dimension_numbers<[1], [0], [0], [1], [0, 0, 1, 1], [], []>} : vector<128x32xf32>, vector<32x64xf32>, vector<128x64xf32> -> vector<128x64xf32>
    %69 = arith.addf %62, %68 : vector<128x64xf32>
    %c0_70 = arith.constant 0 : index
    %c0_71 = arith.constant 0 : index
    %70 = vector.load %arg5[%c0_70, %c0_71] : memref<1x64xf32, #tpu.memory_space<vmem>>, vector<1x64xf32>
    %71 = vector.broadcast %70 : vector<1x64xf32> to vector<128x64xf32>
    %72 = arith.addf %69, %71 : vector<128x64xf32>
    %cst_72 = arith.constant 0.000000e+00 : f32
    %73 = vector.broadcast %cst_72 : f32 to vector<128x64xf32>
    %74 = arith.maximumf %72, %73 : vector<128x64xf32>
    %c0_73 = arith.constant 0 : index
    %c0_74 = arith.constant 0 : index
    %c0_75 = arith.constant 0 : index
    %75 = vector.load %arg6[%c0_73, %c0_74, %c0_75] : memref<9x32x128xf32, #tpu.memory_space<vmem>>, vector<1x32x128xf32>
    %76 = vector.shape_cast %75 : vector<1x32x128xf32> to vector<32x128xf32>
    %cst_76 = arith.constant dense<0.000000e+00> : vector<32x64xf32>
    %77 = tpu.matmul %76, %74, %cst_76 {dimension_numbers = #tpu.dot_dimension_numbers<[1], [0], [0], [1], [0, 0, 1, 1], [], []>} : vector<32x128xf32>, vector<128x64xf32>, vector<32x64xf32> -> vector<32x64xf32>
    %c0_77 = arith.constant 0 : index
    %c0_78 = arith.constant 0 : index
    %c0_79 = arith.constant 0 : index
    %78 = vector.load %arg7[%c0_77, %c0_78, %c0_79] : memref<9x64x128xf32, #tpu.memory_space<vmem>>, vector<1x64x128xf32>
    %79 = vector.shape_cast %78 : vector<1x64x128xf32> to vector<64x128xf32>
    %cst_80 = arith.constant dense<0.000000e+00> : vector<32x128xf32>
    %80 = tpu.matmul %77, %79, %cst_80 {dimension_numbers = #tpu.dot_dimension_numbers<[1], [0], [0], [1], [0, 0, 1, 1], [], []>} : vector<32x64xf32>, vector<64x128xf32>, vector<32x128xf32> -> vector<32x128xf32>
    %c1_81 = arith.constant 1 : index
    %c0_82 = arith.constant 0 : index
    %c0_83 = arith.constant 0 : index
    %81 = vector.load %arg6[%c1_81, %c0_82, %c0_83] : memref<9x32x128xf32, #tpu.memory_space<vmem>>, vector<1x32x128xf32>
    %82 = vector.shape_cast %81 : vector<1x32x128xf32> to vector<32x128xf32>
    %cst_84 = arith.constant dense<0.000000e+00> : vector<32x64xf32>
    %83 = tpu.matmul %82, %74, %cst_84 {dimension_numbers = #tpu.dot_dimension_numbers<[1], [0], [0], [1], [0, 0, 1, 1], [], []>} : vector<32x128xf32>, vector<128x64xf32>, vector<32x64xf32> -> vector<32x64xf32>
    %c1_85 = arith.constant 1 : index
    %c0_86 = arith.constant 0 : index
    %c0_87 = arith.constant 0 : index
    %84 = vector.load %arg7[%c1_85, %c0_86, %c0_87] : memref<9x64x128xf32, #tpu.memory_space<vmem>>, vector<1x64x128xf32>
    %85 = vector.shape_cast %84 : vector<1x64x128xf32> to vector<64x128xf32>
    %cst_88 = arith.constant dense<0.000000e+00> : vector<32x128xf32>
    %86 = tpu.matmul %83, %85, %cst_88 {dimension_numbers = #tpu.dot_dimension_numbers<[1], [0], [0], [1], [0, 0, 1, 1], [], []>} : vector<32x64xf32>, vector<64x128xf32>, vector<32x128xf32> -> vector<32x128xf32>
    %87 = arith.addf %80, %86 : vector<32x128xf32>
    %c2_89 = arith.constant 2 : index
    %c0_90 = arith.constant 0 : index
    %c0_91 = arith.constant 0 : index
    %88 = vector.load %arg6[%c2_89, %c0_90, %c0_91] : memref<9x32x128xf32, #tpu.memory_space<vmem>>, vector<1x32x128xf32>
    %89 = vector.shape_cast %88 : vector<1x32x128xf32> to vector<32x128xf32>
    %cst_92 = arith.constant dense<0.000000e+00> : vector<32x64xf32>
    %90 = tpu.matmul %89, %74, %cst_92 {dimension_numbers = #tpu.dot_dimension_numbers<[1], [0], [0], [1], [0, 0, 1, 1], [], []>} : vector<32x128xf32>, vector<128x64xf32>, vector<32x64xf32> -> vector<32x64xf32>
    %c2_93 = arith.constant 2 : index
    %c0_94 = arith.constant 0 : index
    %c0_95 = arith.constant 0 : index
    %91 = vector.load %arg7[%c2_93, %c0_94, %c0_95] : memref<9x64x128xf32, #tpu.memory_space<vmem>>, vector<1x64x128xf32>
    %92 = vector.shape_cast %91 : vector<1x64x128xf32> to vector<64x128xf32>
    %cst_96 = arith.constant dense<0.000000e+00> : vector<32x128xf32>
    %93 = tpu.matmul %90, %92, %cst_96 {dimension_numbers = #tpu.dot_dimension_numbers<[1], [0], [0], [1], [0, 0, 1, 1], [], []>} : vector<32x64xf32>, vector<64x128xf32>, vector<32x128xf32> -> vector<32x128xf32>
    %94 = arith.addf %87, %93 : vector<32x128xf32>
    %c3_97 = arith.constant 3 : index
    %c0_98 = arith.constant 0 : index
    %c0_99 = arith.constant 0 : index
    %95 = vector.load %arg6[%c3_97, %c0_98, %c0_99] : memref<9x32x128xf32, #tpu.memory_space<vmem>>, vector<1x32x128xf32>
    %96 = vector.shape_cast %95 : vector<1x32x128xf32> to vector<32x128xf32>
    %cst_100 = arith.constant dense<0.000000e+00> : vector<32x64xf32>
    %97 = tpu.matmul %96, %74, %cst_100 {dimension_numbers = #tpu.dot_dimension_numbers<[1], [0], [0], [1], [0, 0, 1, 1], [], []>} : vector<32x128xf32>, vector<128x64xf32>, vector<32x64xf32> -> vector<32x64xf32>
    %c3_101 = arith.constant 3 : index
    %c0_102 = arith.constant 0 : index
    %c0_103 = arith.constant 0 : index
    %98 = vector.load %arg7[%c3_101, %c0_102, %c0_103] : memref<9x64x128xf32, #tpu.memory_space<vmem>>, vector<1x64x128xf32>
    %99 = vector.shape_cast %98 : vector<1x64x128xf32> to vector<64x128xf32>
    %cst_104 = arith.constant dense<0.000000e+00> : vector<32x128xf32>
    %100 = tpu.matmul %97, %99, %cst_104 {dimension_numbers = #tpu.dot_dimension_numbers<[1], [0], [0], [1], [0, 0, 1, 1], [], []>} : vector<32x64xf32>, vector<64x128xf32>, vector<32x128xf32> -> vector<32x128xf32>
    %101 = arith.addf %94, %100 : vector<32x128xf32>
    %c4_105 = arith.constant 4 : index
    %c0_106 = arith.constant 0 : index
    %c0_107 = arith.constant 0 : index
    %102 = vector.load %arg6[%c4_105, %c0_106, %c0_107] : memref<9x32x128xf32, #tpu.memory_space<vmem>>, vector<1x32x128xf32>
    %103 = vector.shape_cast %102 : vector<1x32x128xf32> to vector<32x128xf32>
    %cst_108 = arith.constant dense<0.000000e+00> : vector<32x64xf32>
    %104 = tpu.matmul %103, %74, %cst_108 {dimension_numbers = #tpu.dot_dimension_numbers<[1], [0], [0], [1], [0, 0, 1, 1], [], []>} : vector<32x128xf32>, vector<128x64xf32>, vector<32x64xf32> -> vector<32x64xf32>
    %c4_109 = arith.constant 4 : index
    %c0_110 = arith.constant 0 : index
    %c0_111 = arith.constant 0 : index
    %105 = vector.load %arg7[%c4_109, %c0_110, %c0_111] : memref<9x64x128xf32, #tpu.memory_space<vmem>>, vector<1x64x128xf32>
    %106 = vector.shape_cast %105 : vector<1x64x128xf32> to vector<64x128xf32>
    %cst_112 = arith.constant dense<0.000000e+00> : vector<32x128xf32>
    %107 = tpu.matmul %104, %106, %cst_112 {dimension_numbers = #tpu.dot_dimension_numbers<[1], [0], [0], [1], [0, 0, 1, 1], [], []>} : vector<32x64xf32>, vector<64x128xf32>, vector<32x128xf32> -> vector<32x128xf32>
    %108 = arith.addf %101, %107 : vector<32x128xf32>
    %c5_113 = arith.constant 5 : index
    %c0_114 = arith.constant 0 : index
    %c0_115 = arith.constant 0 : index
    %109 = vector.load %arg6[%c5_113, %c0_114, %c0_115] : memref<9x32x128xf32, #tpu.memory_space<vmem>>, vector<1x32x128xf32>
    %110 = vector.shape_cast %109 : vector<1x32x128xf32> to vector<32x128xf32>
    %cst_116 = arith.constant dense<0.000000e+00> : vector<32x64xf32>
    %111 = tpu.matmul %110, %74, %cst_116 {dimension_numbers = #tpu.dot_dimension_numbers<[1], [0], [0], [1], [0, 0, 1, 1], [], []>} : vector<32x128xf32>, vector<128x64xf32>, vector<32x64xf32> -> vector<32x64xf32>
    %c5_117 = arith.constant 5 : index
    %c0_118 = arith.constant 0 : index
    %c0_119 = arith.constant 0 : index
    %112 = vector.load %arg7[%c5_117, %c0_118, %c0_119] : memref<9x64x128xf32, #tpu.memory_space<vmem>>, vector<1x64x128xf32>
    %113 = vector.shape_cast %112 : vector<1x64x128xf32> to vector<64x128xf32>
    %cst_120 = arith.constant dense<0.000000e+00> : vector<32x128xf32>
    %114 = tpu.matmul %111, %113, %cst_120 {dimension_numbers = #tpu.dot_dimension_numbers<[1], [0], [0], [1], [0, 0, 1, 1], [], []>} : vector<32x64xf32>, vector<64x128xf32>, vector<32x128xf32> -> vector<32x128xf32>
    %115 = arith.addf %108, %114 : vector<32x128xf32>
    %c6_121 = arith.constant 6 : index
    %c0_122 = arith.constant 0 : index
    %c0_123 = arith.constant 0 : index
    %116 = vector.load %arg6[%c6_121, %c0_122, %c0_123] : memref<9x32x128xf32, #tpu.memory_space<vmem>>, vector<1x32x128xf32>
    %117 = vector.shape_cast %116 : vector<1x32x128xf32> to vector<32x128xf32>
    %cst_124 = arith.constant dense<0.000000e+00> : vector<32x64xf32>
    %118 = tpu.matmul %117, %74, %cst_124 {dimension_numbers = #tpu.dot_dimension_numbers<[1], [0], [0], [1], [0, 0, 1, 1], [], []>} : vector<32x128xf32>, vector<128x64xf32>, vector<32x64xf32> -> vector<32x64xf32>
    %c6_125 = arith.constant 6 : index
    %c0_126 = arith.constant 0 : index
    %c0_127 = arith.constant 0 : index
    %119 = vector.load %arg7[%c6_125, %c0_126, %c0_127] : memref<9x64x128xf32, #tpu.memory_space<vmem>>, vector<1x64x128xf32>
    %120 = vector.shape_cast %119 : vector<1x64x128xf32> to vector<64x128xf32>
    %cst_128 = arith.constant dense<0.000000e+00> : vector<32x128xf32>
    %121 = tpu.matmul %118, %120, %cst_128 {dimension_numbers = #tpu.dot_dimension_numbers<[1], [0], [0], [1], [0, 0, 1, 1], [], []>} : vector<32x64xf32>, vector<64x128xf32>, vector<32x128xf32> -> vector<32x128xf32>
    %122 = arith.addf %115, %121 : vector<32x128xf32>
    %c7_129 = arith.constant 7 : index
    %c0_130 = arith.constant 0 : index
    %c0_131 = arith.constant 0 : index
    %123 = vector.load %arg6[%c7_129, %c0_130, %c0_131] : memref<9x32x128xf32, #tpu.memory_space<vmem>>, vector<1x32x128xf32>
    %124 = vector.shape_cast %123 : vector<1x32x128xf32> to vector<32x128xf32>
    %cst_132 = arith.constant dense<0.000000e+00> : vector<32x64xf32>
    %125 = tpu.matmul %124, %74, %cst_132 {dimension_numbers = #tpu.dot_dimension_numbers<[1], [0], [0], [1], [0, 0, 1, 1], [], []>} : vector<32x128xf32>, vector<128x64xf32>, vector<32x64xf32> -> vector<32x64xf32>
    %c7_133 = arith.constant 7 : index
    %c0_134 = arith.constant 0 : index
    %c0_135 = arith.constant 0 : index
    %126 = vector.load %arg7[%c7_133, %c0_134, %c0_135] : memref<9x64x128xf32, #tpu.memory_space<vmem>>, vector<1x64x128xf32>
    %127 = vector.shape_cast %126 : vector<1x64x128xf32> to vector<64x128xf32>
    %cst_136 = arith.constant dense<0.000000e+00> : vector<32x128xf32>
    %128 = tpu.matmul %125, %127, %cst_136 {dimension_numbers = #tpu.dot_dimension_numbers<[1], [0], [0], [1], [0, 0, 1, 1], [], []>} : vector<32x64xf32>, vector<64x128xf32>, vector<32x128xf32> -> vector<32x128xf32>
    %129 = arith.addf %122, %128 : vector<32x128xf32>
    %c8_137 = arith.constant 8 : index
    %c0_138 = arith.constant 0 : index
    %c0_139 = arith.constant 0 : index
    %130 = vector.load %arg6[%c8_137, %c0_138, %c0_139] : memref<9x32x128xf32, #tpu.memory_space<vmem>>, vector<1x32x128xf32>
    %131 = vector.shape_cast %130 : vector<1x32x128xf32> to vector<32x128xf32>
    %cst_140 = arith.constant dense<0.000000e+00> : vector<32x64xf32>
    %132 = tpu.matmul %131, %74, %cst_140 {dimension_numbers = #tpu.dot_dimension_numbers<[1], [0], [0], [1], [0, 0, 1, 1], [], []>} : vector<32x128xf32>, vector<128x64xf32>, vector<32x64xf32> -> vector<32x64xf32>
    %c8_141 = arith.constant 8 : index
    %c0_142 = arith.constant 0 : index
    %c0_143 = arith.constant 0 : index
    %133 = vector.load %arg7[%c8_141, %c0_142, %c0_143] : memref<9x64x128xf32, #tpu.memory_space<vmem>>, vector<1x64x128xf32>
    %134 = vector.shape_cast %133 : vector<1x64x128xf32> to vector<64x128xf32>
    %cst_144 = arith.constant dense<0.000000e+00> : vector<32x128xf32>
    %135 = tpu.matmul %132, %134, %cst_144 {dimension_numbers = #tpu.dot_dimension_numbers<[1], [0], [0], [1], [0, 0, 1, 1], [], []>} : vector<32x64xf32>, vector<64x128xf32>, vector<32x128xf32> -> vector<32x128xf32>
    %136 = arith.addf %129, %135 : vector<32x128xf32>
    %c0_145 = arith.constant 0 : index
    %c0_146 = arith.constant 0 : index
    %137 = vector.load %arg8[%c0_145, %c0_146] : memref<1x128xf32, #tpu.memory_space<vmem>>, vector<1x128xf32>
    %138 = vector.broadcast %137 : vector<1x128xf32> to vector<32x128xf32>
    %139 = arith.addf %136, %138 : vector<32x128xf32>
    %cst_147 = arith.constant 0.000000e+00 : f32
    %140 = vector.broadcast %cst_147 : f32 to vector<32x128xf32>
    %141 = arith.maximumf %139, %140 : vector<32x128xf32>
    %c0_148 = arith.constant 0 : index
    %c0_149 = arith.constant 0 : index
    %c0_150 = arith.constant 0 : index
    %142 = vector.load %arg9[%c0_148, %c0_149, %c0_150] : memref<9x8x32xf32, #tpu.memory_space<vmem>>, vector<1x8x32xf32>
    %143 = vector.shape_cast %142 : vector<1x8x32xf32> to vector<8x32xf32>
    %cst_151 = arith.constant dense<0.000000e+00> : vector<8x128xf32>
    %144 = tpu.matmul %143, %141, %cst_151 {dimension_numbers = #tpu.dot_dimension_numbers<[1], [0], [0], [1], [0, 0, 1, 1], [], []>} : vector<8x32xf32>, vector<32x128xf32>, vector<8x128xf32> -> vector<8x128xf32>
    %c0_152 = arith.constant 0 : index
    %c0_153 = arith.constant 0 : index
    %c0_154 = arith.constant 0 : index
    %145 = vector.load %arg10[%c0_152, %c0_153, %c0_154] : memref<9x128x256xf32, #tpu.memory_space<vmem>>, vector<1x128x256xf32>
    %146 = vector.shape_cast %145 : vector<1x128x256xf32> to vector<128x256xf32>
    %cst_155 = arith.constant dense<0.000000e+00> : vector<8x256xf32>
    %147 = tpu.matmul %144, %146, %cst_155 {dimension_numbers = #tpu.dot_dimension_numbers<[1], [0], [0], [1], [0, 0, 1, 1], [], []>} : vector<8x128xf32>, vector<128x256xf32>, vector<8x256xf32> -> vector<8x256xf32>
    %c1_156 = arith.constant 1 : index
    %c0_157 = arith.constant 0 : index
    %c0_158 = arith.constant 0 : index
    %148 = vector.load %arg9[%c1_156, %c0_157, %c0_158] : memref<9x8x32xf32, #tpu.memory_space<vmem>>, vector<1x8x32xf32>
    %149 = vector.shape_cast %148 : vector<1x8x32xf32> to vector<8x32xf32>
    %cst_159 = arith.constant dense<0.000000e+00> : vector<8x128xf32>
    %150 = tpu.matmul %149, %141, %cst_159 {dimension_numbers = #tpu.dot_dimension_numbers<[1], [0], [0], [1], [0, 0, 1, 1], [], []>} : vector<8x32xf32>, vector<32x128xf32>, vector<8x128xf32> -> vector<8x128xf32>
    %c1_160 = arith.constant 1 : index
    %c0_161 = arith.constant 0 : index
    %c0_162 = arith.constant 0 : index
    %151 = vector.load %arg10[%c1_160, %c0_161, %c0_162] : memref<9x128x256xf32, #tpu.memory_space<vmem>>, vector<1x128x256xf32>
    %152 = vector.shape_cast %151 : vector<1x128x256xf32> to vector<128x256xf32>
    %cst_163 = arith.constant dense<0.000000e+00> : vector<8x256xf32>
    %153 = tpu.matmul %150, %152, %cst_163 {dimension_numbers = #tpu.dot_dimension_numbers<[1], [0], [0], [1], [0, 0, 1, 1], [], []>} : vector<8x128xf32>, vector<128x256xf32>, vector<8x256xf32> -> vector<8x256xf32>
    %154 = arith.addf %147, %153 : vector<8x256xf32>
    %c2_164 = arith.constant 2 : index
    %c0_165 = arith.constant 0 : index
    %c0_166 = arith.constant 0 : index
    %155 = vector.load %arg9[%c2_164, %c0_165, %c0_166] : memref<9x8x32xf32, #tpu.memory_space<vmem>>, vector<1x8x32xf32>
    %156 = vector.shape_cast %155 : vector<1x8x32xf32> to vector<8x32xf32>
    %cst_167 = arith.constant dense<0.000000e+00> : vector<8x128xf32>
    %157 = tpu.matmul %156, %141, %cst_167 {dimension_numbers = #tpu.dot_dimension_numbers<[1], [0], [0], [1], [0, 0, 1, 1], [], []>} : vector<8x32xf32>, vector<32x128xf32>, vector<8x128xf32> -> vector<8x128xf32>
    %c2_168 = arith.constant 2 : index
    %c0_169 = arith.constant 0 : index
    %c0_170 = arith.constant 0 : index
    %158 = vector.load %arg10[%c2_168, %c0_169, %c0_170] : memref<9x128x256xf32, #tpu.memory_space<vmem>>, vector<1x128x256xf32>
    %159 = vector.shape_cast %158 : vector<1x128x256xf32> to vector<128x256xf32>
    %cst_171 = arith.constant dense<0.000000e+00> : vector<8x256xf32>
    %160 = tpu.matmul %157, %159, %cst_171 {dimension_numbers = #tpu.dot_dimension_numbers<[1], [0], [0], [1], [0, 0, 1, 1], [], []>} : vector<8x128xf32>, vector<128x256xf32>, vector<8x256xf32> -> vector<8x256xf32>
    %161 = arith.addf %154, %160 : vector<8x256xf32>
    %c3_172 = arith.constant 3 : index
    %c0_173 = arith.constant 0 : index
    %c0_174 = arith.constant 0 : index
    %162 = vector.load %arg9[%c3_172, %c0_173, %c0_174] : memref<9x8x32xf32, #tpu.memory_space<vmem>>, vector<1x8x32xf32>
    %163 = vector.shape_cast %162 : vector<1x8x32xf32> to vector<8x32xf32>
    %cst_175 = arith.constant dense<0.000000e+00> : vector<8x128xf32>
    %164 = tpu.matmul %163, %141, %cst_175 {dimension_numbers = #tpu.dot_dimension_numbers<[1], [0], [0], [1], [0, 0, 1, 1], [], []>} : vector<8x32xf32>, vector<32x128xf32>, vector<8x128xf32> -> vector<8x128xf32>
    %c3_176 = arith.constant 3 : index
    %c0_177 = arith.constant 0 : index
    %c0_178 = arith.constant 0 : index
    %165 = vector.load %arg10[%c3_176, %c0_177, %c0_178] : memref<9x128x256xf32, #tpu.memory_space<vmem>>, vector<1x128x256xf32>
    %166 = vector.shape_cast %165 : vector<1x128x256xf32> to vector<128x256xf32>
    %cst_179 = arith.constant dense<0.000000e+00> : vector<8x256xf32>
    %167 = tpu.matmul %164, %166, %cst_179 {dimension_numbers = #tpu.dot_dimension_numbers<[1], [0], [0], [1], [0, 0, 1, 1], [], []>} : vector<8x128xf32>, vector<128x256xf32>, vector<8x256xf32> -> vector<8x256xf32>
    %168 = arith.addf %161, %167 : vector<8x256xf32>
    %c4_180 = arith.constant 4 : index
    %c0_181 = arith.constant 0 : index
    %c0_182 = arith.constant 0 : index
    %169 = vector.load %arg9[%c4_180, %c0_181, %c0_182] : memref<9x8x32xf32, #tpu.memory_space<vmem>>, vector<1x8x32xf32>
    %170 = vector.shape_cast %169 : vector<1x8x32xf32> to vector<8x32xf32>
    %cst_183 = arith.constant dense<0.000000e+00> : vector<8x128xf32>
    %171 = tpu.matmul %170, %141, %cst_183 {dimension_numbers = #tpu.dot_dimension_numbers<[1], [0], [0], [1], [0, 0, 1, 1], [], []>} : vector<8x32xf32>, vector<32x128xf32>, vector<8x128xf32> -> vector<8x128xf32>
    %c4_184 = arith.constant 4 : index
    %c0_185 = arith.constant 0 : index
    %c0_186 = arith.constant 0 : index
    %172 = vector.load %arg10[%c4_184, %c0_185, %c0_186] : memref<9x128x256xf32, #tpu.memory_space<vmem>>, vector<1x128x256xf32>
    %173 = vector.shape_cast %172 : vector<1x128x256xf32> to vector<128x256xf32>
    %cst_187 = arith.constant dense<0.000000e+00> : vector<8x256xf32>
    %174 = tpu.matmul %171, %173, %cst_187 {dimension_numbers = #tpu.dot_dimension_numbers<[1], [0], [0], [1], [0, 0, 1, 1], [], []>} : vector<8x128xf32>, vector<128x256xf32>, vector<8x256xf32> -> vector<8x256xf32>
    %175 = arith.addf %168, %174 : vector<8x256xf32>
    %c5_188 = arith.constant 5 : index
    %c0_189 = arith.constant 0 : index
    %c0_190 = arith.constant 0 : index
    %176 = vector.load %arg9[%c5_188, %c0_189, %c0_190] : memref<9x8x32xf32, #tpu.memory_space<vmem>>, vector<1x8x32xf32>
    %177 = vector.shape_cast %176 : vector<1x8x32xf32> to vector<8x32xf32>
    %cst_191 = arith.constant dense<0.000000e+00> : vector<8x128xf32>
    %178 = tpu.matmul %177, %141, %cst_191 {dimension_numbers = #tpu.dot_dimension_numbers<[1], [0], [0], [1], [0, 0, 1, 1], [], []>} : vector<8x32xf32>, vector<32x128xf32>, vector<8x128xf32> -> vector<8x128xf32>
    %c5_192 = arith.constant 5 : index
    %c0_193 = arith.constant 0 : index
    %c0_194 = arith.constant 0 : index
    %179 = vector.load %arg10[%c5_192, %c0_193, %c0_194] : memref<9x128x256xf32, #tpu.memory_space<vmem>>, vector<1x128x256xf32>
    %180 = vector.shape_cast %179 : vector<1x128x256xf32> to vector<128x256xf32>
    %cst_195 = arith.constant dense<0.000000e+00> : vector<8x256xf32>
    %181 = tpu.matmul %178, %180, %cst_195 {dimension_numbers = #tpu.dot_dimension_numbers<[1], [0], [0], [1], [0, 0, 1, 1], [], []>} : vector<8x128xf32>, vector<128x256xf32>, vector<8x256xf32> -> vector<8x256xf32>
    %182 = arith.addf %175, %181 : vector<8x256xf32>
    %c6_196 = arith.constant 6 : index
    %c0_197 = arith.constant 0 : index
    %c0_198 = arith.constant 0 : index
    %183 = vector.load %arg9[%c6_196, %c0_197, %c0_198] : memref<9x8x32xf32, #tpu.memory_space<vmem>>, vector<1x8x32xf32>
    %184 = vector.shape_cast %183 : vector<1x8x32xf32> to vector<8x32xf32>
    %cst_199 = arith.constant dense<0.000000e+00> : vector<8x128xf32>
    %185 = tpu.matmul %184, %141, %cst_199 {dimension_numbers = #tpu.dot_dimension_numbers<[1], [0], [0], [1], [0, 0, 1, 1], [], []>} : vector<8x32xf32>, vector<32x128xf32>, vector<8x128xf32> -> vector<8x128xf32>
    %c6_200 = arith.constant 6 : index
    %c0_201 = arith.constant 0 : index
    %c0_202 = arith.constant 0 : index
    %186 = vector.load %arg10[%c6_200, %c0_201, %c0_202] : memref<9x128x256xf32, #tpu.memory_space<vmem>>, vector<1x128x256xf32>
    %187 = vector.shape_cast %186 : vector<1x128x256xf32> to vector<128x256xf32>
    %cst_203 = arith.constant dense<0.000000e+00> : vector<8x256xf32>
    %188 = tpu.matmul %185, %187, %cst_203 {dimension_numbers = #tpu.dot_dimension_numbers<[1], [0], [0], [1], [0, 0, 1, 1], [], []>} : vector<8x128xf32>, vector<128x256xf32>, vector<8x256xf32> -> vector<8x256xf32>
    %189 = arith.addf %182, %188 : vector<8x256xf32>
    %c7_204 = arith.constant 7 : index
    %c0_205 = arith.constant 0 : index
    %c0_206 = arith.constant 0 : index
    %190 = vector.load %arg9[%c7_204, %c0_205, %c0_206] : memref<9x8x32xf32, #tpu.memory_space<vmem>>, vector<1x8x32xf32>
    %191 = vector.shape_cast %190 : vector<1x8x32xf32> to vector<8x32xf32>
    %cst_207 = arith.constant dense<0.000000e+00> : vector<8x128xf32>
    %192 = tpu.matmul %191, %141, %cst_207 {dimension_numbers = #tpu.dot_dimension_numbers<[1], [0], [0], [1], [0, 0, 1, 1], [], []>} : vector<8x32xf32>, vector<32x128xf32>, vector<8x128xf32> -> vector<8x128xf32>
    %c7_208 = arith.constant 7 : index
    %c0_209 = arith.constant 0 : index
    %c0_210 = arith.constant 0 : index
    %193 = vector.load %arg10[%c7_208, %c0_209, %c0_210] : memref<9x128x256xf32, #tpu.memory_space<vmem>>, vector<1x128x256xf32>
    %194 = vector.shape_cast %193 : vector<1x128x256xf32> to vector<128x256xf32>
    %cst_211 = arith.constant dense<0.000000e+00> : vector<8x256xf32>
    %195 = tpu.matmul %192, %194, %cst_211 {dimension_numbers = #tpu.dot_dimension_numbers<[1], [0], [0], [1], [0, 0, 1, 1], [], []>} : vector<8x128xf32>, vector<128x256xf32>, vector<8x256xf32> -> vector<8x256xf32>
    %196 = arith.addf %189, %195 : vector<8x256xf32>
    %c8_212 = arith.constant 8 : index
    %c0_213 = arith.constant 0 : index
    %c0_214 = arith.constant 0 : index
    %197 = vector.load %arg9[%c8_212, %c0_213, %c0_214] : memref<9x8x32xf32, #tpu.memory_space<vmem>>, vector<1x8x32xf32>
    %198 = vector.shape_cast %197 : vector<1x8x32xf32> to vector<8x32xf32>
    %cst_215 = arith.constant dense<0.000000e+00> : vector<8x128xf32>
    %199 = tpu.matmul %198, %141, %cst_215 {dimension_numbers = #tpu.dot_dimension_numbers<[1], [0], [0], [1], [0, 0, 1, 1], [], []>} : vector<8x32xf32>, vector<32x128xf32>, vector<8x128xf32> -> vector<8x128xf32>
    %c8_216 = arith.constant 8 : index
    %c0_217 = arith.constant 0 : index
    %c0_218 = arith.constant 0 : index
    %200 = vector.load %arg10[%c8_216, %c0_217, %c0_218] : memref<9x128x256xf32, #tpu.memory_space<vmem>>, vector<1x128x256xf32>
    %201 = vector.shape_cast %200 : vector<1x128x256xf32> to vector<128x256xf32>
    %cst_219 = arith.constant dense<0.000000e+00> : vector<8x256xf32>
    %202 = tpu.matmul %199, %201, %cst_219 {dimension_numbers = #tpu.dot_dimension_numbers<[1], [0], [0], [1], [0, 0, 1, 1], [], []>} : vector<8x128xf32>, vector<128x256xf32>, vector<8x256xf32> -> vector<8x256xf32>
    %203 = arith.addf %196, %202 : vector<8x256xf32>
    %c0_220 = arith.constant 0 : index
    %c0_221 = arith.constant 0 : index
    %204 = vector.load %arg11[%c0_220, %c0_221] : memref<1x256xf32, #tpu.memory_space<vmem>>, vector<1x256xf32>
    %205 = vector.broadcast %204 : vector<1x256xf32> to vector<8x256xf32>
    %206 = arith.addf %203, %205 : vector<8x256xf32>
    %207 = vector.extract_strided_slice %206 {offsets = [0, 0], sizes = [2, 256], strides = [1, 1]} : vector<8x256xf32> to vector<2x256xf32>
    %c0_222 = arith.constant 0 : index
    %c0_223 = arith.constant 0 : index
    %c0_224 = arith.constant 0 : index
    %208 = vector.load %arg12[%c0_222, %c0_223, %c0_224] : memref<4x256x32xf32, #tpu.memory_space<vmem>>, vector<1x256x32xf32>
    %209 = vector.shape_cast %208 : vector<1x256x32xf32> to vector<256x32xf32>
    %cst_225 = arith.constant dense<0.000000e+00> : vector<2x32xf32>
    %210 = tpu.matmul %207, %209, %cst_225 {dimension_numbers = #tpu.dot_dimension_numbers<[1], [0], [0], [1], [0, 0, 1, 1], [], []>} : vector<2x256xf32>, vector<256x32xf32>, vector<2x32xf32> -> vector<2x32xf32>
    %211 = vector.extract_strided_slice %206 {offsets = [2, 0], sizes = [2, 256], strides = [1, 1]} : vector<8x256xf32> to vector<2x256xf32>
    %c1_226 = arith.constant 1 : index
    %c0_227 = arith.constant 0 : index
    %c0_228 = arith.constant 0 : index
    %212 = vector.load %arg12[%c1_226, %c0_227, %c0_228] : memref<4x256x32xf32, #tpu.memory_space<vmem>>, vector<1x256x32xf32>
    %213 = vector.shape_cast %212 : vector<1x256x32xf32> to vector<256x32xf32>
    %cst_229 = arith.constant dense<0.000000e+00> : vector<2x32xf32>
    %214 = tpu.matmul %211, %213, %cst_229 {dimension_numbers = #tpu.dot_dimension_numbers<[1], [0], [0], [1], [0, 0, 1, 1], [], []>} : vector<2x256xf32>, vector<256x32xf32>, vector<2x32xf32> -> vector<2x32xf32>
    %215 = arith.addf %210, %214 : vector<2x32xf32>
    %216 = vector.extract_strided_slice %206 {offsets = [4, 0], sizes = [2, 256], strides = [1, 1]} : vector<8x256xf32> to vector<2x256xf32>
    %c2_230 = arith.constant 2 : index
    %c0_231 = arith.constant 0 : index
    %c0_232 = arith.constant 0 : index
    %217 = vector.load %arg12[%c2_230, %c0_231, %c0_232] : memref<4x256x32xf32, #tpu.memory_space<vmem>>, vector<1x256x32xf32>
    %218 = vector.shape_cast %217 : vector<1x256x32xf32> to vector<256x32xf32>
    %cst_233 = arith.constant dense<0.000000e+00> : vector<2x32xf32>
    %219 = tpu.matmul %216, %218, %cst_233 {dimension_numbers = #tpu.dot_dimension_numbers<[1], [0], [0], [1], [0, 0, 1, 1], [], []>} : vector<2x256xf32>, vector<256x32xf32>, vector<2x32xf32> -> vector<2x32xf32>
    %220 = arith.addf %215, %219 : vector<2x32xf32>
    %221 = vector.extract_strided_slice %206 {offsets = [6, 0], sizes = [2, 256], strides = [1, 1]} : vector<8x256xf32> to vector<2x256xf32>
    %c3_234 = arith.constant 3 : index
    %c0_235 = arith.constant 0 : index
    %c0_236 = arith.constant 0 : index
    %222 = vector.load %arg12[%c3_234, %c0_235, %c0_236] : memref<4x256x32xf32, #tpu.memory_space<vmem>>, vector<1x256x32xf32>
    %223 = vector.shape_cast %222 : vector<1x256x32xf32> to vector<256x32xf32>
    %cst_237 = arith.constant dense<0.000000e+00> : vector<2x32xf32>
    %224 = tpu.matmul %221, %223, %cst_237 {dimension_numbers = #tpu.dot_dimension_numbers<[1], [0], [0], [1], [0, 0, 1, 1], [], []>} : vector<2x256xf32>, vector<256x32xf32>, vector<2x32xf32> -> vector<2x32xf32>
    %225 = arith.addf %220, %224 : vector<2x32xf32>
    %c0_238 = arith.constant 0 : index
    %c0_239 = arith.constant 0 : index
    %226 = vector.load %arg13[%c0_238, %c0_239] : memref<1x32xf32, #tpu.memory_space<vmem>>, vector<1x32xf32>
    %227 = vector.broadcast %226 : vector<1x32xf32> to vector<2x32xf32>
    %228 = arith.addf %225, %227 : vector<2x32xf32>
    %c0_240 = arith.constant 0 : index
    %c0_241 = arith.constant 0 : index
    %229 = vector.load %arg14[%c0_240, %c0_241] : memref<2x32xf32, #tpu.memory_space<vmem>>, vector<2x32xf32>
    tpu.vector_store %arg14[%c0_240, %c0_241], %228 {strides = array<i32>} : memref<2x32xf32, #tpu.memory_space<vmem>>, vector<2x32xf32>,
    return
  }
}

</mosaic_0001>

<bundles_post_ra>
// kernel: encoder_forward.1
= control target key start
LH: loop header
LB: loop body
LE: loop exit
PB: predicated region body
PF: predicated region fallthrough
CT: control target
= control target key end

     0   :  { %vm313_vm0 = vcmask 1042432   ;;  %s14005_s0 = inlined_call_operand.vmem [shape: f32[512,27], index: 0, kind: input, shape index: {}]   ;;  %s14006_s1 = inlined_call_operand.vmem [shape: f32[27,32], index: 1, kind: input, shape index: {}]   ;;  %s14007_s2 = inlined_call_operand.vmem [shape: f32[1,32], index: 2, kind: input, shape index: {}]   ;;  %s14008_s3 = inlined_call_operand.vmem [shape: f32[9,128,512], index: 3, kind: input, shape index: {}]   ;;  %s14009_s4 = inlined_call_operand.vmem [shape: f32[9,32,64], index: 4, kind: input, shape index: {}]   ;;  %s14010_s5 = inlined_call_operand.vmem [shape: f32[1,64], index: 5, kind: input, shape index: {}]   ;;  %s14011_s6 = inlined_call_operand.vmem [shape: f32[9,32,128], index: 6, kind: input, shape index: {}]   ;;  %s14012_s7 = inlined_call_operand.vmem [shape: f32[9,64,128], index: 7, kind: input, shape index: {}]   ;;  %s14013_s8 = inlined_call_operand.vmem [shape: f32[1,128], index: 8, kind: input, shape index: {}]   ;;  %s14014_s9 = inlined_call_operand.vmem [shape: f32[9,8,32], index: 9, kind: input, shape index: {}]   ;;  %s14015_s10 = inlined_call_operand.vmem [shape: f32[9,128,256], index: 10, kind: input, shape index: {}]   ;;  %s14016_s11 = inlined_call_operand.vmem [shape: f32[1,256], index: 11, kind: input, shape index: {}]   ;;  %s14017_s12 = inlined_call_operand.vmem [shape: f32[4,256,32], index: 12, kind: input, shape index: {}]   ;;  %s14018_s13 = inlined_call_operand.vmem [shape: f32[1,32], index: 13, kind: input, shape index: {}]   ;;  %s14019_s14 = inlined_call_operand.hbm [shape: f32[2,32], index: 14, kind: output, shape index: {}]  }
   0x1   :  { %v115_v0 = vld [vmem:[%s14006_s1 + $0x18] sm:$0x7]  ;;  %v114_v1 = vld [vmem:[%s14006_s1 + $0x10] sm:$0xff]  ;;  %v113_v2 = vld [vmem:[%s14006_s1 + $0x8] sm:$0xff] }
   0x2   :  { %6751 = vmatpush.msk.msra.mxu0 %vm313_vm0, %v115_v0  ;;  %v112_v3 = vld [vmem:[%s14006_s1] sm:$0xff] }
   0x4   :  { %330 = vmatpush.msra.mxu0 %v114_v1 }
   0x5   :  { %19 = vsyncpa [#allocation3], 0  ;;  %v48_v4 = vld [vmem:[%s14005_s0] sm:$0xff]  ;;  %vm120_vm1 = vcmask 220160   ;;  %v49_v5 = vld [vmem:[%s14005_s0 + $0x8] sm:$0xff]  ;;  %vm1248_vm2 = vcmask 261120  }
   0x6   :  { %331 = vmatpush.msra.mxu0 %v113_v2  ;;  %v50_v6 = vld [vmem:[%s14005_s0 + $0x10] sm:$0xff]  ;;  %v51_v7 = vld [vmem:[%s14005_s0 + $0x18] sm:$0xff]  ;;  %v52_v8 = vld [vmem:[%s14005_s0 + $0x20] sm:$0xff]  ;;  %vm4808_vm3 = vcmask 523264   ;;  %s8069_s15 = smov [#allocation2]   ;;  %s6742_s18 = sshll.u32 %s14019_s14, 4  ;;  %s6743_s18 = int_to_ptr.hbm [resolvable:$true] %s6742_s18 }
   0x7   :  { %v53_v9 = vld [vmem:[%s14005_s0 + $0x28] sm:$0xff]  ;;  %v54_v10 = vld [vmem:[%s14005_s0 + $0x30] sm:$0xff]  ;;  %v55_v11 = vld [vmem:[%s14005_s0 + $0x38] sm:$0xff]  ;;  %vm6733_vm4 = vcmask 254976  }
   0x8   :  { %332 = vmatpush.msra.mxu0 %v112_v3  ;;  %v56_v12 = vld [vmem:[%s14005_s0 + $0x40] sm:$0xff]  ;;  %v57_v13 = vld [vmem:[%s14005_s0 + $0x48] sm:$0xff]  ;;  %v58_v14 = vld [vmem:[%s14005_s0 + $0x50] sm:$0xff] }
   0x9   :  { %6752 = vmatmul.msk.f32.vlgmr.msra.gmra.mxu0 %vm120_vm1, %v48_v4  ;;  %v59_v15 = vld [vmem:[%s14005_s0 + $0x58] sm:$0xff]  ;;  %v60_v16 = vld [vmem:[%s14005_s0 + $0x60] sm:$0xff]  ;;  %v61_v17 = vld [vmem:[%s14005_s0 + $0x68] sm:$0xff] }
   0xa   :  { %v62_v18 = vld [vmem:[%s14005_s0 + $0x70] sm:$0xff]  ;;  %v63_v19 = vld [vmem:[%s14005_s0 + $0x78] sm:$0xff]  ;;  %v64_v21 = vld [vmem:[%s14005_s0 + $0x80] sm:$0xff] }
   0xb   :  { %v65_v23 = vld [vmem:[%s14005_s0 + $0x88] sm:$0xff]  ;;  %v66_v25 = vld [vmem:[%s14005_s0 + $0x90] sm:$0xff]  ;;  %v67_v27 = vld [vmem:[%s14005_s0 + $0x98] sm:$0xff] }
   0xc   :  { %v68_v29 = vld [vmem:[%s14005_s0 + $0xa0] sm:$0xff]  ;;  %v69_v31 = vld [vmem:[%s14005_s0 + $0xa8] sm:$0xff]  ;;  %v70_v33 = vld [vmem:[%s14005_s0 + $0xb0] sm:$0xff] }
   0xd   :  { %v71_v35 = vld [vmem:[%s14005_s0 + $0xb8] sm:$0xff]  ;;  %v72_v37 = vld [vmem:[%s14005_s0 + $0xc0] sm:$0xff]  ;;  %v73_v39 = vld [vmem:[%s14005_s0 + $0xc8] sm:$0xff] }
   0xe   :  { %v74_v41 = vld [vmem:[%s14005_s0 + $0xd0] sm:$0xff]  ;;  %v75_v43 = vld [vmem:[%s14005_s0 + $0xd8] sm:$0xff]  ;;  %v76_v45 = vld [vmem:[%s14005_s0 + $0xe0] sm:$0xff] }
   0xf   :  { %v77_v47 = vld [vmem:[%s14005_s0 + $0xe8] sm:$0xff]  ;;  %v78_v49 = vld [vmem:[%s14005_s0 + $0xf0] sm:$0xff]  ;;  %v8296_v50 = vld [vmem:[%s14007_s2] ss:$0 sm:$0xff] }
  0x10   :  { %v79_v52 = vld [vmem:[%s14005_s0 + $0xf8] sm:$0xff]  ;;  %v80_v62 = vld [vmem:[%s14005_s0 + $0x100] sm:$0xff] }
  0x11   :  { %6753 = vmatmul.msk.f32.gmra.mxu0 %vm120_vm1, %v49_v5 }
  0x19   :  { %6754 = vmatmul.msk.f32.gmra.mxu0 %vm120_vm1, %v50_v6 }
  0x21   :  { %6755 = vmatmul.msk.f32.gmra.mxu0 %vm120_vm1, %v51_v7 }
  0x29   :  { %6756 = vmatmul.msk.f32.gmra.mxu0 %vm120_vm1, %v52_v8  ;;  %v81_v8 = vld [vmem:[%s14005_s0 + $0x108] sm:$0xff] }
  0x31   :  { %6757 = vmatmul.msk.f32.gmra.mxu0 %vm120_vm1, %v53_v9 }
  0x39   :  { %6758 = vmatmul.msk.f32.gmra.mxu0 %vm120_vm1, %v54_v10 }
  0x41   :  { %6759 = vmatmul.msk.f32.gmra.mxu0 %vm120_vm1, %v55_v11 }
  0x49   :  { %6760 = vmatmul.msk.f32.gmra.mxu0 %vm120_vm1, %v56_v12 }
  0x51   :  { %6761 = vmatmul.msk.f32.gmra.mxu0 %vm120_vm1, %v57_v13 }
  0x59   :  { %6762 = vmatmul.msk.f32.gmra.mxu0 %vm120_vm1, %v58_v14 }
  0x61   :  { %6763 = vmatmul.msk.f32.gmra.mxu0 %vm120_vm1, %v59_v15 }
  0x69   :  { %6764 = vmatmul.msk.f32.gmra.mxu0 %vm120_vm1, %v60_v16 }
  0x71   :  { %6765 = vmatmul.msk.f32.gmra.mxu0 %vm120_vm1, %v61_v17 }
  0x79   :  { %6766 = vmatmul.msk.f32.gmra.mxu0 %vm120_vm1, %v62_v18  ;;  %v82_v18 = vld [vmem:[%s14005_s0 + $0x110] sm:$0xff] }
  0x81   :  { %6767 = vmatmul.msk.f32.gmra.mxu0 %vm120_vm1, %v63_v19 }
  0x86   :  { %v8221_v20 = vpop.f32.mrf.mxu0 }
  0x89   :  { %6768 = vmatmul.msk.f32.gmra.mxu0 %vm120_vm1, %v64_v21 }
  0x8e   :  { %v8227_v22 = vpop.f32.mrf.mxu0 }
  0x91   :  { %6769 = vmatmul.msk.f32.gmra.mxu0 %vm120_vm1, %v65_v23  ;;  %v338_v23 = vadd.f32 %v8296_v50, %v8227_v22  ;;  %v83_v22 = vld [vmem:[%s14005_s0 + $0x118] sm:$0xff] }
  0x96   :  { %v8233_v24 = vpop.f32.mrf.mxu0 }
  0x97   :  { %v341_v19 = vadd.f32 %v8296_v50, %v8233_v24  ;;  %v8383_v24 = vmax.f32 %v338_v23, 0.0 }
  0x99   :  { %6770 = vmatmul.msk.f32.gmra.mxu0 %vm120_vm1, %v66_v25  ;;  %14141 = vst [vmem:[#allocation14_spill] sm:$0xff] %v8383_v24 }
  0x9e   :  { %v8239_v26 = vpop.f32.mrf.mxu0 }
  0x9f   :  { %v344_v15 = vadd.f32 %v8296_v50, %v8239_v26  ;;  %v335_v26 = vadd.f32 %v8296_v50, %v8221_v20 }
  0xa1   :  { %6771 = vmatmul.msk.f32.gmra.mxu0 %vm120_vm1, %v67_v27  ;;  %v8374_v25 = vmax.f32 %v344_v15, 0.0  ;;  %v8380_v27 = vmax.f32 %v341_v19, 0.0 }
  0xa3   :  { %14139 = vst [vmem:[#allocation12_spill] sm:$0xff] %v8374_v25 }
  0xa4   :  { %14140 = vst [vmem:[#allocation13_spill] sm:$0xff] %v8380_v27 }
  0xa6   :  { %v8245_v28 = vpop.f32.mrf.mxu0 }
  0xa7   :  { %v347_v13 = vadd.f32 %v8296_v50, %v8245_v28 }
  0xa9   :  { %6772 = vmatmul.msk.f32.gmra.mxu0 %vm120_vm1, %v68_v29  ;;  %v8369_v21 = vmax.f32 %v347_v13, 0.0  ;;  %v8391_v29 = vmax.f32 %v335_v26, 0.0 }
  0xab   :  { %14138 = vst [vmem:[#allocation11_spill] sm:$0xff] %v8369_v21 }
  0xac   :  { %14142 = vst [vmem:[#allocation15_spill] sm:$0xff] %v8391_v29 }
  0xae   :  { %v8251_v30 = vpop.f32.mrf.mxu0 }
  0xaf   :  { %v350_v11 = vadd.f32 %v8296_v50, %v8251_v30  ;;  %v84_v30 = vld [vmem:[%s14005_s0 + $0x120] sm:$0xff] }
  0xb1   :  { %6773 = vmatmul.msk.f32.gmra.mxu0 %vm120_vm1, %v69_v31  ;;  %v8359_v16 = vmax.f32 %v350_v11, 0.0 }
  0xb3   :  { %14137 = vst [vmem:[#allocation10_spill] sm:$0xff] %v8359_v16 }
  0xb6   :  { %v352_v32 = vpop.f32.mrf.mxu0 }
  0xb7   :  { %v353_v9 = vadd.f32 %v8296_v50, %v352_v32  ;;  %v85_v32 = vld [vmem:[%s14005_s0 + $0x128] sm:$0xff] }
  0xb9   :  { %6774 = vmatmul.msk.f32.gmra.mxu0 %vm120_vm1, %v70_v33  ;;  %v8354_v14 = vmax.f32 %v353_v9, 0.0 }
  0xbe   :  { %v355_v34 = vpop.f32.mrf.mxu0 }
  0xbf   :  { %v356_v5 = vadd.f32 %v8296_v50, %v355_v34  ;;  %v86_v34 = vld [vmem:[%s14005_s0 + $0x130] sm:$0xff] }
  0xc1   :  { %6775 = vmatmul.msk.f32.gmra.mxu0 %vm120_vm1, %v71_v35  ;;  %v8348_v12 = vmax.f32 %v356_v5, 0.0 }
  0xc6   :  { %v358_v36 = vpop.f32.mrf.mxu0 }
  0xc7   :  { %v359_v3 = vadd.f32 %v8296_v50, %v358_v36  ;;  %v87_v36 = vld [vmem:[%s14005_s0 + $0x138] sm:$0xff] }
  0xc9   :  { %6776 = vmatmul.msk.f32.gmra.mxu0 %vm120_vm1, %v72_v37  ;;  %v8343_v10 = vmax.f32 %v359_v3, 0.0 }
  0xcb   :  { %14136 = vst [vmem:[#allocation9_spill] sm:$0xff] %v8343_v10 }
  0xce   :  { %v361_v38 = vpop.f32.mrf.mxu0 }
  0xcf   :  { %v362_v1 = vadd.f32 %v8296_v50, %v361_v38  ;;  %v88_v38 = vld [vmem:[%s14005_s0 + $0x140] sm:$0xff] }
  0xd1   :  { %6777 = vmatmul.msk.f32.gmra.mxu0 %vm120_vm1, %v73_v39  ;;  %v8334_v6 = vmax.f32 %v362_v1, 0.0 }
  0xd3   :  { %14135 = vst [vmem:[#allocation8_spill] sm:$0xff] %v8334_v6 }
  0xd6   :  { %v364_v40 = vpop.f32.mrf.mxu0 }
  0xd7   :  { %v365_v63 = vadd.f32 %v8296_v50, %v364_v40  ;;  %v89_v40 = vld [vmem:[%s14005_s0 + $0x148] sm:$0xff] }
  0xd9   :  { %6778 = vmatmul.msk.f32.gmra.mxu0 %vm120_vm1, %v74_v41  ;;  %v8330_v4 = vmax.f32 %v365_v63, 0.0 }
  0xdb   :  { %14134 = vst [vmem:[#allocation7_spill] sm:$0xff] %v8330_v4 }
  0xde   :  { %v367_v42 = vpop.f32.mrf.mxu0 }
  0xdf   :  { %v368_v59 = vadd.f32 %v8296_v50, %v367_v42  ;;  %v90_v42 = vld [vmem:[%s14005_s0 + $0x150] sm:$0xff] }
  0xe1   :  { %6779 = vmatmul.msk.f32.gmra.mxu0 %vm120_vm1, %v75_v43  ;;  %v8325_v2 = vmax.f32 %v368_v59, 0.0 }
  0xe6   :  { %v370_v44 = vpop.f32.mrf.mxu0 }
  0xe7   :  { %v371_v57 = vadd.f32 %v8296_v50, %v370_v44  ;;  %v91_v44 = vld [vmem:[%s14005_s0 + $0x158] sm:$0xff] }
  0xe9   :  { %6780 = vmatmul.msk.f32.gmra.mxu0 %vm120_vm1, %v76_v45  ;;  %v8321_v0 = vmax.f32 %v371_v57, 0.0 }
  0xeb   :  { %14133 = vst [vmem:[#allocation6_spill] sm:$0xff] %v8321_v0 }
  0xee   :  { %v373_v46 = vpop.f32.mrf.mxu0 }
  0xef   :  { %v374_v55 = vadd.f32 %v8296_v50, %v373_v46  ;;  %v92_v46 = vld [vmem:[%s14005_s0 + $0x160] sm:$0xff] }
  0xf1   :  { %6781 = vmatmul.msk.f32.gmra.mxu0 %vm120_vm1, %v77_v47  ;;  %v8312_v60 = vmax.f32 %v374_v55, 0.0 }
  0xf3   :  { %14132 = vst [vmem:[#allocation5_spill] sm:$0xff] %v8312_v60 }
  0xf6   :  { %v376_v48 = vpop.f32.mrf.mxu0 }
  0xf7   :  { %v377_v53 = vadd.f32 %v8296_v50, %v376_v48  ;;  %v93_v48 = vld [vmem:[%s14005_s0 + $0x168] sm:$0xff] }
  0xf9   :  { %6782 = vmatmul.msk.f32.gmra.mxu0 %vm120_vm1, %v78_v49  ;;  %v8308_v58 = vmax.f32 %v377_v53, 0.0  ;;  %v95_v53 = vld [vmem:[%s14005_s0 + $0x178] sm:$0xff] }
  0xfe   :  { %v379_v51 = vpop.f32.mrf.mxu0 }
  0xff   :  { %v380_v54 = vadd.f32 %v8296_v50, %v379_v51  ;;  %v94_v51 = vld [vmem:[%s14005_s0 + $0x170] sm:$0xff] }
 0x101   :  { %v8304_v56 = vmax.f32 %v380_v54, 0.0  ;;  %6783 = vmatmul.msk.f32.gmra.mxu0 %vm120_vm1, %v79_v52 }
 0x103   :  { %654 = vmatpush.msra.mxu1 %v8304_v56 }
 0x105   :  { %655 = vmatpush.msra.mxu1 %v8308_v58 }
 0x106   :  { %v8315_v61 = vpop.f32.mrf.mxu0 }
 0x107   :  { %656 = vmatpush.msra.mxu1 %v8312_v60 }
 0x109   :  { %6784 = vmatmul.msk.f32.gmra.mxu0 %vm120_vm1, %v80_v62  ;;  %657 = vmatpush.msra.mxu1 %v8321_v0 }
 0x10b   :  { %658 = vmatpush.msra.mxu1 %v8325_v2 }
 0x10d   :  { %659 = vmatpush.msra.mxu1 %v8330_v4 }
 0x10e   :  { %v8337_v7 = vpop.f32.mrf.mxu0 }
 0x10f   :  { %660 = vmatpush.msra.mxu1 %v8334_v6 }
 0x111   :  { %6785 = vmatmul.msk.f32.gmra.mxu0 %vm120_vm1, %v81_v8  ;;  %661 = vmatpush.msra.mxu1 %v8343_v10  ;;  %v96_v8 = vld [vmem:[%s14005_s0 + $0x180] sm:$0xff] }
 0x113   :  { %662 = vmatpush.msra.mxu1 %v8348_v12 }
 0x115   :  { %663 = vmatpush.msra.mxu1 %v8354_v14 }
 0x116   :  { %v8362_v17 = vpop.f32.mrf.mxu0 }
 0x117   :  { %664 = vmatpush.msra.mxu1 %v8359_v16 }
 0x119   :  { %6786 = vmatmul.msk.f32.gmra.mxu0 %vm120_vm1, %v82_v18  ;;  %665 = vmatpush.msra.mxu1 %v8369_v21 }
 0x11b   :  { %666 = vmatpush.msra.mxu1 %v8374_v25 }
 0x11d   :  { %667 = vmatpush.msra.mxu1 %v8380_v27 }
 0x11e   :  { %v8386_v28 = vpop.f32.mrf.mxu0 }
 0x11f   :  { %668 = vmatpush.msra.mxu1 %v8383_v24 }
 0x121   :  { %6787 = vmatmul.msk.f32.gmra.mxu0 %vm120_vm1, %v83_v22  ;;  %669 = vmatpush.msra.mxu1 %v8391_v29 }
 0x126   :  { %v8396_v20 = vpop.f32.mrf.mxu0 }
 0x129   :  { %6788 = vmatmul.msk.f32.gmra.mxu0 %vm120_vm1, %v84_v30  ;;  %v97_v30 = vld [vmem:[%s14005_s0 + $0x188] sm:$0xff] }
 0x12e   :  { %v8402_v31 = vpop.f32.mrf.mxu0 }
 0x131   :  { %6789 = vmatmul.msk.f32.gmra.mxu0 %vm120_vm1, %v85_v32 }
 0x136   :  { %v400_v33 = vpop.f32.mrf.mxu0 }
 0x137   :  { %v401_v32 = vadd.f32 %v8296_v50, %v400_v33  ;;  %v392_v33 = vadd.f32 %v8296_v50, %v8386_v28  ;;  %v386_v28 = vadd.f32 %v8296_v50, %v8337_v7  ;;  %v99_v7 = vld [vmem:[%s14005_s0 + $0x198] sm:$0xff] }
 0x139   :  { %6790 = vmatmul.msk.f32.gmra.mxu0 %vm120_vm1, %v86_v34 }
 0x13e   :  { %v403_v35 = vpop.f32.mrf.mxu0 }
 0x13f   :  { %v404_v23 = vadd.f32 %v8296_v50, %v403_v35 }
 0x141   :  { %6791 = vmatmul.msk.f32.gmra.mxu0 %vm120_vm1, %v87_v36  ;;  %v398_v36 = vadd.f32 %v8296_v50, %v8402_v31  ;;  %v8494_v35 = vmax.f32 %v404_v23, 0.0 }
 0x143   :  { %14151 = vst [vmem:[#allocation24_spill] sm:$0xff] %v8494_v35 }
 0x146   :  { %v406_v37 = vpop.f32.mrf.mxu0 }
 0x147   :  { %v407_v18 = vadd.f32 %v8296_v50, %v406_v37  ;;  %v395_v37 = vadd.f32 %v8296_v50, %v8396_v20  ;;  %v389_v20 = vadd.f32 %v8296_v50, %v8362_v17  ;;  %v8529_v17 = vmax.f32 %v386_v28, 0.0  ;;  %v623_v28 = vld [vmem:[%s14008_s3 + $0x108] sm:$0xff] }
 0x149   :  { %6792 = vmatmul.msk.f32.gmra.mxu0 %vm120_vm1, %v88_v38  ;;  %v8489_v34 = vmax.f32 %v407_v18, 0.0  ;;  %v8500_v38 = vmax.f32 %v401_v32, 0.0  ;;  %14157 = vst [vmem:[#allocation30_spill] sm:$0xff] %v8529_v17  ;;  %v611_v18 = vld [vmem:[%s14008_s3 + $0xa8] sm:$0xff] }
 0x14a   :  { %v615_v32 = vld [vmem:[%s14008_s3 + $0xc8] sm:$0xff] }
 0x14b   :  { %14150 = vst [vmem:[#allocation23_spill] sm:$0xff] %v8489_v34 }
 0x14c   :  { %14152 = vst [vmem:[#allocation25_spill] sm:$0xff] %v8500_v38 }
 0x14e   :  { %v409_v39 = vpop.f32.mrf.mxu0 }
 0x14f   :  { %v410_v13 = vadd.f32 %v8296_v50, %v409_v39  ;;  %v8505_v39 = vmax.f32 %v398_v36, 0.0 }
 0x151   :  { %6793 = vmatmul.msk.f32.gmra.mxu0 %vm120_vm1, %v89_v40  ;;  %v8480_v26 = vmax.f32 %v410_v13, 0.0  ;;  %14153 = vst [vmem:[#allocation26_spill] sm:$0xff] %v8505_v39  ;;  %v98_v40 = vld [vmem:[%s14005_s0 + $0x190] sm:$0xff]  ;;  %v104_v13 = vld [vmem:[%s14005_s0 + $0x1c0] sm:$0xff] }
 0x153   :  { %14149 = vst [vmem:[#allocation22_spill] sm:$0xff] %v8480_v26 }
 0x156   :  { %v412_v41 = vpop.f32.mrf.mxu0 }
 0x157   :  { %v413_v9 = vadd.f32 %v8296_v50, %v412_v41  ;;  %v8515_v41 = vmax.f32 %v395_v37, 0.0  ;;  %v106_v37 = vld [vmem:[%s14005_s0 + $0x1d0] sm:$0xff] }
 0x159   :  { %6794 = vmatmul.msk.f32.gmra.mxu0 %vm120_vm1, %v90_v42  ;;  %v8476_v19 = vmax.f32 %v413_v9, 0.0  ;;  %14154 = vst [vmem:[#allocation27_spill] sm:$0xff] %v8515_v41  ;;  %v8520_v42 = vmax.f32 %v392_v33, 0.0  ;;  %v619_v33 = vld [vmem:[%s14008_s3 + $0xe8] sm:$0xff] }
 0x15b   :  { %14148 = vst [vmem:[#allocation21_spill] sm:$0xff] %v8476_v19 }
 0x15c   :  { %14155 = vst [vmem:[#allocation28_spill] sm:$0xff] %v8520_v42 }
 0x15e   :  { %v415_v43 = vpop.f32.mrf.mxu0 }
 0x15f   :  { %v416_v1 = vadd.f32 %v8296_v50, %v415_v43  ;;  %v383_v43 = vadd.f32 %v8296_v50, %v8315_v61  ;;  %v591_v61 = vld [vmem:[%s14008_s3 + $0x8] sm:$0xff] }
 0x161   :  { %6795 = vmatmul.msk.f32.gmra.mxu0 %vm120_vm1, %v91_v44  ;;  %v8471_v15 = vmax.f32 %v416_v1, 0.0  ;;  %v8526_v44 = vmax.f32 %v389_v20, 0.0  ;;  %v103_v1 = vld [vmem:[%s14005_s0 + $0x1b8] sm:$0xff] }
 0x162   :  { %v107_v20 = vld [vmem:[%s14005_s0 + $0x1d8] sm:$0xff] }
 0x163   :  { %14147 = vst [vmem:[#allocation20_spill] sm:$0xff] %v8471_v15 }
 0x164   :  { %14156 = vst [vmem:[#allocation29_spill] sm:$0xff] %v8526_v44 }
 0x166   :  { %v418_v45 = vpop.f32.mrf.mxu0 }
 0x167   :  { %v419_v62 = vadd.f32 %v8296_v50, %v418_v45 }
 0x169   :  { %6796 = vmatmul.msk.f32.gmra.mxu0 %vm120_vm1, %v92_v46  ;;  %v8467_v11 = vmax.f32 %v419_v62, 0.0  ;;  %v8537_v46 = vmax.f32 %v383_v43, 0.0 }
 0x16b   :  { %14146 = vst [vmem:[#allocation19_spill] sm:$0xff] %v8467_v11 }
 0x16c   :  { %14158 = vst [vmem:[#allocation31_spill] sm:$0xff] %v8537_v46 }
 0x16e   :  { %v421_v47 = vpop.f32.mrf.mxu0 }
 0x16f   :  { %v422_v57 = vadd.f32 %v8296_v50, %v421_v47 }
 0x171   :  { %6797 = vmatmul.msk.f32.gmra.mxu0 %vm120_vm1, %v93_v48  ;;  %v8458_v3 = vmax.f32 %v422_v57, 0.0  ;;  %v100_v48 = vld [vmem:[%s14005_s0 + $0x1a0] sm:$0xff]  ;;  %v603_v57 = vld [vmem:[%s14008_s3 + $0x68] sm:$0xff] }
 0x173   :  { %14145 = vst [vmem:[#allocation18_spill] sm:$0xff] %v8458_v3 }
 0x176   :  { %v424_v49 = vpop.f32.mrf.mxu0 }
 0x177   :  { %v425_v54 = vadd.f32 %v8296_v50, %v424_v49  ;;  %v595_v49 = vld [vmem:[%s14008_s3 + $0x28] sm:$0xff] }
 0x179   :  { %6798 = vmatmul.msk.f32.gmra.mxu0 %vm120_vm1, %v94_v51  ;;  %v8454_v63 = vmax.f32 %v425_v54, 0.0 }
 0x17b   :  { %14144 = vst [vmem:[#allocation17_spill] sm:$0xff] %v8454_v63 }
 0x17e   :  { %v427_v52 = vpop.f32.mrf.mxu0 }
 0x17f   :  { %v428_v55 = vadd.f32 %v8296_v50, %v427_v52  ;;  %v101_v52 = vld [vmem:[%s14005_s0 + $0x1a8] sm:$0xff] }
 0x181   :  { %v8450_v59 = vmax.f32 %v428_v55, 0.0  ;;  %6799 = vmatmul.msk.f32.gmra.mxu0 %vm120_vm1, %v95_v53  ;;  %v599_v53 = vld [vmem:[%s14008_s3 + $0x48] sm:$0xff]  ;;  %v102_v55 = vld [vmem:[%s14005_s0 + $0x1b0] sm:$0xff] }
 0x183   :  { %14143 = vst [vmem:[#allocation16_spill] sm:$0xff] %v8450_v59  ;;  %719 = vmatpush.msra.mxu2 %v8450_v59 }
 0x185   :  { %720 = vmatpush.msra.mxu2 %v8454_v63 }
 0x186   :  { %v8461_v5 = vpop.f32.mrf.mxu0 }
 0x187   :  { %721 = vmatpush.msra.mxu2 %v8458_v3 }
 0x189   :  { %6800 = vmatmul.msk.f32.gmra.mxu0 %vm120_vm1, %v96_v8  ;;  %722 = vmatpush.msra.mxu2 %v8467_v11  ;;  %v607_v8 = vld [vmem:[%s14008_s3 + $0x88] sm:$0xff] }
 0x18b   :  { %723 = vmatpush.msra.mxu2 %v8471_v15 }
 0x18d   :  { %724 = vmatpush.msra.mxu2 %v8476_v19 }
 0x18e   :  { %v8483_v22 = vpop.f32.mrf.mxu0 }
 0x18f   :  { %725 = vmatpush.msra.mxu2 %v8480_v26 }
 0x191   :  { %6801 = vmatmul.msk.f32.gmra.mxu0 %vm120_vm1, %v97_v30  ;;  %726 = vmatpush.msra.mxu2 %v8489_v34  ;;  %v105_v30 = vld [vmem:[%s14005_s0 + $0x1c8] sm:$0xff] }
 0x193   :  { %727 = vmatpush.msra.mxu2 %v8494_v35 }
 0x195   :  { %728 = vmatpush.msra.mxu2 %v8500_v38 }
 0x196   :  { %v8508_v31 = vpop.f32.mrf.mxu0 }
 0x197   :  { %729 = vmatpush.msra.mxu2 %v8505_v39 }
 0x199   :  { %6802 = vmatmul.msk.f32.gmra.mxu0 %vm120_vm1, %v98_v40  ;;  %730 = vmatpush.msra.mxu2 %v8515_v41 }
 0x19b   :  { %731 = vmatpush.msra.mxu2 %v8520_v42 }
 0x19d   :  { %732 = vmatpush.msra.mxu2 %v8526_v44 }
 0x19e   :  { %v8532_v45 = vpop.f32.mrf.mxu0 }
 0x19f   :  { %733 = vmatpush.msra.mxu2 %v8529_v17 }
 0x1a1   :  { %6803 = vmatmul.msk.f32.gmra.mxu0 %vm120_vm1, %v99_v7  ;;  %734 = vmatpush.msra.mxu2 %v8537_v46  ;;  %v108_v7 = vld [vmem:[%s14005_s0 + $0x1e0] sm:$0xff] }
 0x1a2   :  { %735 = vmatmul.f32.vlgmr.msra.gmra.mxu2 %v591_v61  ;;  %v627_v61 = vld [vmem:[%s14008_s3 + $0x128] sm:$0xff] }
 0x1a3   :  { %983 = vmatpush.msrb.mxu2 %v8304_v56 }
 0x1a5   :  { %984 = vmatpush.msrb.mxu2 %v8308_v58 }
 0x1a6   :  { %v8547_v47 = vpop.f32.mrf.mxu0 }
 0x1a7   :  { %985 = vmatpush.msrb.mxu2 %v8312_v60 }
 0x1a9   :  { %986 = vmatpush.msrb.mxu2 %v8321_v0  ;;  %6804 = vmatmul.msk.f32.gmra.mxu0 %vm120_vm1, %v100_v48 }
 0x1aa   :  { %738 = vmatmul.f32.gmra.mxu2 %v595_v49  ;;  %v109_v49 = vld [vmem:[%s14005_s0 + $0x1e8] sm:$0xff] }
 0x1ab   :  { %987 = vmatpush.msrb.mxu2 %v8325_v2 }
 0x1ad   :  { %988 = vmatpush.msrb.mxu2 %v8330_v4 }
 0x1ae   :  { %v8560_v51 = vpop.f32.mrf.mxu0 }
 0x1af   :  { %989 = vmatpush.msrb.mxu2 %v8334_v6 }
 0x1b1   :  { %990 = vmatpush.msrb.mxu2 %v8343_v10  ;;  %6805 = vmatmul.msk.f32.gmra.mxu0 %vm120_vm1, %v101_v52  ;;  %v631_v52 = vld [vmem:[%s14008_s3 + $0x148] sm:$0xff] }
 0x1b2   :  { %741 = vmatmul.f32.gmra.mxu2 %v599_v53 }
 0x1b3   :  { %991 = vmatpush.msrb.mxu2 %v8348_v12 }
 0x1b5   :  { %992 = vmatpush.msrb.mxu2 %v8354_v14 }
 0x1b6   :  { %v8573_v54 = vpop.f32.mrf.mxu0 }
 0x1b7   :  { %993 = vmatpush.msrb.mxu2 %v8359_v16 }
 0x1b9   :  { %994 = vmatpush.msrb.mxu2 %v8369_v21  ;;  %6806 = vmatmul.msk.f32.gmra.mxu0 %vm120_vm1, %v102_v55  ;;  %v110_v55 = vld [vmem:[%s14005_s0 + $0x1f0] sm:$0xff] }
 0x1ba   :  { %744 = vmatmul.f32.gmra.mxu2 %v603_v57  ;;  %v635_v57 = vld [vmem:[%s14008_s3 + $0x168] sm:$0xff] }
 0x1bb   :  { %995 = vmatpush.msrb.mxu2 %v8374_v25 }
 0x1bd   :  { %996 = vmatpush.msrb.mxu2 %v8380_v27 }
 0x1be   :  { %v8586_v62 = vpop.f32.mrf.mxu0 }
 0x1bf   :  { %997 = vmatpush.msrb.mxu2 %v8383_v24 }
 0x1c1   :  { %998 = vmatpush.msrb.mxu2 %v8391_v29  ;;  %6807 = vmatmul.msk.f32.gmra.mxu0 %vm120_vm1, %v103_v1 }
 0x1c2   :  { %747 = vmatmul.f32.gmra.mxu2 %v607_v8  ;;  %v111_v8 = vld [vmem:[%s14005_s0 + $0x1f8] sm:$0xff] }
 0x1c6   :  { %v8597_v9 = vpop.f32.mrf.mxu0 }
 0x1c9   :  { %6808 = vmatmul.msk.f32.gmra.mxu0 %vm120_vm1, %v104_v13 }
 0x1ca   :  { %750 = vmatmul.f32.gmra.mxu2 %v611_v18 }
 0x1ce   :  { %v457_v23 = vpop.f32.mrf.mxu0 }
 0x1d1   :  { %6809 = vmatmul.msk.f32.gmra.mxu0 %vm120_vm1, %v105_v30  ;;  %v639_v30 = vld [vmem:[%s14008_s3 + $0x188] sm:$0xff] }
 0x1d2   :  { %753 = vmatmul.f32.gmra.mxu2 %v615_v32 }
 0x1d6   :  { %v460_v36 = vpop.f32.mrf.mxu0 }
 0x1d9   :  { %6810 = vmatmul.msk.f32.gmra.mxu0 %vm120_vm1, %v106_v37 }
 0x1da   :  { %756 = vmatmul.f32.gmra.mxu2 %v619_v33  ;;  %v590_v33 = vld [vmem:[%s14008_s3] sm:$0xff] }
 0x1db   :  { %670 = vmatmul.f32.vlgmr.msra.gmra.mxu1 %v590_v33  ;;  %v440_v33 = vadd.f32 %v8296_v50, %v8532_v45  ;;  %v651_v45 = vld [vmem:[%s14008_s3 + $0x1e8] sm:$0xff] }
 0x1de   :  { %v463_v40 = vpop.f32.mrf.mxu0 }
 0x1e1   :  { %6811 = vmatmul.msk.f32.gmra.mxu0 %vm120_vm1, %v107_v20 }
 0x1e2   :  { %759 = vmatmul.f32.gmra.mxu2 %v623_v28 }
 0x1e6   :  { %v466_v43 = vpop.f32.mrf.mxu0 }
 0x1e7   :  { %v467_v20 = vadd.f32 %v8296_v50, %v466_v43  ;;  %v458_v43 = vadd.f32 %v8296_v50, %v457_v23  ;;  %v452_v23 = vadd.f32 %v8296_v50, %v8586_v62  ;;  %v647_v62 = vld [vmem:[%s14008_s3 + $0x1c8] sm:$0xff] }
 0x1e9   :  { %6812 = vmatmul.msk.f32.gmra.mxu0 %vm120_vm1, %v108_v7  ;;  %v464_v7 = vadd.f32 %v8296_v50, %v463_v40  ;;  %v643_v40 = vld [vmem:[%s14008_s3 + $0x1a8] sm:$0xff] }
 0x1ea   :  { %762 = vmatmul.f32.gmra.mxu2 %v627_v61 }
 0x1ee   :  { %v469_v48 = vpop.f32.mrf.mxu0 }
 0x1ef   :  { %v470_v32 = vadd.f32 %v8296_v50, %v469_v48 }
 0x1f1   :  { %6813 = vmatmul.msk.f32.gmra.mxu0 %vm120_vm1, %v109_v49  ;;  %v8669_v61 = vmax.f32 %v470_v32, 0.0  ;;  %v461_v49 = vadd.f32 %v8296_v50, %v460_v36  ;;  %v594_v36 = vld [vmem:[%s14008_s3 + $0x20] sm:$0xff] }
 0x1f2   :  { %765 = vmatmul.f32.gmra.mxu2 %v631_v52  ;;  %v8676_v52 = vmax.f32 %v467_v20, 0.0  ;;  %673 = vmatmul.f32.gmra.mxu1 %v594_v36 }
 0x1f6   :  { %v472_v53 = vpop.f32.mrf.mxu0 }
 0x1f7   :  { %v473_v13 = vadd.f32 %v8296_v50, %v472_v53  ;;  %v8684_v53 = vmax.f32 %v464_v7, 0.0  ;;  %v437_v7 = vadd.f32 %v8296_v50, %v8508_v31  ;;  %v431_v31 = vadd.f32 %v8296_v50, %v8461_v5 }
 0x1f9   :  { %6814 = vmatmul.msk.f32.gmra.mxu0 %vm120_vm1, %v110_v55  ;;  %v8664_v28 = vmax.f32 %v473_v13, 0.0  ;;  %v455_v55 = vadd.f32 %v8296_v50, %v8597_v9  ;;  %v449_v9 = vadd.f32 %v8296_v50, %v8573_v54  ;;  %v443_v54 = vadd.f32 %v8296_v50, %v8547_v47 }
 0x1fa   :  { %768 = vmatmul.f32.gmra.mxu2 %v635_v57  ;;  %v8693_v57 = vmax.f32 %v461_v49, 0.0  ;;  %v8754_v36 = vmax.f32 %v437_v7, 0.0  ;;  %v8767_v5 = vmax.f32 %v431_v31, 0.0  ;;  %v6820_v7 = vld [vmem:[%s14008_s3 + $0x220] sm:$0xff] }
 0x1fb   :  { %v8707_v13 = vmax.f32 %v455_v55, 0.0  ;;  %v8722_v32 = vmax.f32 %v449_v9, 0.0  ;;  %v8739_v49 = vmax.f32 %v443_v54, 0.0  ;;  %v592_v9 = vld [vmem:[%s14008_s3 + $0x10] sm:$0xff]  ;;  %v606_v54 = vld [vmem:[%s14008_s3 + $0x80] sm:$0xff] }
 0x1fc   :  { %14161 = vst [vmem:[#allocation34_spill] sm:$0xff] %v8754_v36 }
 0x1fd   :  { %14159 = vst [vmem:[#allocation32_spill] sm:$0xff] %v8739_v49 }
 0x1fe   :  { %v475_v1 = vpop.f32.mrf.mxu0  ;;  %14163 = vst [vmem:[#allocation36_spill] sm:$0xff] %v8767_v5 }
 0x1ff   :  { %v476_v18 = vadd.f32 %v8296_v50, %v475_v1  ;;  %v8699_v1 = vmax.f32 %v458_v43, 0.0  ;;  %v8748_v43 = vmax.f32 %v440_v33, 0.0  ;;  %v596_v33 = vld [vmem:[%s14008_s3 + $0x30] sm:$0xff] }
 0x201   :  { %v8657_v37 = vmax.f32 %v476_v18, 0.0  ;;  %6815 = vmatmul.msk.f32.gmra.mxu0 %vm120_vm1, %v111_v8  ;;  %v446_v18 = vadd.f32 %v8296_v50, %v8560_v51  ;;  %v598_v51 = vld [vmem:[%s14008_s3 + $0x40] sm:$0xff]  ;;  %14160 = vst [vmem:[#allocation33_spill] sm:$0xff] %v8748_v43 }
 0x202   :  { %771 = vmatmul.f32.gmra.mxu2 %v639_v30  ;;  %v8716_v30 = vmax.f32 %v452_v23, 0.0  ;;  %676 = vmatmul.f32.gmra.mxu1 %v598_v51 }
 0x203   :  { %784 = vmatpush.msra.mxu3 %v8657_v37  ;;  %1670 = vmatpush.msrb.mxu0 %v8657_v37  ;;  %v8731_v20 = vmax.f32 %v446_v18, 0.0  ;;  %v6918_v18 = vld [vmem:[%s14008_s3 + $0x410] sm:$0xff] }
 0x205   :  { %785 = vmatpush.msra.mxu3 %v8664_v28  ;;  %1671 = vmatpush.msrb.mxu0 %v8664_v28 }
 0x206   :  { %v8673_v48 = vpop.f32.mrf.mxu0 }
 0x207   :  { %786 = vmatpush.msra.mxu3 %v8669_v61  ;;  %1672 = vmatpush.msrb.mxu0 %v8669_v61 }
 0x209   :  { %787 = vmatpush.msra.mxu3 %v8676_v52  ;;  %1673 = vmatpush.msrb.mxu0 %v8676_v52 }
 0x20a   :  { %774 = vmatmul.f32.gmra.mxu2 %v643_v40  ;;  %v434_v40 = vadd.f32 %v8296_v50, %v8483_v22  ;;  %v602_v22 = vld [vmem:[%s14008_s3 + $0x60] sm:$0xff] }
 0x20b   :  { %788 = vmatpush.msra.mxu3 %v8684_v53  ;;  %1674 = vmatpush.msrb.mxu0 %v8684_v53 }
 0x20c   :  { %679 = vmatmul.f32.gmra.mxu1 %v602_v22  ;;  %v8761_v55 = vmax.f32 %v434_v40, 0.0  ;;  %v610_v40 = vld [vmem:[%s14008_s3 + $0xa0] sm:$0xff]  ;;  %v600_v22 = vld [vmem:[%s14008_s3 + $0x50] sm:$0xff] }
 0x20d   :  { %789 = vmatpush.msra.mxu3 %v8693_v57  ;;  %1675 = vmatpush.msrb.mxu0 %v8693_v57 }
 0x20e   :  { %v8703_v8 = vpop.f32.mrf.mxu0  ;;  %14162 = vst [vmem:[#allocation35_spill] sm:$0xff] %v8761_v55 }
 0x20f   :  { %790 = vmatpush.msra.mxu3 %v8699_v1  ;;  %1676 = vmatpush.msrb.mxu0 %v8699_v1 }
 0x211   :  { %791 = vmatpush.msra.mxu3 %v8707_v13  ;;  %1677 = vmatpush.msrb.mxu0 %v8707_v13 }
 0x212   :  { %777 = vmatmul.f32.gmra.mxu2 %v647_v62  ;;  %v6816_v62 = vld [vmem:[%s14008_s3 + $0x200] sm:$0xff] }
 0x213   :  { %792 = vmatpush.msra.mxu3 %v8716_v30  ;;  %1678 = vmatpush.msrb.mxu0 %v8716_v30 }
 0x214   :  { %682 = vmatmul.f32.gmra.mxu1 %v606_v54 }
 0x215   :  { %793 = vmatpush.msra.mxu3 %v8722_v32  ;;  %1679 = vmatpush.msrb.mxu0 %v8722_v32 }
 0x216   :  { %v8735_v47 = vpop.f32.mrf.mxu0 }
 0x217   :  { %794 = vmatpush.msra.mxu3 %v8731_v20  ;;  %1680 = vmatpush.msrb.mxu0 %v8731_v20 }
 0x219   :  { %795 = vmatpush.msra.mxu3 %v8739_v49  ;;  %1681 = vmatpush.msrb.mxu0 %v8739_v49 }
 0x21a   :  { %780 = vmatmul.f32.gmra.mxu2 %v651_v45  ;;  %v6922_v45 = vld [vmem:[%s14008_s3 + $0x430] sm:$0xff] }
 0x21b   :  { %796 = vmatpush.msra.mxu3 %v8748_v43  ;;  %1682 = vmatpush.msrb.mxu0 %v8748_v43 }
 0x21c   :  { %685 = vmatmul.f32.gmra.mxu1 %v610_v40  ;;  %v618_v40 = vld [vmem:[%s14008_s3 + $0xe0] sm:$0xff] }
 0x21d   :  { %797 = vmatpush.msra.mxu3 %v8754_v36  ;;  %1683 = vmatpush.msrb.mxu0 %v8754_v36 }
 0x21e   :  { %v8765_v23 = vpop.f32.mrf.mxu0 }
 0x21f   :  { %798 = vmatpush.msra.mxu3 %v8761_v55  ;;  %1684 = vmatpush.msrb.mxu0 %v8761_v55  ;;  %v636_v55 = vld [vmem:[%s14008_s3 + $0x170] sm:$0xff] }
 0x221   :  { %799 = vmatpush.msra.mxu3 %v8767_v5  ;;  %1685 = vmatpush.msrb.mxu0 %v8767_v5 }
 0x222   :  { %800 = vmatmul.f32.vlgmr.msra.gmra.mxu3 %v592_v9  ;;  %999 = vmatmul.f32.vlgmr.msrb.gmra.mxu2 %v6816_v62  ;;  %v6824_v9 = vld [vmem:[%s14008_s3 + $0x240] sm:$0xff]  ;;  %v6926_v62 = vld [vmem:[%s14008_s3 + $0x450] sm:$0xff] }
 0x223   :  { %1048 = vmatpush.msrb.mxu3 %v8450_v59  ;;  %1686 = vmatmul.f32.vlgmr.msrb.gmra.mxu0 %v6918_v18  ;;  %v614_v18 = vld [vmem:[%s14008_s3 + $0xc0] sm:$0xff] }
 0x224   :  { %2064 = vmatpush.msra.mxu0 %v8450_v59  ;;  %688 = vmatmul.f32.gmra.mxu1 %v614_v18  ;;  %v6934_v18 = vld [vmem:[%s14008_s3 + $0x490] sm:$0xff] }
 0x225   :  { %1049 = vmatpush.msrb.mxu3 %v8454_v63 }
 0x226   :  { %2065 = vmatpush.msra.mxu0 %v8454_v63  ;;  %v8789_v51 = vpop.f32.mrf.mxu0 }
 0x227   :  { %1050 = vmatpush.msrb.mxu3 %v8458_v3 }
 0x228   :  { %2066 = vmatpush.msra.mxu0 %v8458_v3 }
 0x229   :  { %1051 = vmatpush.msrb.mxu3 %v8467_v11 }
 0x22a   :  { %2067 = vmatpush.msra.mxu0 %v8467_v11  ;;  %803 = vmatmul.f32.gmra.mxu3 %v596_v33  ;;  %v604_v33 = vld [vmem:[%s14008_s3 + $0x70] sm:$0xff] }
 0x22b   :  { %1002 = vmatmul.f32.gmra.mxu2 %v6820_v7  ;;  %1052 = vmatpush.msrb.mxu3 %v8471_v15  ;;  %v6828_v7 = vld [vmem:[%s14008_s3 + $0x260] sm:$0xff] }
 0x22c   :  { %1689 = vmatmul.f32.gmra.mxu0 %v6922_v45  ;;  %v6930_v45 = vld [vmem:[%s14008_s3 + $0x470] sm:$0xff]  ;;  %691 = vmatmul.f32.gmra.mxu1 %v618_v40 }
 0x22d   :  { %2068 = vmatpush.msra.mxu0 %v8471_v15  ;;  %1053 = vmatpush.msrb.mxu3 %v8476_v19  ;;  %v612_v40 = vld [vmem:[%s14008_s3 + $0xb0] sm:$0xff] }
 0x22e   :  { %v8810_v31 = vpop.f32.mrf.mxu0 }
 0x22f   :  { %2069 = vmatpush.msra.mxu0 %v8476_v19  ;;  %1054 = vmatpush.msrb.mxu3 %v8480_v26 }
 0x231   :  { %2070 = vmatpush.msra.mxu0 %v8480_v26  ;;  %1055 = vmatpush.msrb.mxu3 %v8489_v34 }
 0x232   :  { %806 = vmatmul.f32.gmra.mxu3 %v600_v22 }
 0x233   :  { %2071 = vmatpush.msra.mxu0 %v8489_v34  ;;  %1005 = vmatmul.f32.gmra.mxu2 %v6824_v9  ;;  %v608_v9 = vld [vmem:[%s14008_s3 + $0x90] sm:$0xff] }
 0x234   :  { %1056 = vmatpush.msrb.mxu3 %v8494_v35  ;;  %1692 = vmatmul.f32.gmra.mxu0 %v6926_v62  ;;  %v6832_v62 = vld [vmem:[%s14008_s3 + $0x280] sm:$0xff] }
 0x235   :  { %2072 = vmatpush.msra.mxu0 %v8494_v35 }
 0x236   :  { %1057 = vmatpush.msrb.mxu3 %v8500_v38  ;;  %v8832_v54 = vpop.f32.mrf.mxu0 }
 0x237   :  { %2073 = vmatpush.msra.mxu0 %v8500_v38 }
 0x238   :  { %1058 = vmatpush.msrb.mxu3 %v8505_v39 }
 0x239   :  { %2074 = vmatpush.msra.mxu0 %v8505_v39 }
 0x23a   :  { %1059 = vmatpush.msrb.mxu3 %v8515_v41 }
 0x23b   :  { %2075 = vmatpush.msra.mxu0 %v8515_v41  ;;  %809 = vmatmul.f32.gmra.mxu3 %v604_v33  ;;  %v8869_v33 = vpop.f32.mrf.mxu2 }
 0x23c   :  { %1008 = vmatmul.f32.gmra.mxu2 %v6828_v7  ;;  %1060 = vmatpush.msrb.mxu3 %v8520_v42  ;;  %14164 = vst [vmem:[#allocation37_spill] sm:$0xff] %v8869_v33  ;;  %v622_v7 = vld [vmem:[%s14008_s3 + $0x100] sm:$0xff] }
 0x23d   :  { %1695 = vmatmul.f32.gmra.mxu0 %v6930_v45  ;;  %694 = vmatmul.f32.gmra.mxu1 %v622_v7  ;;  %v626_v7 = vld [vmem:[%s14008_s3 + $0x120] sm:$0xff] }
 0x23e   :  { %2076 = vmatpush.msra.mxu0 %v8520_v42  ;;  %1061 = vmatpush.msrb.mxu3 %v8526_v44  ;;  %v8854_v22 = vpop.f32.mrf.mxu0 }
 0x240   :  { %2077 = vmatpush.msra.mxu0 %v8526_v44  ;;  %1062 = vmatpush.msrb.mxu3 %v8529_v17 }
 0x242   :  { %2078 = vmatpush.msra.mxu0 %v8529_v17  ;;  %1063 = vmatpush.msrb.mxu3 %v8537_v46  ;;  %v628_v17 = vld [vmem:[%s14008_s3 + $0x130] sm:$0xff] }
 0x243   :  { %812 = vmatmul.f32.gmra.mxu3 %v608_v9  ;;  %v6836_v9 = vld [vmem:[%s14008_s3 + $0x2a0] sm:$0xff] }
 0x244   :  { %2079 = vmatpush.msra.mxu0 %v8537_v46  ;;  %1011 = vmatmul.f32.gmra.mxu2 %v6832_v62  ;;  %v6938_v62 = vld [vmem:[%s14008_s3 + $0x4b0] sm:$0xff] }
 0x245   :  { %1698 = vmatmul.f32.gmra.mxu0 %v6934_v18  ;;  %v8890_v18 = vpop.f32.mrf.mxu2  ;;  %697 = vmatmul.f32.gmra.mxu1 %v626_v7  ;;  %v630_v7 = vld [vmem:[%s14008_s3 + $0x140] sm:$0xff] }
 0x246   :  { %2458 = vmatpush.msrb.mxu0 %v8304_v56  ;;  %v8876_v45 = vpop.f32.mrf.mxu0  ;;  %14165 = vst [vmem:[#allocation38_spill] sm:$0xff] %v8890_v18 }
 0x248   :  { %2459 = vmatpush.msrb.mxu0 %v8308_v58 }
 0x24a   :  { %2460 = vmatpush.msrb.mxu0 %v8312_v60 }
 0x24b   :  { %815 = vmatmul.f32.gmra.mxu3 %v612_v40  ;;  %v616_v40 = vld [vmem:[%s14008_s3 + $0xd0] sm:$0xff] }
 0x24c   :  { %2461 = vmatpush.msrb.mxu0 %v8321_v0  ;;  %1014 = vmatmul.f32.gmra.mxu2 %v6836_v9  ;;  %v6840_v9 = vld [vmem:[%s14008_s3 + $0x2c0] sm:$0xff] }
 0x24d   :  { %1701 = vmatmul.f32.gmra.mxu0 %v6938_v62  ;;  %v6942_v62 = vld [vmem:[%s14008_s3 + $0x4d0] sm:$0xff]  ;;  %v8910_v18 = vpop.f32.mrf.mxu2  ;;  %700 = vmatmul.f32.gmra.mxu1 %v630_v7  ;;  %v634_v7 = vld [vmem:[%s14008_s3 + $0x160] sm:$0xff] }
 0x24e   :  { %2462 = vmatpush.msrb.mxu0 %v8325_v2  ;;  %v8896_v33 = vpop.f32.mrf.mxu0  ;;  %14166 = vst [vmem:[#allocation39_spill] sm:$0xff] %v8910_v18 }
 0x250   :  { %2463 = vmatpush.msrb.mxu0 %v8330_v4 }
 0x252   :  { %2464 = vmatpush.msrb.mxu0 %v8334_v6 }
 0x253   :  { %818 = vmatmul.f32.gmra.mxu3 %v616_v40  ;;  %v620_v40 = vld [vmem:[%s14008_s3 + $0xf0] sm:$0xff] }
 0x254   :  { %2465 = vmatpush.msrb.mxu0 %v8343_v10  ;;  %1017 = vmatmul.f32.gmra.mxu2 %v6840_v9  ;;  %v6844_v9 = vld [vmem:[%s14008_s3 + $0x2e0] sm:$0xff] }
 0x255   :  { %1704 = vmatmul.f32.gmra.mxu0 %v6942_v62  ;;  %v6946_v62 = vld [vmem:[%s14008_s3 + $0x4f0] sm:$0xff]  ;;  %v8930_v18 = vpop.f32.mrf.mxu2  ;;  %703 = vmatmul.f32.gmra.mxu1 %v634_v7  ;;  %v638_v7 = vld [vmem:[%s14008_s3 + $0x180] sm:$0xff] }
 0x256   :  { %2466 = vmatpush.msrb.mxu0 %v8348_v12  ;;  %v8916_v46 = vpop.f32.mrf.mxu0  ;;  %14167 = vst [vmem:[#allocation40_spill] sm:$0xff] %v8930_v18 }
 0x258   :  { %2467 = vmatpush.msrb.mxu0 %v8354_v14 }
 0x25a   :  { %2468 = vmatpush.msrb.mxu0 %v8359_v16 }
 0x25b   :  { %821 = vmatmul.f32.gmra.mxu3 %v620_v40  ;;  %v624_v40 = vld [vmem:[%s14008_s3 + $0x110] sm:$0xff] }
 0x25c   :  { %2469 = vmatpush.msrb.mxu0 %v8369_v21  ;;  %1020 = vmatmul.f32.gmra.mxu2 %v6844_v9  ;;  %v6848_v9 = vld [vmem:[%s14008_s3 + $0x300] sm:$0xff] }
 0x25d   :  { %1707 = vmatmul.f32.gmra.mxu0 %v6946_v62  ;;  %v6950_v62 = vld [vmem:[%s14008_s3 + $0x510] sm:$0xff]  ;;  %v8950_v18 = vpop.f32.mrf.mxu2  ;;  %706 = vmatmul.f32.gmra.mxu1 %v638_v7 }
 0x25e   :  { %2470 = vmatpush.msrb.mxu0 %v8374_v25  ;;  %v8936_v5 = vpop.f32.mrf.mxu0  ;;  %14168 = vst [vmem:[#allocation41_spill] sm:$0xff] %v8950_v18 }
 0x260   :  { %2471 = vmatpush.msrb.mxu0 %v8380_v27  ;;  %v6883_v27 = vld [vmem:[%s14009_s4 + $0x38] sm:$0xff] }
 0x261   :  { %1309 = vmatpush.msra.mxu3 %v6883_v27  ;;  %v6881_v27 = vld [vmem:[%s14009_s4 + $0x28] sm:$0xff] }
 0x262   :  { %2472 = vmatpush.msrb.mxu0 %v8383_v24 }
 0x263   :  { %824 = vmatmul.f32.gmra.mxu3 %v624_v40  ;;  %v6852_v40 = vld [vmem:[%s14008_s3 + $0x320] sm:$0xff] }
 0x264   :  { %2473 = vmatpush.msrb.mxu0 %v8391_v29  ;;  %1023 = vmatmul.f32.gmra.mxu2 %v6848_v9  ;;  %v6954_v9 = vld [vmem:[%s14008_s3 + $0x530] sm:$0xff] }
 0x265   :  { %1710 = vmatmul.f32.gmra.mxu0 %v6950_v62  ;;  %v8964_v18 = vpop.f32.mrf.mxu2  ;;  %v642_v62 = vld [vmem:[%s14008_s3 + $0x1a0] sm:$0xff]  ;;  %v632_v29 = vld [vmem:[%s14008_s3 + $0x150] sm:$0xff] }
 0x266   :  { %v514_v24 = vpop.f32.mrf.mxu0  ;;  %14169 = vst [vmem:[#allocation42_spill] sm:$0xff] %v8964_v18  ;;  %709 = vmatmul.f32.gmra.mxu1 %v642_v62 }
 0x26b   :  { %827 = vmatmul.f32.gmra.mxu3 %v628_v17  ;;  %v6856_v17 = vld [vmem:[%s14008_s3 + $0x340] sm:$0xff] }
 0x26c   :  { %1026 = vmatmul.f32.gmra.mxu2 %v6852_v40  ;;  %v6958_v40 = vld [vmem:[%s14008_s3 + $0x550] sm:$0xff] }
 0x26d   :  { %1713 = vmatmul.f32.gmra.mxu0 %v6954_v9  ;;  %v8978_v18 = vpop.f32.mrf.mxu2  ;;  %v646_v9 = vld [vmem:[%s14008_s3 + $0x1c0] sm:$0xff] }
 0x26e   :  { %v517_v7 = vpop.f32.mrf.mxu0  ;;  %14170 = vst [vmem:[#allocation43_spill] sm:$0xff] %v8978_v18  ;;  %712 = vmatmul.f32.gmra.mxu1 %v646_v9 }
 0x26f   :  { %v518_v36 = vadd.f32 %v8296_v50, %v517_v7  ;;  %v6966_v7 = vld [vmem:[%s14008_s3 + $0x590] sm:$0xff] }
 0x273   :  { %830 = vmatmul.f32.gmra.mxu3 %v632_v29  ;;  %v6860_v29 = vld [vmem:[%s14008_s3 + $0x360] sm:$0xff] }
 0x274   :  { %1029 = vmatmul.f32.gmra.mxu2 %v6856_v17  ;;  %v6962_v17 = vld [vmem:[%s14008_s3 + $0x570] sm:$0xff] }
 0x275   :  { %1716 = vmatmul.f32.gmra.mxu0 %v6958_v40  ;;  %v8992_v18 = vpop.f32.mrf.mxu2  ;;  %v650_v40 = vld [vmem:[%s14008_s3 + $0x1e0] sm:$0xff] }
 0x276   :  { %v520_v62 = vpop.f32.mrf.mxu0  ;;  %14171 = vst [vmem:[#allocation44_spill] sm:$0xff] %v8992_v18  ;;  %715 = vmatmul.f32.gmra.mxu1 %v650_v40  ;;  %v640_v18 = vld [vmem:[%s14008_s3 + $0x190] sm:$0xff]  ;;  %v515_v40 = vadd.f32 %v8296_v50, %v514_v24  ;;  %v512_v24 = vadd.f32 %v8296_v50, %v8936_v5 }
 0x277   :  { %v521_v44 = vadd.f32 %v8296_v50, %v520_v62  ;;  %v6864_v62 = vld [vmem:[%s14008_s3 + $0x380] sm:$0xff] }
 0x27b   :  { %833 = vmatmul.f32.gmra.mxu3 %v636_v55 }
 0x27c   :  { %1032 = vmatmul.f32.gmra.mxu2 %v6860_v29  ;;  %v6882_v29 = vld [vmem:[%s14009_s4 + $0x30] sm:$0xff] }
 0x27d   :  { %1719 = vmatmul.f32.gmra.mxu0 %v6962_v17  ;;  %v9008_v17 = vpop.f32.mrf.mxu1  ;;  %1310 = vmatpush.msra.mxu3 %v6882_v29  ;;  %v9029_v29 = vpop.f32.mrf.mxu2 }
 0x27e   :  { %v523_v9 = vpop.f32.mrf.mxu0  ;;  %14172 = vst [vmem:[#allocation45_spill] sm:$0xff] %v9008_v17  ;;  %v9031_v17 = vmax.f32 %v518_v36, 0.0  ;;  %v8042_v36 = vld [vmem:[%s14007_s2] ss:$0 sm:$0xff] }
 0x27f   :  { %v524_v55 = vadd.f32 %v8296_v50, %v523_v9  ;;  %v9020_v9 = vmax.f32 %v521_v44, 0.0  ;;  %14174 = vst [vmem:[#allocation47_spill] sm:$0xff] %v9029_v29  ;;  %1311 = vmatpush.msra.mxu3 %v6881_v27  ;;  %v9037_v44 = vmax.f32 %v515_v40, 0.0  ;;  %v6868_v50 = vld [vmem:[%s14008_s3 + $0x3a0] sm:$0xff]  ;;  %v506_v5 = vadd.f32 %v8042_v36, %v8896_v33 }
 0x280   :  { %v9054_v27 = vmax.f32 %v512_v24, 0.0  ;;  %v500_v33 = vadd.f32 %v8042_v36, %v8854_v22  ;;  %v6872_v22 = vld [vmem:[%s14008_s3 + $0x3c0] sm:$0xff] }
 0x281   :  { %v9011_v25 = vmax.f32 %v524_v55, 0.0  ;;  %v6880_v55 = vld [vmem:[%s14009_s4 + $0x20] sm:$0xff]  ;;  %14175 = vst [vmem:[#allocation48_spill] sm:$0xff] %v9037_v44  ;;  %v9070_v24 = vmax.f32 %v506_v5, 0.0 }
 0x282   :  { %1312 = vmatpush.msra.mxu3 %v6880_v55  ;;  %14176 = vst [vmem:[#allocation49_spill] sm:$0xff] %v9054_v27  ;;  %v9086_v5 = vmax.f32 %v500_v33, 0.0  ;;  %v488_v33 = vadd.f32 %v8042_v36, %v8765_v23  ;;  %v6876_v23 = vld [vmem:[%s14008_s3 + $0x3e0] sm:$0xff] }
 0x283   :  { %14173 = vst [vmem:[#allocation46_spill] sm:$0xff] %v9011_v25  ;;  %836 = vmatmul.f32.gmra.mxu3 %v640_v18  ;;  %849 = vmatpush.msrb.mxu1 %v9011_v25  ;;  %v509_v18 = vadd.f32 %v8042_v36, %v8916_v46  ;;  %v6970_v46 = vld [vmem:[%s14008_s3 + $0x5b0] sm:$0xff] }
 0x284   :  { %1035 = vmatmul.f32.gmra.mxu2 %v6864_v62  ;;  %v644_v62 = vld [vmem:[%s14008_s3 + $0x1b0] sm:$0xff]  ;;  %14178 = vst [vmem:[#allocation51_spill] sm:$0xff] %v9086_v5 }
 0x285   :  { %1178 = vmatpush.msra.mxu2 %v9011_v25  ;;  %850 = vmatpush.msrb.mxu1 %v9020_v9  ;;  %v9056_v40 = vpop.f32.mrf.mxu1  ;;  %v9063_v55 = vmax.f32 %v509_v18, 0.0  ;;  %v9066_v29 = vpop.f32.mrf.mxu2 }
 0x286   :  { %1722 = vmatmul.f32.gmra.mxu0 %v6966_v7  ;;  %v503_v7 = vadd.f32 %v8042_v36, %v8876_v45  ;;  %14177 = vst [vmem:[#allocation50_spill] sm:$0xff] %v9066_v29  ;;  %v497_v45 = vadd.f32 %v8042_v36, %v8832_v54  ;;  %v6974_v54 = vld [vmem:[%s14008_s3 + $0x5d0] sm:$0xff] }
 0x287   :  { %1179 = vmatpush.msra.mxu2 %v9020_v9  ;;  %851 = vmatpush.msrb.mxu1 %v9031_v17 }
 0x288   :  { %v9075_v18 = vmax.f32 %v503_v7, 0.0  ;;  %v9094_v7 = vmax.f32 %v497_v45, 0.0 }
 0x289   :  { %1180 = vmatpush.msra.mxu2 %v9031_v17  ;;  %852 = vmatpush.msrb.mxu1 %v9037_v44 }
 0x28b   :  { %1181 = vmatpush.msra.mxu2 %v9037_v44  ;;  %839 = vmatmul.f32.gmra.mxu3 %v644_v62  ;;  %v648_v62 = vld [vmem:[%s14008_s3 + $0x1d0] sm:$0xff] }
 0x28c   :  { %1038 = vmatmul.f32.gmra.mxu2 %v6868_v50  ;;  %853 = vmatpush.msrb.mxu1 %v9054_v27  ;;  %v494_v50 = vadd.f32 %v8042_v36, %v8810_v31 }
 0x28d   :  { %1182 = vmatpush.msra.mxu2 %v9054_v27  ;;  %v9097_v29 = vpop.f32.mrf.mxu1  ;;  %v9100_v31 = vpop.f32.mrf.mxu2 }
 0x28e   :  { %1725 = vmatmul.f32.gmra.mxu0 %v6970_v46  ;;  %854 = vmatpush.msrb.mxu1 %v9063_v55  ;;  %v491_v46 = vadd.f32 %v8042_v36, %v8789_v51  ;;  %14179 = vst [vmem:[#allocation52_spill] sm:$0xff] %v9097_v29  ;;  %v485_v51 = vadd.f32 %v8042_v36, %v8735_v47  ;;  %v6978_v47 = vld [vmem:[%s14008_s3 + $0x5f0] sm:$0xff] }
 0x28f   :  { %1183 = vmatpush.msra.mxu2 %v9063_v55  ;;  %14180 = vst [vmem:[#allocation53_spill] sm:$0xff] %v9100_v31 }
 0x290   :  { %855 = vmatpush.msrb.mxu1 %v9070_v24  ;;  %v9108_v45 = vmax.f32 %v491_v46, 0.0  ;;  %v479_v46 = vadd.f32 %v8042_v36, %v8673_v48  ;;  %v9127_v31 = vmax.f32 %v485_v51, 0.0  ;;  %v593_v48 = vld [vmem:[%s14008_s3 + $0x18] sm:$0xff] }
 0x291   :  { %1184 = vmatpush.msra.mxu2 %v9070_v24  ;;  %v6819_v51 = vld [vmem:[%s14008_s3 + $0x218] sm:$0xff] }
 0x292   :  { %856 = vmatpush.msrb.mxu1 %v9075_v18  ;;  %14182 = vst [vmem:[#allocation55_spill] sm:$0xff] %v9108_v45  ;;  %v9139_v29 = vmax.f32 %v479_v46, 0.0  ;;  %v597_v46 = vld [vmem:[%s14008_s3 + $0x38] sm:$0xff] }
 0x293   :  { %1185 = vmatpush.msra.mxu2 %v9075_v18  ;;  %842 = vmatmul.f32.gmra.mxu3 %v648_v62  ;;  %v9103_v62 = vmax.f32 %v494_v50, 0.0  ;;  %v482_v50 = vadd.f32 %v8042_v36, %v8703_v8  ;;  %14184 = vst [vmem:[#allocation57_spill] sm:$0xff] %v9127_v31  ;;  %v6817_v36 = vld [vmem:[%s14008_s3 + $0x208] sm:$0xff] }
 0x294   :  { %1041 = vmatmul.f32.gmra.mxu2 %v6872_v22  ;;  %857 = vmatpush.msrb.mxu1 %v9086_v5  ;;  %v652_v22 = vld [vmem:[%s14008_s3 + $0x1f0] sm:$0xff]  ;;  %14187 = vst [vmem:[#allocation60_spill] sm:$0xff] %v9139_v29 }
 0x295   :  { %1186 = vmatpush.msra.mxu2 %v9086_v5  ;;  %14181 = vst [vmem:[#allocation54_spill] sm:$0xff] %v9103_v62  ;;  %v9131_v8 = vmax.f32 %v482_v50, 0.0 }
 0x296   :  { %1728 = vmatmul.f32.gmra.mxu0 %v6974_v54  ;;  %858 = vmatpush.msrb.mxu1 %v9094_v7  ;;  %v9119_v54 = vmax.f32 %v488_v33, 0.0  ;;  %v9134_v33 = vpop.f32.mrf.mxu1 }
 0x297   :  { %1187 = vmatpush.msra.mxu2 %v9094_v7  ;;  %14185 = vst [vmem:[#allocation58_spill] sm:$0xff] %v9131_v8 }
 0x298   :  { %859 = vmatpush.msrb.mxu1 %v9103_v62  ;;  %14183 = vst [vmem:[#allocation56_spill] sm:$0xff] %v9119_v54 }
 0x299   :  { %1188 = vmatpush.msra.mxu2 %v9103_v62 }
 0x29a   :  { %860 = vmatpush.msrb.mxu1 %v9108_v45 }
 0x29b   :  { %1189 = vmatpush.msra.mxu2 %v9108_v45  ;;  %845 = vmatmul.f32.gmra.mxu3 %v652_v22  ;;  %v9136_v22 = vpop.f32.mrf.mxu2 }
 0x29c   :  { %1044 = vmatmul.f32.gmra.mxu2 %v6876_v23  ;;  %861 = vmatpush.msrb.mxu1 %v9119_v54  ;;  %14186 = vst [vmem:[#allocation59_spill] sm:$0xff] %v9136_v22  ;;  %v7001_v23 = vld [vmem:[%s14008_s3 + $0x608] sm:$0xff] }
 0x29d   :  { %1190 = vmatpush.msra.mxu2 %v9119_v54 }
 0x29e   :  { %1731 = vmatmul.f32.gmra.mxu0 %v6978_v47  ;;  %862 = vmatpush.msrb.mxu1 %v9127_v31  ;;  %v9163_v50 = vpop.f32.mrf.mxu1 }
 0x29f   :  { %1191 = vmatpush.msra.mxu2 %v9127_v31  ;;  %14188 = vst [vmem:[#allocation61_spill] sm:$0xff] %v9163_v50  ;;  %v6870_v50 = vld [vmem:[%s14008_s3 + $0x3b0] sm:$0xff] }
 0x2a0   :  { %863 = vmatpush.msrb.mxu1 %v9131_v8 }
 0x2a1   :  { %1192 = vmatpush.msra.mxu2 %v9131_v8 }
 0x2a2   :  { %864 = vmatpush.msrb.mxu1 %v9139_v29 }
 0x2a3   :  { %1193 = vmatpush.msra.mxu2 %v9139_v29  ;;  %865 = vmatmul.f32.vlgmr.msrb.gmra.mxu1 %v593_v48  ;;  %v9165_v47 = vpop.f32.mrf.mxu2  ;;  %v6821_v48 = vld [vmem:[%s14008_s3 + $0x228] sm:$0xff] }
 0x2a4   :  { %1064 = vmatmul.f32.vlgmr.msrb.gmra.mxu3 %v6817_v36  ;;  %1113 = vmatpush.msra.mxu1 %v8657_v37  ;;  %14189 = vst [vmem:[#allocation62_spill] sm:$0xff] %v9165_v47  ;;  %v6823_v36 = vld [vmem:[%s14008_s3 + $0x238] sm:$0xff] }
 0x2a5   :  { %1194 = vmatmul.f32.vlgmr.msra.gmra.mxu2 %v6819_v51  ;;  %1605 = vmatpush.msrb.mxu3 %v8450_v59  ;;  %v7005_v51 = vld [vmem:[%s14008_s3 + $0x628] sm:$0xff]  ;;  %v14205_v59 = vld [vmem:[#allocation15_spill] sm:$0xff]  ;;  %v9310_v47 = vpop.f32.mrf.mxu3 }
 0x2a6   :  { %1540 = vmatpush.msrb.mxu2 %v8304_v56  ;;  %2080 = vmatmul.f32.vlgmr.msra.gmra.mxu0 %v7001_v23 }
 0x2a7   :  { %1114 = vmatpush.msra.mxu1 %v8664_v28  ;;  %1606 = vmatpush.msrb.mxu3 %v8454_v63 }
 0x2a8   :  { %1541 = vmatpush.msrb.mxu2 %v8308_v58 }
 0x2a9   :  { %1115 = vmatpush.msra.mxu1 %v8669_v61  ;;  %1607 = vmatpush.msrb.mxu3 %v8458_v3  ;;  %v14203_v3 = vld [vmem:[#allocation31_spill] sm:$0xff] }
 0x2aa   :  { %1542 = vmatpush.msrb.mxu2 %v8312_v60 }
 0x2ab   :  { %1116 = vmatpush.msra.mxu1 %v8676_v52  ;;  %1608 = vmatpush.msrb.mxu3 %v8467_v11  ;;  %v9190_v23 = vpop.f32.mrf.mxu2  ;;  %v14200_v11 = vld [vmem:[#allocation30_spill] sm:$0xff] }
 0x2ac   :  { %1543 = vmatpush.msrb.mxu2 %v8321_v0  ;;  %868 = vmatmul.f32.gmra.mxu1 %v597_v46  ;;  %14190 = vst [vmem:[#allocation63_spill] sm:$0xff] %v9190_v23  ;;  %v601_v46 = vld [vmem:[%s14008_s3 + $0x58] sm:$0xff] }
 0x2ad   :  { %1067 = vmatmul.f32.gmra.mxu3 %v6821_v48  ;;  %1117 = vmatpush.msra.mxu1 %v8684_v53  ;;  %v9198_v48 = vpop.f32.mrf.mxu1  ;;  %v617_v23 = vld [vmem:[%s14008_s3 + $0xd8] sm:$0xff] }
 0x2ae   :  { %1197 = vmatmul.f32.gmra.mxu2 %v6823_v36  ;;  %1609 = vmatpush.msrb.mxu3 %v8471_v15  ;;  %14191 = vst [vmem:[#allocation64_spill] sm:$0xff] %v9198_v48  ;;  %v6825_v36 = vld [vmem:[%s14008_s3 + $0x248] sm:$0xff]  ;;  %v14199_v15 = vld [vmem:[#allocation35_spill] sm:$0xff] }
 0x2af   :  { %1544 = vmatpush.msrb.mxu2 %v8325_v2  ;;  %2083 = vmatmul.f32.gmra.mxu0 %v7005_v51  ;;  %v6827_v51 = vld [vmem:[%s14008_s3 + $0x258] sm:$0xff] }
 0x2b0   :  { %1118 = vmatpush.msra.mxu1 %v8693_v57  ;;  %1610 = vmatpush.msrb.mxu3 %v8476_v19  ;;  %v14197_v19 = vld [vmem:[#allocation29_spill] sm:$0xff] }
 0x2b1   :  { %1545 = vmatpush.msrb.mxu2 %v8330_v4 }
 0x2b2   :  { %1119 = vmatpush.msra.mxu1 %v8699_v1  ;;  %1611 = vmatpush.msrb.mxu3 %v8480_v26  ;;  %v7009_v26 = vld [vmem:[%s14008_s3 + $0x648] sm:$0xff] }
 0x2b3   :  { %1546 = vmatpush.msrb.mxu2 %v8334_v6 }
 0x2b4   :  { %1120 = vmatpush.msra.mxu1 %v8707_v13  ;;  %1612 = vmatpush.msrb.mxu3 %v8489_v34  ;;  %v9216_v34 = vpop.f32.mrf.mxu2 }
 0x2b5   :  { %1547 = vmatpush.msrb.mxu2 %v8343_v10  ;;  %871 = vmatmul.f32.gmra.mxu1 %v601_v46  ;;  %14192 = vst [vmem:[#allocation65_spill] sm:$0xff] %v9216_v34  ;;  %v605_v46 = vld [vmem:[%s14008_s3 + $0x78] sm:$0xff]  ;;  %v6837_v34 = vld [vmem:[%s14008_s3 + $0x2a8] sm:$0xff] }
 0x2b6   :  { %1070 = vmatmul.f32.gmra.mxu3 %v6825_v36  ;;  %1121 = vmatpush.msra.mxu1 %v8716_v30  ;;  %v9230_v36 = vpop.f32.mrf.mxu1 }
 0x2b7   :  { %1200 = vmatmul.f32.gmra.mxu2 %v6827_v51  ;;  %1613 = vmatpush.msrb.mxu3 %v8494_v35  ;;  %14193 = vst [vmem:[#allocation66_spill] sm:$0xff] %v9230_v36  ;;  %v6831_v51 = vld [vmem:[%s14008_s3 + $0x278] sm:$0xff]  ;;  %v14196_v35 = vld [vmem:[#allocation34_spill] sm:$0xff] }
 0x2b8   :  { %1548 = vmatpush.msrb.mxu2 %v8348_v12  ;;  %2086 = vmatmul.f32.gmra.mxu0 %v7009_v26  ;;  %v6829_v26 = vld [vmem:[%s14008_s3 + $0x268] sm:$0xff] }
 0x2b9   :  { %1122 = vmatpush.msra.mxu1 %v8722_v32  ;;  %1614 = vmatpush.msrb.mxu3 %v8500_v38 }
 0x2ba   :  { %1549 = vmatpush.msrb.mxu2 %v8354_v14 }
 0x2bb   :  { %1123 = vmatpush.msra.mxu1 %v8731_v20  ;;  %1615 = vmatpush.msrb.mxu3 %v8505_v39  ;;  %v7013_v39 = vld [vmem:[%s14008_s3 + $0x668] sm:$0xff] }
 0x2bc   :  { %1550 = vmatpush.msrb.mxu2 %v8359_v16  ;;  %v9243_v38 = vpop.f32.mrf.mxu2 }
 0x2bd   :  { %1124 = vmatpush.msra.mxu1 %v8739_v49  ;;  %1616 = vmatpush.msrb.mxu3 %v8515_v41  ;;  %14194 = vst [vmem:[#allocation67_spill] sm:$0xff] %v9243_v38  ;;  %v14195_v41 = vld [vmem:[#allocation12_spill] sm:$0xff] }
 0x2be   :  { %1551 = vmatpush.msrb.mxu2 %v8369_v21  ;;  %874 = vmatmul.f32.gmra.mxu1 %v605_v46  ;;  %v14198_v46 = vld [vmem:[#allocation13_spill] sm:$0xff]  ;;  %v9266_v63 = vpop.f32.mrf.mxu1 }
 0x2bf   :  { %1073 = vmatmul.f32.gmra.mxu3 %v6829_v26  ;;  %1125 = vmatpush.msra.mxu1 %v8748_v43  ;;  %v609_v26 = vld [vmem:[%s14008_s3 + $0x98] sm:$0xff]  ;;  %14204 = vst [vmem:[#allocation68_spill] sm:$0xff] %v9266_v63  ;;  %v14262_v21 = vld [vmem:[#allocation45_spill] sm:$0xff] }
 0x2c0   :  { %1203 = vmatmul.f32.gmra.mxu2 %v6831_v51  ;;  %1617 = vmatpush.msrb.mxu3 %v8520_v42  ;;  %v14201_v51 = vld [vmem:[#allocation14_spill] sm:$0xff]  ;;  %v14202_v42 = vld [vmem:[#allocation36_spill] sm:$0xff] }
 0x2c1   :  { %1552 = vmatpush.msrb.mxu2 %v14195_v41  ;;  %2089 = vmatmul.f32.gmra.mxu0 %v7013_v39  ;;  %v6833_v39 = vld [vmem:[%s14008_s3 + $0x288] sm:$0xff]  ;;  %v625_v63 = vld [vmem:[%s14008_s3 + $0x118] sm:$0xff] }
 0x2c2   :  { %1126 = vmatpush.msra.mxu1 %v14196_v35  ;;  %1618 = vmatpush.msrb.mxu3 %v14197_v19  ;;  %v6835_v19 = vld [vmem:[%s14008_s3 + $0x298] sm:$0xff] }
 0x2c3   :  { %1553 = vmatpush.msrb.mxu2 %v14198_v46  ;;  %v637_v35 = vld [vmem:[%s14008_s3 + $0x178] sm:$0xff] }
 0x2c4   :  { %1127 = vmatpush.msra.mxu1 %v14199_v15  ;;  %1619 = vmatpush.msrb.mxu3 %v14200_v11  ;;  %v7017_v11 = vld [vmem:[%s14008_s3 + $0x688] sm:$0xff]  ;;  %v9270_v38 = vpop.f32.mrf.mxu2  ;;  %v7150_v15 = vld [vmem:[%s14009_s4 + $0x90] sm:$0xff] }
 0x2c5   :  { %1554 = vmatpush.msrb.mxu2 %v14201_v51  ;;  %v7151_v51 = vld [vmem:[%s14009_s4 + $0x98] sm:$0xff] }
 0x2c6   :  { %1128 = vmatpush.msra.mxu1 %v14202_v42  ;;  %1620 = vmatpush.msrb.mxu3 %v14203_v3  ;;  %v613_v3 = vld [vmem:[%s14008_s3 + $0xb8] sm:$0xff] }
 0x2c7   :  { %1555 = vmatpush.msrb.mxu2 %v14205_v59  ;;  %877 = vmatmul.f32.gmra.mxu1 %v609_v26  ;;  %v6839_v26 = vld [vmem:[%s14008_s3 + $0x2b8] sm:$0xff]  ;;  %v6853_v59 = vld [vmem:[%s14008_s3 + $0x328] sm:$0xff] }
 0x2c8   :  { %1076 = vmatmul.f32.gmra.mxu3 %v6833_v39  ;;  %1206 = vmatmul.f32.gmra.mxu2 %v6835_v19  ;;  %v9288_v19 = vpop.f32.mrf.mxu1  ;;  %v6855_v42 = vld [vmem:[%s14008_s3 + $0x338] sm:$0xff] }
 0x2c9   :  { %8005 = vmatpush.msra.mxu2 %v9011_v25  ;;  %2092 = vmatmul.f32.gmra.mxu0 %v7017_v11  ;;  %v7021_v11 = vld [vmem:[%s14008_s3 + $0x6a8] sm:$0xff]  ;;  %14206 = vst [vmem:[#allocation69_spill] sm:$0xff] %v9288_v19  ;;  %v9315_v19 = vpop.f32.mrf.mxu0 }
 0x2ca   :  { %14208 = vst [vmem:[#allocation71_spill] sm:$0xff] %v9315_v19  ;;  %2783 = vmatpush.msra.mxu0 %v7151_v51  ;;  %v6859_v51 = vld [vmem:[%s14008_s3 + $0x358] sm:$0xff] }
 0x2cb   :  { %8006 = vmatpush.msra.mxu2 %v9020_v9 }
 0x2cc   :  { %v9290_v39 = vpop.f32.mrf.mxu2  ;;  %2784 = vmatpush.msra.mxu0 %v7150_v15 }
 0x2cd   :  { %8007 = vmatpush.msra.mxu2 %v9031_v17 }
 0x2cf   :  { %8008 = vmatpush.msra.mxu2 %v9037_v44  ;;  %880 = vmatmul.f32.gmra.mxu1 %v613_v3  ;;  %v6841_v3 = vld [vmem:[%s14008_s3 + $0x2c8] sm:$0xff] }
 0x2d0   :  { %1079 = vmatmul.f32.gmra.mxu3 %v6837_v34  ;;  %1209 = vmatmul.f32.gmra.mxu2 %v6839_v26  ;;  %v6843_v34 = vld [vmem:[%s14008_s3 + $0x2d8] sm:$0xff]  ;;  %v7025_v26 = vld [vmem:[%s14008_s3 + $0x6c8] sm:$0xff]  ;;  %v9313_v22 = vpop.f32.mrf.mxu1 }
 0x2d1   :  { %8009 = vmatpush.msra.mxu2 %v9054_v27  ;;  %2095 = vmatmul.f32.gmra.mxu0 %v7021_v11  ;;  %14207 = vst [vmem:[#allocation70_spill] sm:$0xff] %v9313_v22  ;;  %v9335_v22 = vpop.f32.mrf.mxu3 }
 0x2d3   :  { %8010 = vmatpush.msra.mxu2 %v9063_v55 }
 0x2d4   :  { %v9308_v11 = vpop.f32.mrf.mxu2 }
 0x2d5   :  { %8011 = vmatpush.msra.mxu2 %v9070_v24 }
 0x2d7   :  { %8012 = vmatpush.msra.mxu2 %v9075_v18  ;;  %883 = vmatmul.f32.gmra.mxu1 %v617_v23  ;;  %v621_v23 = vld [vmem:[%s14008_s3 + $0xf8] sm:$0xff] }
 0x2d8   :  { %1082 = vmatmul.f32.gmra.mxu3 %v6841_v3  ;;  %1212 = vmatmul.f32.gmra.mxu2 %v6843_v34  ;;  %v6845_v3 = vld [vmem:[%s14008_s3 + $0x2e8] sm:$0xff]  ;;  %v6847_v34 = vld [vmem:[%s14008_s3 + $0x2f8] sm:$0xff]  ;;  %v9341_v36 = vpop.f32.mrf.mxu1 }
 0x2d9   :  { %8013 = vmatpush.msra.mxu2 %v9086_v5  ;;  %2098 = vmatmul.f32.gmra.mxu0 %v7025_v26  ;;  %v7029_v26 = vld [vmem:[%s14008_s3 + $0x6e8] sm:$0xff]  ;;  %14209 = vst [vmem:[#allocation72_spill] sm:$0xff] %v9341_v36  ;;  %v9360_v36 = vpop.f32.mrf.mxu3 }
 0x2db   :  { %8014 = vmatpush.msra.mxu2 %v9094_v7 }
 0x2dc   :  { %v9332_v19 = vpop.f32.mrf.mxu2 }
 0x2dd   :  { %8015 = vmatpush.msra.mxu2 %v9103_v62 }
 0x2df   :  { %8016 = vmatpush.msra.mxu2 %v9108_v45  ;;  %886 = vmatmul.f32.gmra.mxu1 %v621_v23  ;;  %v6849_v23 = vld [vmem:[%s14008_s3 + $0x308] sm:$0xff] }
 0x2e0   :  { %1085 = vmatmul.f32.gmra.mxu3 %v6845_v3  ;;  %1215 = vmatmul.f32.gmra.mxu2 %v6847_v34  ;;  %v9346_v3 = vpop.f32.mrf.mxu0  ;;  %v6851_v34 = vld [vmem:[%s14008_s3 + $0x318] sm:$0xff] }
 0x2e1   :  { %8017 = vmatpush.msra.mxu2 %v9119_v54  ;;  %2101 = vmatmul.f32.gmra.mxu0 %v7029_v26  ;;  %14210 = vst [vmem:[#allocation73_spill] sm:$0xff] %v9346_v3  ;;  %v7033_v26 = vld [vmem:[%s14008_s3 + $0x708] sm:$0xff]  ;;  %v629_v3 = vld [vmem:[%s14008_s3 + $0x138] sm:$0xff] }
 0x2e3   :  { %8018 = vmatpush.msra.mxu2 %v9127_v31 }
 0x2e4   :  { %v9355_v48 = vpop.f32.mrf.mxu2 }
 0x2e5   :  { %8019 = vmatpush.msra.mxu2 %v9131_v8  ;;  %14211 = vst [vmem:[#allocation74_spill] sm:$0xff] %v9355_v48 }
 0x2e7   :  { %8020 = vmatpush.msra.mxu2 %v9139_v29  ;;  %889 = vmatmul.f32.gmra.mxu1 %v625_v63  ;;  %v7037_v63 = vld [vmem:[%s14008_s3 + $0x728] sm:$0xff] }
 0x2e8   :  { %1088 = vmatmul.f32.gmra.mxu3 %v6849_v23  ;;  %1218 = vmatmul.f32.gmra.mxu2 %v6851_v34  ;;  %v9371_v23 = vpop.f32.mrf.mxu1  ;;  %v9373_v34 = vpop.f32.mrf.mxu0 }
 0x2e9   :  { %2104 = vmatmul.f32.gmra.mxu0 %v7033_v26  ;;  %14212 = vst [vmem:[#allocation75_spill] sm:$0xff] %v9371_v23  ;;  %v9401_v23 = vpop.f32.mrf.mxu3 }
 0x2ea   :  { %14213 = vst [vmem:[#allocation76_spill] sm:$0xff] %v9373_v34  ;;  %v7041_v34 = vld [vmem:[%s14008_s3 + $0x748] sm:$0xff] }
 0x2ec   :  { %v9375_v26 = vpop.f32.mrf.mxu2 }
 0x2ed   :  { %14214 = vst [vmem:[#allocation77_spill] sm:$0xff] %v9375_v26 }
 0x2ef   :  { %892 = vmatmul.f32.gmra.mxu1 %v629_v3  ;;  %v7149_v3 = vld [vmem:[%s14009_s4 + $0x88] sm:$0xff] }
 0x2f0   :  { %1091 = vmatmul.f32.gmra.mxu3 %v6853_v59  ;;  %1221 = vmatmul.f32.gmra.mxu2 %v6855_v42  ;;  %v633_v59 = vld [vmem:[%s14008_s3 + $0x158] sm:$0xff]  ;;  %v6857_v42 = vld [vmem:[%s14008_s3 + $0x348] sm:$0xff]  ;;  %v9403_v15 = vpop.f32.mrf.mxu1  ;;  %v9407_v46 = vpop.f32.mrf.mxu0 }
 0x2f1   :  { %2107 = vmatmul.f32.gmra.mxu0 %v7037_v63  ;;  %v7148_v63 = vld [vmem:[%s14009_s4 + $0x80] sm:$0xff]  ;;  %14215 = vst [vmem:[#allocation78_spill] sm:$0xff] %v9403_v15 }
 0x2f2   :  { %2785 = vmatpush.msra.mxu0 %v7149_v3  ;;  %14217 = vst [vmem:[#allocation80_spill] sm:$0xff] %v9407_v46  ;;  %v6861_v3 = vld [vmem:[%s14008_s3 + $0x368] sm:$0xff]  ;;  %v917_v46 = vld [vmem:[%s14009_s4 + $0x18] sm:$0xff] }
 0x2f3   :  { %1422 = vmatpush.msrb.mxu1 %v917_v46  ;;  %v7049_v46 = vld [vmem:[%s14008_s3 + $0x788] sm:$0xff] }
 0x2f4   :  { %2786 = vmatpush.msra.mxu0 %v7148_v63  ;;  %v9405_v26 = vpop.f32.mrf.mxu2  ;;  %v9423_v63 = vpop.f32.mrf.mxu3 }
 0x2f5   :  { %14216 = vst [vmem:[#allocation79_spill] sm:$0xff] %v9405_v26  ;;  %v645_v26 = vld [vmem:[%s14008_s3 + $0x1b8] sm:$0xff] }
 0x2f6   :  { %14219 = vst [vmem:[#allocation82_spill] sm:$0xff] %v9423_v63 }
 0x2f7   :  { %895 = vmatmul.f32.gmra.mxu1 %v633_v59  ;;  %v6863_v59 = vld [vmem:[%s14008_s3 + $0x378] sm:$0xff] }
 0x2f8   :  { %1094 = vmatmul.f32.gmra.mxu3 %v6857_v42  ;;  %1224 = vmatmul.f32.gmra.mxu2 %v6859_v51  ;;  %v7045_v42 = vld [vmem:[%s14008_s3 + $0x768] sm:$0xff]  ;;  %v9425_v51 = vpop.f32.mrf.mxu1  ;;  %v9430_v15 = vpop.f32.mrf.mxu0 }
 0x2f9   :  { %2110 = vmatmul.f32.gmra.mxu0 %v7041_v34  ;;  %14220 = vst [vmem:[#allocation83_spill] sm:$0xff] %v9425_v51  ;;  %v914_v51 = vld [vmem:[%s14009_s4] sm:$0xff] }
 0x2fa   :  { %14221 = vst [vmem:[#allocation84_spill] sm:$0xff] %v9430_v15  ;;  %v915_v15 = vld [vmem:[%s14009_s4 + $0x8] sm:$0xff] }
 0x2fc   :  { %v9421_v34 = vpop.f32.mrf.mxu2 }
 0x2fd   :  { %14218 = vst [vmem:[#allocation81_spill] sm:$0xff] %v9421_v34  ;;  %v9455_v34 = vpop.f32.mrf.mxu3 }
 0x2fe   :  { %14223 = vst [vmem:[#allocation86_spill] sm:$0xff] %v9455_v34 }
 0x2ff   :  { %898 = vmatmul.f32.gmra.mxu1 %v637_v35  ;;  %v641_v35 = vld [vmem:[%s14008_s3 + $0x198] sm:$0xff] }
 0x300   :  { %1097 = vmatmul.f32.gmra.mxu3 %v6861_v3  ;;  %1227 = vmatmul.f32.gmra.mxu2 %v6863_v59  ;;  %v916_v3 = vld [vmem:[%s14009_s4 + $0x10] sm:$0xff]  ;;  %v6865_v59 = vld [vmem:[%s14008_s3 + $0x388] sm:$0xff]  ;;  %v9460_v63 = vpop.f32.mrf.mxu1 }
 0x301   :  { %2113 = vmatmul.f32.gmra.mxu0 %v7045_v42  ;;  %1423 = vmatpush.msrb.mxu1 %v916_v3  ;;  %v6867_v42 = vld [vmem:[%s14008_s3 + $0x398] sm:$0xff]  ;;  %14224 = vst [vmem:[#allocation87_spill] sm:$0xff] %v9460_v63 }
 0x303   :  { %1424 = vmatpush.msrb.mxu1 %v915_v15  ;;  %v6869_v15 = vld [vmem:[%s14008_s3 + $0x3a8] sm:$0xff] }
 0x304   :  { %v9453_v3 = vpop.f32.mrf.mxu2 }
 0x305   :  { %14222 = vst [vmem:[#allocation85_spill] sm:$0xff] %v9453_v3  ;;  %1425 = vmatpush.msrb.mxu1 %v914_v51  ;;  %v7053_v51 = vld [vmem:[%s14008_s3 + $0x7a8] sm:$0xff]  ;;  %v9481_v63 = vpop.f32.mrf.mxu3  ;;  %v6875_v3 = vld [vmem:[%s14008_s3 + $0x3d8] sm:$0xff] }
 0x306   :  { %14227 = vst [vmem:[#allocation90_spill] sm:$0xff] %v9481_v63  ;;  %v6830_v63 = vld [vmem:[%s14008_s3 + $0x270] sm:$0xff] }
 0x307   :  { %901 = vmatmul.f32.gmra.mxu1 %v641_v35  ;;  %v9465_v35 = vpop.f32.mrf.mxu0 }
 0x308   :  { %1100 = vmatmul.f32.gmra.mxu3 %v6865_v59  ;;  %1230 = vmatmul.f32.gmra.mxu2 %v6867_v42  ;;  %14225 = vst [vmem:[#allocation88_spill] sm:$0xff] %v9465_v35  ;;  %v6871_v59 = vld [vmem:[%s14008_s3 + $0x3b8] sm:$0xff]  ;;  %v6873_v35 = vld [vmem:[%s14008_s3 + $0x3c8] sm:$0xff] }
 0x309   :  { %2116 = vmatmul.f32.gmra.mxu0 %v7049_v46  ;;  %v649_v46 = vld [vmem:[%s14008_s3 + $0x1d8] sm:$0xff] }
 0x30c   :  { %v9473_v42 = vpop.f32.mrf.mxu2 }
 0x30d   :  { %14226 = vst [vmem:[#allocation89_spill] sm:$0xff] %v9473_v42  ;;  %v653_v42 = vld [vmem:[%s14008_s3 + $0x1f8] sm:$0xff] }
 0x30f   :  { %904 = vmatmul.f32.gmra.mxu1 %v645_v26  ;;  %v7084_v26 = vld [vmem:[%s14008_s3 + $0x800] sm:$0xff] }
 0x310   :  { %1103 = vmatmul.f32.gmra.mxu3 %v6869_v15  ;;  %1233 = vmatmul.f32.gmra.mxu2 %v6871_v59  ;;  %v9489_v15 = vpop.f32.mrf.mxu1  ;;  %v9491_v59 = vpop.f32.mrf.mxu0 }
 0x311   :  { %2119 = vmatmul.f32.gmra.mxu0 %v7053_v51  ;;  %14228 = vst [vmem:[#allocation91_spill] sm:$0xff] %v9489_v15  ;;  %v6877_v15 = vld [vmem:[%s14008_s3 + $0x3e8] sm:$0xff] }
 0x312   :  { %14229 = vst [vmem:[#allocation92_spill] sm:$0xff] %v9491_v59 }
 0x314   :  { %v9494_v51 = vpop.f32.mrf.mxu2 }
 0x315   :  { %14230 = vst [vmem:[#allocation93_spill] sm:$0xff] %v9494_v51 }
 0x317   :  { %907 = vmatmul.f32.gmra.mxu1 %v649_v46 }
 0x318   :  { %1106 = vmatmul.f32.gmra.mxu3 %v6873_v35  ;;  %1236 = vmatmul.f32.gmra.mxu2 %v6875_v3  ;;  %v6879_v3 = vld [vmem:[%s14008_s3 + $0x3f8] sm:$0xff]  ;;  %v9507_v35 = vpop.f32.mrf.mxu3 }
 0x319   :  { %2474 = vmatmul.f32.vlgmr.msrb.gmra.mxu0 %v7084_v26  ;;  %14231 = vst [vmem:[#allocation94_spill] sm:$0xff] %v9507_v35  ;;  %v6818_v26 = vld [vmem:[%s14008_s3 + $0x210] sm:$0xff] }
 0x31a   :  { %3112 = vmatpush.msrb.mxu0 %v9011_v25 }
 0x31c   :  { %3113 = vmatpush.msrb.mxu0 %v9020_v9  ;;  %v9517_v59 = vpop.f32.mrf.mxu2 }
 0x31d   :  { %14232 = vst [vmem:[#allocation95_spill] sm:$0xff] %v9517_v59 }
 0x31e   :  { %3114 = vmatpush.msrb.mxu0 %v9031_v17 }
 0x31f   :  { %910 = vmatmul.f32.gmra.mxu1 %v653_v42  ;;  %v6916_v42 = vld [vmem:[%s14008_s3 + $0x400] sm:$0xff] }
 0x320   :  { %3115 = vmatpush.msrb.mxu0 %v9037_v44  ;;  %1109 = vmatmul.f32.gmra.mxu3 %v6877_v15  ;;  %v9510_v46 = vpop.f32.mrf.mxu1  ;;  %v9543_v59 = vpop.f32.mrf.mxu3 }
 0x321   :  { %1239 = vmatmul.f32.gmra.mxu2 %v6879_v3  ;;  %v6822_v3 = vld [vmem:[%s14008_s3 + $0x230] sm:$0xff]  ;;  %14234 = vst [vmem:[#allocation97_spill] sm:$0xff] %v9543_v59 }
 0x322   :  { %3116 = vmatpush.msrb.mxu0 %v9054_v27 }
 0x324   :  { %3117 = vmatpush.msrb.mxu0 %v9063_v55 }
 0x326   :  { %3118 = vmatpush.msrb.mxu0 %v9070_v24 }
 0x327   :  { %1129 = vmatmul.f32.vlgmr.msra.gmra.mxu1 %v6818_v26  ;;  %v6920_v26 = vld [vmem:[%s14008_s3 + $0x420] sm:$0xff] }
 0x328   :  { %3119 = vmatpush.msrb.mxu0 %v9075_v18  ;;  %1735 = vmatpush.msra.mxu1 %v9011_v25  ;;  %v9566_v35 = vpop.f32.mrf.mxu3 }
 0x329   :  { %1556 = vmatmul.f32.vlgmr.msrb.gmra.mxu2 %v6916_v42  ;;  %v9525_v15 = vpop.f32.mrf.mxu1  ;;  %v9539_v42 = vpop.f32.mrf.mxu2  ;;  %14236 = vst [vmem:[#allocation99_spill] sm:$0xff] %v9566_v35  ;;  %v6834_v35 = vld [vmem:[%s14008_s3 + $0x290] sm:$0xff] }
 0x32a   :  { %3120 = vmatpush.msrb.mxu0 %v9086_v5  ;;  %1736 = vmatpush.msra.mxu1 %v9020_v9  ;;  %14233 = vst [vmem:[#allocation96_spill] sm:$0xff] %v9539_v42 }
 0x32c   :  { %3121 = vmatpush.msrb.mxu0 %v9094_v7  ;;  %1737 = vmatpush.msra.mxu1 %v9031_v17 }
 0x32e   :  { %3122 = vmatpush.msrb.mxu0 %v9103_v62  ;;  %1738 = vmatpush.msra.mxu1 %v9037_v44 }
 0x32f   :  { %1132 = vmatmul.f32.gmra.mxu1 %v6822_v3  ;;  %v6826_v3 = vld [vmem:[%s14008_s3 + $0x250] sm:$0xff] }
 0x330   :  { %3123 = vmatpush.msrb.mxu0 %v9108_v45  ;;  %1739 = vmatpush.msra.mxu1 %v9054_v27  ;;  %v9586_v34 = vpop.f32.mrf.mxu3 }
 0x331   :  { %1559 = vmatmul.f32.gmra.mxu2 %v6920_v26  ;;  %v6924_v26 = vld [vmem:[%s14008_s3 + $0x440] sm:$0xff]  ;;  %v9561_v42 = vpop.f32.mrf.mxu2  ;;  %14239 = vst [vmem:[#allocation102_spill] sm:$0xff] %v9586_v34 }
 0x332   :  { %3124 = vmatpush.msrb.mxu0 %v9119_v54  ;;  %1740 = vmatpush.msra.mxu1 %v9063_v55  ;;  %v9547_v51 = vpop.f32.mrf.mxu1  ;;  %14235 = vst [vmem:[#allocation98_spill] sm:$0xff] %v9561_v42  ;;  %v6936_v34 = vld [vmem:[%s14008_s3 + $0x4a0] sm:$0xff] }
 0x334   :  { %3125 = vmatpush.msrb.mxu0 %v9127_v31  ;;  %1741 = vmatpush.msra.mxu1 %v9070_v24 }
 0x336   :  { %3126 = vmatpush.msrb.mxu0 %v9131_v8  ;;  %1742 = vmatpush.msra.mxu1 %v9075_v18 }
 0x337   :  { %1135 = vmatmul.f32.gmra.mxu1 %v6826_v3  ;;  %v6928_v3 = vld [vmem:[%s14008_s3 + $0x460] sm:$0xff] }
 0x338   :  { %3127 = vmatpush.msrb.mxu0 %v9139_v29  ;;  %1743 = vmatpush.msra.mxu1 %v9086_v5 }
 0x339   :  { %1562 = vmatmul.f32.gmra.mxu2 %v6924_v26  ;;  %v9578_v26 = vpop.f32.mrf.mxu2 }
 0x33a   :  { %1744 = vmatpush.msra.mxu1 %v9094_v7  ;;  %14237 = vst [vmem:[#allocation100_spill] sm:$0xff] %v9578_v26  ;;  %v6838_v26 = vld [vmem:[%s14008_s3 + $0x2b0] sm:$0xff] }
 0x33b   :  { %v9564_v59 = vpop.f32.mrf.mxu1 }
 0x33c   :  { %1745 = vmatpush.msra.mxu1 %v9103_v62 }
 0x33e   :  { %1746 = vmatpush.msra.mxu1 %v9108_v45  ;;  %v14263_v45 = vld [vmem:[#allocation37_spill] sm:$0xff] }
 0x33f   :  { %1138 = vmatmul.f32.gmra.mxu1 %v6830_v63  ;;  %v6932_v63 = vld [vmem:[%s14008_s3 + $0x480] sm:$0xff]  ;;  %v737_v49 = vadd.f32 %v14263_v45, %v14262_v21  ;;  %v14264_v21 = vld [vmem:[#allocation38_spill] sm:$0xff] }
 0x340   :  { %1747 = vmatpush.msra.mxu1 %v9119_v54  ;;  %v6982_v54 = vld [vmem:[%s14009_s4 + $0x50] sm:$0xff] }
 0x341   :  { %1565 = vmatmul.f32.gmra.mxu2 %v6928_v3 }
 0x342   :  { %1748 = vmatpush.msra.mxu1 %v9127_v31 }
 0x344   :  { %1749 = vmatpush.msra.mxu1 %v9131_v8  ;;  %v9581_v42 = vpop.f32.mrf.mxu1  ;;  %v9597_v8 = vpop.f32.mrf.mxu2 }
 0x345   :  { %14238 = vst [vmem:[#allocation101_spill] sm:$0xff] %v9581_v42 }
 0x346   :  { %1750 = vmatpush.msra.mxu1 %v9139_v29  ;;  %14241 = vst [vmem:[#allocation104_spill] sm:$0xff] %v9597_v8  ;;  %v9602_v29 = vpop.f32.mrf.mxu3 }
 0x347   :  { %1141 = vmatmul.f32.gmra.mxu1 %v6834_v35  ;;  %14242 = vst [vmem:[#allocation105_spill] sm:$0xff] %v9602_v29  ;;  %v6842_v35 = vld [vmem:[%s14008_s3 + $0x2d0] sm:$0xff]  ;;  %v6944_v29 = vld [vmem:[%s14008_s3 + $0x4e0] sm:$0xff] }
 0x349   :  { %1568 = vmatmul.f32.gmra.mxu2 %v6932_v63  ;;  %v6940_v63 = vld [vmem:[%s14008_s3 + $0x4c0] sm:$0xff] }
 0x34c   :  { %v9592_v3 = vpop.f32.mrf.mxu1  ;;  %v9612_v8 = vpop.f32.mrf.mxu2 }
 0x34d   :  { %14240 = vst [vmem:[#allocation103_spill] sm:$0xff] %v9592_v3 }
 0x34e   :  { %v9614_v3 = vpop.f32.mrf.mxu3 }
 0x34f   :  { %1144 = vmatmul.f32.gmra.mxu1 %v6838_v26  ;;  %14244 = vst [vmem:[#allocation107_spill] sm:$0xff] %v9614_v3  ;;  %v6948_v3 = vld [vmem:[%s14008_s3 + $0x500] sm:$0xff] }
 0x351   :  { %1571 = vmatmul.f32.gmra.mxu2 %v6936_v34  ;;  %v6846_v34 = vld [vmem:[%s14008_s3 + $0x2f0] sm:$0xff] }
 0x354   :  { %v9604_v42 = vpop.f32.mrf.mxu1 }
 0x355   :  { %14243 = vst [vmem:[#allocation106_spill] sm:$0xff] %v9604_v42  ;;  %v9624_v42 = vpop.f32.mrf.mxu2 }
 0x357   :  { %1147 = vmatmul.f32.gmra.mxu1 %v6842_v35  ;;  %v9626_v35 = vpop.f32.mrf.mxu3 }
 0x358   :  { %14246 = vst [vmem:[#allocation109_spill] sm:$0xff] %v9626_v35 }
 0x359   :  { %1574 = vmatmul.f32.gmra.mxu2 %v6940_v63  ;;  %v6850_v63 = vld [vmem:[%s14008_s3 + $0x310] sm:$0xff] }
 0x35c   :  { %v9616_v26 = vpop.f32.mrf.mxu1 }
 0x35d   :  { %14245 = vst [vmem:[#allocation108_spill] sm:$0xff] %v9616_v26  ;;  %v9636_v26 = vpop.f32.mrf.mxu2 }
 0x35f   :  { %1150 = vmatmul.f32.gmra.mxu1 %v6846_v34  ;;  %v9643_v35 = vpop.f32.mrf.mxu3 }
 0x360   :  { %14249 = vst [vmem:[#allocation112_spill] sm:$0xff] %v9643_v35 }
 0x361   :  { %1577 = vmatmul.f32.gmra.mxu2 %v6944_v29  ;;  %v6854_v29 = vld [vmem:[%s14008_s3 + $0x330] sm:$0xff] }
 0x364   :  { %v9628_v31 = vpop.f32.mrf.mxu1 }
 0x365   :  { %14247 = vst [vmem:[#allocation110_spill] sm:$0xff] %v9628_v31  ;;  %v6952_v31 = vld [vmem:[%s14008_s3 + $0x520] sm:$0xff] }
 0x367   :  { %1153 = vmatmul.f32.gmra.mxu1 %v6850_v63  ;;  %v9653_v63 = vpop.f32.mrf.mxu2  ;;  %v9658_v35 = vpop.f32.mrf.mxu3 }
 0x368   :  { %14251 = vst [vmem:[#allocation114_spill] sm:$0xff] %v9653_v63 }
 0x369   :  { %1580 = vmatmul.f32.gmra.mxu2 %v6948_v3  ;;  %v6858_v3 = vld [vmem:[%s14008_s3 + $0x350] sm:$0xff]  ;;  %14252 = vst [vmem:[#allocation115_spill] sm:$0xff] %v9658_v35 }
 0x36c   :  { %v9638_v34 = vpop.f32.mrf.mxu1 }
 0x36d   :  { %14248 = vst [vmem:[#allocation111_spill] sm:$0xff] %v9638_v34  ;;  %v6956_v34 = vld [vmem:[%s14008_s3 + $0x540] sm:$0xff] }
 0x36f   :  { %1156 = vmatmul.f32.gmra.mxu1 %v6854_v29  ;;  %v6960_v29 = vld [vmem:[%s14008_s3 + $0x560] sm:$0xff]  ;;  %v1065_v35 = vpop.f32.mrf.mxu3 }
 0x371   :  { %1583 = vmatmul.f32.gmra.mxu2 %v6952_v31  ;;  %v6862_v31 = vld [vmem:[%s14008_s3 + $0x370] sm:$0xff] }
 0x374   :  { %v9648_v41 = vpop.f32.mrf.mxu1 }
 0x375   :  { %14250 = vst [vmem:[#allocation113_spill] sm:$0xff] %v9648_v41  ;;  %v9668_v41 = vpop.f32.mrf.mxu2 }
 0x376   :  { %14254 = vst [vmem:[#allocation117_spill] sm:$0xff] %v9668_v41 }
 0x377   :  { %1159 = vmatmul.f32.gmra.mxu1 %v6858_v3  ;;  %v6983_v3 = vld [vmem:[%s14009_s4 + $0x58] sm:$0xff]  ;;  %v1068_v41 = vpop.f32.mrf.mxu3 }
 0x378   :  { %1865 = vmatpush.msrb.mxu2 %v6983_v3  ;;  %v6980_v3 = vld [vmem:[%s14009_s4 + $0x40] sm:$0xff] }
 0x379   :  { %1586 = vmatmul.f32.gmra.mxu2 %v6956_v34 }
 0x37a   :  { %1866 = vmatpush.msrb.mxu2 %v6982_v54 }
 0x37c   :  { %v9660_v48 = vpop.f32.mrf.mxu1 }
 0x37d   :  { %14253 = vst [vmem:[#allocation116_spill] sm:$0xff] %v9660_v48  ;;  %v6866_v48 = vld [vmem:[%s14008_s3 + $0x390] sm:$0xff] }
 0x37f   :  { %1162 = vmatmul.f32.gmra.mxu1 %v6862_v31  ;;  %v6964_v31 = vld [vmem:[%s14008_s3 + $0x580] sm:$0xff] }
 0x381   :  { %1589 = vmatmul.f32.gmra.mxu2 %v6960_v29  ;;  %v6981_v29 = vld [vmem:[%s14009_s4 + $0x48] sm:$0xff] }
 0x382   :  { %1867 = vmatpush.msrb.mxu2 %v6981_v29 }
 0x384   :  { %v9673_v34 = vpop.f32.mrf.mxu1  ;;  %1868 = vmatpush.msrb.mxu2 %v6980_v3  ;;  %v1071_v3 = vpop.f32.mrf.mxu3 }
 0x385   :  { %14255 = vst [vmem:[#allocation118_spill] sm:$0xff] %v9673_v34  ;;  %v9690_v34 = vpop.f32.mrf.mxu2 }
 0x386   :  { %14256 = vst [vmem:[#allocation119_spill] sm:$0xff] %v9690_v34 }
 0x387   :  { %1165 = vmatmul.f32.gmra.mxu1 %v6866_v48  ;;  %v6968_v48 = vld [vmem:[%s14008_s3 + $0x5a0] sm:$0xff] }
 0x389   :  { %1592 = vmatmul.f32.gmra.mxu2 %v6964_v31  ;;  %v6874_v31 = vld [vmem:[%s14008_s3 + $0x3d0] sm:$0xff] }
 0x38c   :  { %v9692_v54 = vpop.f32.mrf.mxu1 }
 0x38d   :  { %14257 = vst [vmem:[#allocation120_spill] sm:$0xff] %v9692_v54  ;;  %v9700_v29 = vpop.f32.mrf.mxu2  ;;  %v6972_v54 = vld [vmem:[%s14008_s3 + $0x5c0] sm:$0xff] }
 0x38e   :  { %14258 = vst [vmem:[#allocation121_spill] sm:$0xff] %v9700_v29  ;;  %v1074_v29 = vpop.f32.mrf.mxu3 }
 0x38f   :  { %1168 = vmatmul.f32.gmra.mxu1 %v6870_v50  ;;  %v6878_v50 = vld [vmem:[%s14008_s3 + $0x3f0] sm:$0xff] }
 0x391   :  { %1595 = vmatmul.f32.gmra.mxu2 %v6968_v48 }
 0x394   :  { %v9702_v43 = vpop.f32.mrf.mxu1 }
 0x395   :  { %14259 = vst [vmem:[#allocation122_spill] sm:$0xff] %v9702_v43  ;;  %v9715_v48 = vpop.f32.mrf.mxu2  ;;  %v6976_v43 = vld [vmem:[%s14008_s3 + $0x5e0] sm:$0xff] }
 0x396   :  { %14261 = vst [vmem:[#allocation124_spill] sm:$0xff] %v9715_v48  ;;  %v6979_v48 = vld [vmem:[%s14008_s3 + $0x5f8] sm:$0xff] }
 0x397   :  { %1171 = vmatmul.f32.gmra.mxu1 %v6874_v31  ;;  %v1066_v31 = vadd.f32 %v1065_v35, %v9270_v38  ;;  %v740_v38 = vadd.f32 %v14264_v21, %v9056_v40  ;;  %v14270_v21 = vld [vmem:[#allocation10_spill] sm:$0xff] }
 0x399   :  { %1598 = vmatmul.f32.gmra.mxu2 %v6972_v54  ;;  %v802_v54 = vadd.f32 %v9310_v47, %v737_v49  ;;  %v9736_v49 = vpop.f32.mrf.mxu3  ;;  %v14266_v47 = vld [vmem:[#allocation39_spill] sm:$0xff] }
 0x39b   :  { %v867_v16 = vadd.f32 %v9510_v46, %v802_v54  ;;  %v1072_v46 = vadd.f32 %v1071_v3, %v9308_v11 }
 0x39c   :  { %v9710_v34 = vpop.f32.mrf.mxu1 }
 0x39d   :  { %14260 = vst [vmem:[#allocation123_spill] sm:$0xff] %v9710_v34  ;;  %v9729_v62 = vpop.f32.mrf.mxu2 }
 0x39f   :  { %1174 = vmatmul.f32.gmra.mxu1 %v6878_v50 }
 0x3a1   :  { %1601 = vmatmul.f32.gmra.mxu2 %v6976_v43  ;;  %v1069_v43 = vadd.f32 %v1068_v41, %v9290_v39 }
 0x3a4   :  { %v1130_v34 = vpop.f32.mrf.mxu1 }
 0x3a5   :  { %v1131_v63 = vadd.f32 %v1130_v34, %v1066_v31 }
 0x3a7   :  { %v1196_v50 = vadd.f32 %v9612_v8, %v1131_v63  ;;  %6900 = vmatmul.msk.f32.vlgmr.msrb.gmra.mxu1 %vm1248_vm2, %v867_v16  ;;  %v805_v16 = vadd.f32 %v9335_v22, %v740_v38  ;;  %v14265_v22 = vld [vmem:[#allocation52_spill] sm:$0xff] }
 0x3a8   :  { %2129 = vmatpush.msrb.mxu1 %v8657_v37  ;;  %v743_v39 = vadd.f32 %v14266_v47, %v14265_v22  ;;  %v14271_v38 = vld [vmem:[#allocation32_spill] sm:$0xff] }
 0x3a9   :  { %1796 = vmatmul.f32.vlgmr.msra.gmra.mxu2 %v6979_v48  ;;  %6884 = vmatmul.msk.f32.vlgmr.msra.gmra.mxu3 %vm1248_vm2, %v1196_v50  ;;  %v870_v8 = vadd.f32 %v9525_v15, %v805_v16  ;;  %v14268_v50 = vld [vmem:[#allocation54_spill] sm:$0xff]  ;;  %v14274_v16 = vld [vmem:[#allocation33_spill] sm:$0xff]  ;;  %v14279_v47 = vld [vmem:[#allocation12_spill] sm:$0xff] }
 0x3aa   :  { %2194 = vmatpush.msra.mxu2 %v9011_v25  ;;  %1999 = vmatpush.msra.mxu3 %v8304_v56  ;;  %v808_v15 = vadd.f32 %v9360_v36, %v743_v39  ;;  %v14267_v36 = vld [vmem:[#allocation40_spill] sm:$0xff]  ;;  %v14280_v39 = vld [vmem:[#allocation34_spill] sm:$0xff] }
 0x3ab   :  { %2130 = vmatpush.msrb.mxu1 %v8664_v28  ;;  %v746_v3 = vadd.f32 %v14267_v36, %v9134_v33 }
 0x3ac   :  { %2195 = vmatpush.msra.mxu2 %v9020_v9  ;;  %2000 = vmatpush.msra.mxu3 %v8308_v58  ;;  %v1133_v45 = vpop.f32.mrf.mxu1  ;;  %v873_v34 = vadd.f32 %v9547_v51, %v808_v15  ;;  %v1075_v51 = vadd.f32 %v1074_v29, %v9332_v19  ;;  %v14269_v19 = vld [vmem:[#allocation114_spill] sm:$0xff] }
 0x3ad   :  { %2131 = vmatpush.msrb.mxu1 %v8669_v61  ;;  %v1134_v40 = vadd.f32 %v1133_v45, %v1069_v43  ;;  %v14273_v43 = vld [vmem:[#allocation11_spill] sm:$0xff]  ;;  %v14275_v45 = vld [vmem:[#allocation61_spill] sm:$0xff] }
 0x3ae   :  { %2196 = vmatpush.msra.mxu2 %v9031_v17  ;;  %2001 = vmatpush.msra.mxu3 %v8312_v60 }
 0x3af   :  { %v1199_v41 = vadd.f32 %v9624_v42, %v1134_v40  ;;  %2132 = vmatpush.msrb.mxu1 %v8676_v52  ;;  %v1080_v42 = vpop.f32.mrf.mxu3  ;;  %v14276_v40 = vld [vmem:[#allocation41_spill] sm:$0xff] }
 0x3b0   :  { %2197 = vmatpush.msra.mxu2 %v9037_v44  ;;  %6901 = vmatmul.msk.f32.gmra.mxu1 %vm1248_vm2, %v870_v8  ;;  %v14277_v8 = vld [vmem:[#allocation56_spill] sm:$0xff] }
 0x3b1   :  { %2002 = vmatpush.msra.mxu3 %v8321_v0  ;;  %2133 = vmatpush.msrb.mxu1 %v8684_v53 }
 0x3b2   :  { %2198 = vmatpush.msra.mxu2 %v9054_v27  ;;  %6885 = vmatmul.msk.f32.gmra.mxu3 %vm1248_vm2, %v1199_v41  ;;  %v14278_v41 = vld [vmem:[#allocation74_spill] sm:$0xff] }
 0x3b3   :  { %2003 = vmatpush.msra.mxu3 %v8325_v2  ;;  %2134 = vmatpush.msrb.mxu1 %v8693_v57  ;;  %v1078_v22 = vadd.f32 %v9736_v49, %v14278_v41 }
 0x3b4   :  { %2199 = vmatpush.msra.mxu2 %v9063_v55  ;;  %v1136_v35 = vpop.f32.mrf.mxu1 }
 0x3b5   :  { %2004 = vmatpush.msra.mxu3 %v8330_v4  ;;  %2135 = vmatpush.msrb.mxu1 %v8699_v1  ;;  %v1137_v63 = vadd.f32 %v1136_v35, %v1072_v46  ;;  %v14281_v46 = vld [vmem:[#allocation82_spill] sm:$0xff]  ;;  %v14282_v35 = vld [vmem:[#allocation57_spill] sm:$0xff] }
 0x3b6   :  { %2200 = vmatpush.msra.mxu2 %v9070_v24 }
 0x3b7   :  { %v1202_v11 = vadd.f32 %v9636_v26, %v1137_v63  ;;  %2005 = vmatpush.msra.mxu3 %v8334_v6  ;;  %2136 = vmatpush.msrb.mxu1 %v8707_v13  ;;  %v811_v26 = vadd.f32 %v9401_v23, %v746_v3  ;;  %v1083_v31 = vpop.f32.mrf.mxu3  ;;  %v14272_v23 = vld [vmem:[#allocation55_spill] sm:$0xff]  ;;  %v14285_v3 = vld [vmem:[#allocation101_spill] sm:$0xff] }
 0x3b8   :  { %2201 = vmatpush.msra.mxu2 %v9075_v18  ;;  %6902 = vmatmul.msk.f32.gmra.mxu1 %vm1248_vm2, %v873_v34  ;;  %v14283_v34 = vld [vmem:[#allocation13_spill] sm:$0xff] }
 0x3b9   :  { %2006 = vmatpush.msra.mxu3 %v8343_v10  ;;  %2137 = vmatpush.msrb.mxu1 %v8716_v30  ;;  %v876_v54 = vadd.f32 %v9564_v59, %v811_v26  ;;  %v749_v59 = vadd.f32 %v14276_v40, %v14275_v45  ;;  %v14286_v26 = vld [vmem:[#allocation58_spill] sm:$0xff]  ;;  %v14291_v45 = vld [vmem:[#allocation15_spill] sm:$0xff]  ;;  %v14292_v40 = vld [vmem:[#allocation64_spill] sm:$0xff] }
 0x3ba   :  { %2202 = vmatpush.msra.mxu2 %v9086_v5  ;;  %6886 = vmatmul.msk.f32.gmra.mxu3 %vm1248_vm2, %v1202_v11  ;;  %v14284_v11 = vld [vmem:[#allocation35_spill] sm:$0xff] }
 0x3bb   :  { %2007 = vmatpush.msra.mxu3 %v8348_v12  ;;  %2138 = vmatpush.msrb.mxu1 %v8722_v32  ;;  %v814_v15 = vadd.f32 %v14281_v46, %v749_v59  ;;  %v14293_v59 = vld [vmem:[#allocation42_spill] sm:$0xff] }
 0x3bc   :  { %2203 = vmatpush.msra.mxu2 %v9094_v7  ;;  %v1139_v48 = vpop.f32.mrf.mxu1  ;;  %v752_v41 = vadd.f32 %v14293_v59, %v14292_v40  ;;  %v14300_v40 = vld [vmem:[#allocation79_spill] sm:$0xff]  ;;  %v14301_v59 = vld [vmem:[#allocation90_spill] sm:$0xff] }
 0x3bd   :  { %2008 = vmatpush.msra.mxu3 %v8354_v14  ;;  %2139 = vmatpush.msrb.mxu1 %v8731_v20  ;;  %v1140_v33 = vadd.f32 %v1139_v48, %v1075_v51  ;;  %v879_v51 = vadd.f32 %v14285_v3, %v814_v15  ;;  %v14287_v48 = vld [vmem:[#allocation117_spill] sm:$0xff]  ;;  %v14295_v15 = vld [vmem:[#allocation86_spill] sm:$0xff] }
 0x3be   :  { %2204 = vmatpush.msra.mxu2 %v14268_v50 }
 0x3bf   :  { %v1205_v29 = vadd.f32 %v14269_v19, %v1140_v33  ;;  %2009 = vmatpush.msra.mxu3 %v14270_v21  ;;  %2140 = vmatpush.msrb.mxu1 %v14271_v38  ;;  %v14288_v33 = vld [vmem:[#allocation14_spill] sm:$0xff]  ;;  %v1086_v19 = vpop.f32.mrf.mxu3 }
 0x3c0   :  { %2205 = vmatpush.msra.mxu2 %v14272_v23  ;;  %6903 = vmatmul.msk.f32.gmra.mxu1 %vm1248_vm2, %v876_v54  ;;  %v14289_v54 = vld [vmem:[#allocation36_spill] sm:$0xff] }
 0x3c1   :  { %2010 = vmatpush.msra.mxu3 %v14273_v43  ;;  %2141 = vmatpush.msrb.mxu1 %v14274_v16 }
 0x3c2   :  { %2206 = vmatpush.msra.mxu2 %v14277_v8  ;;  %6887 = vmatmul.msk.f32.gmra.mxu3 %vm1248_vm2, %v1205_v29  ;;  %v14290_v29 = vld [vmem:[#allocation60_spill] sm:$0xff] }
 0x3c3   :  { %2011 = vmatpush.msra.mxu3 %v14279_v47  ;;  %2142 = vmatpush.msrb.mxu1 %v14280_v39 }
 0x3c4   :  { %2207 = vmatpush.msra.mxu2 %v14282_v35  ;;  %v1142_v63 = vpop.f32.mrf.mxu1  ;;  %v14297_v35 = vld [vmem:[#allocation119_spill] sm:$0xff] }
 0x3c5   :  { %2012 = vmatpush.msra.mxu3 %v14283_v34  ;;  %2143 = vmatpush.msrb.mxu1 %v14284_v11  ;;  %v1143_v36 = vadd.f32 %v1142_v63, %v1078_v22  ;;  %v14294_v22 = vld [vmem:[#allocation77_spill] sm:$0xff]  ;;  %v817_v63 = vadd.f32 %v14295_v15, %v752_v41  ;;  %v14302_v15 = vld [vmem:[#allocation106_spill] sm:$0xff] }
 0x3c6   :  { %2208 = vmatpush.msra.mxu2 %v14286_v26  ;;  %v1081_v46 = vadd.f32 %v1080_v42, %v14294_v22 }
 0x3c7   :  { %v1208_v49 = vadd.f32 %v14287_v48, %v1143_v36  ;;  %2013 = vmatpush.msra.mxu3 %v14288_v33  ;;  %2144 = vmatpush.msrb.mxu1 %v14289_v54  ;;  %v14296_v48 = vld [vmem:[#allocation103_spill] sm:$0xff]  ;;  %v1089_v50 = vpop.f32.mrf.mxu3 }
 0x3c8   :  { %2209 = vmatpush.msra.mxu2 %v14290_v29  ;;  %6904 = vmatmul.msk.f32.gmra.mxu1 %vm1248_vm2, %v879_v51  ;;  %v882_v26 = vadd.f32 %v14296_v48, %v817_v63  ;;  %v14298_v51 = vld [vmem:[#allocation66_spill] sm:$0xff]  ;;  %v14299_v29 = vld [vmem:[#allocation43_spill] sm:$0xff] }
 0x3c9   :  { %2014 = vmatpush.msra.mxu3 %v14291_v45  ;;  %v755_v23 = vadd.f32 %v14299_v29, %v14298_v51  ;;  %v14306_v29 = vld [vmem:[#allocation81_spill] sm:$0xff] }
 0x3ca   :  { %6888 = vmatmul.msk.f32.gmra.mxu3 %vm1248_vm2, %v1208_v49  ;;  %v1084_v49 = vadd.f32 %v1083_v31, %v14300_v40  ;;  %v1087_v48 = vadd.f32 %v1086_v19, %v14306_v29  ;;  %v14313_v19 = vld [vmem:[#allocation97_spill] sm:$0xff] }
 0x3cb   :  { %v820_v42 = vadd.f32 %v14301_v59, %v755_v23  ;;  %v14308_v59 = vld [vmem:[#allocation108_spill] sm:$0xff] }
 0x3cc   :  { %v1145_v36 = vpop.f32.mrf.mxu1 }
 0x3cd   :  { %v1146_v3 = vadd.f32 %v1145_v36, %v1081_v46  ;;  %v885_v46 = vadd.f32 %v14302_v15, %v820_v42  ;;  %v14303_v36 = vld [vmem:[#allocation121_spill] sm:$0xff] }
 0x3ce   :  { %v14310_v15 = vld [vmem:[#allocation69_spill] sm:$0xff] }
 0x3cf   :  { %v1211_v8 = vadd.f32 %v14297_v35, %v1146_v3  ;;  %v14304_v35 = vld [vmem:[#allocation68_spill] sm:$0xff]  ;;  %v1092_v31 = vpop.f32.mrf.mxu3 }
 0x3d0   :  { %6905 = vmatmul.msk.f32.gmra.mxu1 %vm1248_vm2, %v882_v26  ;;  %v14305_v26 = vld [vmem:[#allocation44_spill] sm:$0xff] }
 0x3d1   :  { %v758_v3 = vadd.f32 %v14305_v26, %v14304_v35 }
 0x3d2   :  { %6889 = vmatmul.msk.f32.gmra.mxu3 %vm1248_vm2, %v1211_v8  ;;  %v14307_v8 = vld [vmem:[#allocation94_spill] sm:$0xff] }
 0x3d3   :  { %v823_v51 = vadd.f32 %v14307_v8, %v758_v3  ;;  %v14314_v8 = vld [vmem:[#allocation110_spill] sm:$0xff] }
 0x3d4   :  { %v1148_v22 = vpop.f32.mrf.mxu1 }
 0x3d5   :  { %v1149_v41 = vadd.f32 %v1148_v22, %v1084_v49  ;;  %v888_v49 = vadd.f32 %v14308_v59, %v823_v51  ;;  %v14309_v22 = vld [vmem:[#allocation124_spill] sm:$0xff]  ;;  %v14316_v59 = vld [vmem:[#allocation50_spill] sm:$0xff] }
 0x3d7   :  { %v1214_v63 = vadd.f32 %v14303_v36, %v1149_v41  ;;  %v1222_v41 = vpop.f32.mrf.mxu2 }
 0x3d8   :  { %6906 = vmatmul.msk.f32.gmra.mxu1 %vm1248_vm2, %v885_v46  ;;  %v14311_v46 = vld [vmem:[#allocation47_spill] sm:$0xff] }
 0x3d9   :  { %v761_v36 = vadd.f32 %v14311_v46, %v14310_v15 }
 0x3da   :  { %6890 = vmatmul.msk.f32.gmra.mxu3 %vm1248_vm2, %v1214_v63  ;;  %v14312_v63 = vld [vmem:[#allocation85_spill] sm:$0xff] }
 0x3db   :  { %v1090_v35 = vadd.f32 %v1089_v50, %v14312_v63  ;;  %v826_v26 = vadd.f32 %v14313_v19, %v761_v36  ;;  %v14318_v50 = vld [vmem:[#allocation99_spill] sm:$0xff] }
 0x3dc   :  { %v1151_v40 = vpop.f32.mrf.mxu1 }
 0x3dd   :  { %v1152_v23 = vadd.f32 %v1151_v40, %v1087_v48  ;;  %v891_v48 = vadd.f32 %v14314_v8, %v826_v26  ;;  %v1095_v40 = vpop.f32.mrf.mxu3 }
 0x3df   :  { %v1217_v42 = vadd.f32 %v14309_v22, %v1152_v23  ;;  %v14315_v23 = vld [vmem:[#allocation70_spill] sm:$0xff]  ;;  %v1225_v22 = vpop.f32.mrf.mxu2 }
 0x3e0   :  { %6907 = vmatmul.msk.f32.gmra.mxu1 %vm1248_vm2, %v888_v49  ;;  %v764_v49 = vadd.f32 %v14316_v59, %v14315_v23  ;;  %v14323_v23 = vld [vmem:[#allocation102_spill] sm:$0xff] }
 0x3e2   :  { %6891 = vmatmul.msk.f32.gmra.mxu3 %vm1248_vm2, %v1217_v42  ;;  %v14317_v42 = vld [vmem:[#allocation89_spill] sm:$0xff]  ;;  %v829_v46 = vadd.f32 %v14318_v50, %v764_v49 }
 0x3e3   :  { %v1093_v15 = vadd.f32 %v1092_v31, %v14317_v42  ;;  %v14324_v50 = vld [vmem:[#allocation113_spill] sm:$0xff] }
 0x3e4   :  { %v1154_v3 = vpop.f32.mrf.mxu1 }
 0x3e5   :  { %v1155_v29 = vadd.f32 %v1154_v3, %v1090_v35  ;;  %v14319_v35 = vld [vmem:[#allocation111_spill] sm:$0xff]  ;;  %v1098_v3 = vpop.f32.mrf.mxu3 }
 0x3e6   :  { %v894_v19 = vadd.f32 %v14319_v35, %v829_v46  ;;  %v14326_v46 = vld [vmem:[#allocation59_spill] sm:$0xff] }
 0x3e7   :  { %v1220_v51 = vadd.f32 %v9729_v62, %v1155_v29  ;;  %v14320_v62 = vld [vmem:[#allocation72_spill] sm:$0xff]  ;;  %v14321_v29 = vld [vmem:[#allocation53_spill] sm:$0xff]  ;;  %v1228_v42 = vpop.f32.mrf.mxu2 }
 0x3e8   :  { %6908 = vmatmul.msk.f32.gmra.mxu1 %vm1248_vm2, %v891_v48  ;;  %v767_v8 = vadd.f32 %v14321_v29, %v14320_v62  ;;  %v14322_v48 = vld [vmem:[#allocation93_spill] sm:$0xff] }
 0x3e9   :  { %v14328_v62 = vld [vmem:[#allocation105_spill] sm:$0xff] }
 0x3ea   :  { %6892 = vmatmul.msk.f32.gmra.mxu3 %vm1248_vm2, %v1220_v51  ;;  %v1096_v51 = vadd.f32 %v1095_v40, %v14322_v48  ;;  %v832_v59 = vadd.f32 %v14323_v23, %v767_v8  ;;  %v14329_v48 = vld [vmem:[#allocation116_spill] sm:$0xff] }
 0x3ec   :  { %v1157_v36 = vpop.f32.mrf.mxu1 }
 0x3ed   :  { %v1158_v63 = vadd.f32 %v1157_v36, %v1093_v15  ;;  %v897_v15 = vadd.f32 %v14324_v50, %v832_v59  ;;  %v1101_v35 = vpop.f32.mrf.mxu3  ;;  %v14331_v59 = vld [vmem:[#allocation62_spill] sm:$0xff]  ;;  %v14332_v50 = vld [vmem:[#allocation96_spill] sm:$0xff] }
 0x3ef   :  { %v1223_v26 = vadd.f32 %v1222_v41, %v1158_v63  ;;  %v14325_v41 = vld [vmem:[#allocation75_spill] sm:$0xff] }
 0x3f0   :  { %6909 = vmatmul.msk.f32.gmra.mxu1 %vm1248_vm2, %v894_v19  ;;  %v770_v63 = vadd.f32 %v14326_v46, %v14325_v41  ;;  %v14327_v19 = vld [vmem:[#allocation95_spill] sm:$0xff] }
 0x3f2   :  { %6893 = vmatmul.msk.f32.gmra.mxu3 %vm1248_vm2, %v1223_v26  ;;  %v1099_v26 = vadd.f32 %v1098_v3, %v14327_v19  ;;  %v835_v40 = vadd.f32 %v14328_v62, %v770_v63  ;;  %v14334_v19 = vld [vmem:[#allocation118_spill] sm:$0xff] }
 0x3f4   :  { %v1160_v31 = vpop.f32.mrf.mxu1  ;;  %v900_v23 = vadd.f32 %v14329_v48, %v835_v40  ;;  %v14335_v40 = vld [vmem:[#allocation83_spill] sm:$0xff]  ;;  %v14337_v48 = vld [vmem:[#allocation98_spill] sm:$0xff] }
 0x3f5   :  { %v1161_v49 = vadd.f32 %v1160_v31, %v1096_v51  ;;  %v1231_v51 = vpop.f32.mrf.mxu2  ;;  %v1104_v3 = vpop.f32.mrf.mxu3 }
 0x3f7   :  { %v1226_v36 = vadd.f32 %v1225_v22, %v1161_v49  ;;  %v14330_v22 = vld [vmem:[#allocation78_spill] sm:$0xff] }
 0x3f8   :  { %6910 = vmatmul.msk.f32.gmra.mxu1 %vm1248_vm2, %v897_v15  ;;  %v773_v49 = vadd.f32 %v14331_v59, %v14330_v22  ;;  %v1102_v15 = vadd.f32 %v1101_v35, %v14332_v50 }
 0x3fa   :  { %6894 = vmatmul.msk.f32.gmra.mxu3 %vm1248_vm2, %v1226_v36  ;;  %v14333_v36 = vld [vmem:[#allocation107_spill] sm:$0xff] }
 0x3fb   :  { %v838_v41 = vadd.f32 %v14333_v36, %v773_v49  ;;  %v14339_v49 = vld [vmem:[#allocation120_spill] sm:$0xff] }
 0x3fc   :  { %v1163_v29 = vpop.f32.mrf.mxu1 }
 0x3fd   :  { %v1164_v8 = vadd.f32 %v1163_v29, %v1099_v26  ;;  %v903_v26 = vadd.f32 %v14334_v19, %v838_v41  ;;  %v14336_v29 = vld [vmem:[#allocation63_spill] sm:$0xff]  ;;  %v14341_v41 = vld [vmem:[#allocation65_spill] sm:$0xff]  ;;  %v14342_v19 = vld [vmem:[#allocation100_spill] sm:$0xff] }
 0x3ff   :  { %v1229_v31 = vadd.f32 %v1228_v42, %v1164_v8  ;;  %v1234_v42 = vpop.f32.mrf.mxu2  ;;  %v776_v8 = vadd.f32 %v14336_v29, %v14335_v40 }
 0x400   :  { %6911 = vmatmul.msk.f32.gmra.mxu1 %vm1248_vm2, %v900_v23  ;;  %v1105_v23 = vadd.f32 %v1104_v3, %v14337_v48 }
 0x402   :  { %6895 = vmatmul.msk.f32.gmra.mxu3 %vm1248_vm2, %v1229_v31  ;;  %v14338_v31 = vld [vmem:[#allocation109_spill] sm:$0xff] }
 0x403   :  { %v841_v35 = vadd.f32 %v14338_v31, %v776_v8  ;;  %v14344_v8 = vld [vmem:[#allocation122_spill] sm:$0xff] }
 0x404   :  { %v1166_v46 = vpop.f32.mrf.mxu1 }
 0x405   :  { %v1167_v63 = vadd.f32 %v1166_v46, %v1102_v15  ;;  %v906_v50 = vadd.f32 %v14339_v49, %v841_v35  ;;  %v1107_v15 = vpop.f32.mrf.mxu3  ;;  %v14346_v35 = vld [vmem:[#allocation67_spill] sm:$0xff] }
 0x407   :  { %v1232_v62 = vadd.f32 %v1231_v51, %v1167_v63  ;;  %v14340_v51 = vld [vmem:[#allocation87_spill] sm:$0xff]  ;;  %v1237_v63 = vpop.f32.mrf.mxu2 }
 0x408   :  { %6912 = vmatmul.msk.f32.gmra.mxu1 %vm1248_vm2, %v903_v26  ;;  %v779_v46 = vadd.f32 %v14341_v41, %v14340_v51  ;;  %v1108_v26 = vadd.f32 %v1107_v15, %v14342_v19 }
 0x40a   :  { %6896 = vmatmul.msk.f32.gmra.mxu3 %vm1248_vm2, %v1232_v62  ;;  %v14343_v62 = vld [vmem:[#allocation112_spill] sm:$0xff] }
 0x40b   :  { %v844_v3 = vadd.f32 %v14343_v62, %v779_v46  ;;  %v14349_v46 = vld [vmem:[#allocation123_spill] sm:$0xff] }
 0x40c   :  { %v1169_v22 = vpop.f32.mrf.mxu1  ;;  %v6919_v62 = vld [vmem:[%s14008_s3 + $0x418] sm:$0xff] }
 0x40d   :  { %v1170_v59 = vadd.f32 %v1169_v22, %v1105_v23  ;;  %v909_v48 = vadd.f32 %v14344_v8, %v844_v3  ;;  %v1110_v31 = vpop.f32.mrf.mxu3  ;;  %v6917_v3 = vld [vmem:[%s14008_s3 + $0x408] sm:$0xff] }
 0x40f   :  { %v1235_v36 = vadd.f32 %v1234_v42, %v1170_v59  ;;  %v14345_v42 = vld [vmem:[#allocation91_spill] sm:$0xff]  ;;  %v14347_v59 = vld [vmem:[#allocation104_spill] sm:$0xff]  ;;  %v1240_v51 = vpop.f32.mrf.mxu2 }
 0x410   :  { %6913 = vmatmul.msk.f32.gmra.mxu1 %vm1248_vm2, %v906_v50  ;;  %v782_v22 = vadd.f32 %v14346_v35, %v14345_v42  ;;  %v1111_v49 = vadd.f32 %v1110_v31, %v14347_v59  ;;  %v14348_v50 = vld [vmem:[#allocation115_spill] sm:$0xff]  ;;  %v14354_v59 = vld [vmem:[#allocation20_spill] sm:$0xff] }
 0x411   :  { %v6923_v42 = vld [vmem:[%s14008_s3 + $0x438] sm:$0xff] }
 0x412   :  { %6897 = vmatmul.msk.f32.gmra.mxu3 %vm1248_vm2, %v1235_v36  ;;  %v847_v36 = vadd.f32 %v14348_v50, %v782_v22  ;;  %v14353_v35 = vld [vmem:[#allocation19_spill] sm:$0xff]  ;;  %v6921_v22 = vld [vmem:[%s14008_s3 + $0x428] sm:$0xff] }
 0x413   :  { %v14356_v50 = vld [vmem:[#allocation22_spill] sm:$0xff] }
 0x414   :  { %v1172_v40 = vpop.f32.mrf.mxu1  ;;  %v912_v19 = vadd.f32 %v14349_v46, %v847_v36  ;;  %v14357_v46 = vld [vmem:[#allocation23_spill] sm:$0xff] }
 0x415   :  { %v1173_v29 = vadd.f32 %v1172_v40, %v1108_v26  ;;  %v14350_v40 = vld [vmem:[#allocation16_spill] sm:$0xff] }
 0x417   :  { %v1238_v23 = vadd.f32 %v1237_v63, %v1173_v29  ;;  %v14351_v29 = vld [vmem:[#allocation17_spill] sm:$0xff] }
 0x418   :  { %6914 = vmatmul.msk.f32.gmra.mxu1 %vm1248_vm2, %v909_v48  ;;  %v14352_v48 = vld [vmem:[#allocation18_spill] sm:$0xff] }
 0x41a   :  { %6898 = vmatmul.msk.f32.gmra.mxu3 %vm1248_vm2, %v1238_v23 }
 0x41c   :  { %v1175_v15 = vpop.f32.mrf.mxu1 }
 0x41d   :  { %v1176_v41 = vadd.f32 %v1175_v15, %v1111_v49  ;;  %v14355_v49 = vld [vmem:[#allocation21_spill] sm:$0xff] }
 0x41f   :  { %v1241_v26 = vadd.f32 %v1240_v51, %v1176_v41  ;;  %v6927_v51 = vld [vmem:[%s14008_s3 + $0x458] sm:$0xff] }
 0x420   :  { %6915 = vmatmul.msk.f32.gmra.mxu1 %vm1248_vm2, %v912_v19  ;;  %v6925_v19 = vld [vmem:[%s14008_s3 + $0x448] sm:$0xff] }
 0x422   :  { %6899 = vmatmul.msk.f32.gmra.mxu3 %vm1248_vm2, %v1241_v26  ;;  %v14358_v26 = vld [vmem:[#allocation24_spill] sm:$0xff] }
 0x424   :  { %v1427_v63 = vpop.f32.mrf.mxu1 }
 0x428   :  { %1751 = vmatmul.f32.vlgmr.msra.gmra.mxu1 %v6919_v62  ;;  %v14360_v62 = vld [vmem:[#allocation26_spill] sm:$0xff] }
 0x429   :  { %2523 = vmatpush.msra.mxu1 %v14350_v40 }
 0x42a   :  { %1621 = vmatmul.f32.vlgmr.msrb.gmra.mxu3 %v6917_v3 }
 0x42b   :  { %8021 = vmatpush.msrb.mxu3 %v14350_v40  ;;  %2524 = vmatpush.msra.mxu1 %v14351_v29 }
 0x42c   :  { %v1314_v8 = vpop.f32.mrf.mxu3 }
 0x42d   :  { %8022 = vmatpush.msrb.mxu3 %v14351_v29  ;;  %2525 = vmatpush.msra.mxu1 %v14352_v48  ;;  %v9908_v23 = vadd.f32 %v1427_v63, %v1314_v8  ;;  %v1430_v31 = vpop.f32.mrf.mxu1  ;;  %v14359_v63 = vld [vmem:[#allocation25_spill] sm:$0xff] }
 0x42f   :  { %8023 = vmatpush.msrb.mxu3 %v14352_v48  ;;  %2526 = vmatpush.msra.mxu1 %v14353_v35 }
 0x430   :  { %1754 = vmatmul.f32.gmra.mxu1 %v6923_v42 }
 0x431   :  { %8024 = vmatpush.msrb.mxu3 %v14353_v35  ;;  %2527 = vmatpush.msra.mxu1 %v14354_v59 }
 0x432   :  { %1624 = vmatmul.f32.gmra.mxu3 %v6921_v22  ;;  %v14362_v22 = vld [vmem:[#allocation27_spill] sm:$0xff] }
 0x433   :  { %8025 = vmatpush.msrb.mxu3 %v14354_v59  ;;  %2528 = vmatpush.msra.mxu1 %v14355_v49 }
 0x435   :  { %8026 = vmatpush.msrb.mxu3 %v14355_v49  ;;  %2529 = vmatpush.msra.mxu1 %v14356_v50  ;;  %v1317_v36 = vpop.f32.mrf.mxu3  ;;  %v1433_v15 = vpop.f32.mrf.mxu1 }
 0x436   :  { %v9927_v41 = vadd.f32 %v1430_v31, %v1317_v36  ;;  %v6931_v31 = vld [vmem:[%s14008_s3 + $0x478] sm:$0xff]  ;;  %v6929_v36 = vld [vmem:[%s14008_s3 + $0x468] sm:$0xff] }
 0x437   :  { %8027 = vmatpush.msrb.mxu3 %v14356_v50  ;;  %2530 = vmatpush.msra.mxu1 %v14357_v46 }
 0x438   :  { %1757 = vmatmul.f32.gmra.mxu1 %v6927_v51  ;;  %v14363_v51 = vld [vmem:[#allocation28_spill] sm:$0xff] }
 0x439   :  { %8028 = vmatpush.msrb.mxu3 %v14357_v46  ;;  %2531 = vmatpush.msra.mxu1 %v14358_v26 }
 0x43a   :  { %1627 = vmatmul.f32.gmra.mxu3 %v6925_v19  ;;  %v14364_v19 = vld [vmem:[#allocation29_spill] sm:$0xff] }
 0x43b   :  { %8029 = vmatpush.msrb.mxu3 %v14358_v26  ;;  %2532 = vmatpush.msra.mxu1 %v14359_v63 }
 0x43d   :  { %8030 = vmatpush.msrb.mxu3 %v14359_v63  ;;  %2533 = vmatpush.msra.mxu1 %v14360_v62  ;;  %v1320_v3 = vpop.f32.mrf.mxu3  ;;  %v1436_v8 = vpop.f32.mrf.mxu1  ;;  %v6939_v63 = vld [vmem:[%s14008_s3 + $0x4b8] sm:$0xff] }
 0x43e   :  { %v9943_v42 = vadd.f32 %v1433_v15, %v1320_v3  ;;  %v14365_v15 = vld [vmem:[#allocation30_spill] sm:$0xff] }
 0x43f   :  { %8031 = vmatpush.msrb.mxu3 %v14360_v62  ;;  %2534 = vmatpush.msra.mxu1 %v14362_v22 }
 0x440   :  { %14361 = vst [vmem:[#allocation45_spill] sm:$0xff] %v9943_v42  ;;  %1760 = vmatmul.f32.gmra.mxu1 %v6931_v31  ;;  %v6935_v42 = vld [vmem:[%s14008_s3 + $0x498] sm:$0xff] }
 0x441   :  { %8032 = vmatpush.msrb.mxu3 %v14362_v22  ;;  %2535 = vmatpush.msra.mxu1 %v14363_v51  ;;  %v14367_v22 = vld [vmem:[#allocation31_spill] sm:$0xff] }
 0x442   :  { %1630 = vmatmul.f32.gmra.mxu3 %v6929_v36  ;;  %v6933_v36 = vld [vmem:[%s14008_s3 + $0x488] sm:$0xff] }
 0x443   :  { %8033 = vmatpush.msrb.mxu3 %v14363_v51  ;;  %2536 = vmatpush.msra.mxu1 %v14364_v19 }
 0x445   :  { %8034 = vmatpush.msrb.mxu3 %v14364_v19  ;;  %2537 = vmatpush.msra.mxu1 %v14365_v15  ;;  %v1323_v3 = vpop.f32.mrf.mxu3  ;;  %v1439_v62 = vpop.f32.mrf.mxu1 }
 0x446   :  { %v9959_v31 = vadd.f32 %v1436_v8, %v1323_v3  ;;  %v6937_v3 = vld [vmem:[%s14008_s3 + $0x4a8] sm:$0xff] }
 0x447   :  { %8035 = vmatpush.msrb.mxu3 %v14365_v15  ;;  %2538 = vmatpush.msra.mxu1 %v14367_v22 }
 0x448   :  { %14366 = vst [vmem:[#allocation37_spill] sm:$0xff] %v9959_v31  ;;  %1763 = vmatmul.f32.gmra.mxu1 %v6935_v42  ;;  %v6943_v42 = vld [vmem:[%s14008_s3 + $0x4d8] sm:$0xff] }
 0x449   :  { %8036 = vmatpush.msrb.mxu3 %v14367_v22  ;;  %v6941_v22 = vld [vmem:[%s14008_s3 + $0x4c8] sm:$0xff] }
 0x44a   :  { %1633 = vmatmul.f32.gmra.mxu3 %v6933_v36 }
 0x44d   :  { %v1326_v19 = vpop.f32.mrf.mxu3  ;;  %v1442_v51 = vpop.f32.mrf.mxu1 }
 0x44e   :  { %v9970_v8 = vadd.f32 %v1439_v62, %v1326_v19 }
 0x450   :  { %14368 = vst [vmem:[#allocation38_spill] sm:$0xff] %v9970_v8  ;;  %1766 = vmatmul.f32.gmra.mxu1 %v6939_v63  ;;  %v6947_v63 = vld [vmem:[%s14008_s3 + $0x4f8] sm:$0xff]  ;;  %v6945_v8 = vld [vmem:[%s14008_s3 + $0x4e8] sm:$0xff] }
 0x452   :  { %1636 = vmatmul.f32.gmra.mxu3 %v6937_v3 }
 0x455   :  { %v1329_v15 = vpop.f32.mrf.mxu3  ;;  %v1445_v31 = vpop.f32.mrf.mxu1 }
 0x456   :  { %v9978_v36 = vadd.f32 %v1442_v51, %v1329_v15 }
 0x458   :  { %14369 = vst [vmem:[#allocation52_spill] sm:$0xff] %v9978_v36  ;;  %1769 = vmatmul.f32.gmra.mxu1 %v6943_v42  ;;  %v6949_v36 = vld [vmem:[%s14008_s3 + $0x508] sm:$0xff] }
 0x45a   :  { %1639 = vmatmul.f32.gmra.mxu3 %v6941_v22  ;;  %v6951_v22 = vld [vmem:[%s14008_s3 + $0x518] sm:$0xff] }
 0x45d   :  { %v1332_v62 = vpop.f32.mrf.mxu3  ;;  %v1448_v19 = vpop.f32.mrf.mxu1 }
 0x45e   :  { %v9986_v3 = vadd.f32 %v1445_v31, %v1332_v62 }
 0x460   :  { %14370 = vst [vmem:[#allocation39_spill] sm:$0xff] %v9986_v3  ;;  %1772 = vmatmul.f32.gmra.mxu1 %v6947_v63  ;;  %v6953_v3 = vld [vmem:[%s14008_s3 + $0x528] sm:$0xff] }
 0x462   :  { %1642 = vmatmul.f32.gmra.mxu3 %v6945_v8  ;;  %v6955_v8 = vld [vmem:[%s14008_s3 + $0x538] sm:$0xff] }
 0x465   :  { %v1335_v51 = vpop.f32.mrf.mxu3  ;;  %v1451_v15 = vpop.f32.mrf.mxu1 }
 0x466   :  { %v9994_v42 = vadd.f32 %v1448_v19, %v1335_v51 }
 0x468   :  { %14371 = vst [vmem:[#allocation40_spill] sm:$0xff] %v9994_v42  ;;  %1775 = vmatmul.f32.gmra.mxu1 %v6951_v22  ;;  %v6957_v42 = vld [vmem:[%s14008_s3 + $0x548] sm:$0xff] }
 0x46a   :  { %1645 = vmatmul.f32.gmra.mxu3 %v6949_v36  ;;  %v6959_v36 = vld [vmem:[%s14008_s3 + $0x558] sm:$0xff] }
 0x46d   :  { %v1338_v31 = vpop.f32.mrf.mxu3  ;;  %v1454_v62 = vpop.f32.mrf.mxu1 }
 0x46e   :  { %v10002_v63 = vadd.f32 %v1451_v15, %v1338_v31 }
 0x470   :  { %14372 = vst [vmem:[#allocation114_spill] sm:$0xff] %v10002_v63  ;;  %1778 = vmatmul.f32.gmra.mxu1 %v6955_v8  ;;  %v6961_v63 = vld [vmem:[%s14008_s3 + $0x568] sm:$0xff] }
 0x472   :  { %1648 = vmatmul.f32.gmra.mxu3 %v6953_v3  ;;  %v6963_v3 = vld [vmem:[%s14008_s3 + $0x578] sm:$0xff] }
 0x475   :  { %v1341_v19 = vpop.f32.mrf.mxu3  ;;  %v1457_v51 = vpop.f32.mrf.mxu1 }
 0x476   :  { %v10010_v22 = vadd.f32 %v1454_v62, %v1341_v19 }
 0x478   :  { %14373 = vst [vmem:[#allocation10_spill] sm:$0xff] %v10010_v22  ;;  %1781 = vmatmul.f32.gmra.mxu1 %v6959_v36  ;;  %v6965_v22 = vld [vmem:[%s14008_s3 + $0x588] sm:$0xff] }
 0x47a   :  { %1651 = vmatmul.f32.gmra.mxu3 %v6957_v42  ;;  %v6967_v42 = vld [vmem:[%s14008_s3 + $0x598] sm:$0xff] }
 0x47d   :  { %v1344_v15 = vpop.f32.mrf.mxu3  ;;  %v1460_v31 = vpop.f32.mrf.mxu1 }
 0x47e   :  { %v10018_v8 = vadd.f32 %v1457_v51, %v1344_v15  ;;  %v1557_v51 = vpop.f32.mrf.mxu2 }
 0x480   :  { %14374 = vst [vmem:[#allocation11_spill] sm:$0xff] %v10018_v8  ;;  %1784 = vmatmul.f32.gmra.mxu1 %v6963_v3 }
 0x482   :  { %1654 = vmatmul.f32.gmra.mxu3 %v6961_v63  ;;  %v6971_v63 = vld [vmem:[%s14008_s3 + $0x5b8] sm:$0xff] }
 0x485   :  { %v1347_v62 = vpop.f32.mrf.mxu3  ;;  %v1463_v19 = vpop.f32.mrf.mxu1 }
 0x486   :  { %v10026_v36 = vadd.f32 %v1460_v31, %v1347_v62  ;;  %v6969_v31 = vld [vmem:[%s14008_s3 + $0x5a8] sm:$0xff]  ;;  %v1560_v62 = vpop.f32.mrf.mxu2 }
 0x488   :  { %14375 = vst [vmem:[#allocation33_spill] sm:$0xff] %v10026_v36  ;;  %1787 = vmatmul.f32.gmra.mxu1 %v6967_v42 }
 0x48a   :  { %1657 = vmatmul.f32.gmra.mxu3 %v6965_v22  ;;  %v6975_v22 = vld [vmem:[%s14008_s3 + $0x5d8] sm:$0xff] }
 0x48d   :  { %v1350_v15 = vpop.f32.mrf.mxu3  ;;  %v1466_v8 = vpop.f32.mrf.mxu1 }
 0x48e   :  { %v10034_v3 = vadd.f32 %v1463_v19, %v1350_v15  ;;  %v6973_v19 = vld [vmem:[%s14008_s3 + $0x5c8] sm:$0xff]  ;;  %v1563_v15 = vpop.f32.mrf.mxu2 }
 0x490   :  { %14376 = vst [vmem:[#allocation61_spill] sm:$0xff] %v10034_v3  ;;  %1790 = vmatmul.f32.gmra.mxu1 %v6971_v63  ;;  %v7002_v63 = vld [vmem:[%s14008_s3 + $0x610] sm:$0xff] }
 0x492   :  { %1660 = vmatmul.f32.gmra.mxu3 %v6969_v31 }
 0x495   :  { %v1353_v36 = vpop.f32.mrf.mxu3  ;;  %v1469_v26 = vpop.f32.mrf.mxu1 }
 0x496   :  { %v10042_v42 = vadd.f32 %v1466_v8, %v1353_v36  ;;  %v6977_v8 = vld [vmem:[%s14008_s3 + $0x5e8] sm:$0xff]  ;;  %v10057_v36 = vpop.f32.mrf.mxu2 }
 0x498   :  { %1793 = vmatmul.f32.gmra.mxu1 %v6975_v22 }
 0x49a   :  { %1663 = vmatmul.f32.gmra.mxu3 %v6973_v19 }
 0x49d   :  { %v1356_v3 = vpop.f32.mrf.mxu3  ;;  %v1472_v46 = vpop.f32.mrf.mxu1 }
 0x49e   :  { %v10050_v31 = vadd.f32 %v1469_v26, %v1356_v3  ;;  %v7006_v26 = vld [vmem:[%s14008_s3 + $0x630] sm:$0xff] }
 0x4a0   :  { %2145 = vmatmul.f32.vlgmr.msrb.gmra.mxu1 %v7002_v63  ;;  %v7000_v63 = vld [vmem:[%s14008_s3 + $0x600] sm:$0xff] }
 0x4a1   :  { %2917 = vmatpush.msrb.mxu1 %v8304_v56 }
 0x4a2   :  { %1666 = vmatmul.f32.gmra.mxu3 %v6977_v8 }
 0x4a3   :  { %2918 = vmatpush.msrb.mxu1 %v8308_v58 }
 0x4a5   :  { %2919 = vmatpush.msrb.mxu1 %v8312_v60  ;;  %v1359_v22 = vpop.f32.mrf.mxu3  ;;  %v1752_v3 = vpop.f32.mrf.mxu1 }
 0x4a6   :  { %v10063_v19 = vadd.f32 %v1472_v46, %v1359_v22  ;;  %v7010_v46 = vld [vmem:[%s14008_s3 + $0x650] sm:$0xff] }
 0x4a7   :  { %2920 = vmatpush.msrb.mxu1 %v8321_v0  ;;  %v10075_v0 = vpop.f32.mrf.mxu2 }
 0x4a8   :  { %2148 = vmatmul.f32.gmra.mxu1 %v7006_v26  ;;  %v7004_v26 = vld [vmem:[%s14008_s3 + $0x620] sm:$0xff] }
 0x4a9   :  { %2921 = vmatpush.msrb.mxu1 %v8325_v2 }
 0x4aa   :  { %2015 = vmatmul.f32.vlgmr.msra.gmra.mxu3 %v7000_v63  ;;  %v14377_v63 = vld [vmem:[#allocation71_spill] sm:$0xff] }
 0x4ab   :  { %2922 = vmatpush.msrb.mxu1 %v8330_v4 }
 0x4ad   :  { %2923 = vmatpush.msrb.mxu1 %v8334_v6  ;;  %v1622_v8 = vpop.f32.mrf.mxu3  ;;  %v1755_v22 = vpop.f32.mrf.mxu1 }
 0x4ae   :  { %v1623_v60 = vadd.f32 %v1622_v8, %v1557_v51  ;;  %v7014_v8 = vld [vmem:[%s14008_s3 + $0x670] sm:$0xff] }
 0x4af   :  { %2924 = vmatpush.msrb.mxu1 %v8343_v10 }
 0x4b0   :  { %2151 = vmatmul.f32.gmra.mxu1 %v7010_v46  ;;  %v1688_v4 = vadd.f32 %v14377_v63, %v1623_v60  ;;  %v7008_v60 = vld [vmem:[%s14008_s3 + $0x640] sm:$0xff] }
 0x4b1   :  { %2925 = vmatpush.msrb.mxu1 %v8348_v12 }
 0x4b2   :  { %v1753_v6 = vadd.f32 %v1752_v3, %v1688_v4  ;;  %2018 = vmatmul.f32.gmra.mxu3 %v7004_v26  ;;  %v14378_v4 = vld [vmem:[#allocation73_spill] sm:$0xff]  ;;  %v1572_v3 = vpop.f32.mrf.mxu2 }
 0x4b3   :  { %2926 = vmatpush.msrb.mxu1 %v8354_v14 }
 0x4b4   :  { %6984 = vmatmul.msk.f32.vlgmr.msrb.gmra.mxu2 %vm1248_vm2, %v1753_v6 }
 0x4b5   :  { %2588 = vmatpush.msrb.mxu2 %v8657_v37  ;;  %2927 = vmatpush.msrb.mxu1 %v14270_v21  ;;  %v1625_v51 = vpop.f32.mrf.mxu3  ;;  %v1758_v46 = vpop.f32.mrf.mxu1 }
 0x4b6   :  { %v1626_v10 = vadd.f32 %v1625_v51, %v1560_v62 }
 0x4b7   :  { %2589 = vmatpush.msrb.mxu2 %v8664_v28  ;;  %2928 = vmatpush.msrb.mxu1 %v14273_v43 }
 0x4b8   :  { %2154 = vmatmul.f32.gmra.mxu1 %v7014_v8  ;;  %v1691_v6 = vadd.f32 %v14378_v4, %v1626_v10  ;;  %v7018_v10 = vld [vmem:[%s14008_s3 + $0x690] sm:$0xff]  ;;  %v14379_v8 = vld [vmem:[#allocation76_spill] sm:$0xff] }
 0x4b9   :  { %2590 = vmatpush.msrb.mxu2 %v8669_v61  ;;  %2929 = vmatpush.msrb.mxu1 %v14279_v47 }
 0x4ba   :  { %v1756_v26 = vadd.f32 %v1755_v22, %v1691_v6  ;;  %2021 = vmatmul.f32.gmra.mxu3 %v7008_v60  ;;  %v7012_v22 = vld [vmem:[%s14008_s3 + $0x660] sm:$0xff]  ;;  %v1575_v6 = vpop.f32.mrf.mxu2 }
 0x4bb   :  { %2591 = vmatpush.msrb.mxu2 %v8676_v52  ;;  %2930 = vmatpush.msrb.mxu1 %v14283_v34 }
 0x4bc   :  { %6985 = vmatmul.msk.f32.gmra.mxu2 %vm1248_vm2, %v1756_v26  ;;  %v7022_v26 = vld [vmem:[%s14008_s3 + $0x6b0] sm:$0xff] }
 0x4bd   :  { %2592 = vmatpush.msrb.mxu2 %v8684_v53  ;;  %2931 = vmatpush.msrb.mxu1 %v14288_v33  ;;  %v1628_v62 = vpop.f32.mrf.mxu3  ;;  %v1761_v63 = vpop.f32.mrf.mxu1 }
 0x4be   :  { %v1629_v51 = vadd.f32 %v1628_v62, %v1563_v15 }
 0x4bf   :  { %2593 = vmatpush.msrb.mxu2 %v8693_v57  ;;  %2932 = vmatpush.msrb.mxu1 %v14291_v45 }
 0x4c0   :  { %2157 = vmatmul.f32.gmra.mxu1 %v7018_v10  ;;  %v1694_v60 = vadd.f32 %v14379_v8, %v1629_v51  ;;  %v14380_v51 = vld [vmem:[#allocation80_spill] sm:$0xff] }
 0x4c1   :  { %2594 = vmatpush.msrb.mxu2 %v8699_v1 }
 0x4c2   :  { %v1759_v4 = vadd.f32 %v1758_v46, %v1694_v60  ;;  %2024 = vmatmul.f32.gmra.mxu3 %v7012_v22  ;;  %v7016_v46 = vld [vmem:[%s14008_s3 + $0x680] sm:$0xff]  ;;  %v1578_v60 = vpop.f32.mrf.mxu2 }
 0x4c3   :  { %2595 = vmatpush.msrb.mxu2 %v8707_v13 }
 0x4c4   :  { %6986 = vmatmul.msk.f32.gmra.mxu2 %vm1248_vm2, %v1759_v4  ;;  %v7026_v4 = vld [vmem:[%s14008_s3 + $0x6d0] sm:$0xff] }
 0x4c5   :  { %2596 = vmatpush.msrb.mxu2 %v8716_v30  ;;  %v1631_v15 = vpop.f32.mrf.mxu3  ;;  %v1764_v62 = vpop.f32.mrf.mxu1 }
 0x4c6   :  { %v1632_v10 = vadd.f32 %v1631_v15, %v10057_v36 }
 0x4c7   :  { %2597 = vmatpush.msrb.mxu2 %v8722_v32 }
 0x4c8   :  { %2160 = vmatmul.f32.gmra.mxu1 %v7022_v26  ;;  %v1697_v22 = vadd.f32 %v14380_v51, %v1632_v10  ;;  %v14381_v10 = vld [vmem:[#allocation84_spill] sm:$0xff] }
 0x4c9   :  { %2598 = vmatpush.msrb.mxu2 %v8731_v20 }
 0x4ca   :  { %v1762_v8 = vadd.f32 %v1761_v63, %v1697_v22  ;;  %2027 = vmatmul.f32.gmra.mxu3 %v7016_v46  ;;  %v7020_v63 = vld [vmem:[%s14008_s3 + $0x6a0] sm:$0xff]  ;;  %v1708_v22 = vpop.f32.mrf.mxu0 }
 0x4cb   :  { %2599 = vmatpush.msrb.mxu2 %v14271_v38 }
 0x4cc   :  { %6987 = vmatmul.msk.f32.gmra.mxu2 %vm1248_vm2, %v1762_v8 }
 0x4cd   :  { %2600 = vmatpush.msrb.mxu2 %v14274_v16  ;;  %v1634_v36 = vpop.f32.mrf.mxu3  ;;  %v1767_v15 = vpop.f32.mrf.mxu1 }
 0x4ce   :  { %v1635_v26 = vadd.f32 %v1634_v36, %v10075_v0  ;;  %v7030_v0 = vld [vmem:[%s14008_s3 + $0x6f0] sm:$0xff] }
 0x4cf   :  { %2601 = vmatpush.msrb.mxu2 %v14280_v39 }
 0x4d0   :  { %2163 = vmatmul.f32.gmra.mxu1 %v7026_v4  ;;  %v1700_v46 = vadd.f32 %v14381_v10, %v1635_v26  ;;  %v7024_v4 = vld [vmem:[%s14008_s3 + $0x6c0] sm:$0xff]  ;;  %v1581_v26 = vpop.f32.mrf.mxu2 }
 0x4d1   :  { %2602 = vmatpush.msrb.mxu2 %v14284_v11 }
 0x4d2   :  { %v1765_v51 = vadd.f32 %v1764_v62, %v1700_v46  ;;  %2030 = vmatmul.f32.gmra.mxu3 %v7020_v63  ;;  %v14382_v62 = vld [vmem:[#allocation88_spill] sm:$0xff] }
 0x4d3   :  { %2603 = vmatpush.msrb.mxu2 %v14289_v54 }
 0x4d4   :  { %6988 = vmatmul.msk.f32.gmra.mxu2 %vm1248_vm2, %v1765_v51  ;;  %v7034_v51 = vld [vmem:[%s14008_s3 + $0x710] sm:$0xff] }
 0x4d5   :  { %v1637_v8 = vpop.f32.mrf.mxu3  ;;  %v1770_v36 = vpop.f32.mrf.mxu1 }
 0x4d6   :  { %v1638_v39 = vadd.f32 %v1637_v8, %v1572_v3  ;;  %v7028_v3 = vld [vmem:[%s14008_s3 + $0x6e0] sm:$0xff]  ;;  %v1711_v8 = vpop.f32.mrf.mxu0 }
 0x4d8   :  { %2166 = vmatmul.f32.gmra.mxu1 %v7030_v0  ;;  %v1703_v63 = vadd.f32 %v14382_v62, %v1638_v39  ;;  %v14383_v0 = vld [vmem:[#allocation92_spill] sm:$0xff]  ;;  %v1584_v39 = vpop.f32.mrf.mxu2  ;;  %v7038_v62 = vld [vmem:[%s14008_s3 + $0x730] sm:$0xff] }
 0x4da   :  { %v1768_v10 = vadd.f32 %v1767_v15, %v1703_v63  ;;  %2033 = vmatmul.f32.gmra.mxu3 %v7024_v4 }
 0x4dc   :  { %6989 = vmatmul.msk.f32.gmra.mxu2 %vm1248_vm2, %v1768_v10  ;;  %v7032_v10 = vld [vmem:[%s14008_s3 + $0x700] sm:$0xff] }
 0x4dd   :  { %v1640_v46 = vpop.f32.mrf.mxu3  ;;  %v1773_v54 = vpop.f32.mrf.mxu1 }
 0x4de   :  { %v1641_v11 = vadd.f32 %v1640_v46, %v1575_v6 }
 0x4e0   :  { %2169 = vmatmul.f32.gmra.mxu1 %v7034_v51  ;;  %v1706_v45 = vadd.f32 %v14383_v0, %v1641_v11  ;;  %v1714_v51 = vpop.f32.mrf.mxu0 }
 0x4e2   :  { %v1771_v15 = vadd.f32 %v1770_v36, %v1706_v45  ;;  %2036 = vmatmul.f32.gmra.mxu3 %v7028_v3  ;;  %v1587_v45 = vpop.f32.mrf.mxu2  ;;  %v7042_v3 = vld [vmem:[%s14008_s3 + $0x750] sm:$0xff] }
 0x4e4   :  { %6990 = vmatmul.msk.f32.gmra.mxu2 %vm1248_vm2, %v1771_v15 }
 0x4e5   :  { %v1643_v4 = vpop.f32.mrf.mxu3  ;;  %v1776_v63 = vpop.f32.mrf.mxu1 }
 0x4e6   :  { %v1644_v6 = vadd.f32 %v1643_v4, %v1578_v60  ;;  %v7036_v60 = vld [vmem:[%s14008_s3 + $0x720] sm:$0xff] }
 0x4e8   :  { %v1709_v46 = vadd.f32 %v1708_v22, %v1644_v6  ;;  %2172 = vmatmul.f32.gmra.mxu1 %v7038_v62  ;;  %v7046_v6 = vld [vmem:[%s14008_s3 + $0x770] sm:$0xff] }
 0x4ea   :  { %v1774_v11 = vadd.f32 %v1773_v54, %v1709_v46  ;;  %2039 = vmatmul.f32.gmra.mxu3 %v7032_v10  ;;  %v1717_v54 = vpop.f32.mrf.mxu0  ;;  %v1590_v10 = vpop.f32.mrf.mxu2 }
 0x4ec   :  { %6991 = vmatmul.msk.f32.gmra.mxu2 %vm1248_vm2, %v1774_v11 }
 0x4ed   :  { %v1646_v36 = vpop.f32.mrf.mxu3  ;;  %v1779_v0 = vpop.f32.mrf.mxu1 }
 0x4ee   :  { %v1647_v15 = vadd.f32 %v1646_v36, %v1581_v26  ;;  %v7040_v26 = vld [vmem:[%s14008_s3 + $0x740] sm:$0xff] }
 0x4f0   :  { %v1712_v4 = vadd.f32 %v1711_v8, %v1647_v15  ;;  %2175 = vmatmul.f32.gmra.mxu1 %v7042_v3  ;;  %v7050_v3 = vld [vmem:[%s14008_s3 + $0x790] sm:$0xff] }
 0x4f2   :  { %v1777_v22 = vadd.f32 %v1776_v63, %v1712_v4  ;;  %2042 = vmatmul.f32.gmra.mxu3 %v7036_v60  ;;  %v1720_v15 = vpop.f32.mrf.mxu0  ;;  %v1593_v4 = vpop.f32.mrf.mxu2 }
 0x4f4   :  { %6992 = vmatmul.msk.f32.gmra.mxu2 %vm1248_vm2, %v1777_v22 }
 0x4f5   :  { %v1649_v62 = vpop.f32.mrf.mxu3  ;;  %v1782_v11 = vpop.f32.mrf.mxu1 }
 0x4f6   :  { %v1650_v46 = vadd.f32 %v1649_v62, %v1584_v39  ;;  %v7044_v39 = vld [vmem:[%s14008_s3 + $0x760] sm:$0xff] }
 0x4f8   :  { %v1715_v36 = vadd.f32 %v1714_v51, %v1650_v46  ;;  %2178 = vmatmul.f32.gmra.mxu1 %v7046_v6 }
 0x4fa   :  { %v1780_v8 = vadd.f32 %v1779_v0, %v1715_v36  ;;  %2045 = vmatmul.f32.gmra.mxu3 %v7040_v26  ;;  %v7067_v0 = vld [vmem:[%s14009_s4 + $0x78] sm:$0xff]  ;;  %v7048_v26 = vld [vmem:[%s14008_s3 + $0x780] sm:$0xff] }
 0x4fb   :  { %2324 = vmatpush.msra.mxu3 %v7067_v0 }
 0x4fc   :  { %6993 = vmatmul.msk.f32.gmra.mxu2 %vm1248_vm2, %v1780_v8  ;;  %v7065_v8 = vld [vmem:[%s14009_s4 + $0x68] sm:$0xff] }
 0x4fd   :  { %v1652_v63 = vpop.f32.mrf.mxu3  ;;  %v1785_v51 = vpop.f32.mrf.mxu1 }
 0x4fe   :  { %v1653_v60 = vadd.f32 %v1652_v63, %v1587_v45  ;;  %v7054_v45 = vld [vmem:[%s14008_s3 + $0x7b0] sm:$0xff]  ;;  %v1596_v63 = vpop.f32.mrf.mxu2 }
 0x500   :  { %v1718_v22 = vadd.f32 %v1717_v54, %v1653_v60  ;;  %2181 = vmatmul.f32.gmra.mxu1 %v7050_v3  ;;  %v7066_v54 = vld [vmem:[%s14009_s4 + $0x70] sm:$0xff] }
 0x501   :  { %2325 = vmatpush.msra.mxu3 %v7066_v54  ;;  %v7062_v54 = vld [vmem:[%s14008_s3 + $0x7f0] sm:$0xff] }
 0x502   :  { %v1783_v62 = vadd.f32 %v1782_v11, %v1718_v22  ;;  %2048 = vmatmul.f32.gmra.mxu3 %v7044_v39  ;;  %v1723_v11 = vpop.f32.mrf.mxu0 }
 0x503   :  { %2326 = vmatpush.msra.mxu3 %v7065_v8 }
 0x504   :  { %6994 = vmatmul.msk.f32.gmra.mxu2 %vm1248_vm2, %v1783_v62  ;;  %v7052_v62 = vld [vmem:[%s14008_s3 + $0x7a0] sm:$0xff] }
 0x505   :  { %v1655_v6 = vpop.f32.mrf.mxu3  ;;  %v1788_v60 = vpop.f32.mrf.mxu1 }
 0x506   :  { %v1656_v46 = vadd.f32 %v1655_v6, %v1590_v10  ;;  %v7064_v10 = vld [vmem:[%s14009_s4 + $0x60] sm:$0xff] }
 0x507   :  { %2327 = vmatpush.msra.mxu3 %v7064_v10 }
 0x508   :  { %v1721_v36 = vadd.f32 %v1720_v15, %v1656_v46  ;;  %2184 = vmatmul.f32.gmra.mxu1 %v7054_v45  ;;  %v7058_v15 = vld [vmem:[%s14008_s3 + $0x7d0] sm:$0xff]  ;;  %v1599_v45 = vpop.f32.mrf.mxu2 }
 0x50a   :  { %v1786_v3 = vadd.f32 %v1785_v51, %v1721_v36  ;;  %2051 = vmatmul.f32.gmra.mxu3 %v7048_v26  ;;  %v1726_v0 = vpop.f32.mrf.mxu0 }
 0x50c   :  { %6995 = vmatmul.msk.f32.gmra.mxu2 %vm1248_vm2, %v1786_v3 }
 0x50d   :  { %v1658_v39 = vpop.f32.mrf.mxu3  ;;  %v1791_v26 = vpop.f32.mrf.mxu1 }
 0x50e   :  { %v1659_v22 = vadd.f32 %v1658_v39, %v1593_v4  ;;  %v7056_v4 = vld [vmem:[%s14008_s3 + $0x7c0] sm:$0xff] }
 0x510   :  { %v1724_v51 = vadd.f32 %v1723_v11, %v1659_v22  ;;  %2187 = vmatmul.f32.gmra.mxu1 %v7058_v15  ;;  %v1602_v39 = vpop.f32.mrf.mxu2 }
 0x512   :  { %v1789_v6 = vadd.f32 %v1788_v60, %v1724_v51  ;;  %2054 = vmatmul.f32.gmra.mxu3 %v7052_v62  ;;  %v1729_v3 = vpop.f32.mrf.mxu0  ;;  %v7085_v60 = vld [vmem:[%s14008_s3 + $0x808] sm:$0xff] }
 0x514   :  { %6996 = vmatmul.msk.f32.gmra.mxu2 %vm1248_vm2, %v1789_v6 }
 0x515   :  { %v1661_v46 = vpop.f32.mrf.mxu3  ;;  %v1794_v22 = vpop.f32.mrf.mxu1 }
 0x516   :  { %v1662_v36 = vadd.f32 %v1661_v46, %v1596_v63  ;;  %v7060_v63 = vld [vmem:[%s14008_s3 + $0x7e0] sm:$0xff]  ;;  %v7089_v46 = vld [vmem:[%s14008_s3 + $0x828] sm:$0xff] }
 0x518   :  { %v1727_v8 = vadd.f32 %v1726_v0, %v1662_v36  ;;  %2190 = vmatmul.f32.gmra.mxu1 %v7062_v54 }
 0x51a   :  { %v1792_v11 = vadd.f32 %v1791_v26, %v1727_v8  ;;  %2057 = vmatmul.f32.gmra.mxu3 %v7056_v4  ;;  %v1732_v6 = vpop.f32.mrf.mxu0  ;;  %v1797_v26 = vpop.f32.mrf.mxu2  ;;  %v7093_v8 = vld [vmem:[%s14008_s3 + $0x848] sm:$0xff] }
 0x51c   :  { %6997 = vmatmul.msk.f32.gmra.mxu2 %vm1248_vm2, %v1792_v11  ;;  %v7003_v11 = vld [vmem:[%s14008_s3 + $0x618] sm:$0xff] }
 0x51d   :  { %v1664_v10 = vpop.f32.mrf.mxu3 }
 0x51e   :  { %v1665_v15 = vadd.f32 %v1664_v10, %v1599_v45  ;;  %v7057_v45 = vld [vmem:[%s14008_s3 + $0x7c8] sm:$0xff] }
 0x520   :  { %v1730_v62 = vadd.f32 %v1729_v3, %v1665_v15  ;;  %2539 = vmatmul.f32.vlgmr.msra.gmra.mxu1 %v7085_v60  ;;  %v7097_v3 = vld [vmem:[%s14008_s3 + $0x868] sm:$0xff] }
 0x521   :  { %v14385_v15 = vld [vmem:[#allocation54_spill] sm:$0xff] }
 0x522   :  { %v1795_v51 = vadd.f32 %v1794_v22, %v1730_v62  ;;  %2060 = vmatmul.f32.gmra.mxu3 %v7060_v63  ;;  %v14387_v62 = vld [vmem:[#allocation55_spill] sm:$0xff] }
 0x524   :  { %6998 = vmatmul.msk.f32.gmra.mxu2 %vm1248_vm2, %v1795_v51  ;;  %v7011_v51 = vld [vmem:[%s14008_s3 + $0x658] sm:$0xff] }
 0x525   :  { %v1667_v0 = vpop.f32.mrf.mxu3 }
 0x526   :  { %v1668_v54 = vadd.f32 %v1667_v0, %v1602_v39  ;;  %v7007_v39 = vld [vmem:[%s14008_s3 + $0x638] sm:$0xff] }
 0x527   :  { %v14388_v0 = vld [vmem:[#allocation56_spill] sm:$0xff] }
 0x528   :  { %v1733_v36 = vadd.f32 %v1732_v6, %v1668_v54  ;;  %2542 = vmatmul.f32.gmra.mxu1 %v7089_v46  ;;  %v14389_v6 = vld [vmem:[#allocation23_spill] sm:$0xff]  ;;  %v14390_v46 = vld [vmem:[#allocation57_spill] sm:$0xff]  ;;  %v14391_v54 = vld [vmem:[#allocation24_spill] sm:$0xff] }
 0x52a   :  { %v1798_v4 = vadd.f32 %v1797_v26, %v1733_v36  ;;  %2122 = vmatmul.f32.vlgmr.msrb.gmra.mxu3 %v7057_v45  ;;  %v14392_v26 = vld [vmem:[#allocation58_spill] sm:$0xff]  ;;  %v14393_v45 = vld [vmem:[#allocation25_spill] sm:$0xff] }
 0x52b   :  { %2653 = vmatpush.msrb.mxu3 %v9011_v25 }
 0x52c   :  { %6999 = vmatmul.msk.f32.gmra.mxu2 %vm1248_vm2, %v1798_v4  ;;  %v14394_v4 = vld [vmem:[#allocation45_spill] sm:$0xff] }
 0x52d   :  { %2654 = vmatpush.msrb.mxu3 %v9020_v9 }
 0x52f   :  { %2655 = vmatpush.msrb.mxu3 %v9031_v17 }
 0x530   :  { %2545 = vmatmul.f32.gmra.mxu1 %v7093_v8 }
 0x531   :  { %2656 = vmatpush.msrb.mxu3 %v9037_v44 }
 0x533   :  { %2657 = vmatpush.msrb.mxu3 %v9054_v27 }
 0x534   :  { %2210 = vmatmul.f32.vlgmr.msra.gmra.mxu2 %v7003_v11  ;;  %v14396_v11 = vld [vmem:[#allocation60_spill] sm:$0xff] }
 0x535   :  { %2658 = vmatpush.msrb.mxu3 %v9063_v55  ;;  %2982 = vmatpush.msra.mxu2 %v14350_v40 }
 0x537   :  { %2659 = vmatpush.msrb.mxu3 %v9070_v24  ;;  %2983 = vmatpush.msra.mxu2 %v14351_v29  ;;  %v1870_v10 = vpop.f32.mrf.mxu2 }
 0x538   :  { %v10251_v60 = vadd.f32 %v1870_v10, %v9908_v23  ;;  %2548 = vmatmul.f32.gmra.mxu1 %v7097_v3  ;;  %v7101_v23 = vld [vmem:[%s14008_s3 + $0x888] sm:$0xff]  ;;  %v7015_v10 = vld [vmem:[%s14008_s3 + $0x678] sm:$0xff] }
 0x539   :  { %2660 = vmatpush.msrb.mxu3 %v9075_v18  ;;  %2984 = vmatpush.msra.mxu2 %v14352_v48  ;;  %v14397_v3 = vld [vmem:[#allocation26_spill] sm:$0xff] }
 0x53a   :  { %14384 = vst [vmem:[#allocation41_spill] sm:$0xff] %v10251_v60  ;;  %v14422_v60 = vld [vmem:[#allocation61_spill] sm:$0xff] }
 0x53b   :  { %2661 = vmatpush.msrb.mxu3 %v9086_v5  ;;  %2985 = vmatpush.msra.mxu2 %v14353_v35 }
 0x53c   :  { %2213 = vmatmul.f32.gmra.mxu2 %v7007_v39  ;;  %v14398_v39 = vld [vmem:[#allocation27_spill] sm:$0xff] }
 0x53d   :  { %2662 = vmatpush.msrb.mxu3 %v9094_v7  ;;  %2986 = vmatpush.msra.mxu2 %v14354_v59  ;;  %v14419_v59 = vld [vmem:[#allocation33_spill] sm:$0xff] }
 0x53f   :  { %2663 = vmatpush.msrb.mxu3 %v14385_v15  ;;  %2987 = vmatpush.msra.mxu2 %v14355_v49  ;;  %v1873_v22 = vpop.f32.mrf.mxu2 }
 0x540   :  { %v10268_v63 = vadd.f32 %v1873_v22, %v9927_v41  ;;  %2551 = vmatmul.f32.gmra.mxu1 %v7101_v23  ;;  %v7105_v41 = vld [vmem:[%s14008_s3 + $0x8a8] sm:$0xff]  ;;  %v14399_v23 = vld [vmem:[#allocation28_spill] sm:$0xff] }
 0x541   :  { %2664 = vmatpush.msrb.mxu3 %v14387_v62  ;;  %2988 = vmatpush.msra.mxu2 %v14356_v50  ;;  %v7109_v22 = vld [vmem:[%s14008_s3 + $0x8c8] sm:$0xff] }
 0x542   :  { %14386 = vst [vmem:[#allocation74_spill] sm:$0xff] %v10268_v63 }
 0x543   :  { %2665 = vmatpush.msrb.mxu3 %v14388_v0  ;;  %2989 = vmatpush.msra.mxu2 %v14389_v6 }
 0x544   :  { %2216 = vmatmul.f32.gmra.mxu2 %v7011_v51  ;;  %v10297_v51 = vpop.f32.mrf.mxu1 }
 0x545   :  { %2666 = vmatpush.msrb.mxu3 %v14390_v46  ;;  %2990 = vmatpush.msra.mxu2 %v14391_v54 }
 0x547   :  { %2667 = vmatpush.msrb.mxu3 %v14392_v26  ;;  %2991 = vmatpush.msra.mxu2 %v14393_v45  ;;  %v1876_v36 = vpop.f32.mrf.mxu2 }
 0x548   :  { %v10285_v8 = vadd.f32 %v1876_v36, %v14394_v4  ;;  %2554 = vmatmul.f32.gmra.mxu1 %v7105_v41  ;;  %v14400_v41 = vld [vmem:[#allocation29_spill] sm:$0xff] }
 0x549   :  { %2668 = vmatpush.msrb.mxu3 %v14396_v11  ;;  %2992 = vmatpush.msra.mxu2 %v14397_v3  ;;  %v14401_v4 = vld [vmem:[#allocation37_spill] sm:$0xff] }
 0x54a   :  { %14395 = vst [vmem:[#allocation82_spill] sm:$0xff] %v10285_v8  ;;  %v14403_v8 = vld [vmem:[#allocation30_spill] sm:$0xff] }
 0x54b   :  { %2993 = vmatpush.msra.mxu2 %v14398_v39  ;;  %v7113_v39 = vld [vmem:[%s14008_s3 + $0x8e8] sm:$0xff] }
 0x54c   :  { %2219 = vmatmul.f32.gmra.mxu2 %v7015_v10  ;;  %v7019_v10 = vld [vmem:[%s14008_s3 + $0x698] sm:$0xff] }
 0x54d   :  { %2994 = vmatpush.msra.mxu2 %v14399_v23  ;;  %v14404_v23 = vld [vmem:[#allocation31_spill] sm:$0xff] }
 0x54f   :  { %2995 = vmatpush.msra.mxu2 %v14400_v41  ;;  %v1879_v36 = vpop.f32.mrf.mxu2  ;;  %v14405_v41 = vld [vmem:[#allocation38_spill] sm:$0xff] }
 0x550   :  { %v10301_v3 = vadd.f32 %v1879_v36, %v14401_v4  ;;  %2557 = vmatmul.f32.gmra.mxu1 %v7109_v22  ;;  %v10314_v36 = vpop.f32.mrf.mxu1  ;;  %v7023_v22 = vld [vmem:[%s14008_s3 + $0x6b8] sm:$0xff]  ;;  %v7117_v4 = vld [vmem:[%s14008_s3 + $0x908] sm:$0xff] }
 0x551   :  { %2996 = vmatpush.msra.mxu2 %v14403_v8 }
 0x552   :  { %14402 = vst [vmem:[#allocation101_spill] sm:$0xff] %v10301_v3 }
 0x553   :  { %2997 = vmatpush.msra.mxu2 %v14404_v23  ;;  %v14407_v23 = vld [vmem:[#allocation52_spill] sm:$0xff] }
 0x554   :  { %2222 = vmatmul.f32.gmra.mxu2 %v7019_v10 }
 0x557   :  { %v1882_v45 = vpop.f32.mrf.mxu2 }
 0x558   :  { %v10312_v54 = vadd.f32 %v1882_v45, %v14405_v41  ;;  %2560 = vmatmul.f32.gmra.mxu1 %v7113_v39  ;;  %v7027_v45 = vld [vmem:[%s14008_s3 + $0x6d8] sm:$0xff]  ;;  %v10328_v39 = vpop.f32.mrf.mxu1  ;;  %v7121_v41 = vld [vmem:[%s14008_s3 + $0x928] sm:$0xff] }
 0x55a   :  { %14406 = vst [vmem:[#allocation117_spill] sm:$0xff] %v10312_v54  ;;  %v14409_v54 = vld [vmem:[#allocation39_spill] sm:$0xff] }
 0x55c   :  { %2225 = vmatmul.f32.gmra.mxu2 %v7023_v22 }
 0x55f   :  { %v1885_v10 = vpop.f32.mrf.mxu2 }
 0x560   :  { %v10323_v8 = vadd.f32 %v1885_v10, %v14407_v23  ;;  %2563 = vmatmul.f32.gmra.mxu1 %v7117_v4  ;;  %v7031_v23 = vld [vmem:[%s14008_s3 + $0x6f8] sm:$0xff]  ;;  %v10339_v4 = vpop.f32.mrf.mxu1  ;;  %v7125_v10 = vld [vmem:[%s14008_s3 + $0x948] sm:$0xff] }
 0x562   :  { %14408 = vst [vmem:[#allocation64_spill] sm:$0xff] %v10323_v8  ;;  %v14411_v8 = vld [vmem:[#allocation40_spill] sm:$0xff] }
 0x564   :  { %2228 = vmatmul.f32.gmra.mxu2 %v7027_v45 }
 0x567   :  { %v1888_v22 = vpop.f32.mrf.mxu2 }
 0x568   :  { %v10334_v3 = vadd.f32 %v1888_v22, %v14409_v54  ;;  %2566 = vmatmul.f32.gmra.mxu1 %v7121_v41  ;;  %v7035_v54 = vld [vmem:[%s14008_s3 + $0x718] sm:$0xff]  ;;  %v7129_v41 = vld [vmem:[%s14008_s3 + $0x968] sm:$0xff]  ;;  %v10353_v22 = vpop.f32.mrf.mxu1 }
 0x56a   :  { %14410 = vst [vmem:[#allocation42_spill] sm:$0xff] %v10334_v3  ;;  %v14413_v3 = vld [vmem:[#allocation114_spill] sm:$0xff] }
 0x56c   :  { %2231 = vmatmul.f32.gmra.mxu2 %v7031_v23 }
 0x56f   :  { %v1891_v45 = vpop.f32.mrf.mxu2 }
 0x570   :  { %v10345_v6 = vadd.f32 %v1891_v45, %v14411_v8  ;;  %2569 = vmatmul.f32.gmra.mxu1 %v7125_v10  ;;  %v7061_v8 = vld [vmem:[%s14008_s3 + $0x7e8] sm:$0xff]  ;;  %v7235_v10 = vld [vmem:[%s14009_s4 + $0xb8] sm:$0xff] }
 0x571   :  { %v7039_v45 = vld [vmem:[%s14008_s3 + $0x738] sm:$0xff]  ;;  %2125 = vmatmul.f32.gmra.mxu3 %v7061_v8  ;;  %3242 = vmatpush.msra.mxu1 %v7235_v10  ;;  %v10379_v10 = vpop.f32.mrf.mxu1 }
 0x572   :  { %14412 = vst [vmem:[#allocation77_spill] sm:$0xff] %v10345_v6  ;;  %v14415_v6 = vld [vmem:[#allocation10_spill] sm:$0xff] }
 0x574   :  { %2234 = vmatmul.f32.gmra.mxu2 %v7035_v54  ;;  %v7233_v54 = vld [vmem:[%s14009_s4 + $0xa8] sm:$0xff] }
 0x577   :  { %v1894_v23 = vpop.f32.mrf.mxu2 }
 0x578   :  { %v10356_v50 = vadd.f32 %v1894_v23, %v14413_v3  ;;  %2572 = vmatmul.f32.gmra.mxu1 %v7129_v41  ;;  %v7234_v3 = vld [vmem:[%s14009_s4 + $0xb0] sm:$0xff]  ;;  %v7133_v41 = vld [vmem:[%s14008_s3 + $0x988] sm:$0xff]  ;;  %v2016_v23 = vpop.f32.mrf.mxu3 }
 0x579   :  { %3243 = vmatpush.msra.mxu1 %v7234_v3  ;;  %v7043_v3 = vld [vmem:[%s14008_s3 + $0x758] sm:$0xff]  ;;  %v10398_v49 = vpop.f32.mrf.mxu1 }
 0x57a   :  { %14414 = vst [vmem:[#allocation86_spill] sm:$0xff] %v10356_v50 }
 0x57b   :  { %3244 = vmatpush.msra.mxu1 %v7233_v54  ;;  %v7137_v54 = vld [vmem:[%s14008_s3 + $0x9a8] sm:$0xff] }
 0x57c   :  { %2237 = vmatmul.f32.gmra.mxu2 %v7039_v45  ;;  %v7232_v45 = vld [vmem:[%s14009_s4 + $0xa0] sm:$0xff] }
 0x57d   :  { %3245 = vmatpush.msra.mxu1 %v7232_v45  ;;  %v7141_v45 = vld [vmem:[%s14008_s3 + $0x9c8] sm:$0xff] }
 0x57f   :  { %v1897_v50 = vpop.f32.mrf.mxu2 }
 0x580   :  { %v10377_v8 = vadd.f32 %v1897_v50, %v14415_v6  ;;  %2575 = vmatmul.f32.gmra.mxu1 %v7133_v41  ;;  %v10390_v50 = vpop.f32.mrf.mxu3  ;;  %v14417_v6 = vld [vmem:[#allocation11_spill] sm:$0xff] }
 0x582   :  { %14416 = vst [vmem:[#allocation103_spill] sm:$0xff] %v10377_v8  ;;  %v7047_v8 = vld [vmem:[%s14008_s3 + $0x778] sm:$0xff] }
 0x584   :  { %2240 = vmatmul.f32.gmra.mxu2 %v7043_v3 }
 0x587   :  { %v1900_v63 = vpop.f32.mrf.mxu2 }
 0x588   :  { %v10393_v41 = vadd.f32 %v1900_v63, %v14417_v6  ;;  %2578 = vmatmul.f32.gmra.mxu1 %v7137_v54  ;;  %v7051_v63 = vld [vmem:[%s14008_s3 + $0x798] sm:$0xff]  ;;  %v10409_v54 = vpop.f32.mrf.mxu3  ;;  %v10411_v6 = vpop.f32.mrf.mxu1 }
 0x589   :  { %14421 = vst [vmem:[#allocation43_spill] sm:$0xff] %v10411_v6 }
 0x58a   :  { %14418 = vst [vmem:[#allocation119_spill] sm:$0xff] %v10393_v41  ;;  %v2081_v41 = vpop.f32.mrf.mxu0 }
 0x58c   :  { %2243 = vmatmul.f32.gmra.mxu2 %v7047_v8  ;;  %v7145_v8 = vld [vmem:[%s14008_s3 + $0x9e8] sm:$0xff] }
 0x58f   :  { %v1903_v3 = vpop.f32.mrf.mxu2 }
 0x590   :  { %v10404_v35 = vadd.f32 %v1903_v3, %v14419_v59  ;;  %2581 = vmatmul.f32.gmra.mxu1 %v7141_v45  ;;  %v7055_v59 = vld [vmem:[%s14008_s3 + $0x7b8] sm:$0xff]  ;;  %v10422_v45 = vpop.f32.mrf.mxu3  ;;  %v7168_v3 = vld [vmem:[%s14008_s3 + $0xa00] sm:$0xff] }
 0x592   :  { %14420 = vst [vmem:[#allocation66_spill] sm:$0xff] %v10404_v35  ;;  %v2084_v35 = vpop.f32.mrf.mxu0 }
 0x594   :  { %2246 = vmatmul.f32.gmra.mxu2 %v7051_v63  ;;  %v10427_v63 = vpop.f32.mrf.mxu1 }
 0x597   :  { %v1906_v48 = vpop.f32.mrf.mxu2 }
 0x598   :  { %v10417_v29 = vadd.f32 %v1906_v48, %v14422_v60  ;;  %2584 = vmatmul.f32.gmra.mxu1 %v7145_v8  ;;  %v7059_v48 = vld [vmem:[%s14008_s3 + $0x7d8] sm:$0xff]  ;;  %v10438_v60 = vpop.f32.mrf.mxu3 }
 0x59c   :  { %2249 = vmatmul.f32.gmra.mxu2 %v7055_v59  ;;  %v7063_v59 = vld [vmem:[%s14008_s3 + $0x7f8] sm:$0xff] }
 0x59f   :  { %v1909_v40 = vpop.f32.mrf.mxu2 }
 0x5a0   :  { %v10430_v6 = vadd.f32 %v1909_v40, %v10042_v42  ;;  %2933 = vmatmul.f32.vlgmr.msrb.gmra.mxu1 %v7168_v3  ;;  %v2087_v42 = vpop.f32.mrf.mxu0 }
 0x5a1   :  { %3571 = vmatpush.msrb.mxu1 %v9011_v25 }
 0x5a3   :  { %3572 = vmatpush.msrb.mxu1 %v9020_v9 }
 0x5a4   :  { %2252 = vmatmul.f32.gmra.mxu2 %v7059_v48  ;;  %v10451_v48 = vpop.f32.mrf.mxu3 }
 0x5a5   :  { %3573 = vmatpush.msrb.mxu1 %v9031_v17 }
 0x5a7   :  { %3574 = vmatpush.msrb.mxu1 %v9037_v44  ;;  %v1912_v8 = vpop.f32.mrf.mxu2 }
 0x5a8   :  { %v10442_v40 = vadd.f32 %v1912_v8, %v10050_v31  ;;  %v7086_v8 = vld [vmem:[%s14008_s3 + $0x810] sm:$0xff]  ;;  %v2090_v44 = vpop.f32.mrf.mxu0 }
 0x5a9   :  { %3575 = vmatpush.msrb.mxu1 %v9054_v27  ;;  %v2082_v27 = vadd.f32 %v2081_v41, %v2016_v23  ;;  %v7090_v23 = vld [vmem:[%s14008_s3 + $0x830] sm:$0xff] }
 0x5ab   :  { %3576 = vmatpush.msrb.mxu1 %v9063_v55 }
 0x5ac   :  { %2255 = vmatmul.f32.gmra.mxu2 %v7063_v59  ;;  %v2147_v59 = vadd.f32 %v10297_v51, %v2082_v27  ;;  %v10471_v41 = vpop.f32.mrf.mxu3  ;;  %v14424_v27 = vld [vmem:[#allocation6_spill] sm:$0xff] }
 0x5ad   :  { %3577 = vmatpush.msrb.mxu1 %v9070_v24 }
 0x5af   :  { %3578 = vmatpush.msrb.mxu1 %v9075_v18  ;;  %v1915_v3 = vpop.f32.mrf.mxu2 }
 0x5b0   :  { %v10454_v31 = vadd.f32 %v1915_v3, %v10063_v19  ;;  %v2093_v51 = vpop.f32.mrf.mxu0 }
 0x5b1   :  { %3579 = vmatpush.msrb.mxu1 %v9086_v5  ;;  %v14423_v5 = vld [vmem:[#allocation5_spill] sm:$0xff] }
 0x5b3   :  { %3580 = vmatpush.msrb.mxu1 %v9094_v7 }
 0x5b4   :  { %2604 = vmatmul.f32.vlgmr.msrb.gmra.mxu2 %v7086_v8  ;;  %v2085_v8 = vadd.f32 %v2084_v35, %v10390_v50  ;;  %v14425_v35 = vld [vmem:[#allocation7_spill] sm:$0xff] }
 0x5b5   :  { %3376 = vmatpush.msrb.mxu2 %v8304_v56  ;;  %3581 = vmatpush.msrb.mxu1 %v14385_v15 }
 0x5b7   :  { %3377 = vmatpush.msrb.mxu2 %v8308_v58  ;;  %3582 = vmatpush.msrb.mxu1 %v14387_v62  ;;  %v2211_v19 = vpop.f32.mrf.mxu2 }
 0x5b8   :  { %v2212_v3 = vadd.f32 %v2211_v19, %v2147_v59  ;;  %v2150_v59 = vadd.f32 %v10314_v36, %v2085_v8  ;;  %v14427_v36 = vld [vmem:[#allocation9_spill] sm:$0xff]  ;;  %v2037_v8 = vpop.f32.mrf.mxu3 }
 0x5b9   :  { %3378 = vmatpush.msrb.mxu2 %v14423_v5  ;;  %3583 = vmatpush.msrb.mxu1 %v14388_v0 }
 0x5ba   :  { %7068 = vmatmul.msk.f32.vlgmr.msra.gmra.mxu3 %vm1248_vm2, %v2212_v3  ;;  %v14426_v3 = vld [vmem:[#allocation8_spill] sm:$0xff] }
 0x5bb   :  { %3047 = vmatpush.msra.mxu3 %v8657_v37  ;;  %3379 = vmatpush.msrb.mxu2 %v14424_v27 }
 0x5bc   :  { %3584 = vmatpush.msrb.mxu1 %v14390_v46  ;;  %2607 = vmatmul.f32.gmra.mxu2 %v7090_v23  ;;  %v7094_v23 = vld [vmem:[%s14008_s3 + $0x850] sm:$0xff] }
 0x5bd   :  { %3048 = vmatpush.msra.mxu3 %v8664_v28  ;;  %3380 = vmatpush.msrb.mxu2 %v8325_v2 }
 0x5be   :  { %3585 = vmatpush.msrb.mxu1 %v14392_v26  ;;  %v2088_v26 = vadd.f32 %v2087_v42, %v10409_v54 }
 0x5bf   :  { %3049 = vmatpush.msra.mxu3 %v8669_v61  ;;  %3381 = vmatpush.msrb.mxu2 %v14425_v35  ;;  %v2214_v50 = vpop.f32.mrf.mxu2 }
 0x5c0   :  { %3586 = vmatpush.msrb.mxu1 %v14396_v11  ;;  %v2215_v19 = vadd.f32 %v2214_v50, %v2150_v59  ;;  %v2153_v59 = vadd.f32 %v10328_v39, %v2088_v26  ;;  %v2096_v50 = vpop.f32.mrf.mxu0  ;;  %v2040_v26 = vpop.f32.mrf.mxu3 }
 0x5c1   :  { %3050 = vmatpush.msra.mxu3 %v8676_v52  ;;  %3382 = vmatpush.msrb.mxu2 %v14426_v3 }
 0x5c2   :  { %7069 = vmatmul.msk.f32.gmra.mxu3 %vm1248_vm2, %v2215_v19  ;;  %v7098_v19 = vld [vmem:[%s14008_s3 + $0x870] sm:$0xff] }
 0x5c3   :  { %3051 = vmatpush.msra.mxu3 %v8684_v53  ;;  %3383 = vmatpush.msrb.mxu2 %v14427_v36 }
 0x5c4   :  { %2610 = vmatmul.f32.gmra.mxu2 %v7094_v23  ;;  %v2091_v23 = vadd.f32 %v2090_v44, %v10422_v45 }
 0x5c5   :  { %3052 = vmatpush.msra.mxu3 %v8693_v57  ;;  %3384 = vmatpush.msrb.mxu2 %v8348_v12 }
 0x5c6   :  { %v2156_v39 = vadd.f32 %v10339_v4, %v2091_v23  ;;  %v14428_v4 = vld [vmem:[#allocation15_spill] sm:$0xff] }
 0x5c7   :  { %3053 = vmatpush.msra.mxu3 %v8699_v1  ;;  %3385 = vmatpush.msrb.mxu2 %v8354_v14  ;;  %v2217_v54 = vpop.f32.mrf.mxu2 }
 0x5c8   :  { %v2218_v42 = vadd.f32 %v2217_v54, %v2153_v59  ;;  %v2099_v45 = vpop.f32.mrf.mxu0  ;;  %v7102_v54 = vld [vmem:[%s14008_s3 + $0x890] sm:$0xff] }
 0x5c9   :  { %3054 = vmatpush.msra.mxu3 %v8707_v13  ;;  %3386 = vmatpush.msrb.mxu2 %v14270_v21 }
 0x5ca   :  { %7070 = vmatmul.msk.f32.gmra.mxu3 %vm1248_vm2, %v2218_v42  ;;  %v2094_v42 = vadd.f32 %v2093_v51, %v10438_v60  ;;  %v7106_v60 = vld [vmem:[%s14008_s3 + $0x8b0] sm:$0xff]  ;;  %v2097_v51 = vadd.f32 %v2096_v50, %v10451_v48 }
 0x5cb   :  { %3055 = vmatpush.msra.mxu3 %v8716_v30  ;;  %3387 = vmatpush.msrb.mxu2 %v14273_v43 }
 0x5cc   :  { %2613 = vmatmul.f32.gmra.mxu2 %v7098_v19  ;;  %v14429_v19 = vld [vmem:[#allocation34_spill] sm:$0xff]  ;;  %v2159_v23 = vadd.f32 %v10353_v22, %v2094_v42 }
 0x5cd   :  { %3056 = vmatpush.msra.mxu3 %v8722_v32  ;;  %3388 = vmatpush.msrb.mxu2 %v14279_v47 }
 0x5cf   :  { %3057 = vmatpush.msra.mxu3 %v8731_v20  ;;  %3389 = vmatpush.msrb.mxu2 %v14283_v34  ;;  %v2220_v59 = vpop.f32.mrf.mxu2  ;;  %v14431_v34 = vld [vmem:[#allocation36_spill] sm:$0xff] }
 0x5d0   :  { %v2221_v44 = vadd.f32 %v2220_v59, %v2156_v39  ;;  %v14430_v39 = vld [vmem:[#allocation35_spill] sm:$0xff] }
 0x5d1   :  { %3058 = vmatpush.msra.mxu3 %v14271_v38  ;;  %3390 = vmatpush.msrb.mxu2 %v14288_v33  ;;  %v2043_v33 = vpop.f32.mrf.mxu3 }
 0x5d2   :  { %7071 = vmatmul.msk.f32.gmra.mxu3 %vm1248_vm2, %v2221_v44  ;;  %v2102_v44 = vpop.f32.mrf.mxu0 }
 0x5d3   :  { %3059 = vmatpush.msra.mxu3 %v14274_v16  ;;  %3391 = vmatpush.msrb.mxu2 %v14428_v4 }
 0x5d4   :  { %2616 = vmatmul.f32.gmra.mxu2 %v7102_v54  ;;  %v2162_v54 = vadd.f32 %v10379_v10, %v2097_v51  ;;  %v7114_v10 = vld [vmem:[%s14008_s3 + $0x8f0] sm:$0xff] }
 0x5d5   :  { %3060 = vmatpush.msra.mxu3 %v14429_v19 }
 0x5d7   :  { %3061 = vmatpush.msra.mxu3 %v14430_v39  ;;  %v2223_v59 = vpop.f32.mrf.mxu2 }
 0x5d8   :  { %v2224_v38 = vadd.f32 %v2223_v59, %v2159_v23  ;;  %v7110_v23 = vld [vmem:[%s14008_s3 + $0x8d0] sm:$0xff]  ;;  %v2100_v59 = vadd.f32 %v2099_v45, %v10471_v41  ;;  %v2173_v45 = vpop.f32.mrf.mxu1 }
 0x5d9   :  { %3062 = vmatpush.msra.mxu3 %v14431_v34  ;;  %v2046_v39 = vpop.f32.mrf.mxu3 }
 0x5da   :  { %7072 = vmatmul.msk.f32.gmra.mxu3 %vm1248_vm2, %v2224_v38  ;;  %v2105_v34 = vpop.f32.mrf.mxu0  ;;  %v2165_v48 = vadd.f32 %v10398_v49, %v2100_v59  ;;  %v7118_v49 = vld [vmem:[%s14008_s3 + $0x910] sm:$0xff] }
 0x5dc   :  { %2619 = vmatmul.f32.gmra.mxu2 %v7106_v60  ;;  %v2103_v60 = vadd.f32 %v2102_v44, %v2037_v8 }
 0x5df   :  { %v2226_v22 = vpop.f32.mrf.mxu2 }
 0x5e0   :  { %v2227_v42 = vadd.f32 %v2226_v22, %v2162_v54  ;;  %v14432_v22 = vld [vmem:[#allocation43_spill] sm:$0xff] }
 0x5e1   :  { %v2049_v51 = vpop.f32.mrf.mxu3  ;;  %v2168_v41 = vadd.f32 %v14432_v22, %v2103_v60 }
 0x5e2   :  { %7073 = vmatmul.msk.f32.gmra.mxu3 %vm1248_vm2, %v2227_v42  ;;  %v2108_v54 = vpop.f32.mrf.mxu0 }
 0x5e3   :  { %v2109_v60 = vadd.f32 %v2108_v54, %v2043_v33 }
 0x5e4   :  { %2622 = vmatmul.f32.gmra.mxu2 %v7110_v23  ;;  %v2106_v23 = vadd.f32 %v2105_v34, %v2040_v26 }
 0x5e5   :  { %v2174_v22 = vadd.f32 %v2173_v45, %v2109_v60  ;;  %v7130_v45 = vld [vmem:[%s14008_s3 + $0x970] sm:$0xff] }
 0x5e6   :  { %v2171_v8 = vadd.f32 %v10427_v63, %v2106_v23  ;;  %v7126_v63 = vld [vmem:[%s14008_s3 + $0x950] sm:$0xff] }
 0x5e7   :  { %v2229_v38 = vpop.f32.mrf.mxu2 }
 0x5e8   :  { %v2230_v50 = vadd.f32 %v2229_v38, %v2165_v48 }
 0x5e9   :  { %v2052_v59 = vpop.f32.mrf.mxu3 }
 0x5ea   :  { %7074 = vmatmul.msk.f32.gmra.mxu3 %vm1248_vm2, %v2230_v50  ;;  %v2111_v48 = vpop.f32.mrf.mxu0  ;;  %v2176_v50 = vpop.f32.mrf.mxu1 }
 0x5ec   :  { %2625 = vmatmul.f32.gmra.mxu2 %v7114_v10  ;;  %v7122_v10 = vld [vmem:[%s14008_s3 + $0x930] sm:$0xff] }
 0x5ef   :  { %v2232_v42 = vpop.f32.mrf.mxu2 }
 0x5f0   :  { %v2233_v19 = vadd.f32 %v2232_v42, %v2168_v41  ;;  %v2112_v41 = vadd.f32 %v2111_v48, %v2046_v39 }
 0x5f1   :  { %v2055_v34 = vpop.f32.mrf.mxu3 }
 0x5f2   :  { %7075 = vmatmul.msk.f32.gmra.mxu3 %vm1248_vm2, %v2233_v19  ;;  %v2114_v42 = vpop.f32.mrf.mxu0  ;;  %v2177_v23 = vadd.f32 %v2176_v50, %v2112_v41  ;;  %v7134_v50 = vld [vmem:[%s14008_s3 + $0x990] sm:$0xff] }
 0x5f4   :  { %2628 = vmatmul.f32.gmra.mxu2 %v7118_v49  ;;  %v2179_v49 = vpop.f32.mrf.mxu1 }
 0x5f7   :  { %v2235_v44 = vpop.f32.mrf.mxu2 }
 0x5f8   :  { %v2236_v38 = vadd.f32 %v2235_v44, %v2171_v8  ;;  %v2115_v44 = vadd.f32 %v2114_v42, %v2049_v51 }
 0x5f9   :  { %v2058_v54 = vpop.f32.mrf.mxu3 }
 0x5fa   :  { %7076 = vmatmul.msk.f32.gmra.mxu3 %vm1248_vm2, %v2236_v38  ;;  %v2117_v38 = vpop.f32.mrf.mxu0  ;;  %v2180_v39 = vadd.f32 %v2179_v49, %v2115_v44  ;;  %v7138_v49 = vld [vmem:[%s14008_s3 + $0x9b0] sm:$0xff] }
 0x5fc   :  { %2631 = vmatmul.f32.gmra.mxu2 %v7122_v10  ;;  %v2182_v10 = vpop.f32.mrf.mxu1 }
 0x5ff   :  { %v2238_v26 = vpop.f32.mrf.mxu2 }
 0x600   :  { %v2239_v19 = vadd.f32 %v2238_v26, %v2174_v22  ;;  %v2118_v22 = vadd.f32 %v2117_v38, %v2052_v59  ;;  %v7142_v38 = vld [vmem:[%s14008_s3 + $0x9d0] sm:$0xff] }
 0x601   :  { %v2061_v26 = vpop.f32.mrf.mxu3 }
 0x602   :  { %7077 = vmatmul.msk.f32.gmra.mxu3 %vm1248_vm2, %v2239_v19  ;;  %v2183_v19 = vadd.f32 %v2182_v10, %v2118_v22  ;;  %v7146_v22 = vld [vmem:[%s14008_s3 + $0x9f0] sm:$0xff] }
 0x604   :  { %2634 = vmatmul.f32.gmra.mxu2 %v7126_v63  ;;  %v2120_v63 = vpop.f32.mrf.mxu0  ;;  %v2185_v51 = vpop.f32.mrf.mxu1 }
 0x607   :  { %v2241_v8 = vpop.f32.mrf.mxu2 }
 0x608   :  { %v2242_v33 = vadd.f32 %v2241_v8, %v2177_v23  ;;  %v2121_v23 = vadd.f32 %v2120_v63, %v2055_v34  ;;  %v7092_v63 = vld [vmem:[%s14008_s3 + $0x840] sm:$0xff] }
 0x609   :  { %v2123_v8 = vpop.f32.mrf.mxu3 }
 0x60a   :  { %7078 = vmatmul.msk.f32.gmra.mxu3 %vm1248_vm2, %v2242_v33  ;;  %v2186_v33 = vadd.f32 %v2185_v51, %v2121_v23  ;;  %v2124_v10 = vadd.f32 %v2123_v8, %v2058_v54  ;;  %v7087_v23 = vld [vmem:[%s14008_s3 + $0x818] sm:$0xff]  ;;  %v7173_v8 = vld [vmem:[%s14008_s3 + $0xa28] sm:$0xff] }
 0x60c   :  { %2637 = vmatmul.f32.gmra.mxu2 %v7130_v45  ;;  %v2188_v44 = vpop.f32.mrf.mxu1 }
 0x60d   :  { %v2189_v34 = vadd.f32 %v2188_v44, %v2124_v10 }
 0x60f   :  { %v2244_v48 = vpop.f32.mrf.mxu2 }
 0x610   :  { %v2245_v60 = vadd.f32 %v2244_v48, %v2180_v39  ;;  %v7088_v39 = vld [vmem:[%s14008_s3 + $0x820] sm:$0xff] }
 0x611   :  { %2477 = vmatmul.f32.gmra.mxu0 %v7088_v39  ;;  %v2126_v48 = vpop.f32.mrf.mxu3  ;;  %v14437_v39 = vld [vmem:[#allocation18_spill] sm:$0xff] }
 0x612   :  { %7079 = vmatmul.msk.f32.gmra.mxu3 %vm1248_vm2, %v2245_v60 }
 0x614   :  { %2640 = vmatmul.f32.gmra.mxu2 %v7134_v50  ;;  %v2191_v54 = vpop.f32.mrf.mxu1 }
 0x617   :  { %v2247_v41 = vpop.f32.mrf.mxu2 }
 0x618   :  { %v2248_v42 = vadd.f32 %v2247_v41, %v2183_v19  ;;  %v2127_v19 = vadd.f32 %v2126_v48, %v2061_v26  ;;  %v7096_v26 = vld [vmem:[%s14008_s3 + $0x860] sm:$0xff]  ;;  %v14438_v48 = vld [vmem:[#allocation19_spill] sm:$0xff] }
 0x619   :  { %2480 = vmatmul.f32.gmra.mxu0 %v7092_v63  ;;  %v14441_v63 = vld [vmem:[#allocation74_spill] sm:$0xff] }
 0x61a   :  { %7080 = vmatmul.msk.f32.gmra.mxu3 %vm1248_vm2, %v2248_v42  ;;  %v2192_v51 = vadd.f32 %v2191_v54, %v2127_v19  ;;  %v14440_v19 = vld [vmem:[#allocation21_spill] sm:$0xff] }
 0x61c   :  { %2643 = vmatmul.f32.gmra.mxu2 %v7138_v49  ;;  %v7169_v49 = vld [vmem:[%s14008_s3 + $0xa08] sm:$0xff] }
 0x61f   :  { %v2250_v59 = vpop.f32.mrf.mxu2 }
 0x620   :  { %v2251_v45 = vadd.f32 %v2250_v59, %v2186_v33  ;;  %v7100_v33 = vld [vmem:[%s14008_s3 + $0x880] sm:$0xff] }
 0x621   :  { %2483 = vmatmul.f32.gmra.mxu0 %v7096_v26  ;;  %v14433_v59 = vld [vmem:[#allocation16_spill] sm:$0xff]  ;;  %v7181_v26 = vld [vmem:[%s14008_s3 + $0xa68] sm:$0xff] }
 0x622   :  { %7081 = vmatmul.msk.f32.gmra.mxu3 %vm1248_vm2, %v2251_v45  ;;  %v14434_v45 = vld [vmem:[#allocation17_spill] sm:$0xff] }
 0x624   :  { %2646 = vmatmul.f32.gmra.mxu2 %v7142_v38  ;;  %v14435_v38 = vld [vmem:[#allocation41_spill] sm:$0xff] }
 0x627   :  { %v2253_v60 = vpop.f32.mrf.mxu2 }
 0x628   :  { %v2254_v50 = vadd.f32 %v2253_v60, %v2189_v34  ;;  %v7091_v34 = vld [vmem:[%s14008_s3 + $0x838] sm:$0xff]  ;;  %v7177_v60 = vld [vmem:[%s14008_s3 + $0xa48] sm:$0xff] }
 0x629   :  { %2486 = vmatmul.f32.gmra.mxu0 %v7100_v33  ;;  %v14446_v33 = vld [vmem:[#allocation25_spill] sm:$0xff] }
 0x62a   :  { %7082 = vmatmul.msk.f32.gmra.mxu3 %vm1248_vm2, %v2254_v50  ;;  %v7104_v50 = vld [vmem:[%s14008_s3 + $0x8a0] sm:$0xff] }
 0x62c   :  { %2649 = vmatmul.f32.gmra.mxu2 %v7146_v22  ;;  %v14439_v22 = vld [vmem:[#allocation20_spill] sm:$0xff] }
 0x62f   :  { %v2256_v41 = vpop.f32.mrf.mxu2 }
 0x630   :  { %v2257_v42 = vadd.f32 %v2256_v41, %v2192_v51  ;;  %v14443_v41 = vld [vmem:[#allocation22_spill] sm:$0xff] }
 0x631   :  { %2489 = vmatmul.f32.gmra.mxu0 %v7104_v50  ;;  %v7099_v50 = vld [vmem:[%s14008_s3 + $0x878] sm:$0xff] }
 0x632   :  { %7083 = vmatmul.msk.f32.gmra.mxu3 %vm1248_vm2, %v2257_v42  ;;  %v7095_v42 = vld [vmem:[%s14008_s3 + $0x858] sm:$0xff] }
 0x634   :  { %2998 = vmatmul.f32.vlgmr.msra.gmra.mxu2 %v7169_v49  ;;  %v14444_v49 = vld [vmem:[#allocation23_spill] sm:$0xff] }
 0x63a   :  { %2669 = vmatmul.f32.vlgmr.msrb.gmra.mxu3 %v7087_v23  ;;  %v7108_v23 = vld [vmem:[%s14008_s3 + $0x8c0] sm:$0xff] }
 0x63b   :  { %3441 = vmatpush.msrb.mxu3 %v14433_v59  ;;  %2492 = vmatmul.f32.gmra.mxu0 %v7108_v23  ;;  %v14452_v23 = vld [vmem:[#allocation29_spill] sm:$0xff] }
 0x63c   :  { %3001 = vmatmul.f32.gmra.mxu2 %v7173_v8  ;;  %v14445_v8 = vld [vmem:[#allocation24_spill] sm:$0xff] }
 0x63d   :  { %3442 = vmatpush.msrb.mxu3 %v14434_v45  ;;  %v2329_v44 = vpop.f32.mrf.mxu3 }
 0x63e   :  { %v10601_v10 = vadd.f32 %v2329_v44, %v14435_v38  ;;  %v14447_v38 = vld [vmem:[#allocation82_spill] sm:$0xff] }
 0x63f   :  { %3443 = vmatpush.msrb.mxu3 %v14437_v39 }
 0x640   :  { %14436 = vst [vmem:[#allocation79_spill] sm:$0xff] %v10601_v10  ;;  %v14456_v10 = vld [vmem:[#allocation31_spill] sm:$0xff] }
 0x641   :  { %3444 = vmatpush.msrb.mxu3 %v14438_v48 }
 0x642   :  { %2672 = vmatmul.f32.gmra.mxu3 %v7091_v34 }
 0x643   :  { %3445 = vmatpush.msrb.mxu3 %v14439_v22 }
 0x644   :  { %3004 = vmatmul.f32.gmra.mxu2 %v7177_v60  ;;  %v14449_v60 = vld [vmem:[#allocation26_spill] sm:$0xff] }
 0x645   :  { %3446 = vmatpush.msrb.mxu3 %v14440_v19  ;;  %v2332_v54 = vpop.f32.mrf.mxu3  ;;  %v2540_v19 = vpop.f32.mrf.mxu1 }
 0x646   :  { %v10617_v51 = vadd.f32 %v2332_v54, %v14441_v63  ;;  %v14450_v54 = vld [vmem:[#allocation27_spill] sm:$0xff]  ;;  %v7185_v63 = vld [vmem:[%s14008_s3 + $0xa88] sm:$0xff] }
 0x647   :  { %3447 = vmatpush.msrb.mxu3 %v14443_v41  ;;  %v2475_v41 = vpop.f32.mrf.mxu0 }
 0x648   :  { %14442 = vst [vmem:[#allocation90_spill] sm:$0xff] %v10617_v51  ;;  %v14455_v51 = vld [vmem:[#allocation30_spill] sm:$0xff] }
 0x649   :  { %3448 = vmatpush.msrb.mxu3 %v14444_v49 }
 0x64a   :  { %2675 = vmatmul.f32.gmra.mxu3 %v7095_v42  ;;  %v7112_v42 = vld [vmem:[%s14008_s3 + $0x8e0] sm:$0xff] }
 0x64b   :  { %3449 = vmatpush.msrb.mxu3 %v14445_v8  ;;  %2495 = vmatmul.f32.gmra.mxu0 %v7112_v42  ;;  %v14471_v8 = vld [vmem:[#allocation66_spill] sm:$0xff] }
 0x64c   :  { %3007 = vmatmul.f32.gmra.mxu2 %v7181_v26  ;;  %v14451_v26 = vld [vmem:[#allocation28_spill] sm:$0xff] }
 0x64d   :  { %3450 = vmatpush.msrb.mxu3 %v14446_v33  ;;  %v2335_v44 = vpop.f32.mrf.mxu3  ;;  %v7131_v33 = vld [vmem:[%s14008_s3 + $0x978] sm:$0xff] }
 0x64e   :  { %v10633_v34 = vadd.f32 %v2335_v44, %v14447_v38  ;;  %v14453_v38 = vld [vmem:[#allocation101_spill] sm:$0xff] }
 0x64f   :  { %3451 = vmatpush.msrb.mxu3 %v14449_v60  ;;  %v7213_v60 = vld [vmem:[%s14008_s3 + $0xb68] sm:$0xff] }
 0x650   :  { %14448 = vst [vmem:[#allocation106_spill] sm:$0xff] %v10633_v34 }
 0x651   :  { %3452 = vmatpush.msrb.mxu3 %v14450_v54 }
 0x652   :  { %2678 = vmatmul.f32.gmra.mxu3 %v7099_v50  ;;  %v7103_v50 = vld [vmem:[%s14008_s3 + $0x898] sm:$0xff] }
 0x653   :  { %3453 = vmatpush.msrb.mxu3 %v14451_v26  ;;  %v7189_v26 = vld [vmem:[%s14008_s3 + $0xaa8] sm:$0xff] }
 0x654   :  { %3010 = vmatmul.f32.gmra.mxu2 %v7185_v63  ;;  %v7116_v63 = vld [vmem:[%s14008_s3 + $0x900] sm:$0xff] }
 0x655   :  { %3454 = vmatpush.msrb.mxu3 %v14452_v23  ;;  %v2338_v44 = vpop.f32.mrf.mxu3  ;;  %2498 = vmatmul.f32.gmra.mxu0 %v7116_v63  ;;  %v14463_v23 = vld [vmem:[#allocation77_spill] sm:$0xff] }
 0x656   :  { %v10649_v34 = vadd.f32 %v2338_v44, %v14453_v38  ;;  %v14457_v44 = vld [vmem:[#allocation117_spill] sm:$0xff] }
 0x657   :  { %3455 = vmatpush.msrb.mxu3 %v14455_v51  ;;  %v7124_v51 = vld [vmem:[%s14008_s3 + $0x940] sm:$0xff] }
 0x658   :  { %14454 = vst [vmem:[#allocation121_spill] sm:$0xff] %v10649_v34  ;;  %v7107_v34 = vld [vmem:[%s14008_s3 + $0x8b8] sm:$0xff] }
 0x659   :  { %3456 = vmatpush.msrb.mxu3 %v14456_v10  ;;  %v7193_v10 = vld [vmem:[%s14008_s3 + $0xac8] sm:$0xff] }
 0x65a   :  { %2681 = vmatmul.f32.gmra.mxu3 %v7103_v50  ;;  %v10671_v50 = vpop.f32.mrf.mxu2 }
 0x65c   :  { %3013 = vmatmul.f32.gmra.mxu2 %v7189_v26  ;;  %v7120_v26 = vld [vmem:[%s14008_s3 + $0x920] sm:$0xff] }
 0x65d   :  { %v2341_v42 = vpop.f32.mrf.mxu3  ;;  %2501 = vmatmul.f32.gmra.mxu0 %v7120_v26 }
 0x65e   :  { %v10663_v38 = vadd.f32 %v2341_v42, %v14457_v44  ;;  %v14459_v42 = vld [vmem:[#allocation64_spill] sm:$0xff] }
 0x660   :  { %14458 = vst [vmem:[#allocation68_spill] sm:$0xff] %v10663_v38  ;;  %v7111_v38 = vld [vmem:[%s14008_s3 + $0x8d8] sm:$0xff] }
 0x662   :  { %2684 = vmatmul.f32.gmra.mxu3 %v7107_v34  ;;  %v7197_v34 = vld [vmem:[%s14008_s3 + $0xae8] sm:$0xff] }
 0x664   :  { %3016 = vmatmul.f32.gmra.mxu2 %v7193_v10  ;;  %v10688_v10 = vpop.f32.mrf.mxu2 }
 0x665   :  { %v2344_v63 = vpop.f32.mrf.mxu3  ;;  %2504 = vmatmul.f32.gmra.mxu0 %v7124_v51 }
 0x666   :  { %v10677_v44 = vadd.f32 %v2344_v63, %v14459_v42  ;;  %v14461_v63 = vld [vmem:[#allocation42_spill] sm:$0xff] }
 0x668   :  { %14460 = vst [vmem:[#allocation44_spill] sm:$0xff] %v10677_v44  ;;  %v7115_v44 = vld [vmem:[%s14008_s3 + $0x8f8] sm:$0xff] }
 0x66a   :  { %2687 = vmatmul.f32.gmra.mxu3 %v7111_v38  ;;  %v7201_v38 = vld [vmem:[%s14008_s3 + $0xb08] sm:$0xff] }
 0x66c   :  { %3019 = vmatmul.f32.gmra.mxu2 %v7197_v34  ;;  %v7128_v34 = vld [vmem:[%s14008_s3 + $0x960] sm:$0xff] }
 0x66d   :  { %v2347_v26 = vpop.f32.mrf.mxu3  ;;  %2507 = vmatmul.f32.gmra.mxu0 %v7128_v34 }
 0x66e   :  { %v10691_v42 = vadd.f32 %v2347_v26, %v14461_v63  ;;  %v10705_v26 = vpop.f32.mrf.mxu2  ;;  %v7119_v63 = vld [vmem:[%s14008_s3 + $0x918] sm:$0xff] }
 0x670   :  { %14462 = vst [vmem:[#allocation81_spill] sm:$0xff] %v10691_v42 }
 0x672   :  { %2690 = vmatmul.f32.gmra.mxu3 %v7115_v44  ;;  %v7205_v44 = vld [vmem:[%s14008_s3 + $0xb28] sm:$0xff] }
 0x674   :  { %3022 = vmatmul.f32.gmra.mxu2 %v7201_v38  ;;  %v7132_v38 = vld [vmem:[%s14008_s3 + $0x980] sm:$0xff] }
 0x675   :  { %v2350_v51 = vpop.f32.mrf.mxu3  ;;  %2510 = vmatmul.f32.gmra.mxu0 %v7132_v38 }
 0x676   :  { %v10703_v54 = vadd.f32 %v2350_v51, %v14463_v23  ;;  %v14465_v23 = vld [vmem:[#allocation86_spill] sm:$0xff]  ;;  %v10722_v42 = vpop.f32.mrf.mxu2 }
 0x678   :  { %14464 = vst [vmem:[#allocation94_spill] sm:$0xff] %v10703_v54  ;;  %v7123_v54 = vld [vmem:[%s14008_s3 + $0x938] sm:$0xff] }
 0x67a   :  { %2693 = vmatmul.f32.gmra.mxu3 %v7119_v63  ;;  %v7209_v63 = vld [vmem:[%s14008_s3 + $0xb48] sm:$0xff] }
 0x67c   :  { %3025 = vmatmul.f32.gmra.mxu2 %v7205_v44  ;;  %v7136_v44 = vld [vmem:[%s14008_s3 + $0x9a0] sm:$0xff] }
 0x67d   :  { %v2353_v34 = vpop.f32.mrf.mxu3  ;;  %2513 = vmatmul.f32.gmra.mxu0 %v7136_v44 }
 0x67e   :  { %v10717_v51 = vadd.f32 %v2353_v34, %v14465_v23  ;;  %v14467_v34 = vld [vmem:[#allocation103_spill] sm:$0xff] }
 0x680   :  { %14466 = vst [vmem:[#allocation108_spill] sm:$0xff] %v10717_v51  ;;  %v7127_v51 = vld [vmem:[%s14008_s3 + $0x958] sm:$0xff] }
 0x682   :  { %2696 = vmatmul.f32.gmra.mxu3 %v7123_v54  ;;  %v10739_v54 = vpop.f32.mrf.mxu2 }
 0x684   :  { %3028 = vmatmul.f32.gmra.mxu2 %v7209_v63  ;;  %v7140_v63 = vld [vmem:[%s14008_s3 + $0x9c0] sm:$0xff] }
 0x685   :  { %v2356_v38 = vpop.f32.mrf.mxu3  ;;  %2516 = vmatmul.f32.gmra.mxu0 %v7140_v63  ;;  %v7217_v63 = vld [vmem:[%s14008_s3 + $0xb88] sm:$0xff] }
 0x686   :  { %v10731_v23 = vadd.f32 %v2356_v38, %v14467_v34  ;;  %v14469_v38 = vld [vmem:[#allocation119_spill] sm:$0xff] }
 0x688   :  { %14468 = vst [vmem:[#allocation124_spill] sm:$0xff] %v10731_v23  ;;  %v7319_v23 = vld [vmem:[%s14009_s4 + $0xd8] sm:$0xff] }
 0x689   :  { %3701 = vmatpush.msra.mxu2 %v7319_v23 }
 0x68a   :  { %2699 = vmatmul.f32.gmra.mxu3 %v7127_v51  ;;  %v7318_v51 = vld [vmem:[%s14009_s4 + $0xd0] sm:$0xff]  ;;  %v10768_v23 = vpop.f32.mrf.mxu2 }
 0x68b   :  { %3702 = vmatpush.msra.mxu2 %v7318_v51  ;;  %v7221_v51 = vld [vmem:[%s14008_s3 + $0xba8] sm:$0xff] }
 0x68c   :  { %3031 = vmatmul.f32.gmra.mxu2 %v7213_v60  ;;  %v7317_v60 = vld [vmem:[%s14009_s4 + $0xc8] sm:$0xff] }
 0x68d   :  { %v2359_v44 = vpop.f32.mrf.mxu3  ;;  %3703 = vmatpush.msra.mxu2 %v7317_v60 }
 0x68e   :  { %v10745_v34 = vadd.f32 %v2359_v44, %v14469_v38  ;;  %v7316_v44 = vld [vmem:[%s14009_s4 + $0xc0] sm:$0xff] }
 0x68f   :  { %v7144_v38 = vld [vmem:[%s14008_s3 + $0x9e0] sm:$0xff]  ;;  %3704 = vmatpush.msra.mxu2 %v7316_v44 }
 0x690   :  { %14470 = vst [vmem:[#allocation69_spill] sm:$0xff] %v10745_v34  ;;  %2519 = vmatmul.f32.gmra.mxu0 %v7144_v38  ;;  %v2478_v38 = vpop.f32.mrf.mxu0 }
 0x692   :  { %2702 = vmatmul.f32.gmra.mxu3 %v7131_v33  ;;  %v7135_v33 = vld [vmem:[%s14008_s3 + $0x998] sm:$0xff]  ;;  %v10782_v44 = vpop.f32.mrf.mxu2 }
 0x694   :  { %3034 = vmatmul.f32.gmra.mxu2 %v7217_v63 }
 0x695   :  { %v2362_v34 = vpop.f32.mrf.mxu3 }
 0x696   :  { %v10771_v49 = vadd.f32 %v2362_v34, %v14471_v8  ;;  %v7139_v8 = vld [vmem:[%s14008_s3 + $0x9b8] sm:$0xff]  ;;  %v7225_v34 = vld [vmem:[%s14008_s3 + $0xbc8] sm:$0xff] }
 0x698   :  { %14472 = vst [vmem:[#allocation47_spill] sm:$0xff] %v10771_v49  ;;  %v2543_v49 = vpop.f32.mrf.mxu1  ;;  %v2481_v22 = vpop.f32.mrf.mxu0 }
 0x69a   :  { %2705 = vmatmul.f32.gmra.mxu3 %v7135_v33 }
 0x69c   :  { %3037 = vmatmul.f32.gmra.mxu2 %v7221_v51 }
 0x69d   :  { %v2365_v60 = vpop.f32.mrf.mxu3 }
 0x69e   :  { %v10780_v63 = vadd.f32 %v2365_v60, %v10417_v29  ;;  %v7143_v29 = vld [vmem:[%s14008_s3 + $0x9d8] sm:$0xff]  ;;  %v10796_v60 = vpop.f32.mrf.mxu2 }
 0x6a0   :  { %14473 = vst [vmem:[#allocation85_spill] sm:$0xff] %v10780_v63  ;;  %v7229_v63 = vld [vmem:[%s14008_s3 + $0xbe8] sm:$0xff]  ;;  %v2484_v39 = vpop.f32.mrf.mxu0 }
 0x6a2   :  { %2708 = vmatmul.f32.gmra.mxu3 %v7139_v8  ;;  %v2546_v8 = vpop.f32.mrf.mxu1 }
 0x6a4   :  { %3040 = vmatmul.f32.gmra.mxu2 %v7225_v34 }
 0x6a5   :  { %v2368_v33 = vpop.f32.mrf.mxu3 }
 0x6a6   :  { %v10791_v51 = vadd.f32 %v2368_v33, %v10430_v6  ;;  %v7147_v6 = vld [vmem:[%s14008_s3 + $0x9f8] sm:$0xff]  ;;  %v7252_v33 = vld [vmem:[%s14008_s3 + $0xc00] sm:$0xff] }
 0x6a8   :  { %14474 = vst [vmem:[#allocation97_spill] sm:$0xff] %v10791_v51  ;;  %v10810_v51 = vpop.f32.mrf.mxu2 }
 0x6aa   :  { %2711 = vmatmul.f32.gmra.mxu3 %v7143_v29  ;;  %v2549_v29 = vpop.f32.mrf.mxu1 }
 0x6ac   :  { %3043 = vmatmul.f32.gmra.mxu2 %v7229_v63 }
 0x6ad   :  { %v2371_v48 = vpop.f32.mrf.mxu3 }
 0x6ae   :  { %v10802_v34 = vadd.f32 %v2371_v48, %v10442_v40  ;;  %v2541_v48 = vadd.f32 %v2540_v19, %v2475_v41 }
 0x6b0   :  { %14475 = vst [vmem:[#allocation110_spill] sm:$0xff] %v10802_v34  ;;  %v7170_v34 = vld [vmem:[%s14008_s3 + $0xa10] sm:$0xff] }
 0x6b2   :  { %2714 = vmatmul.f32.gmra.mxu3 %v7147_v6  ;;  %v2606_v6 = vadd.f32 %v10671_v50, %v2541_v48  ;;  %v2552_v41 = vpop.f32.mrf.mxu1  ;;  %v7174_v50 = vld [vmem:[%s14008_s3 + $0xa30] sm:$0xff] }
 0x6b4   :  { %3392 = vmatmul.f32.vlgmr.msrb.gmra.mxu2 %v7252_v33  ;;  %v14477_v33 = vld [vmem:[#allocation48_spill] sm:$0xff] }
 0x6b5   :  { %4030 = vmatpush.msrb.mxu2 %v9011_v25  ;;  %v2374_v63 = vpop.f32.mrf.mxu3  ;;  %v10824_v25 = vpop.f32.mrf.mxu0 }
 0x6b6   :  { %v10814_v40 = vadd.f32 %v2374_v63, %v10454_v31  ;;  %v14478_v31 = vld [vmem:[#allocation49_spill] sm:$0xff] }
 0x6b7   :  { %4031 = vmatpush.msrb.mxu2 %v9020_v9 }
 0x6b8   :  { %14476 = vst [vmem:[#allocation70_spill] sm:$0xff] %v10814_v40  ;;  %v2544_v40 = vadd.f32 %v2543_v49, %v2478_v38  ;;  %v14479_v38 = vld [vmem:[#allocation51_spill] sm:$0xff] }
 0x6b9   :  { %4032 = vmatpush.msrb.mxu2 %v9031_v17 }
 0x6ba   :  { %3063 = vmatmul.f32.vlgmr.msra.gmra.mxu3 %v7170_v34  ;;  %v2609_v34 = vadd.f32 %v10688_v10, %v2544_v40  ;;  %v7178_v10 = vld [vmem:[%s14008_s3 + $0xa50] sm:$0xff]  ;;  %v2555_v40 = vpop.f32.mrf.mxu1 }
 0x6bb   :  { %3835 = vmatpush.msra.mxu3 %v8304_v56  ;;  %4033 = vmatpush.msrb.mxu2 %v14477_v33 }
 0x6bd   :  { %3836 = vmatpush.msra.mxu3 %v8308_v58  ;;  %4034 = vmatpush.msrb.mxu2 %v14478_v31  ;;  %v2670_v19 = vpop.f32.mrf.mxu3 }
 0x6be   :  { %v2671_v63 = vadd.f32 %v2670_v19, %v2606_v6  ;;  %v2547_v6 = vadd.f32 %v2546_v8, %v2481_v22  ;;  %v2490_v19 = vpop.f32.mrf.mxu0 }
 0x6bf   :  { %3837 = vmatpush.msra.mxu3 %v14423_v5  ;;  %4035 = vmatpush.msrb.mxu2 %v9063_v55 }
 0x6c0   :  { %7152 = vmatmul.msk.f32.vlgmr.msra.gmra.mxu0 %vm1248_vm2, %v2671_v63  ;;  %v2612_v22 = vadd.f32 %v10705_v26, %v2547_v6  ;;  %v7182_v26 = vld [vmem:[%s14008_s3 + $0xa70] sm:$0xff] }
 0x6c1   :  { %3506 = vmatpush.msra.mxu0 %v8657_v37  ;;  %3838 = vmatpush.msra.mxu3 %v14424_v27 }
 0x6c2   :  { %4036 = vmatpush.msrb.mxu2 %v9070_v24  ;;  %3066 = vmatmul.f32.gmra.mxu3 %v7174_v50  ;;  %v2550_v50 = vadd.f32 %v2549_v29, %v2484_v39  ;;  %v14481_v29 = vld [vmem:[#allocation13_spill] sm:$0xff] }
 0x6c3   :  { %3507 = vmatpush.msra.mxu0 %v8664_v28  ;;  %3839 = vmatpush.msra.mxu3 %v8325_v2 }
 0x6c4   :  { %4037 = vmatpush.msrb.mxu2 %v9075_v18  ;;  %v2615_v39 = vadd.f32 %v10722_v42, %v2550_v50  ;;  %v7186_v42 = vld [vmem:[%s14008_s3 + $0xa90] sm:$0xff] }
 0x6c5   :  { %3508 = vmatpush.msra.mxu0 %v8669_v61  ;;  %3840 = vmatpush.msra.mxu3 %v14425_v35  ;;  %v2673_v49 = vpop.f32.mrf.mxu3 }
 0x6c6   :  { %4038 = vmatpush.msrb.mxu2 %v14479_v38  ;;  %v2674_v48 = vadd.f32 %v2673_v49, %v2609_v34  ;;  %v2493_v34 = vpop.f32.mrf.mxu0  ;;  %v2558_v49 = vpop.f32.mrf.mxu1 }
 0x6c7   :  { %3509 = vmatpush.msra.mxu0 %v8676_v52  ;;  %3841 = vmatpush.msra.mxu3 %v14426_v3 }
 0x6c8   :  { %4039 = vmatpush.msrb.mxu2 %v9094_v7  ;;  %7153 = vmatmul.msk.f32.gmra.mxu0 %vm1248_vm2, %v2674_v48  ;;  %v14480_v48 = vld [vmem:[#allocation58_spill] sm:$0xff] }
 0x6c9   :  { %3510 = vmatpush.msra.mxu0 %v8684_v53  ;;  %3842 = vmatpush.msra.mxu3 %v14427_v36 }
 0x6ca   :  { %4040 = vmatpush.msrb.mxu2 %v14385_v15  ;;  %3069 = vmatmul.f32.gmra.mxu3 %v7178_v10 }
 0x6cb   :  { %3511 = vmatpush.msra.mxu0 %v8693_v57  ;;  %3843 = vmatpush.msra.mxu3 %v8348_v12 }
 0x6cc   :  { %4041 = vmatpush.msrb.mxu2 %v14387_v62 }
 0x6cd   :  { %3512 = vmatpush.msra.mxu0 %v8699_v1  ;;  %3844 = vmatpush.msra.mxu3 %v8354_v14  ;;  %v2676_v8 = vpop.f32.mrf.mxu3 }
 0x6ce   :  { %4042 = vmatpush.msrb.mxu2 %v14388_v0  ;;  %v2677_v63 = vadd.f32 %v2676_v8, %v2612_v22  ;;  %v2553_v22 = vadd.f32 %v2552_v41, %v10824_v25  ;;  %v14482_v8 = vld [vmem:[#allocation32_spill] sm:$0xff]  ;;  %v2561_v25 = vpop.f32.mrf.mxu1  ;;  %v14485_v41 = vld [vmem:[#allocation35_spill] sm:$0xff] }
 0x6cf   :  { %3513 = vmatpush.msra.mxu0 %v8707_v13  ;;  %3845 = vmatpush.msra.mxu3 %v14270_v21 }
 0x6d0   :  { %4043 = vmatpush.msrb.mxu2 %v14390_v46  ;;  %7154 = vmatmul.msk.f32.gmra.mxu0 %vm1248_vm2, %v2677_v63  ;;  %v14483_v63 = vld [vmem:[#allocation14_spill] sm:$0xff]  ;;  %v2618_v50 = vadd.f32 %v10739_v54, %v2553_v22 }
 0x6d1   :  { %3514 = vmatpush.msra.mxu0 %v8716_v30  ;;  %3846 = vmatpush.msra.mxu3 %v14273_v43 }
 0x6d2   :  { %4044 = vmatpush.msrb.mxu2 %v14480_v48  ;;  %3072 = vmatmul.f32.gmra.mxu3 %v7182_v26  ;;  %v2496_v26 = vpop.f32.mrf.mxu0 }
 0x6d3   :  { %3515 = vmatpush.msra.mxu0 %v8722_v32  ;;  %3847 = vmatpush.msra.mxu3 %v14279_v47  ;;  %v2559_v47 = vadd.f32 %v2558_v49, %v2493_v34  ;;  %v2632_v49 = vpop.f32.mrf.mxu2 }
 0x6d4   :  { %4045 = vmatpush.msrb.mxu2 %v14396_v11  ;;  %v14486_v11 = vld [vmem:[#allocation36_spill] sm:$0xff] }
 0x6d5   :  { %3516 = vmatpush.msra.mxu0 %v8731_v20  ;;  %3848 = vmatpush.msra.mxu3 %v14481_v29  ;;  %v2679_v6 = vpop.f32.mrf.mxu3  ;;  %v2556_v29 = vadd.f32 %v2555_v40, %v2490_v19  ;;  %v7194_v19 = vld [vmem:[%s14008_s3 + $0xad0] sm:$0xff]  ;;  %v2624_v40 = vadd.f32 %v10782_v44, %v2559_v47 }
 0x6d6   :  { %v2680_v10 = vadd.f32 %v2679_v6, %v2615_v39  ;;  %v14484_v39 = vld [vmem:[#allocation34_spill] sm:$0xff] }
 0x6d7   :  { %3517 = vmatpush.msra.mxu0 %v14482_v8  ;;  %3849 = vmatpush.msra.mxu3 %v14483_v63  ;;  %v2621_v54 = vadd.f32 %v10768_v23, %v2556_v29  ;;  %v7198_v23 = vld [vmem:[%s14008_s3 + $0xaf0] sm:$0xff] }
 0x6d8   :  { %7155 = vmatmul.msk.f32.gmra.mxu0 %vm1248_vm2, %v2680_v10  ;;  %v7190_v10 = vld [vmem:[%s14008_s3 + $0xab0] sm:$0xff] }
 0x6d9   :  { %3518 = vmatpush.msra.mxu0 %v14274_v16  ;;  %3850 = vmatpush.msra.mxu3 %v14428_v4  ;;  %v2564_v4 = vpop.f32.mrf.mxu1  ;;  %v7202_v47 = vld [vmem:[%s14008_s3 + $0xb10] sm:$0xff] }
 0x6da   :  { %3075 = vmatmul.f32.gmra.mxu3 %v7186_v42  ;;  %v2499_v22 = vpop.f32.mrf.mxu0 }
 0x6db   :  { %3519 = vmatpush.msra.mxu0 %v14484_v39 }
 0x6dd   :  { %3520 = vmatpush.msra.mxu0 %v14485_v41  ;;  %v2682_v6 = vpop.f32.mrf.mxu3 }
 0x6de   :  { %v2683_v63 = vadd.f32 %v2682_v6, %v2618_v50 }
 0x6df   :  { %3521 = vmatpush.msra.mxu0 %v14486_v11 }
 0x6e0   :  { %7156 = vmatmul.msk.f32.gmra.mxu0 %vm1248_vm2, %v2683_v63  ;;  %v2562_v63 = vadd.f32 %v2561_v25, %v2496_v26 }
 0x6e1   :  { %v2567_v29 = vpop.f32.mrf.mxu1 }
 0x6e2   :  { %3078 = vmatmul.f32.gmra.mxu3 %v7190_v10  ;;  %v2502_v10 = vpop.f32.mrf.mxu0  ;;  %v2627_v34 = vadd.f32 %v10796_v60, %v2562_v63  ;;  %v7206_v60 = vld [vmem:[%s14008_s3 + $0xb30] sm:$0xff] }
 0x6e5   :  { %v2685_v42 = vpop.f32.mrf.mxu3 }
 0x6e6   :  { %v2686_v39 = vadd.f32 %v2685_v42, %v2621_v54  ;;  %v2565_v42 = vadd.f32 %v2564_v4, %v2499_v22 }
 0x6e8   :  { %7157 = vmatmul.msk.f32.gmra.mxu0 %vm1248_vm2, %v2686_v39  ;;  %v2630_v25 = vadd.f32 %v10810_v51, %v2565_v42  ;;  %v7210_v51 = vld [vmem:[%s14008_s3 + $0xb50] sm:$0xff] }
 0x6e9   :  { %v2570_v26 = vpop.f32.mrf.mxu1 }
 0x6ea   :  { %3081 = vmatmul.f32.gmra.mxu3 %v7194_v19  ;;  %v2505_v44 = vpop.f32.mrf.mxu0 }
 0x6ed   :  { %v2688_v50 = vpop.f32.mrf.mxu3 }
 0x6ee   :  { %v2689_v6 = vadd.f32 %v2688_v50, %v2624_v40  ;;  %v2635_v40 = vpop.f32.mrf.mxu2 }
 0x6f0   :  { %7158 = vmatmul.msk.f32.gmra.mxu0 %vm1248_vm2, %v2689_v6  ;;  %v2568_v6 = vadd.f32 %v2567_v29, %v2502_v10 }
 0x6f1   :  { %v2573_v63 = vpop.f32.mrf.mxu1 }
 0x6f2   :  { %3084 = vmatmul.f32.gmra.mxu3 %v7198_v23  ;;  %v2633_v4 = vadd.f32 %v2632_v49, %v2568_v6  ;;  %v2508_v22 = vpop.f32.mrf.mxu0  ;;  %v7214_v49 = vld [vmem:[%s14008_s3 + $0xb70] sm:$0xff] }
 0x6f5   :  { %v2691_v54 = vpop.f32.mrf.mxu3 }
 0x6f6   :  { %v2692_v39 = vadd.f32 %v2691_v54, %v2627_v34  ;;  %v2571_v54 = vadd.f32 %v2570_v26, %v2505_v44 }
 0x6f8   :  { %7159 = vmatmul.msk.f32.gmra.mxu0 %vm1248_vm2, %v2692_v39  ;;  %v2638_v39 = vpop.f32.mrf.mxu2  ;;  %v2636_v10 = vadd.f32 %v2635_v40, %v2571_v54  ;;  %v7218_v40 = vld [vmem:[%s14008_s3 + $0xb90] sm:$0xff] }
 0x6fa   :  { %3087 = vmatmul.f32.gmra.mxu3 %v7202_v47  ;;  %v2511_v29 = vpop.f32.mrf.mxu0  ;;  %v2576_v47 = vpop.f32.mrf.mxu1 }
 0x6fd   :  { %v2694_v19 = vpop.f32.mrf.mxu3 }
 0x6fe   :  { %v2695_v50 = vadd.f32 %v2694_v19, %v2630_v25  ;;  %v2574_v19 = vadd.f32 %v2573_v63, %v2508_v22 }
 0x700   :  { %7160 = vmatmul.msk.f32.gmra.mxu0 %vm1248_vm2, %v2695_v50  ;;  %v2641_v44 = vpop.f32.mrf.mxu2  ;;  %v2639_v26 = vadd.f32 %v2638_v39, %v2574_v19  ;;  %v7222_v39 = vld [vmem:[%s14008_s3 + $0xbb0] sm:$0xff] }
 0x702   :  { %3090 = vmatmul.f32.gmra.mxu3 %v7206_v60  ;;  %v2577_v60 = vadd.f32 %v2576_v47, %v2511_v29  ;;  %v7172_v47 = vld [vmem:[%s14008_s3 + $0xa20] sm:$0xff] }
 0x703   :  { %2936 = vmatmul.f32.gmra.mxu1 %v7172_v47 }
 0x704   :  { %v2642_v22 = vadd.f32 %v2641_v44, %v2577_v60 }
 0x705   :  { %v2697_v23 = vpop.f32.mrf.mxu3 }
 0x706   :  { %v2698_v34 = vadd.f32 %v2697_v23, %v2633_v4  ;;  %v2514_v4 = vpop.f32.mrf.mxu0  ;;  %v2579_v23 = vpop.f32.mrf.mxu1 }
 0x708   :  { %7161 = vmatmul.msk.f32.gmra.mxu0 %vm1248_vm2, %v2698_v34  ;;  %v2644_v63 = vpop.f32.mrf.mxu2 }
 0x70a   :  { %3093 = vmatmul.f32.gmra.mxu3 %v7210_v51  ;;  %v2580_v51 = vadd.f32 %v2579_v23, %v2514_v4 }
 0x70d   :  { %v2700_v42 = vpop.f32.mrf.mxu3 }
 0x70e   :  { %v2701_v25 = vadd.f32 %v2700_v42, %v2636_v10  ;;  %v2517_v10 = vpop.f32.mrf.mxu0  ;;  %v2582_v29 = vpop.f32.mrf.mxu1  ;;  %v2645_v42 = vadd.f32 %v2644_v63, %v2580_v51  ;;  %v7230_v63 = vld [vmem:[%s14008_s3 + $0xbf0] sm:$0xff]  ;;  %v7180_v51 = vld [vmem:[%s14008_s3 + $0xa60] sm:$0xff] }
 0x70f   :  { %v2583_v44 = vadd.f32 %v2582_v29, %v2517_v10  ;;  %v7253_v29 = vld [vmem:[%s14008_s3 + $0xc08] sm:$0xff] }
 0x710   :  { %7162 = vmatmul.msk.f32.gmra.mxu0 %vm1248_vm2, %v2701_v25  ;;  %v2647_v19 = vpop.f32.mrf.mxu2 }
 0x712   :  { %3096 = vmatmul.f32.gmra.mxu3 %v7214_v49 }
 0x715   :  { %v2703_v50 = vpop.f32.mrf.mxu3 }
 0x716   :  { %v2704_v6 = vadd.f32 %v2703_v50, %v2639_v26  ;;  %v7226_v26 = vld [vmem:[%s14008_s3 + $0xbd0] sm:$0xff]  ;;  %v2648_v50 = vadd.f32 %v2647_v19, %v2583_v44  ;;  %v2585_v60 = vpop.f32.mrf.mxu1  ;;  %v7257_v19 = vld [vmem:[%s14008_s3 + $0xc28] sm:$0xff] }
 0x717   :  { %v14488_v44 = vld [vmem:[#allocation18_spill] sm:$0xff] }
 0x718   :  { %7163 = vmatmul.msk.f32.gmra.mxu0 %vm1248_vm2, %v2704_v6  ;;  %v2520_v6 = vpop.f32.mrf.mxu0 }
 0x71a   :  { %3099 = vmatmul.f32.gmra.mxu3 %v7218_v40  ;;  %v7176_v40 = vld [vmem:[%s14008_s3 + $0xa40] sm:$0xff] }
 0x71b   :  { %2939 = vmatmul.f32.gmra.mxu1 %v7176_v40  ;;  %v14491_v40 = vld [vmem:[#allocation20_spill] sm:$0xff] }
 0x71d   :  { %v2706_v34 = vpop.f32.mrf.mxu3 }
 0x71e   :  { %v2707_v54 = vadd.f32 %v2706_v34, %v2642_v22  ;;  %v2586_v22 = vadd.f32 %v2585_v60, %v2520_v6  ;;  %v2650_v34 = vpop.f32.mrf.mxu2  ;;  %v14490_v6 = vld [vmem:[#allocation19_spill] sm:$0xff]  ;;  %v7261_v60 = vld [vmem:[%s14008_s3 + $0xc48] sm:$0xff] }
 0x720   :  { %7164 = vmatmul.msk.f32.gmra.mxu0 %vm1248_vm2, %v2707_v54  ;;  %v2651_v54 = vadd.f32 %v2650_v34, %v2586_v22  ;;  %v14493_v22 = vld [vmem:[#allocation22_spill] sm:$0xff]  ;;  %v7179_v34 = vld [vmem:[%s14008_s3 + $0xa58] sm:$0xff] }
 0x722   :  { %3102 = vmatmul.f32.gmra.mxu3 %v7222_v39 }
 0x723   :  { %2942 = vmatmul.f32.gmra.mxu1 %v7180_v51  ;;  %v7265_v51 = vld [vmem:[%s14008_s3 + $0xc68] sm:$0xff] }
 0x725   :  { %v2709_v25 = vpop.f32.mrf.mxu3 }
 0x726   :  { %v2710_v49 = vadd.f32 %v2709_v25, %v2645_v42  ;;  %v7184_v42 = vld [vmem:[%s14008_s3 + $0xa80] sm:$0xff]  ;;  %v7171_v25 = vld [vmem:[%s14008_s3 + $0xa18] sm:$0xff] }
 0x728   :  { %7165 = vmatmul.msk.f32.gmra.mxu0 %vm1248_vm2, %v2710_v49  ;;  %v7188_v49 = vld [vmem:[%s14008_s3 + $0xaa0] sm:$0xff] }
 0x72a   :  { %3105 = vmatmul.f32.gmra.mxu3 %v7226_v26 }
 0x72b   :  { %2945 = vmatmul.f32.gmra.mxu1 %v7184_v42  ;;  %v14498_v42 = vld [vmem:[#allocation26_spill] sm:$0xff] }
 0x72d   :  { %v2712_v4 = vpop.f32.mrf.mxu3 }
 0x72e   :  { %v2713_v23 = vadd.f32 %v2712_v4, %v2648_v50  ;;  %v7175_v50 = vld [vmem:[%s14008_s3 + $0xa38] sm:$0xff]  ;;  %v7192_v4 = vld [vmem:[%s14008_s3 + $0xac0] sm:$0xff] }
 0x730   :  { %7166 = vmatmul.msk.f32.gmra.mxu0 %vm1248_vm2, %v2713_v23  ;;  %v14492_v23 = vld [vmem:[#allocation21_spill] sm:$0xff] }
 0x732   :  { %3108 = vmatmul.f32.gmra.mxu3 %v7230_v63 }
 0x733   :  { %2948 = vmatmul.f32.gmra.mxu1 %v7188_v49  ;;  %v14500_v49 = vld [vmem:[#allocation27_spill] sm:$0xff] }
 0x735   :  { %v2715_v39 = vpop.f32.mrf.mxu3 }
 0x736   :  { %v2716_v10 = vadd.f32 %v2715_v39, %v2651_v54  ;;  %v14495_v54 = vld [vmem:[#allocation23_spill] sm:$0xff]  ;;  %v14496_v39 = vld [vmem:[#allocation24_spill] sm:$0xff] }
 0x738   :  { %7167 = vmatmul.msk.f32.gmra.mxu0 %vm1248_vm2, %v2716_v10  ;;  %v7196_v10 = vld [vmem:[%s14008_s3 + $0xae0] sm:$0xff] }
 0x73a   :  { %3457 = vmatmul.f32.vlgmr.msrb.gmra.mxu3 %v7253_v29  ;;  %v14497_v29 = vld [vmem:[#allocation25_spill] sm:$0xff] }
 0x73b   :  { %2951 = vmatmul.f32.gmra.mxu1 %v7192_v4  ;;  %v7200_v4 = vld [vmem:[%s14008_s3 + $0xb00] sm:$0xff] }
 0x73d   :  { %v10954_v47 = vpop.f32.mrf.mxu0 }
 0x73e   :  { %14487 = vst [vmem:[#allocation50_spill] sm:$0xff] %v10954_v47  ;;  %v11033_v47 = vpop.f32.mrf.mxu3 }
 0x740   :  { %3128 = vmatmul.f32.vlgmr.msrb.gmra.mxu0 %v7171_v25 }
 0x741   :  { %3900 = vmatpush.msrb.mxu0 %v14433_v59 }
 0x742   :  { %3460 = vmatmul.f32.gmra.mxu3 %v7257_v19  ;;  %v7183_v19 = vld [vmem:[%s14008_s3 + $0xa78] sm:$0xff] }
 0x743   :  { %3901 = vmatpush.msrb.mxu0 %v14434_v45  ;;  %2954 = vmatmul.f32.gmra.mxu1 %v7196_v10  ;;  %v7336_v45 = vld [vmem:[%s14008_s3 + $0xe00] sm:$0xff] }
 0x745   :  { %3902 = vmatpush.msrb.mxu0 %v14488_v44  ;;  %v10968_v26 = vpop.f32.mrf.mxu0 }
 0x746   :  { %14489 = vst [vmem:[#allocation89_spill] sm:$0xff] %v10968_v26  ;;  %v7277_v26 = vld [vmem:[%s14008_s3 + $0xcc8] sm:$0xff] }
 0x747   :  { %3903 = vmatpush.msrb.mxu0 %v14490_v6 }
 0x748   :  { %3131 = vmatmul.f32.gmra.mxu0 %v7175_v50  ;;  %v7269_v50 = vld [vmem:[%s14008_s3 + $0xc88] sm:$0xff] }
 0x749   :  { %3904 = vmatpush.msrb.mxu0 %v14491_v40 }
 0x74a   :  { %3463 = vmatmul.f32.gmra.mxu3 %v7261_v60  ;;  %v14501_v60 = vld [vmem:[#allocation28_spill] sm:$0xff] }
 0x74b   :  { %3905 = vmatpush.msrb.mxu0 %v14492_v23  ;;  %2957 = vmatmul.f32.gmra.mxu1 %v7200_v4 }
 0x74d   :  { %3906 = vmatpush.msrb.mxu0 %v14493_v22  ;;  %v10983_v63 = vpop.f32.mrf.mxu0 }
 0x74e   :  { %14494 = vst [vmem:[#allocation99_spill] sm:$0xff] %v10983_v63  ;;  %v14505_v63 = vld [vmem:[#allocation31_spill] sm:$0xff] }
 0x74f   :  { %3907 = vmatpush.msrb.mxu0 %v14495_v54 }
 0x750   :  { %3134 = vmatmul.f32.gmra.mxu0 %v7179_v34  ;;  %v14502_v34 = vld [vmem:[#allocation29_spill] sm:$0xff] }
 0x751   :  { %3908 = vmatpush.msrb.mxu0 %v14496_v39  ;;  %v7219_v39 = vld [vmem:[%s14008_s3 + $0xb98] sm:$0xff] }
 0x752   :  { %3466 = vmatmul.f32.gmra.mxu3 %v7265_v51  ;;  %v14503_v51 = vld [vmem:[#allocation30_spill] sm:$0xff] }
 0x753   :  { %3909 = vmatpush.msrb.mxu0 %v14497_v29 }
 0x755   :  { %3910 = vmatpush.msrb.mxu0 %v14498_v42  ;;  %v10998_v25 = vpop.f32.mrf.mxu0 }
 0x756   :  { %14499 = vst [vmem:[#allocation111_spill] sm:$0xff] %v10998_v25  ;;  %v7187_v25 = vld [vmem:[%s14008_s3 + $0xa98] sm:$0xff] }
 0x757   :  { %3911 = vmatpush.msrb.mxu0 %v14500_v49  ;;  %v7301_v49 = vld [vmem:[%s14008_s3 + $0xd88] sm:$0xff] }
 0x758   :  { %3137 = vmatmul.f32.gmra.mxu0 %v7183_v19  ;;  %v7273_v19 = vld [vmem:[%s14008_s3 + $0xca8] sm:$0xff] }
 0x759   :  { %3912 = vmatpush.msrb.mxu0 %v14501_v60 }
 0x75a   :  { %3469 = vmatmul.f32.gmra.mxu3 %v7269_v50  ;;  %v7204_v50 = vld [vmem:[%s14008_s3 + $0xb20] sm:$0xff] }
 0x75b   :  { %3913 = vmatpush.msrb.mxu0 %v14502_v34  ;;  %2960 = vmatmul.f32.gmra.mxu1 %v7204_v50  ;;  %v7195_v50 = vld [vmem:[%s14008_s3 + $0xad8] sm:$0xff]  ;;  %v7293_v34 = vld [vmem:[%s14008_s3 + $0xd48] sm:$0xff] }
 0x75d   :  { %3914 = vmatpush.msrb.mxu0 %v14503_v51  ;;  %v11013_v10 = vpop.f32.mrf.mxu0  ;;  %v7289_v51 = vld [vmem:[%s14008_s3 + $0xd28] sm:$0xff] }
 0x75e   :  { %14504 = vst [vmem:[#allocation72_spill] sm:$0xff] %v11013_v10  ;;  %v7191_v10 = vld [vmem:[%s14008_s3 + $0xab8] sm:$0xff] }
 0x75f   :  { %3915 = vmatpush.msrb.mxu0 %v14505_v63  ;;  %v7285_v63 = vld [vmem:[%s14008_s3 + $0xd08] sm:$0xff] }
 0x760   :  { %3140 = vmatmul.f32.gmra.mxu0 %v7187_v25  ;;  %v7208_v25 = vld [vmem:[%s14008_s3 + $0xb40] sm:$0xff] }
 0x762   :  { %3472 = vmatmul.f32.gmra.mxu3 %v7273_v19 }
 0x763   :  { %2963 = vmatmul.f32.gmra.mxu1 %v7208_v25 }
 0x765   :  { %v11025_v4 = vpop.f32.mrf.mxu0 }
 0x766   :  { %14506 = vst [vmem:[#allocation53_spill] sm:$0xff] %v11025_v4  ;;  %v7281_v4 = vld [vmem:[%s14008_s3 + $0xce8] sm:$0xff] }
 0x768   :  { %3143 = vmatmul.f32.gmra.mxu0 %v7191_v10  ;;  %v11046_v10 = vpop.f32.mrf.mxu3 }
 0x76a   :  { %3475 = vmatmul.f32.gmra.mxu3 %v7277_v26  ;;  %v7212_v26 = vld [vmem:[%s14008_s3 + $0xb60] sm:$0xff] }
 0x76b   :  { %2966 = vmatmul.f32.gmra.mxu1 %v7212_v26 }
 0x76d   :  { %v11038_v19 = vpop.f32.mrf.mxu0 }
 0x76e   :  { %14507 = vst [vmem:[#allocation93_spill] sm:$0xff] %v11038_v19  ;;  %v7199_v19 = vld [vmem:[%s14008_s3 + $0xaf8] sm:$0xff] }
 0x770   :  { %3146 = vmatmul.f32.gmra.mxu0 %v7195_v50  ;;  %v11062_v50 = vpop.f32.mrf.mxu3 }
 0x772   :  { %3478 = vmatmul.f32.gmra.mxu3 %v7281_v4  ;;  %v7216_v4 = vld [vmem:[%s14008_s3 + $0xb80] sm:$0xff] }
 0x773   :  { %2969 = vmatmul.f32.gmra.mxu1 %v7216_v4  ;;  %v7207_v4 = vld [vmem:[%s14008_s3 + $0xb38] sm:$0xff] }
 0x775   :  { %v11051_v25 = vpop.f32.mrf.mxu0 }
 0x776   :  { %14508 = vst [vmem:[#allocation102_spill] sm:$0xff] %v11051_v25  ;;  %v7203_v25 = vld [vmem:[%s14008_s3 + $0xb18] sm:$0xff] }
 0x778   :  { %3149 = vmatmul.f32.gmra.mxu0 %v7199_v19 }
 0x77a   :  { %3481 = vmatmul.f32.gmra.mxu3 %v7285_v63  ;;  %v7220_v63 = vld [vmem:[%s14008_s3 + $0xba0] sm:$0xff] }
 0x77b   :  { %2972 = vmatmul.f32.gmra.mxu1 %v7220_v63  ;;  %v7211_v63 = vld [vmem:[%s14008_s3 + $0xb58] sm:$0xff] }
 0x77d   :  { %v11064_v26 = vpop.f32.mrf.mxu0 }
 0x77e   :  { %14509 = vst [vmem:[#allocation113_spill] sm:$0xff] %v11064_v26  ;;  %v11080_v26 = vpop.f32.mrf.mxu3 }
 0x780   :  { %3152 = vmatmul.f32.gmra.mxu0 %v7203_v25 }
 0x782   :  { %3484 = vmatmul.f32.gmra.mxu3 %v7289_v51  ;;  %v7224_v51 = vld [vmem:[%s14008_s3 + $0xbc0] sm:$0xff] }
 0x783   :  { %2975 = vmatmul.f32.gmra.mxu1 %v7224_v51 }
 0x785   :  { %v11075_v19 = vpop.f32.mrf.mxu0 }
 0x786   :  { %14510 = vst [vmem:[#allocation75_spill] sm:$0xff] %v11075_v19  ;;  %v7297_v19 = vld [vmem:[%s14008_s3 + $0xd68] sm:$0xff]  ;;  %v11096_v60 = vpop.f32.mrf.mxu3 }
 0x788   :  { %3155 = vmatmul.f32.gmra.mxu0 %v7207_v4  ;;  %v7228_v4 = vld [vmem:[%s14008_s3 + $0xbe0] sm:$0xff] }
 0x78a   :  { %3487 = vmatmul.f32.gmra.mxu3 %v7293_v34  ;;  %v7403_v34 = vld [vmem:[%s14009_s4 + $0xf8] sm:$0xff] }
 0x78b   :  { %4160 = vmatpush.msrb.mxu3 %v7403_v34  ;;  %2978 = vmatmul.f32.gmra.mxu1 %v7228_v4  ;;  %v2934_v34 = vpop.f32.mrf.mxu1  ;;  %v2999_v4 = vpop.f32.mrf.mxu2 }
 0x78d   :  { %v11088_v25 = vpop.f32.mrf.mxu0 }
 0x78e   :  { %14511 = vst [vmem:[#allocation59_spill] sm:$0xff] %v11088_v25  ;;  %v7215_v25 = vld [vmem:[%s14008_s3 + $0xb78] sm:$0xff]  ;;  %v11121_v42 = vpop.f32.mrf.mxu3 }
 0x78f   :  { %14513 = vst [vmem:[#allocation105_spill] sm:$0xff] %v11121_v42 }
 0x790   :  { %3158 = vmatmul.f32.gmra.mxu0 %v7211_v63  ;;  %v7401_v63 = vld [vmem:[%s14009_s4 + $0xe8] sm:$0xff] }
 0x792   :  { %3490 = vmatmul.f32.gmra.mxu3 %v7297_v19  ;;  %v7402_v19 = vld [vmem:[%s14009_s4 + $0xf0] sm:$0xff] }
 0x793   :  { %4161 = vmatpush.msrb.mxu3 %v7402_v19  ;;  %v2937_v19 = vpop.f32.mrf.mxu1  ;;  %v3002_v54 = vpop.f32.mrf.mxu2 }
 0x794   :  { %v3003_v42 = vadd.f32 %v3002_v54, %v2937_v19 }
 0x795   :  { %v11104_v51 = vpop.f32.mrf.mxu0  ;;  %4162 = vmatpush.msrb.mxu3 %v7401_v63  ;;  %v7309_v63 = vld [vmem:[%s14008_s3 + $0xdc8] sm:$0xff] }
 0x796   :  { %14512 = vst [vmem:[#allocation95_spill] sm:$0xff] %v11104_v51  ;;  %v7400_v51 = vld [vmem:[%s14009_s4 + $0xe0] sm:$0xff]  ;;  %v11131_v22 = vpop.f32.mrf.mxu3 }
 0x797   :  { %4163 = vmatpush.msrb.mxu3 %v7400_v51  ;;  %14515 = vst [vmem:[#allocation78_spill] sm:$0xff] %v11131_v22  ;;  %v7223_v51 = vld [vmem:[%s14008_s3 + $0xbb8] sm:$0xff] }
 0x798   :  { %3161 = vmatmul.f32.gmra.mxu0 %v7215_v25  ;;  %v7305_v25 = vld [vmem:[%s14008_s3 + $0xda8] sm:$0xff] }
 0x79a   :  { %3493 = vmatmul.f32.gmra.mxu3 %v7301_v49 }
 0x79b   :  { %v3005_v23 = vpop.f32.mrf.mxu2 }
 0x79d   :  { %v11123_v29 = vpop.f32.mrf.mxu0 }
 0x79e   :  { %14514 = vst [vmem:[#allocation116_spill] sm:$0xff] %v11123_v29  ;;  %v2940_v29 = vpop.f32.mrf.mxu1  ;;  %v11146_v40 = vpop.f32.mrf.mxu3 }
 0x79f   :  { %14518 = vst [vmem:[#allocation107_spill] sm:$0xff] %v11146_v40 }
 0x7a0   :  { %3164 = vmatmul.f32.gmra.mxu0 %v7219_v39 }
 0x7a2   :  { %3496 = vmatmul.f32.gmra.mxu3 %v7305_v25  ;;  %v7227_v25 = vld [vmem:[%s14008_s3 + $0xbd8] sm:$0xff] }
 0x7a3   :  { %v3008_v44 = vpop.f32.mrf.mxu2 }
 0x7a5   :  { %v11133_v49 = vpop.f32.mrf.mxu0 }
 0x7a6   :  { %14516 = vst [vmem:[#allocation62_spill] sm:$0xff] %v11133_v49  ;;  %v7313_v49 = vld [vmem:[%s14008_s3 + $0xde8] sm:$0xff]  ;;  %v2943_v6 = vpop.f32.mrf.mxu1  ;;  %v11159_v59 = vpop.f32.mrf.mxu3 }
 0x7a8   :  { %3167 = vmatmul.f32.gmra.mxu0 %v7223_v51 }
 0x7aa   :  { %3499 = vmatmul.f32.gmra.mxu3 %v7309_v63  ;;  %v7231_v63 = vld [vmem:[%s14008_s3 + $0xbf8] sm:$0xff] }
 0x7ad   :  { %v11141_v39 = vpop.f32.mrf.mxu0 }
 0x7ae   :  { %14517 = vst [vmem:[#allocation96_spill] sm:$0xff] %v11141_v39  ;;  %v3000_v39 = vadd.f32 %v2999_v4, %v2934_v34  ;;  %v2946_v40 = vpop.f32.mrf.mxu1  ;;  %v7254_v34 = vld [vmem:[%s14008_s3 + $0xc10] sm:$0xff]  ;;  %v3011_v4 = vpop.f32.mrf.mxu2 }
 0x7b0   :  { %3170 = vmatmul.f32.gmra.mxu0 %v7227_v25  ;;  %v3065_v25 = vadd.f32 %v11033_v47, %v3000_v39  ;;  %v3006_v47 = vadd.f32 %v3005_v23, %v2940_v29 }
 0x7b2   :  { %3502 = vmatmul.f32.gmra.mxu3 %v7313_v49  ;;  %v14520_v49 = vld [vmem:[#allocation46_spill] sm:$0xff] }
 0x7b5   :  { %v11151_v51 = vpop.f32.mrf.mxu0 }
 0x7b6   :  { %14519 = vst [vmem:[#allocation118_spill] sm:$0xff] %v11151_v51 }
 0x7b8   :  { %3173 = vmatmul.f32.gmra.mxu0 %v7231_v63 }
 0x7ba   :  { %3851 = vmatmul.f32.vlgmr.msra.gmra.mxu3 %v7336_v45 }
 0x7bb   :  { %4489 = vmatpush.msra.mxu3 %v14520_v49 }
 0x7bd   :  { %4490 = vmatpush.msra.mxu3 %v9020_v9  ;;  %v3129_v51 = vpop.f32.mrf.mxu0  ;;  %v3068_v9 = vadd.f32 %v11046_v10, %v3003_v42  ;;  %v14528_v42 = vld [vmem:[#allocation78_spill] sm:$0xff] }
 0x7be   :  { %v3130_v22 = vadd.f32 %v3129_v51, %v3065_v25  ;;  %v14529_v51 = vld [vmem:[#allocation107_spill] sm:$0xff]  ;;  %v3091_v25 = vpop.f32.mrf.mxu3 }
 0x7bf   :  { %4491 = vmatpush.msra.mxu3 %v9031_v17 }
 0x7c0   :  { %7236 = vmatmul.msk.f32.vlgmr.msra.gmra.mxu1 %vm1248_vm2, %v3130_v22  ;;  %3522 = vmatmul.f32.vlgmr.msra.gmra.mxu0 %v7254_v34 }
 0x7c1   :  { %3965 = vmatpush.msra.mxu1 %v8657_v37  ;;  %4294 = vmatpush.msra.mxu0 %v8304_v56  ;;  %v2949_v56 = vpop.f32.mrf.mxu1 }
 0x7c2   :  { %4492 = vmatpush.msra.mxu3 %v14477_v33  ;;  %v3014_v33 = vpop.f32.mrf.mxu2 }
 0x7c3   :  { %3966 = vmatpush.msra.mxu1 %v8664_v28  ;;  %4295 = vmatpush.msra.mxu0 %v8308_v58  ;;  %v3071_v58 = vadd.f32 %v11062_v50, %v3006_v47 }
 0x7c4   :  { %4493 = vmatpush.msra.mxu3 %v14478_v31 }
 0x7c5   :  { %3967 = vmatpush.msra.mxu1 %v8669_v61  ;;  %4296 = vmatpush.msra.mxu0 %v14423_v5  ;;  %v3132_v17 = vpop.f32.mrf.mxu0  ;;  %v3009_v5 = vadd.f32 %v3008_v44, %v2943_v6  ;;  %v14527_v44 = vld [vmem:[#allocation105_spill] sm:$0xff] }
 0x7c6   :  { %4494 = vmatpush.msra.mxu3 %v9063_v55  ;;  %v3133_v45 = vadd.f32 %v3132_v17, %v3068_v9 }
 0x7c7   :  { %3968 = vmatpush.msra.mxu1 %v8676_v52  ;;  %4297 = vmatpush.msra.mxu0 %v14424_v27 }
 0x7c8   :  { %4495 = vmatpush.msra.mxu3 %v9070_v24  ;;  %7237 = vmatmul.msk.f32.gmra.mxu1 %vm1248_vm2, %v3133_v45 }
 0x7c9   :  { %3969 = vmatpush.msra.mxu1 %v8684_v53  ;;  %4298 = vmatpush.msra.mxu0 %v8325_v2  ;;  %v2952_v2 = vpop.f32.mrf.mxu1 }
 0x7ca   :  { %4496 = vmatpush.msra.mxu3 %v9075_v18  ;;  %v3017_v18 = vpop.f32.mrf.mxu2 }
 0x7cb   :  { %3970 = vmatpush.msra.mxu1 %v8693_v57  ;;  %4299 = vmatpush.msra.mxu0 %v14425_v35  ;;  %v14524_v35 = vld [vmem:[#allocation13_spill] sm:$0xff]  ;;  %v3018_v29 = vadd.f32 %v3017_v18, %v2952_v2 }
 0x7cc   :  { %4497 = vmatpush.msra.mxu3 %v14479_v38  ;;  %v3015_v38 = vadd.f32 %v3014_v33, %v2949_v56  ;;  %v3094_v56 = vpop.f32.mrf.mxu3 }
 0x7cd   :  { %3971 = vmatpush.msra.mxu1 %v8699_v1  ;;  %4300 = vmatpush.msra.mxu0 %v14426_v3  ;;  %v3135_v55 = vpop.f32.mrf.mxu0 }
 0x7ce   :  { %4498 = vmatpush.msra.mxu3 %v9094_v7  ;;  %v3136_v24 = vadd.f32 %v3135_v55, %v3071_v58  ;;  %v3074_v7 = vadd.f32 %v11080_v26, %v3009_v5  ;;  %v3080_v6 = vadd.f32 %v14527_v44, %v3015_v38 }
 0x7cf   :  { %3972 = vmatpush.msra.mxu1 %v8707_v13  ;;  %4301 = vmatpush.msra.mxu0 %v14427_v36 }
 0x7d0   :  { %4499 = vmatpush.msra.mxu3 %v14385_v15  ;;  %7238 = vmatmul.msk.f32.gmra.mxu1 %vm1248_vm2, %v3136_v24 }
 0x7d1   :  { %3973 = vmatpush.msra.mxu1 %v8716_v30  ;;  %4302 = vmatpush.msra.mxu0 %v8348_v12  ;;  %v3012_v12 = vadd.f32 %v3011_v4, %v2946_v40 }
 0x7d2   :  { %4500 = vmatpush.msra.mxu3 %v14387_v62  ;;  %v14522_v62 = vld [vmem:[#allocation60_spill] sm:$0xff]  ;;  %v3020_v3 = vpop.f32.mrf.mxu2 }
 0x7d3   :  { %3974 = vmatpush.msra.mxu1 %v8722_v32  ;;  %4303 = vmatpush.msra.mxu0 %v8354_v14  ;;  %v14521_v14 = vld [vmem:[#allocation12_spill] sm:$0xff] }
 0x7d4   :  { %4501 = vmatpush.msra.mxu3 %v14388_v0  ;;  %v2955_v0 = vpop.f32.mrf.mxu1 }
 0x7d5   :  { %3975 = vmatpush.msra.mxu1 %v8731_v20  ;;  %4304 = vmatpush.msra.mxu0 %v14270_v21  ;;  %v3138_v15 = vpop.f32.mrf.mxu0  ;;  %v3077_v21 = vadd.f32 %v11096_v60, %v3012_v12  ;;  %v3083_v60 = vadd.f32 %v14528_v42, %v3018_v29  ;;  %v3021_v26 = vadd.f32 %v3020_v3, %v2955_v0 }
 0x7d6   :  { %4502 = vmatpush.msra.mxu3 %v14390_v46  ;;  %v3139_v27 = vadd.f32 %v3138_v15, %v3074_v7  ;;  %v14523_v46 = vld [vmem:[#allocation34_spill] sm:$0xff]  ;;  %v3097_v15 = vpop.f32.mrf.mxu3 }
 0x7d7   :  { %3976 = vmatpush.msra.mxu1 %v14482_v8  ;;  %4305 = vmatpush.msra.mxu0 %v14273_v43  ;;  %v14525_v43 = vld [vmem:[#allocation14_spill] sm:$0xff]  ;;  %v3086_v63 = vadd.f32 %v14529_v51, %v3021_v26 }
 0x7d8   :  { %4503 = vmatpush.msra.mxu3 %v14480_v48  ;;  %7239 = vmatmul.msk.f32.gmra.mxu1 %vm1248_vm2, %v3139_v27  ;;  %v14526_v48 = vld [vmem:[#allocation15_spill] sm:$0xff] }
 0x7d9   :  { %3977 = vmatpush.msra.mxu1 %v14274_v16  ;;  %4306 = vmatpush.msra.mxu0 %v14521_v14 }
 0x7da   :  { %4504 = vmatpush.msra.mxu3 %v14522_v62  ;;  %v3023_v22 = vpop.f32.mrf.mxu2 }
 0x7db   :  { %3978 = vmatpush.msra.mxu1 %v14523_v46  ;;  %4307 = vmatpush.msra.mxu0 %v14524_v35 }
 0x7dc   :  { %v2958_v40 = vpop.f32.mrf.mxu1 }
 0x7dd   :  { %3979 = vmatpush.msra.mxu1 %v14485_v41  ;;  %4308 = vmatpush.msra.mxu0 %v14525_v43  ;;  %v3141_v36 = vpop.f32.mrf.mxu0  ;;  %v3024_v4 = vadd.f32 %v3023_v22, %v2958_v40  ;;  %v7256_v22 = vld [vmem:[%s14008_s3 + $0xc20] sm:$0xff] }
 0x7de   :  { %v3142_v31 = vadd.f32 %v3141_v36, %v3077_v21  ;;  %v3100_v0 = vpop.f32.mrf.mxu3  ;;  %3395 = vmatmul.f32.gmra.mxu2 %v7256_v22  ;;  %v7267_v22 = vld [vmem:[%s14008_s3 + $0xc78] sm:$0xff] }
 0x7df   :  { %3980 = vmatpush.msra.mxu1 %v14486_v11  ;;  %4309 = vmatpush.msra.mxu0 %v14526_v48  ;;  %v3089_v45 = vadd.f32 %v11159_v59, %v3024_v4 }
 0x7e0   :  { %7240 = vmatmul.msk.f32.gmra.mxu1 %vm1248_vm2, %v3142_v31 }
 0x7e2   :  { %v3026_v39 = vpop.f32.mrf.mxu2 }
 0x7e4   :  { %v2961_v19 = vpop.f32.mrf.mxu1 }
 0x7e5   :  { %v3144_v23 = vpop.f32.mrf.mxu0  ;;  %v3027_v58 = vadd.f32 %v3026_v39, %v2961_v19  ;;  %v7260_v19 = vld [vmem:[%s14008_s3 + $0xc40] sm:$0xff]  ;;  %v7258_v39 = vld [vmem:[%s14008_s3 + $0xc30] sm:$0xff] }
 0x7e6   :  { %v3145_v54 = vadd.f32 %v3144_v23, %v3080_v6  ;;  %v3103_v44 = vpop.f32.mrf.mxu3  ;;  %3398 = vmatmul.f32.gmra.mxu2 %v7260_v19  ;;  %3525 = vmatmul.f32.gmra.mxu0 %v7258_v39  ;;  %v7271_v19 = vld [vmem:[%s14008_s3 + $0xc98] sm:$0xff]  ;;  %v7288_v39 = vld [vmem:[%s14008_s3 + $0xd20] sm:$0xff] }
 0x7e7   :  { %v3092_v55 = vadd.f32 %v3091_v25, %v3027_v58  ;;  %v7268_v58 = vld [vmem:[%s14008_s3 + $0xc80] sm:$0xff] }
 0x7e8   :  { %7241 = vmatmul.msk.f32.gmra.mxu1 %vm1248_vm2, %v3145_v54 }
 0x7ea   :  { %v3029_v17 = vpop.f32.mrf.mxu2 }
 0x7ec   :  { %v2964_v9 = vpop.f32.mrf.mxu1 }
 0x7ed   :  { %v3147_v10 = vpop.f32.mrf.mxu0  ;;  %v3030_v7 = vadd.f32 %v3029_v17, %v2964_v9  ;;  %v7264_v9 = vld [vmem:[%s14008_s3 + $0xc60] sm:$0xff]  ;;  %v7262_v17 = vld [vmem:[%s14008_s3 + $0xc50] sm:$0xff] }
 0x7ee   :  { %v3148_v50 = vadd.f32 %v3147_v10, %v3083_v60  ;;  %v3106_v10 = vpop.f32.mrf.mxu3  ;;  %3401 = vmatmul.f32.gmra.mxu2 %v7264_v9  ;;  %3528 = vmatmul.f32.gmra.mxu0 %v7262_v17  ;;  %v7279_v17 = vld [vmem:[%s14008_s3 + $0xcd8] sm:$0xff] }
 0x7ef   :  { %v3095_v27 = vadd.f32 %v3094_v56, %v3030_v7  ;;  %v14530_v7 = vld [vmem:[#allocation16_spill] sm:$0xff] }
 0x7f0   :  { %7242 = vmatmul.msk.f32.gmra.mxu1 %vm1248_vm2, %v3148_v50 }
 0x7f2   :  { %v3032_v5 = vpop.f32.mrf.mxu2 }
 0x7f4   :  { %v2967_v24 = vpop.f32.mrf.mxu1 }
 0x7f5   :  { %v3150_v49 = vpop.f32.mrf.mxu0  ;;  %v3033_v21 = vadd.f32 %v3032_v5, %v2967_v24  ;;  %v7255_v5 = vld [vmem:[%s14008_s3 + $0xc18] sm:$0xff] }
 0x7f6   :  { %v3151_v34 = vadd.f32 %v3150_v49, %v3086_v63  ;;  %3404 = vmatmul.f32.gmra.mxu2 %v7268_v58  ;;  %v7300_v58 = vld [vmem:[%s14008_s3 + $0xd80] sm:$0xff] }
 0x7f7   :  { %v3098_v35 = vadd.f32 %v3097_v15, %v3033_v21  ;;  %v14531_v15 = vld [vmem:[#allocation17_spill] sm:$0xff]  ;;  %v14533_v21 = vld [vmem:[#allocation19_spill] sm:$0xff] }
 0x7f8   :  { %7243 = vmatmul.msk.f32.gmra.mxu1 %vm1248_vm2, %v3151_v34 }
 0x7fa   :  { %v3035_v62 = vpop.f32.mrf.mxu2 }
 0x7fc   :  { %v2970_v12 = vpop.f32.mrf.mxu1 }
 0x7fd   :  { %v3153_v47 = vpop.f32.mrf.mxu0  ;;  %v3036_v36 = vadd.f32 %v3035_v62, %v2970_v12  ;;  %v7276_v62 = vld [vmem:[%s14008_s3 + $0xcc0] sm:$0xff] }
 0x7fe   :  { %v3154_v33 = vadd.f32 %v3153_v47, %v3089_v45  ;;  %v3109_v45 = vpop.f32.mrf.mxu3 }
 0x7ff   :  { %v3101_v48 = vadd.f32 %v3100_v0, %v3036_v36  ;;  %v14534_v0 = vld [vmem:[#allocation20_spill] sm:$0xff] }
 0x800   :  { %7244 = vmatmul.msk.f32.gmra.mxu1 %vm1248_vm2, %v3154_v33  ;;  %v7263_v36 = vld [vmem:[%s14008_s3 + $0xc58] sm:$0xff] }
 0x802   :  { %v3038_v38 = vpop.f32.mrf.mxu2 }
 0x804   :  { %v2973_v31 = vpop.f32.mrf.mxu1 }
 0x805   :  { %v3156_v2 = vpop.f32.mrf.mxu0  ;;  %v3039_v23 = vadd.f32 %v3038_v38, %v2973_v31  ;;  %v7280_v31 = vld [vmem:[%s14008_s3 + $0xce0] sm:$0xff]  ;;  %v7278_v38 = vld [vmem:[%s14008_s3 + $0xcd0] sm:$0xff] }
 0x806   :  { %v3157_v18 = vadd.f32 %v3156_v2, %v3092_v55  ;;  %v7266_v55 = vld [vmem:[%s14008_s3 + $0xc70] sm:$0xff]  ;;  %v7272_v2 = vld [vmem:[%s14008_s3 + $0xca0] sm:$0xff] }
 0x807   :  { %v3104_v42 = vadd.f32 %v3103_v44, %v3039_v23  ;;  %3531 = vmatmul.f32.gmra.mxu0 %v7266_v55  ;;  %3407 = vmatmul.f32.gmra.mxu2 %v7272_v2  ;;  %v14538_v44 = vld [vmem:[#allocation24_spill] sm:$0xff]  ;;  %v7298_v55 = vld [vmem:[%s14008_s3 + $0xd70] sm:$0xff] }
 0x808   :  { %7245 = vmatmul.msk.f32.gmra.mxu1 %vm1248_vm2, %v3157_v18  ;;  %v7270_v18 = vld [vmem:[%s14008_s3 + $0xc90] sm:$0xff]  ;;  %v7287_v2 = vld [vmem:[%s14008_s3 + $0xd18] sm:$0xff] }
 0x80a   :  { %v3041_v29 = vpop.f32.mrf.mxu2 }
 0x80c   :  { %v2976_v54 = vpop.f32.mrf.mxu1 }
 0x80d   :  { %v3159_v14 = vpop.f32.mrf.mxu0  ;;  %v3042_v26 = vadd.f32 %v3041_v29, %v2976_v54  ;;  %v7284_v54 = vld [vmem:[%s14008_s3 + $0xd00] sm:$0xff]  ;;  %v7282_v29 = vld [vmem:[%s14008_s3 + $0xcf0] sm:$0xff] }
 0x80e   :  { %v3160_v59 = vadd.f32 %v3159_v14, %v3095_v27  ;;  %v14532_v27 = vld [vmem:[#allocation18_spill] sm:$0xff]  ;;  %v7259_v14 = vld [vmem:[%s14008_s3 + $0xc38] sm:$0xff] }
 0x80f   :  { %v3107_v51 = vadd.f32 %v3106_v10, %v3042_v26  ;;  %3534 = vmatmul.f32.gmra.mxu0 %v7270_v18  ;;  %3410 = vmatmul.f32.gmra.mxu2 %v7276_v62  ;;  %v14543_v10 = vld [vmem:[#allocation29_spill] sm:$0xff]  ;;  %v7306_v62 = vld [vmem:[%s14008_s3 + $0xdb0] sm:$0xff] }
 0x810   :  { %7246 = vmatmul.msk.f32.gmra.mxu1 %vm1248_vm2, %v3160_v59  ;;  %v7274_v59 = vld [vmem:[%s14008_s3 + $0xcb0] sm:$0xff]  ;;  %v7304_v18 = vld [vmem:[%s14008_s3 + $0xda0] sm:$0xff] }
 0x812   :  { %v3044_v25 = vpop.f32.mrf.mxu2 }
 0x814   :  { %v2979_v63 = vpop.f32.mrf.mxu1 }
 0x815   :  { %v3162_v3 = vpop.f32.mrf.mxu0  ;;  %v3045_v4 = vadd.f32 %v3044_v25, %v2979_v63  ;;  %v14545_v63 = vld [vmem:[#allocation31_spill] sm:$0xff] }
 0x816   :  { %v3163_v43 = vadd.f32 %v3162_v3, %v3098_v35  ;;  %v14535_v35 = vld [vmem:[#allocation21_spill] sm:$0xff]  ;;  %v14536_v3 = vld [vmem:[#allocation22_spill] sm:$0xff] }
 0x817   :  { %v3110_v47 = vadd.f32 %v3109_v45, %v3045_v4  ;;  %3537 = vmatmul.f32.gmra.mxu0 %v7274_v59  ;;  %3413 = vmatmul.f32.gmra.mxu2 %v7280_v31  ;;  %v7290_v4 = vld [vmem:[%s14008_s3 + $0xd30] sm:$0xff]  ;;  %v7296_v45 = vld [vmem:[%s14008_s3 + $0xd60] sm:$0xff] }
 0x818   :  { %7247 = vmatmul.msk.f32.gmra.mxu1 %vm1248_vm2, %v3163_v43  ;;  %v7314_v31 = vld [vmem:[%s14008_s3 + $0xdf0] sm:$0xff] }
 0x81d   :  { %v3165_v6 = vpop.f32.mrf.mxu0 }
 0x81e   :  { %v3166_v40 = vadd.f32 %v3165_v6, %v3101_v48  ;;  %v14537_v48 = vld [vmem:[#allocation23_spill] sm:$0xff]  ;;  %v14539_v6 = vld [vmem:[#allocation25_spill] sm:$0xff] }
 0x81f   :  { %3540 = vmatmul.f32.gmra.mxu0 %v7278_v38  ;;  %3416 = vmatmul.f32.gmra.mxu2 %v7284_v54  ;;  %v3393_v38 = vpop.f32.mrf.mxu2 }
 0x820   :  { %7248 = vmatmul.msk.f32.gmra.mxu1 %vm1248_vm2, %v3166_v40  ;;  %v14540_v40 = vld [vmem:[#allocation26_spill] sm:$0xff] }
 0x825   :  { %v3168_v60 = vpop.f32.mrf.mxu0 }
 0x826   :  { %v3169_v50 = vadd.f32 %v3168_v60, %v3104_v42  ;;  %v14541_v42 = vld [vmem:[#allocation27_spill] sm:$0xff]  ;;  %v14542_v60 = vld [vmem:[#allocation28_spill] sm:$0xff] }
 0x827   :  { %3543 = vmatmul.f32.gmra.mxu0 %v7282_v29  ;;  %3419 = vmatmul.f32.gmra.mxu2 %v7288_v39  ;;  %v7311_v39 = vld [vmem:[%s14008_s3 + $0xdd8] sm:$0xff] }
 0x828   :  { %7249 = vmatmul.msk.f32.gmra.mxu1 %vm1248_vm2, %v3169_v50  ;;  %v14544_v50 = vld [vmem:[#allocation30_spill] sm:$0xff] }
 0x82d   :  { %v3171_v49 = vpop.f32.mrf.mxu0 }
 0x82e   :  { %v3172_v34 = vadd.f32 %v3171_v49, %v3107_v51  ;;  %v7286_v51 = vld [vmem:[%s14008_s3 + $0xd10] sm:$0xff]  ;;  %v7275_v49 = vld [vmem:[%s14008_s3 + $0xcb8] sm:$0xff] }
 0x82f   :  { %3546 = vmatmul.f32.gmra.mxu0 %v7286_v51 }
 0x830   :  { %7250 = vmatmul.msk.f32.gmra.mxu1 %vm1248_vm2, %v3172_v34  ;;  %v7292_v34 = vld [vmem:[%s14008_s3 + $0xd40] sm:$0xff] }
 0x831   :  { %3422 = vmatmul.f32.gmra.mxu2 %v7292_v34 }
 0x835   :  { %v3174_v56 = vpop.f32.mrf.mxu0 }
 0x836   :  { %v3175_v33 = vadd.f32 %v3174_v56, %v3110_v47  ;;  %v7294_v47 = vld [vmem:[%s14008_s3 + $0xd50] sm:$0xff] }
 0x837   :  { %3549 = vmatmul.f32.gmra.mxu0 %v7290_v4  ;;  %v7315_v4 = vld [vmem:[%s14008_s3 + $0xdf8] sm:$0xff] }
 0x838   :  { %7251 = vmatmul.msk.f32.gmra.mxu1 %vm1248_vm2, %v3175_v33  ;;  %v7283_v33 = vld [vmem:[%s14008_s3 + $0xcf8] sm:$0xff] }
 0x839   :  { %3425 = vmatmul.f32.gmra.mxu2 %v7296_v45 }
 0x83d   :  { %v11258_v24 = vpop.f32.mrf.mxu1 }
 0x83f   :  { %3552 = vmatmul.f32.gmra.mxu0 %v7294_v47 }
 0x840   :  { %3587 = vmatmul.f32.vlgmr.msrb.gmra.mxu1 %v7255_v5 }
 0x841   :  { %4359 = vmatpush.msrb.mxu1 %v14530_v7  ;;  %3428 = vmatmul.f32.gmra.mxu2 %v7300_v58  ;;  %v7302_v7 = vld [vmem:[%s14008_s3 + $0xd90] sm:$0xff] }
 0x843   :  { %4360 = vmatpush.msrb.mxu1 %v14531_v15 }
 0x845   :  { %4361 = vmatpush.msrb.mxu1 %v14532_v27  ;;  %v11272_v12 = vpop.f32.mrf.mxu1  ;;  %v7291_v27 = vld [vmem:[%s14008_s3 + $0xd38] sm:$0xff] }
 0x847   :  { %4362 = vmatpush.msrb.mxu1 %v14533_v21  ;;  %3555 = vmatmul.f32.gmra.mxu0 %v7298_v55  ;;  %v7295_v21 = vld [vmem:[%s14008_s3 + $0xd58] sm:$0xff] }
 0x848   :  { %3590 = vmatmul.f32.gmra.mxu1 %v7259_v14  ;;  %v7308_v14 = vld [vmem:[%s14008_s3 + $0xdc0] sm:$0xff] }
 0x849   :  { %4363 = vmatpush.msrb.mxu1 %v14534_v0  ;;  %3431 = vmatmul.f32.gmra.mxu2 %v7304_v18  ;;  %v7312_v0 = vld [vmem:[%s14008_s3 + $0xde0] sm:$0xff] }
 0x84b   :  { %4364 = vmatpush.msrb.mxu1 %v14535_v35  ;;  %v7310_v35 = vld [vmem:[%s14008_s3 + $0xdd0] sm:$0xff] }
 0x84d   :  { %4365 = vmatpush.msrb.mxu1 %v14536_v3  ;;  %v11287_v43 = vpop.f32.mrf.mxu1 }
 0x84f   :  { %4366 = vmatpush.msrb.mxu1 %v14537_v48  ;;  %3558 = vmatmul.f32.gmra.mxu0 %v7302_v7  ;;  %v3458_v48 = vpop.f32.mrf.mxu3 }
 0x850   :  { %3593 = vmatmul.f32.gmra.mxu1 %v7263_v36  ;;  %v7299_v36 = vld [vmem:[%s14008_s3 + $0xd78] sm:$0xff] }
 0x851   :  { %4367 = vmatpush.msrb.mxu1 %v14538_v44  ;;  %3434 = vmatmul.f32.gmra.mxu2 %v7308_v14  ;;  %v3523_v44 = vpop.f32.mrf.mxu0 }
 0x853   :  { %4368 = vmatpush.msrb.mxu1 %v14539_v6 }
 0x855   :  { %4369 = vmatpush.msrb.mxu1 %v14540_v40  ;;  %v11302_v23 = vpop.f32.mrf.mxu1  ;;  %v7303_v40 = vld [vmem:[%s14008_s3 + $0xd98] sm:$0xff] }
 0x857   :  { %4370 = vmatpush.msrb.mxu1 %v14541_v42  ;;  %3561 = vmatmul.f32.gmra.mxu0 %v7306_v62 }
 0x858   :  { %3596 = vmatmul.f32.gmra.mxu1 %v7267_v22  ;;  %v3461_v22 = vpop.f32.mrf.mxu3 }
 0x859   :  { %4371 = vmatpush.msrb.mxu1 %v14542_v60  ;;  %3437 = vmatmul.f32.gmra.mxu2 %v7312_v0  ;;  %v7307_v60 = vld [vmem:[%s14008_s3 + $0xdb8] sm:$0xff] }
 0x85b   :  { %4372 = vmatpush.msrb.mxu1 %v14543_v10 }
 0x85d   :  { %4373 = vmatpush.msrb.mxu1 %v14544_v50  ;;  %v11317_v26 = vpop.f32.mrf.mxu1 }
 0x85f   :  { %4374 = vmatpush.msrb.mxu1 %v14545_v63  ;;  %3564 = vmatmul.f32.gmra.mxu0 %v7310_v35 }
 0x860   :  { %3599 = vmatmul.f32.gmra.mxu1 %v7271_v19  ;;  %v3464_v10 = vpop.f32.mrf.mxu3 }
 0x861   :  { %v3396_v54 = vpop.f32.mrf.mxu2 }
 0x862   :  { %v3462_v18 = vadd.f32 %v3461_v22, %v3396_v54 }
 0x863   :  { %v3526_v29 = vpop.f32.mrf.mxu0 }
 0x865   :  { %v11329_v25 = vpop.f32.mrf.mxu1 }
 0x867   :  { %3567 = vmatmul.f32.gmra.mxu0 %v7314_v31 }
 0x868   :  { %3602 = vmatmul.f32.gmra.mxu1 %v7275_v49  ;;  %v3467_v63 = vpop.f32.mrf.mxu3 }
 0x869   :  { %v3399_v50 = vpop.f32.mrf.mxu2 }
 0x86b   :  { %v3529_v51 = vpop.f32.mrf.mxu0 }
 0x86d   :  { %v11340_v9 = vpop.f32.mrf.mxu1 }
 0x870   :  { %3605 = vmatmul.f32.gmra.mxu1 %v7279_v17  ;;  %v3459_v17 = vadd.f32 %v3458_v48, %v3393_v38 }
 0x871   :  { %v3402_v49 = vpop.f32.mrf.mxu2 }
 0x872   :  { %v3524_v47 = vadd.f32 %v3523_v44, %v3459_v17 }
 0x875   :  { %v11351_v56 = vpop.f32.mrf.mxu1 }
 0x878   :  { %3608 = vmatmul.f32.gmra.mxu1 %v7283_v33  ;;  %v3470_v33 = vpop.f32.mrf.mxu3 }
 0x879   :  { %v3405_v55 = vpop.f32.mrf.mxu2 }
 0x87d   :  { %v11362_v5 = vpop.f32.mrf.mxu1 }
 0x880   :  { %3611 = vmatmul.f32.gmra.mxu1 %v7287_v2  ;;  %v3473_v0 = vpop.f32.mrf.mxu3 }
 0x884   :  { %v3532_v45 = vpop.f32.mrf.mxu0 }
 0x885   :  { %v11373_v15 = vpop.f32.mrf.mxu1 }
 0x888   :  { %3614 = vmatmul.f32.gmra.mxu1 %v7291_v27  ;;  %v3527_v27 = vadd.f32 %v3526_v29, %v3462_v18  ;;  %v3476_v38 = vpop.f32.mrf.mxu3 }
 0x88a   :  { %v3408_v35 = vpop.f32.mrf.mxu2 }
 0x88c   :  { %v3535_v7 = vpop.f32.mrf.mxu0 }
 0x88d   :  { %v11384_v59 = vpop.f32.mrf.mxu1 }
 0x890   :  { %3617 = vmatmul.f32.gmra.mxu1 %v7295_v21  ;;  %v3465_v21 = vadd.f32 %v3464_v10, %v3399_v50 }
 0x895   :  { %v11395_v3 = vpop.f32.mrf.mxu1 }
 0x898   :  { %3620 = vmatmul.f32.gmra.mxu1 %v7299_v36  ;;  %v3530_v36 = vadd.f32 %v3529_v51, %v3465_v21 }
 0x89d   :  { %v11403_v6 = vpop.f32.mrf.mxu1 }
 0x8a0   :  { %3623 = vmatmul.f32.gmra.mxu1 %v7303_v40  ;;  %v3479_v40 = vpop.f32.mrf.mxu3 }
 0x8a5   :  { %v11408_v42 = vpop.f32.mrf.mxu1 }
 0x8a8   :  { %3626 = vmatmul.f32.gmra.mxu1 %v7307_v60  ;;  %v3482_v29 = vpop.f32.mrf.mxu3 }
 0x8ad   :  { %v11413_v19 = vpop.f32.mrf.mxu1 }
 0x8b0   :  { %3629 = vmatmul.f32.gmra.mxu1 %v7311_v39 }
 0x8b5   :  { %v11418_v34 = vpop.f32.mrf.mxu1 }
 0x8b8   :  { %3632 = vmatmul.f32.gmra.mxu1 %v7315_v4 }
 0x8bd   :  { %v3588_v58 = vpop.f32.mrf.mxu1 }
 0x8be   :  { %v3589_v2 = vadd.f32 %v3588_v58, %v3524_v47 }
 0x8c0   :  { %7320 = vmatmul.msk.f32.vlgmr.msra.gmra.mxu2 %vm1248_vm2, %v3589_v2 }
 0x8c1   :  { %4424 = vmatpush.msra.mxu2 %v8657_v37  ;;  %v3538_v37 = vpop.f32.mrf.mxu0 }
 0x8c3   :  { %4425 = vmatpush.msra.mxu2 %v8664_v28 }
 0x8c5   :  { %4426 = vmatpush.msra.mxu2 %v8669_v61  ;;  %v3591_v14 = vpop.f32.mrf.mxu1  ;;  %v3468_v61 = vadd.f32 %v3467_v63, %v3402_v49  ;;  %v3485_v49 = vpop.f32.mrf.mxu3 }
 0x8c6   :  { %v3592_v62 = vadd.f32 %v3591_v14, %v3527_v27 }
 0x8c7   :  { %4427 = vmatpush.msra.mxu2 %v8676_v52  ;;  %v3411_v52 = vpop.f32.mrf.mxu2  ;;  %v3533_v48 = vadd.f32 %v3532_v45, %v3468_v61 }
 0x8c8   :  { %7321 = vmatmul.msk.f32.gmra.mxu2 %vm1248_vm2, %v3592_v62  ;;  %v3477_v50 = vadd.f32 %v3476_v38, %v3411_v52 }
 0x8c9   :  { %4428 = vmatpush.msra.mxu2 %v8684_v53 }
 0x8cb   :  { %4429 = vmatpush.msra.mxu2 %v8693_v57  ;;  %v3541_v57 = vpop.f32.mrf.mxu0 }
 0x8cc   :  { %v3542_v39 = vadd.f32 %v3541_v57, %v3477_v50 }
 0x8cd   :  { %4430 = vmatpush.msra.mxu2 %v8699_v1  ;;  %v3594_v28 = vpop.f32.mrf.mxu1  ;;  %v3471_v1 = vadd.f32 %v3470_v33, %v3405_v55  ;;  %v3488_v58 = vpop.f32.mrf.mxu3 }
 0x8ce   :  { %v3595_v31 = vadd.f32 %v3594_v28, %v3530_v36 }
 0x8cf   :  { %4431 = vmatpush.msra.mxu2 %v8707_v13  ;;  %v3536_v13 = vadd.f32 %v3535_v7, %v3471_v1 }
 0x8d0   :  { %7322 = vmatmul.msk.f32.gmra.mxu2 %vm1248_vm2, %v3595_v31 }
 0x8d1   :  { %4432 = vmatpush.msra.mxu2 %v8716_v30  ;;  %v3414_v30 = vpop.f32.mrf.mxu2 }
 0x8d2   :  { %v3480_v63 = vadd.f32 %v3479_v40, %v3414_v30 }
 0x8d3   :  { %4433 = vmatpush.msra.mxu2 %v8722_v32  ;;  %v3544_v54 = vpop.f32.mrf.mxu0 }
 0x8d5   :  { %4434 = vmatpush.msra.mxu2 %v8731_v20  ;;  %v3597_v53 = vpop.f32.mrf.mxu1  ;;  %v3474_v20 = vadd.f32 %v3473_v0, %v3408_v35  ;;  %v3491_v21 = vpop.f32.mrf.mxu3 }
 0x8d6   :  { %v3598_v44 = vadd.f32 %v3597_v53, %v3533_v48 }
 0x8d7   :  { %4435 = vmatpush.msra.mxu2 %v14482_v8  ;;  %v3539_v8 = vadd.f32 %v3538_v37, %v3474_v20 }
 0x8d8   :  { %7323 = vmatmul.msk.f32.gmra.mxu2 %vm1248_vm2, %v3598_v44 }
 0x8d9   :  { %4436 = vmatpush.msra.mxu2 %v14274_v16  ;;  %v3417_v10 = vpop.f32.mrf.mxu2 }
 0x8da   :  { %v3483_v33 = vadd.f32 %v3482_v29, %v3417_v10 }
 0x8db   :  { %4437 = vmatpush.msra.mxu2 %v14523_v46  ;;  %v3547_v46 = vpop.f32.mrf.mxu0 }
 0x8dc   :  { %v3548_v2 = vadd.f32 %v3547_v46, %v3483_v33  ;;  %v7340_v46 = vld [vmem:[%s14008_s3 + $0xe20] sm:$0xff]  ;;  %v7342_v33 = vld [vmem:[%s14008_s3 + $0xe30] sm:$0xff] }
 0x8dd   :  { %4438 = vmatpush.msra.mxu2 %v14485_v41  ;;  %v3600_v32 = vpop.f32.mrf.mxu1  ;;  %v3494_v61 = vpop.f32.mrf.mxu3  ;;  %3854 = vmatmul.f32.gmra.mxu3 %v7340_v46 }
 0x8de   :  { %v3601_v22 = vadd.f32 %v3600_v32, %v3536_v13 }
 0x8df   :  { %4439 = vmatpush.msra.mxu2 %v14486_v11  ;;  %v3545_v11 = vadd.f32 %v3544_v54, %v3480_v63 }
 0x8e0   :  { %7324 = vmatmul.msk.f32.gmra.mxu2 %vm1248_vm2, %v3601_v22 }
 0x8e1   :  { %v3420_v4 = vpop.f32.mrf.mxu2 }
 0x8e2   :  { %v3486_v14 = vadd.f32 %v3485_v49, %v3420_v4  ;;  %v7341_v4 = vld [vmem:[%s14008_s3 + $0xe28] sm:$0xff] }
 0x8e3   :  { %v3550_v17 = vpop.f32.mrf.mxu0 }
 0x8e4   :  { %v3551_v62 = vadd.f32 %v3550_v17, %v3486_v14  ;;  %v7348_v14 = vld [vmem:[%s14008_s3 + $0xe60] sm:$0xff] }
 0x8e5   :  { %v3603_v60 = vpop.f32.mrf.mxu1  ;;  %v3497_v32 = vpop.f32.mrf.mxu3 }
 0x8e6   :  { %v3604_v16 = vadd.f32 %v3603_v60, %v3539_v8  ;;  %v7337_v60 = vld [vmem:[%s14008_s3 + $0xe08] sm:$0xff] }
 0x8e7   :  { %3916 = vmatmul.f32.vlgmr.msrb.gmra.mxu0 %v7337_v60  ;;  %v7347_v60 = vld [vmem:[%s14008_s3 + $0xe58] sm:$0xff] }
 0x8e8   :  { %7325 = vmatmul.msk.f32.gmra.mxu2 %vm1248_vm2, %v3604_v16 }
 0x8e9   :  { %v3423_v55 = vpop.f32.mrf.mxu2 }
 0x8ea   :  { %v3489_v37 = vadd.f32 %v3488_v58, %v3423_v55 }
 0x8eb   :  { %v3553_v7 = vpop.f32.mrf.mxu0 }
 0x8ec   :  { %v3554_v31 = vadd.f32 %v3553_v7, %v3489_v37  ;;  %v7345_v7 = vld [vmem:[%s14008_s3 + $0xe48] sm:$0xff]  ;;  %v7350_v37 = vld [vmem:[%s14008_s3 + $0xe70] sm:$0xff] }
 0x8ed   :  { %v3606_v51 = vpop.f32.mrf.mxu1  ;;  %v3500_v16 = vpop.f32.mrf.mxu3 }
 0x8ee   :  { %v3607_v41 = vadd.f32 %v3606_v51, %v3542_v39  ;;  %v7338_v39 = vld [vmem:[%s14008_s3 + $0xe10] sm:$0xff] }
 0x8ef   :  { %3981 = vmatmul.f32.vlgmr.msra.gmra.mxu1 %v7338_v39  ;;  %3919 = vmatmul.f32.gmra.mxu0 %v7341_v4  ;;  %v14552_v4 = vld [vmem:[#allocation121_spill] sm:$0xff] }
 0x8f0   :  { %7326 = vmatmul.msk.f32.gmra.mxu2 %vm1248_vm2, %v3607_v41 }
 0x8f1   :  { %v3426_v0 = vpop.f32.mrf.mxu2 }
 0x8f2   :  { %v3492_v53 = vadd.f32 %v3491_v21, %v3426_v0 }
 0x8f3   :  { %v3556_v28 = vpop.f32.mrf.mxu0 }
 0x8f4   :  { %v3557_v44 = vadd.f32 %v3556_v28, %v3492_v53  ;;  %v7339_v28 = vld [vmem:[%s14008_s3 + $0xe18] sm:$0xff] }
 0x8f5   :  { %v3609_v45 = vpop.f32.mrf.mxu1 }
 0x8f6   :  { %v3610_v47 = vadd.f32 %v3609_v45, %v3545_v11  ;;  %v3503_v45 = vpop.f32.mrf.mxu3 }
 0x8f7   :  { %3984 = vmatmul.f32.gmra.mxu1 %v7342_v33  ;;  %3922 = vmatmul.f32.gmra.mxu0 %v7345_v7  ;;  %v14555_v7 = vld [vmem:[#allocation72_spill] sm:$0xff] }
 0x8f8   :  { %7327 = vmatmul.msk.f32.gmra.mxu2 %vm1248_vm2, %v3610_v47  ;;  %v7344_v47 = vld [vmem:[%s14008_s3 + $0xe40] sm:$0xff] }
 0x8f9   :  { %v3429_v52 = vpop.f32.mrf.mxu2  ;;  %3857 = vmatmul.f32.gmra.mxu3 %v7344_v47 }
 0x8fa   :  { %v3495_v40 = vadd.f32 %v3494_v61, %v3429_v52  ;;  %v14547_v61 = vld [vmem:[#allocation50_spill] sm:$0xff] }
 0x8fb   :  { %v3559_v57 = vpop.f32.mrf.mxu0  ;;  %v7353_v52 = vld [vmem:[%s14008_s3 + $0xe88] sm:$0xff] }
 0x8fc   :  { %v3560_v22 = vadd.f32 %v3559_v57, %v3495_v40  ;;  %v14548_v40 = vld [vmem:[#allocation90_spill] sm:$0xff] }
 0x8fd   :  { %v3612_v18 = vpop.f32.mrf.mxu1 }
 0x8fe   :  { %v3613_v27 = vadd.f32 %v3612_v18, %v3548_v2 }
 0x900   :  { %7328 = vmatmul.msk.f32.gmra.mxu2 %vm1248_vm2, %v3613_v27 }
 0x901   :  { %v3432_v30 = vpop.f32.mrf.mxu2  ;;  %3860 = vmatmul.f32.gmra.mxu3 %v7348_v14 }
 0x902   :  { %v3498_v29 = vadd.f32 %v3497_v32, %v3432_v30  ;;  %v14549_v30 = vld [vmem:[#allocation89_spill] sm:$0xff] }
 0x903   :  { %v3562_v20 = vpop.f32.mrf.mxu0  ;;  %v7357_v32 = vld [vmem:[%s14008_s3 + $0xea8] sm:$0xff] }
 0x904   :  { %v3563_v50 = vadd.f32 %v3562_v20, %v3498_v29  ;;  %v7358_v29 = vld [vmem:[%s14008_s3 + $0xeb0] sm:$0xff] }
 0x905   :  { %v3615_v35 = vpop.f32.mrf.mxu1 }
 0x906   :  { %v3616_v36 = vadd.f32 %v3615_v35, %v3551_v62  ;;  %v7346_v62 = vld [vmem:[%s14008_s3 + $0xe50] sm:$0xff]  ;;  %v7349_v35 = vld [vmem:[%s14008_s3 + $0xe68] sm:$0xff] }
 0x907   :  { %3987 = vmatmul.f32.gmra.mxu1 %v7346_v62  ;;  %3925 = vmatmul.f32.gmra.mxu0 %v7349_v35  ;;  %v7370_v35 = vld [vmem:[%s14008_s3 + $0xf10] sm:$0xff] }
 0x908   :  { %7329 = vmatmul.msk.f32.gmra.mxu2 %vm1248_vm2, %v3616_v36  ;;  %v7352_v36 = vld [vmem:[%s14008_s3 + $0xe80] sm:$0xff] }
 0x909   :  { %v3435_v10 = vpop.f32.mrf.mxu2  ;;  %3863 = vmatmul.f32.gmra.mxu3 %v7352_v36  ;;  %v7359_v36 = vld [vmem:[%s14008_s3 + $0xeb8] sm:$0xff] }
 0x90a   :  { %v3501_v49 = vadd.f32 %v3500_v16, %v3435_v10  ;;  %v14550_v10 = vld [vmem:[#allocation106_spill] sm:$0xff]  ;;  %v14551_v16 = vld [vmem:[#allocation99_spill] sm:$0xff] }
 0x90b   :  { %v3565_v41 = vpop.f32.mrf.mxu0 }
 0x90c   :  { %v3566_v11 = vadd.f32 %v3565_v41, %v3501_v49  ;;  %v7364_v41 = vld [vmem:[%s14008_s3 + $0xee0] sm:$0xff]  ;;  %v7351_v49 = vld [vmem:[%s14008_s3 + $0xe78] sm:$0xff] }
 0x90d   :  { %v3618_v38 = vpop.f32.mrf.mxu1 }
 0x90e   :  { %v3619_v48 = vadd.f32 %v3618_v38, %v3554_v31  ;;  %v14546_v31 = vld [vmem:[#allocation79_spill] sm:$0xff] }
 0x90f   :  { %3990 = vmatmul.f32.gmra.mxu1 %v7350_v37  ;;  %v2836_v38 = vadd.f32 %v14547_v61, %v14546_v31  ;;  %3928 = vmatmul.f32.gmra.mxu0 %v7353_v52  ;;  %v14556_v37 = vld [vmem:[#allocation44_spill] sm:$0xff]  ;;  %v7373_v31 = vld [vmem:[%s14008_s3 + $0xf28] sm:$0xff] }
 0x910   :  { %7330 = vmatmul.msk.f32.gmra.mxu2 %vm1248_vm2, %v3619_v48 }
 0x911   :  { %v3438_v17 = vpop.f32.mrf.mxu2  ;;  %v3295_v48 = vadd.f32 %v11258_v24, %v2836_v38  ;;  %v2837_v24 = vadd.f32 %v14549_v30, %v14548_v40  ;;  %v7377_v40 = vld [vmem:[%s14008_s3 + $0xf48] sm:$0xff] }
 0x912   :  { %v3504_v2 = vadd.f32 %v3503_v45, %v3438_v17  ;;  %v7365_v17 = vld [vmem:[%s14008_s3 + $0xee8] sm:$0xff] }
 0x913   :  { %v3568_v18 = vpop.f32.mrf.mxu0 }
 0x914   :  { %v3569_v27 = vadd.f32 %v3568_v18, %v3504_v2  ;;  %v7355_v2 = vld [vmem:[%s14008_s3 + $0xe98] sm:$0xff] }
 0x915   :  { %v3621_v1 = vpop.f32.mrf.mxu1  ;;  %v14554_v18 = vld [vmem:[#allocation68_spill] sm:$0xff] }
 0x916   :  { %v3622_v13 = vadd.f32 %v3621_v1, %v3557_v44  ;;  %v7356_v44 = vld [vmem:[%s14008_s3 + $0xea0] sm:$0xff]  ;;  %v7354_v1 = vld [vmem:[%s14008_s3 + $0xe90] sm:$0xff] }
 0x917   :  { %3866 = vmatmul.f32.gmra.mxu3 %v7356_v44  ;;  %3993 = vmatmul.f32.gmra.mxu1 %v7354_v1  ;;  %v7363_v44 = vld [vmem:[%s14008_s3 + $0xed8] sm:$0xff]  ;;  %v14558_v1 = vld [vmem:[#allocation81_spill] sm:$0xff] }
 0x918   :  { %7331 = vmatmul.msk.f32.gmra.mxu2 %vm1248_vm2, %v3622_v13  ;;  %v7343_v13 = vld [vmem:[%s14008_s3 + $0xe38] sm:$0xff]  ;;  %3931 = vmatmul.f32.gmra.mxu0 %v7357_v32 }
 0x91d   :  { %v3624_v54 = vpop.f32.mrf.mxu1 }
 0x91e   :  { %v3625_v8 = vadd.f32 %v3624_v54, %v3560_v22  ;;  %v3296_v22 = vadd.f32 %v11272_v12, %v2837_v24  ;;  %v2838_v12 = vadd.f32 %v14551_v16, %v14550_v10  ;;  %v7381_v10 = vld [vmem:[%s14008_s3 + $0xf68] sm:$0xff] }
 0x91f   :  { %3996 = vmatmul.f32.gmra.mxu1 %v7358_v29  ;;  %v14560_v29 = vld [vmem:[#allocation94_spill] sm:$0xff] }
 0x920   :  { %7332 = vmatmul.msk.f32.gmra.mxu2 %vm1248_vm2, %v3625_v8  ;;  %v7360_v8 = vld [vmem:[%s14008_s3 + $0xec0] sm:$0xff]  ;;  %v3297_v46 = vadd.f32 %v11287_v43, %v2838_v12 }
 0x921   :  { %3869 = vmatmul.f32.gmra.mxu3 %v7360_v8  ;;  %v7367_v8 = vld [vmem:[%s14008_s3 + $0xef8] sm:$0xff] }
 0x925   :  { %v3627_v51 = vpop.f32.mrf.mxu1 }
 0x926   :  { %v3628_v63 = vadd.f32 %v3627_v51, %v3563_v50  ;;  %v7361_v50 = vld [vmem:[%s14008_s3 + $0xec8] sm:$0xff] }
 0x927   :  { %3934 = vmatmul.f32.gmra.mxu0 %v7361_v50 }
 0x928   :  { %7333 = vmatmul.msk.f32.gmra.mxu2 %vm1248_vm2, %v3628_v63  ;;  %v7362_v63 = vld [vmem:[%s14008_s3 + $0xed0] sm:$0xff] }
 0x929   :  { %3872 = vmatmul.f32.gmra.mxu3 %v7364_v41  ;;  %3999 = vmatmul.f32.gmra.mxu1 %v7362_v63  ;;  %v7371_v41 = vld [vmem:[%s14008_s3 + $0xf18] sm:$0xff] }
 0x92d   :  { %v3630_v58 = vpop.f32.mrf.mxu1 }
 0x92e   :  { %v3631_v55 = vadd.f32 %v3630_v58, %v3566_v11  ;;  %v14553_v11 = vld [vmem:[#allocation111_spill] sm:$0xff]  ;;  %v7368_v58 = vld [vmem:[%s14008_s3 + $0xf00] sm:$0xff] }
 0x92f   :  { %v2839_v43 = vadd.f32 %v14553_v11, %v14552_v4  ;;  %3937 = vmatmul.f32.gmra.mxu0 %v7365_v17  ;;  %v7386_v4 = vld [vmem:[%s14008_s3 + $0xf90] sm:$0xff]  ;;  %v7375_v11 = vld [vmem:[%s14008_s3 + $0xf38] sm:$0xff] }
 0x930   :  { %7334 = vmatmul.msk.f32.gmra.mxu2 %vm1248_vm2, %v3631_v55  ;;  %v7366_v55 = vld [vmem:[%s14008_s3 + $0xef0] sm:$0xff] }
 0x931   :  { %v3298_v45 = vadd.f32 %v11302_v23, %v2839_v43  ;;  %3875 = vmatmul.f32.gmra.mxu3 %v7368_v58  ;;  %4002 = vmatmul.f32.gmra.mxu1 %v7366_v55  ;;  %v2840_v23 = vadd.f32 %v14555_v7, %v14554_v18  ;;  %v7389_v43 = vld [vmem:[%s14008_s3 + $0xfa8] sm:$0xff]  ;;  %v7379_v58 = vld [vmem:[%s14008_s3 + $0xf58] sm:$0xff]  ;;  %v7396_v18 = vld [vmem:[%s14008_s3 + $0xfe0] sm:$0xff] }
 0x932   :  { %v7393_v55 = vld [vmem:[%s14008_s3 + $0xfc8] sm:$0xff]  ;;  %v7394_v7 = vld [vmem:[%s14008_s3 + $0xfd0] sm:$0xff] }
 0x933   :  { %v3299_v14 = vadd.f32 %v11317_v26, %v2840_v23  ;;  %v7383_v23 = vld [vmem:[%s14008_s3 + $0xf78] sm:$0xff] }
 0x935   :  { %v3633_v21 = vpop.f32.mrf.mxu1 }
 0x936   :  { %v3634_v0 = vadd.f32 %v3633_v21, %v3569_v27  ;;  %v7369_v27 = vld [vmem:[%s14008_s3 + $0xf08] sm:$0xff] }
 0x937   :  { %3940 = vmatmul.f32.gmra.mxu0 %v7369_v27  ;;  %v7397_v27 = vld [vmem:[%s14008_s3 + $0xfe8] sm:$0xff] }
 0x938   :  { %7335 = vmatmul.msk.f32.gmra.mxu2 %vm1248_vm2, %v3634_v0  ;;  %v7372_v0 = vld [vmem:[%s14008_s3 + $0xf20] sm:$0xff] }
 0x939   :  { %3878 = vmatmul.f32.gmra.mxu3 %v7372_v0  ;;  %4005 = vmatmul.f32.gmra.mxu1 %v7370_v35  ;;  %v7387_v0 = vld [vmem:[%s14008_s3 + $0xf98] sm:$0xff]  ;;  %v3852_v35 = vpop.f32.mrf.mxu3 }
 0x93f   :  { %3943 = vmatmul.f32.gmra.mxu0 %v7373_v31 }
 0x940   :  { %4046 = vmatmul.f32.vlgmr.msrb.gmra.mxu2 %v7339_v28  ;;  %v14557_v28 = vld [vmem:[#allocation53_spill] sm:$0xff] }
 0x941   :  { %v2841_v26 = vadd.f32 %v14557_v28, %v14556_v37 }
 0x943   :  { %v3706_v53 = vpop.f32.mrf.mxu2  ;;  %v3300_v61 = vadd.f32 %v11329_v25, %v2841_v26  ;;  %v7391_v26 = vld [vmem:[%s14008_s3 + $0xfb8] sm:$0xff] }
 0x944   :  { %v11500_v57 = vadd.f32 %v3706_v53, %v3295_v48  ;;  %v7376_v48 = vld [vmem:[%s14008_s3 + $0xf40] sm:$0xff]  ;;  %v7374_v53 = vld [vmem:[%s14008_s3 + $0xf30] sm:$0xff] }
 0x945   :  { %3881 = vmatmul.f32.gmra.mxu3 %v7376_v48  ;;  %4008 = vmatmul.f32.gmra.mxu1 %v7374_v53  ;;  %v7395_v53 = vld [vmem:[%s14008_s3 + $0xfd8] sm:$0xff] }
 0x947   :  { %3946 = vmatmul.f32.gmra.mxu0 %v7377_v40  ;;  %v7399_v40 = vld [vmem:[%s14008_s3 + $0xff8] sm:$0xff] }
 0x948   :  { %4049 = vmatmul.f32.gmra.mxu2 %v7343_v13  ;;  %v14559_v13 = vld [vmem:[#allocation93_spill] sm:$0xff] }
 0x949   :  { %v2842_v25 = vadd.f32 %v14559_v13, %v14558_v1 }
 0x94b   :  { %v3709_v20 = vpop.f32.mrf.mxu2  ;;  %v3301_v30 = vadd.f32 %v11340_v9, %v2842_v25 }
 0x94c   :  { %v11517_v54 = vadd.f32 %v3709_v20, %v3296_v22  ;;  %v7380_v22 = vld [vmem:[%s14008_s3 + $0xf60] sm:$0xff]  ;;  %v7378_v20 = vld [vmem:[%s14008_s3 + $0xf50] sm:$0xff] }
 0x94d   :  { %3884 = vmatmul.f32.gmra.mxu3 %v7380_v22  ;;  %4011 = vmatmul.f32.gmra.mxu1 %v7378_v20 }
 0x94f   :  { %3949 = vmatmul.f32.gmra.mxu0 %v7381_v10 }
 0x950   :  { %4052 = vmatmul.f32.gmra.mxu2 %v7347_v60  ;;  %v14561_v60 = vld [vmem:[#allocation102_spill] sm:$0xff] }
 0x951   :  { %v2843_v9 = vadd.f32 %v14561_v60, %v14560_v29 }
 0x953   :  { %v3712_v39 = vpop.f32.mrf.mxu2  ;;  %v3302_v16 = vadd.f32 %v11351_v56, %v2843_v9  ;;  %v7385_v56 = vld [vmem:[%s14008_s3 + $0xf88] sm:$0xff] }
 0x954   :  { %v11534_v51 = vadd.f32 %v3712_v39, %v3297_v46  ;;  %v7384_v46 = vld [vmem:[%s14008_s3 + $0xf80] sm:$0xff]  ;;  %v7382_v39 = vld [vmem:[%s14008_s3 + $0xf70] sm:$0xff] }
 0x955   :  { %3887 = vmatmul.f32.gmra.mxu3 %v7384_v46  ;;  %4014 = vmatmul.f32.gmra.mxu1 %v7382_v39 }
 0x957   :  { %3952 = vmatmul.f32.gmra.mxu0 %v7385_v56 }
 0x958   :  { %4055 = vmatmul.f32.gmra.mxu2 %v7351_v49  ;;  %v7388_v49 = vld [vmem:[%s14008_s3 + $0xfa0] sm:$0xff] }
 0x95b   :  { %v3715_v47 = vpop.f32.mrf.mxu2 }
 0x95c   :  { %v11551_v33 = vadd.f32 %v3715_v47, %v3298_v45  ;;  %v7392_v45 = vld [vmem:[%s14008_s3 + $0xfc0] sm:$0xff]  ;;  %v7390_v47 = vld [vmem:[%s14008_s3 + $0xfb0] sm:$0xff] }
 0x95d   :  { %3890 = vmatmul.f32.gmra.mxu3 %v7388_v49  ;;  %4017 = vmatmul.f32.gmra.mxu1 %v7386_v4 }
 0x95f   :  { %3955 = vmatmul.f32.gmra.mxu0 %v7389_v43 }
 0x960   :  { %4058 = vmatmul.f32.gmra.mxu2 %v7355_v2 }
 0x963   :  { %v3718_v62 = vpop.f32.mrf.mxu2 }
 0x964   :  { %v11568_v21 = vadd.f32 %v3718_v62, %v3299_v14  ;;  %v7398_v62 = vld [vmem:[%s14008_s3 + $0xff0] sm:$0xff] }
 0x965   :  { %3893 = vmatmul.f32.gmra.mxu3 %v7392_v45  ;;  %4020 = vmatmul.f32.gmra.mxu1 %v7390_v47 }
 0x967   :  { %3958 = vmatmul.f32.gmra.mxu0 %v7393_v55 }
 0x968   :  { %4061 = vmatmul.f32.gmra.mxu2 %v7359_v36  ;;  %v3917_v36 = vpop.f32.mrf.mxu0 }
 0x969   :  { %v3918_v20 = vadd.f32 %v3917_v36, %v3852_v35 }
 0x96b   :  { %v3721_v38 = vpop.f32.mrf.mxu2 }
 0x96c   :  { %v11585_v52 = vadd.f32 %v3721_v38, %v3300_v61  ;;  %v3982_v37 = vpop.f32.mrf.mxu1  ;;  %v3855_v61 = vpop.f32.mrf.mxu3 }
 0x96d   :  { %3896 = vmatmul.f32.gmra.mxu3 %v7396_v18  ;;  %4023 = vmatmul.f32.gmra.mxu1 %v7394_v7  ;;  %v3983_v29 = vadd.f32 %v3982_v37, %v3918_v20 }
 0x96f   :  { %3961 = vmatmul.f32.gmra.mxu0 %v7397_v27 }
 0x970   :  { %4064 = vmatmul.f32.gmra.mxu2 %v7363_v44  ;;  %v3920_v31 = vpop.f32.mrf.mxu0 }
 0x973   :  { %v3724_v24 = vpop.f32.mrf.mxu2 }
 0x974   :  { %v11602_v32 = vadd.f32 %v3724_v24, %v3301_v30  ;;  %v3985_v38 = vpop.f32.mrf.mxu1 }
 0x975   :  { %4026 = vmatmul.f32.gmra.mxu1 %v7398_v62 }
 0x978   :  { %4067 = vmatmul.f32.gmra.mxu2 %v7367_v8  ;;  %v3923_v44 = vpop.f32.mrf.mxu0 }
 0x97b   :  { %v3727_v12 = vpop.f32.mrf.mxu2 }
 0x97c   :  { %v11619_v50 = vadd.f32 %v3727_v12, %v3302_v16  ;;  %v3858_v1 = vpop.f32.mrf.mxu3  ;;  %v3921_v12 = vadd.f32 %v3920_v31, %v3855_v61 }
 0x97d   :  { %v3924_v49 = vadd.f32 %v3923_v44, %v3858_v1 }
 0x97e   :  { %v3986_v39 = vadd.f32 %v3985_v38, %v3921_v12 }
 0x980   :  { %4070 = vmatmul.f32.gmra.mxu2 %v7371_v41 }
 0x983   :  { %v11633_v63 = vpop.f32.mrf.mxu2 }
 0x984   :  { %v3988_v25 = vpop.f32.mrf.mxu1  ;;  %v3926_v30 = vpop.f32.mrf.mxu0 }
 0x985   :  { %v3861_v24 = vpop.f32.mrf.mxu3  ;;  %v3989_v43 = vadd.f32 %v3988_v25, %v3924_v49 }
 0x986   :  { %v3927_v55 = vadd.f32 %v3926_v30, %v3861_v24 }
 0x988   :  { %4073 = vmatmul.f32.gmra.mxu2 %v7375_v11 }
 0x98b   :  { %v11647_v17 = vpop.f32.mrf.mxu2 }
 0x98c   :  { %v3991_v8 = vpop.f32.mrf.mxu1  ;;  %v3929_v60 = vpop.f32.mrf.mxu0 }
 0x98d   :  { %v3864_v10 = vpop.f32.mrf.mxu3 }
 0x98e   :  { %v3930_v35 = vadd.f32 %v3929_v60, %v3864_v10 }
 0x990   :  { %4076 = vmatmul.f32.gmra.mxu2 %v7379_v58 }
 0x993   :  { %v11661_v2 = vpop.f32.mrf.mxu2 }
 0x994   :  { %v3994_v46 = vpop.f32.mrf.mxu1 }
 0x995   :  { %v3932_v4 = vpop.f32.mrf.mxu0  ;;  %v3995_v36 = vadd.f32 %v3994_v46, %v3930_v35 }
 0x998   :  { %4079 = vmatmul.f32.gmra.mxu2 %v7383_v23  ;;  %v3992_v23 = vadd.f32 %v3991_v8, %v3927_v55 }
 0x99a   :  { %v3867_v11 = vpop.f32.mrf.mxu3 }
 0x99b   :  { %v11675_v14 = vpop.f32.mrf.mxu2  ;;  %v3933_v38 = vadd.f32 %v3932_v4, %v3867_v11 }
 0x99c   :  { %v3997_v45 = vpop.f32.mrf.mxu1 }
 0x99d   :  { %v3998_v44 = vadd.f32 %v3997_v45, %v3933_v38 }
 0x9a0   :  { %4082 = vmatmul.f32.gmra.mxu2 %v7387_v0 }
 0x9a3   :  { %v11683_v28 = vpop.f32.mrf.mxu2 }
 0x9a4   :  { %v3935_v18 = vpop.f32.mrf.mxu0  ;;  %v3870_v7 = vpop.f32.mrf.mxu3 }
 0x9a5   :  { %v3936_v24 = vadd.f32 %v3935_v18, %v3870_v7 }
 0x9a6   :  { %v4000_v62 = vpop.f32.mrf.mxu1 }
 0x9a7   :  { %v4001_v8 = vadd.f32 %v4000_v62, %v3936_v24  ;;  %v7422_v24 = vld [vmem:[%s14008_s3 + $0x1010] sm:$0xff] }
 0x9a8   :  { %4085 = vmatmul.f32.gmra.mxu2 %v7391_v26 }
 0x9ab   :  { %v11688_v48 = vpop.f32.mrf.mxu2 }
 0x9ac   :  { %v3938_v37 = vpop.f32.mrf.mxu0  ;;  %v3873_v26 = vpop.f32.mrf.mxu3 }
 0x9b0   :  { %4088 = vmatmul.f32.gmra.mxu2 %v7395_v53  ;;  %v4003_v53 = vpop.f32.mrf.mxu1 }
 0x9b3   :  { %v11693_v13 = vpop.f32.mrf.mxu2 }
 0x9b4   :  { %v3941_v1 = vpop.f32.mrf.mxu0 }
 0x9b8   :  { %4091 = vmatmul.f32.gmra.mxu2 %v7399_v40  ;;  %v3876_v40 = vpop.f32.mrf.mxu3  ;;  %v4006_v20 = vpop.f32.mrf.mxu1 }
 0x9bb   :  { %v11698_v22 = vpop.f32.mrf.mxu2 }
 0x9bc   :  { %v3944_v10 = vpop.f32.mrf.mxu0 }
 0x9c0   :  { %4440 = vmatmul.f32.vlgmr.msra.gmra.mxu2 %v7422_v24  ;;  %v7442_v24 = vld [vmem:[%s14008_s3 + $0x10b0] sm:$0xff] }
 0x9c2   :  { %v4009_v46 = vpop.f32.mrf.mxu1 }
 0x9c3   :  { %v4047_v9 = vpop.f32.mrf.mxu2 }
 0x9c4   :  { %v4048_v16 = vadd.f32 %v4047_v9, %v3983_v29  ;;  %v3939_v9 = vadd.f32 %v3938_v37, %v3873_v26  ;;  %v3947_v49 = vpop.f32.mrf.mxu0 }
 0x9c6   :  { %7404 = vmatmul.msk.f32.vlgmr.msrb.gmra.mxu3 %vm1248_vm2, %v4048_v16  ;;  %v3879_v16 = vpop.f32.mrf.mxu3  ;;  %v4004_v12 = vadd.f32 %v4003_v53, %v3939_v9 }
 0x9ca   :  { %v4012_v45 = vpop.f32.mrf.mxu1 }
 0x9cb   :  { %v4050_v41 = vpop.f32.mrf.mxu2 }
 0x9cc   :  { %v4051_v56 = vadd.f32 %v4050_v41, %v3986_v39  ;;  %v3950_v18 = vpop.f32.mrf.mxu0 }
 0x9ce   :  { %7405 = vmatmul.msk.f32.gmra.mxu3 %vm1248_vm2, %v4051_v56  ;;  %v3942_v56 = vadd.f32 %v3941_v1, %v3876_v40  ;;  %v3882_v4 = vpop.f32.mrf.mxu3 }
 0x9cf   :  { %v3948_v62 = vadd.f32 %v3947_v49, %v3882_v4 }
 0x9d0   :  { %v4007_v11 = vadd.f32 %v4006_v20, %v3942_v56 }
 0x9d1   :  { %v4013_v35 = vadd.f32 %v4012_v45, %v3948_v62  ;;  %v7425_v45 = vld [vmem:[%s14008_s3 + $0x1028] sm:$0xff] }
 0x9d3   :  { %v4053_v47 = vpop.f32.mrf.mxu2 }
 0x9d4   :  { %v4054_v58 = vadd.f32 %v4053_v47, %v3989_v43 }
 0x9d6   :  { %7406 = vmatmul.msk.f32.gmra.mxu3 %vm1248_vm2, %v4054_v58  ;;  %v3945_v58 = vadd.f32 %v3944_v10, %v3879_v16  ;;  %v3885_v7 = vpop.f32.mrf.mxu3  ;;  %v7420_v10 = vld [vmem:[%s14008_s3 + $0x1000] sm:$0xff]  ;;  %v7421_v16 = vld [vmem:[%s14008_s3 + $0x1008] sm:$0xff] }
 0x9d7   :  { %4310 = vmatmul.f32.vlgmr.msra.gmra.mxu0 %v7420_v10  ;;  %4375 = vmatmul.f32.vlgmr.msrb.gmra.mxu1 %v7421_v16  ;;  %v7431_v10 = vld [vmem:[%s14008_s3 + $0x1058] sm:$0xff]  ;;  %v7444_v16 = vld [vmem:[%s14008_s3 + $0x10c0] sm:$0xff] }
 0x9d8   :  { %v4010_v55 = vadd.f32 %v4009_v46, %v3945_v58 }
 0x9db   :  { %v4056_v27 = vpop.f32.mrf.mxu2 }
 0x9dc   :  { %v4057_v0 = vadd.f32 %v4056_v27, %v3992_v23 }
 0x9de   :  { %7407 = vmatmul.msk.f32.gmra.mxu3 %vm1248_vm2, %v4057_v0  ;;  %v4015_v0 = vpop.f32.mrf.mxu1  ;;  %v3888_v26 = vpop.f32.mrf.mxu3 }
 0x9df   :  { %4378 = vmatmul.f32.gmra.mxu1 %v7425_v45  ;;  %v7452_v45 = vld [vmem:[%s14008_s3 + $0x1100] sm:$0xff] }
 0x9e3   :  { %v4059_v31 = vpop.f32.mrf.mxu2 }
 0x9e4   :  { %v4060_v61 = vadd.f32 %v4059_v31, %v3995_v36  ;;  %v3953_v36 = vpop.f32.mrf.mxu0 }
 0x9e6   :  { %7408 = vmatmul.msk.f32.gmra.mxu3 %vm1248_vm2, %v4060_v61  ;;  %v3951_v61 = vadd.f32 %v3950_v18, %v3885_v7  ;;  %v4018_v38 = vpop.f32.mrf.mxu1  ;;  %v3891_v40 = vpop.f32.mrf.mxu3  ;;  %v7430_v18 = vld [vmem:[%s14008_s3 + $0x1050] sm:$0xff] }
 0x9e8   :  { %v4016_v53 = vadd.f32 %v4015_v0, %v3951_v61  ;;  %v7428_v0 = vld [vmem:[%s14008_s3 + $0x1040] sm:$0xff] }
 0x9e9   :  { %v7432_v61 = vld [vmem:[%s14008_s3 + $0x1060] sm:$0xff] }
 0x9eb   :  { %v4062_v25 = vpop.f32.mrf.mxu2 }
 0x9ec   :  { %v4063_v30 = vadd.f32 %v4062_v25, %v3998_v44  ;;  %v3954_v25 = vadd.f32 %v3953_v36, %v3888_v26 }
 0x9ee   :  { %7409 = vmatmul.msk.f32.gmra.mxu3 %vm1248_vm2, %v4063_v30  ;;  %v3956_v30 = vpop.f32.mrf.mxu0  ;;  %v4019_v20 = vadd.f32 %v4018_v38, %v3954_v25  ;;  %v7433_v38 = vld [vmem:[%s14008_s3 + $0x1068] sm:$0xff] }
 0x9ef   :  { %v3957_v9 = vadd.f32 %v3956_v30, %v3891_v40  ;;  %v7437_v25 = vld [vmem:[%s14008_s3 + $0x1088] sm:$0xff] }
 0x9f3   :  { %v4065_v29 = vpop.f32.mrf.mxu2 }
 0x9f4   :  { %v4066_v60 = vadd.f32 %v4065_v29, %v4001_v8  ;;  %v4021_v8 = vpop.f32.mrf.mxu1 }
 0x9f6   :  { %7410 = vmatmul.msk.f32.gmra.mxu3 %vm1248_vm2, %v4066_v60  ;;  %v3959_v46 = vpop.f32.mrf.mxu0 }
 0x9fb   :  { %v4068_v39 = vpop.f32.mrf.mxu2 }
 0x9fc   :  { %v4069_v41 = vadd.f32 %v4068_v39, %v4004_v12  ;;  %v3894_v12 = vpop.f32.mrf.mxu3  ;;  %v4022_v39 = vadd.f32 %v4021_v8, %v3957_v9  ;;  %v4024_v49 = vpop.f32.mrf.mxu1  ;;  %v7440_v8 = vld [vmem:[%s14008_s3 + $0x10a0] sm:$0xff]  ;;  %v7446_v9 = vld [vmem:[%s14008_s3 + $0x10d0] sm:$0xff] }
 0x9fe   :  { %7411 = vmatmul.msk.f32.gmra.mxu3 %vm1248_vm2, %v4069_v41  ;;  %v7426_v41 = vld [vmem:[%s14008_s3 + $0x1030] sm:$0xff] }
 0x9ff   :  { %4443 = vmatmul.f32.gmra.mxu2 %v7426_v41  ;;  %v7435_v41 = vld [vmem:[%s14008_s3 + $0x1078] sm:$0xff] }
 0xa03   :  { %v4071_v43 = vpop.f32.mrf.mxu2 }
 0xa04   :  { %v4072_v47 = vadd.f32 %v4071_v43, %v4007_v11  ;;  %v3960_v11 = vadd.f32 %v3959_v46, %v3894_v12  ;;  %v7424_v43 = vld [vmem:[%s14008_s3 + $0x1020] sm:$0xff]  ;;  %v3897_v58 = vpop.f32.mrf.mxu3  ;;  %v4027_v62 = vpop.f32.mrf.mxu1  ;;  %v7445_v12 = vld [vmem:[%s14008_s3 + $0x10c8] sm:$0xff] }
 0xa05   :  { %4313 = vmatmul.f32.gmra.mxu0 %v7424_v43  ;;  %v7439_v43 = vld [vmem:[%s14008_s3 + $0x1098] sm:$0xff] }
 0xa06   :  { %7412 = vmatmul.msk.f32.gmra.mxu3 %vm1248_vm2, %v4072_v47  ;;  %v4025_v47 = vadd.f32 %v4024_v49, %v3960_v11  ;;  %v7449_v49 = vld [vmem:[%s14008_s3 + $0x10e8] sm:$0xff]  ;;  %v7454_v11 = vld [vmem:[%s14008_s3 + $0x1110] sm:$0xff] }
 0xa07   :  { %4446 = vmatmul.f32.gmra.mxu2 %v7430_v18  ;;  %v7443_v18 = vld [vmem:[%s14008_s3 + $0x10b8] sm:$0xff] }
 0xa0b   :  { %v4074_v23 = vpop.f32.mrf.mxu2 }
 0xa0c   :  { %v4075_v27 = vadd.f32 %v4074_v23, %v4010_v55  ;;  %v3962_v55 = vpop.f32.mrf.mxu0 }
 0xa0d   :  { %4316 = vmatmul.f32.gmra.mxu0 %v7428_v0  ;;  %v7447_v0 = vld [vmem:[%s14008_s3 + $0x10d8] sm:$0xff] }
 0xa0e   :  { %7413 = vmatmul.msk.f32.gmra.mxu3 %vm1248_vm2, %v4075_v27  ;;  %v3963_v27 = vadd.f32 %v3962_v55, %v3897_v58  ;;  %v7458_v55 = vld [vmem:[%s14008_s3 + $0x1130] sm:$0xff] }
 0xa10   :  { %v4028_v36 = vadd.f32 %v4027_v62, %v3963_v27  ;;  %v7462_v62 = vld [vmem:[%s14008_s3 + $0x1150] sm:$0xff] }
 0xa13   :  { %v4077_v37 = vpop.f32.mrf.mxu2 }
 0xa14   :  { %v4078_v31 = vadd.f32 %v4077_v37, %v4013_v35  ;;  %v7429_v35 = vld [vmem:[%s14008_s3 + $0x1048] sm:$0xff]  ;;  %v7434_v37 = vld [vmem:[%s14008_s3 + $0x1070] sm:$0xff] }
 0xa15   :  { %4381 = vmatmul.f32.gmra.mxu1 %v7429_v35  ;;  %4449 = vmatmul.f32.gmra.mxu2 %v7434_v37  ;;  %v7460_v35 = vld [vmem:[%s14008_s3 + $0x1140] sm:$0xff] }
 0xa16   :  { %7414 = vmatmul.msk.f32.gmra.mxu3 %vm1248_vm2, %v4078_v31  ;;  %4319 = vmatmul.f32.gmra.mxu0 %v7432_v61  ;;  %v7464_v61 = vld [vmem:[%s14008_s3 + $0x1160] sm:$0xff] }
 0xa1b   :  { %v4080_v44 = vpop.f32.mrf.mxu2 }
 0xa1c   :  { %v4081_v1 = vadd.f32 %v4080_v44, %v4016_v53  ;;  %v7438_v53 = vld [vmem:[%s14008_s3 + $0x1090] sm:$0xff]  ;;  %v7423_v44 = vld [vmem:[%s14008_s3 + $0x1018] sm:$0xff] }
 0xa1d   :  { %4384 = vmatmul.f32.gmra.mxu1 %v7433_v38  ;;  %4452 = vmatmul.f32.gmra.mxu2 %v7438_v53  ;;  %v7465_v38 = vld [vmem:[%s14008_s3 + $0x1168] sm:$0xff] }
 0xa1e   :  { %7415 = vmatmul.msk.f32.gmra.mxu3 %vm1248_vm2, %v4081_v1  ;;  %v7436_v1 = vld [vmem:[%s14008_s3 + $0x1080] sm:$0xff] }
 0xa1f   :  { %4322 = vmatmul.f32.gmra.mxu0 %v7436_v1  ;;  %v7455_v1 = vld [vmem:[%s14008_s3 + $0x1118] sm:$0xff] }
 0xa23   :  { %v4083_v29 = vpop.f32.mrf.mxu2 }
 0xa24   :  { %v4084_v60 = vadd.f32 %v4083_v29, %v4019_v20  ;;  %v7427_v20 = vld [vmem:[%s14008_s3 + $0x1038] sm:$0xff]  ;;  %v7441_v29 = vld [vmem:[%s14008_s3 + $0x10a8] sm:$0xff] }
 0xa25   :  { %4387 = vmatmul.f32.gmra.mxu1 %v7437_v25  ;;  %4455 = vmatmul.f32.gmra.mxu2 %v7442_v24  ;;  %v7468_v25 = vld [vmem:[%s14008_s3 + $0x1180] sm:$0xff]  ;;  %v7474_v24 = vld [vmem:[%s14008_s3 + $0x11b0] sm:$0xff] }
 0xa26   :  { %7416 = vmatmul.msk.f32.gmra.mxu3 %vm1248_vm2, %v4084_v60 }
 0xa27   :  { %4325 = vmatmul.f32.gmra.mxu0 %v7440_v8  ;;  %v7459_v8 = vld [vmem:[%s14008_s3 + $0x1138] sm:$0xff] }
 0xa2b   :  { %v4086_v56 = vpop.f32.mrf.mxu2 }
 0xa2c   :  { %v4087_v4 = vadd.f32 %v4086_v56, %v4022_v39  ;;  %v7450_v39 = vld [vmem:[%s14008_s3 + $0x10f0] sm:$0xff]  ;;  %v7448_v56 = vld [vmem:[%s14008_s3 + $0x10e0] sm:$0xff] }
 0xa2d   :  { %4390 = vmatmul.f32.gmra.mxu1 %v7441_v29  ;;  %4458 = vmatmul.f32.gmra.mxu2 %v7446_v9  ;;  %v7472_v29 = vld [vmem:[%s14008_s3 + $0x11a0] sm:$0xff] }
 0xa2e   :  { %7417 = vmatmul.msk.f32.gmra.mxu3 %vm1248_vm2, %v4087_v4 }
 0xa2f   :  { %4328 = vmatmul.f32.gmra.mxu0 %v7444_v16  ;;  %v7463_v16 = vld [vmem:[%s14008_s3 + $0x1158] sm:$0xff] }
 0xa33   :  { %v4089_v7 = vpop.f32.mrf.mxu2 }
 0xa34   :  { %v4090_v23 = vadd.f32 %v4089_v7, %v4025_v47  ;;  %v7453_v47 = vld [vmem:[%s14008_s3 + $0x1108] sm:$0xff]  ;;  %v7456_v7 = vld [vmem:[%s14008_s3 + $0x1120] sm:$0xff] }
 0xa35   :  { %4393 = vmatmul.f32.gmra.mxu1 %v7445_v12  ;;  %4461 = vmatmul.f32.gmra.mxu2 %v7450_v39  ;;  %v7476_v12 = vld [vmem:[%s14008_s3 + $0x11c0] sm:$0xff] }
 0xa36   :  { %7418 = vmatmul.msk.f32.gmra.mxu3 %vm1248_vm2, %v4090_v23  ;;  %v7457_v23 = vld [vmem:[%s14008_s3 + $0x1128] sm:$0xff] }
 0xa37   :  { %4331 = vmatmul.f32.gmra.mxu0 %v7448_v56  ;;  %v7467_v56 = vld [vmem:[%s14008_s3 + $0x1178] sm:$0xff] }
 0xa3b   :  { %v4092_v26 = vpop.f32.mrf.mxu2 }
 0xa3c   :  { %v4093_v31 = vadd.f32 %v4092_v26, %v4028_v36  ;;  %v7461_v36 = vld [vmem:[%s14008_s3 + $0x1148] sm:$0xff]  ;;  %v7466_v26 = vld [vmem:[%s14008_s3 + $0x1170] sm:$0xff] }
 0xa3d   :  { %4396 = vmatmul.f32.gmra.mxu1 %v7449_v49  ;;  %4464 = vmatmul.f32.gmra.mxu2 %v7454_v11  ;;  %v7480_v49 = vld [vmem:[%s14008_s3 + $0x11e0] sm:$0xff] }
 0xa3e   :  { %7419 = vmatmul.msk.f32.gmra.mxu3 %vm1248_vm2, %v4093_v31  ;;  %v7451_v31 = vld [vmem:[%s14008_s3 + $0x10f8] sm:$0xff] }
 0xa3f   :  { %4334 = vmatmul.f32.gmra.mxu0 %v7452_v45  ;;  %v7471_v45 = vld [vmem:[%s14008_s3 + $0x1198] sm:$0xff] }
 0xa45   :  { %4399 = vmatmul.f32.gmra.mxu1 %v7453_v47  ;;  %4467 = vmatmul.f32.gmra.mxu2 %v7458_v55  ;;  %v4441_v55 = vpop.f32.mrf.mxu2 }
 0xa46   :  { %4505 = vmatmul.f32.vlgmr.msra.gmra.mxu3 %v7423_v44  ;;  %v7470_v44 = vld [vmem:[%s14008_s3 + $0x1190] sm:$0xff] }
 0xa47   :  { %4337 = vmatmul.f32.gmra.mxu0 %v7456_v7  ;;  %v7485_v7 = vld [vmem:[%s14009_s4 + $0x108] sm:$0xff] }
 0xa49   :  { %v4165_v40 = vpop.f32.mrf.mxu3 }
 0xa4a   :  { %v11765_v30 = vadd.f32 %v4165_v40, %v11500_v57  ;;  %v7469_v40 = vld [vmem:[%s14008_s3 + $0x1188] sm:$0xff] }
 0xa4d   :  { %4402 = vmatmul.f32.gmra.mxu1 %v7457_v23  ;;  %4470 = vmatmul.f32.gmra.mxu2 %v7462_v62  ;;  %v7484_v23 = vld [vmem:[%s14009_s4 + $0x100] sm:$0xff] }
 0xa4e   :  { %4508 = vmatmul.f32.gmra.mxu3 %v7427_v20  ;;  %v7487_v20 = vld [vmem:[%s14009_s4 + $0x118] sm:$0xff] }
 0xa4f   :  { %4340 = vmatmul.f32.gmra.mxu0 %v7460_v35 }
 0xa50   :  { %4619 = vmatpush.msrb.mxu0 %v7487_v20 }
 0xa51   :  { %v4168_v57 = vpop.f32.mrf.mxu3 }
 0xa52   :  { %v11780_v60 = vadd.f32 %v4168_v57, %v11517_v54  ;;  %v7473_v57 = vld [vmem:[%s14008_s3 + $0x11a8] sm:$0xff] }
 0xa54   :  { %v4311_v47 = vpop.f32.mrf.mxu0 }
 0xa55   :  { %4405 = vmatmul.f32.gmra.mxu1 %v7461_v36  ;;  %4473 = vmatmul.f32.gmra.mxu2 %v7466_v26 }
 0xa56   :  { %4511 = vmatmul.f32.gmra.mxu3 %v7431_v10  ;;  %v7478_v10 = vld [vmem:[%s14008_s3 + $0x11d0] sm:$0xff] }
 0xa57   :  { %4343 = vmatmul.f32.gmra.mxu0 %v7464_v61 }
 0xa59   :  { %v4171_v54 = vpop.f32.mrf.mxu3 }
 0xa5a   :  { %v11795_v46 = vadd.f32 %v4171_v54, %v11534_v51  ;;  %v7477_v54 = vld [vmem:[%s14008_s3 + $0x11c8] sm:$0xff] }
 0xa5d   :  { %4408 = vmatmul.f32.gmra.mxu1 %v7465_v38  ;;  %4476 = vmatmul.f32.gmra.mxu2 %v7470_v44 }
 0xa5e   :  { %4514 = vmatmul.f32.gmra.mxu3 %v7435_v41  ;;  %v7482_v41 = vld [vmem:[%s14008_s3 + $0x11f0] sm:$0xff] }
 0xa5f   :  { %4346 = vmatmul.f32.gmra.mxu0 %v7468_v25 }
 0xa61   :  { %v4174_v51 = vpop.f32.mrf.mxu3 }
 0xa62   :  { %v11810_v4 = vadd.f32 %v4174_v51, %v11551_v33  ;;  %v7481_v51 = vld [vmem:[%s14008_s3 + $0x11e8] sm:$0xff] }
 0xa65   :  { %4411 = vmatmul.f32.gmra.mxu1 %v7469_v40  ;;  %4479 = vmatmul.f32.gmra.mxu2 %v7474_v24 }
 0xa66   :  { %4517 = vmatmul.f32.gmra.mxu3 %v7439_v43  ;;  %v7486_v43 = vld [vmem:[%s14009_s4 + $0x110] sm:$0xff] }
 0xa67   :  { %4349 = vmatmul.f32.gmra.mxu0 %v7472_v29 }
 0xa68   :  { %4620 = vmatpush.msrb.mxu0 %v7486_v43 }
 0xa69   :  { %v4177_v33 = vpop.f32.mrf.mxu3 }
 0xa6a   :  { %v11825_v58 = vadd.f32 %v4177_v33, %v11568_v21  ;;  %v4376_v33 = vpop.f32.mrf.mxu1  ;;  %4621 = vmatpush.msrb.mxu0 %v7485_v7 }
 0xa6b   :  { %v4377_v40 = vadd.f32 %v4376_v33, %v4311_v47 }
 0xa6c   :  { %4622 = vmatpush.msrb.mxu0 %v7484_v23 }
 0xa6d   :  { %4414 = vmatmul.f32.gmra.mxu1 %v7473_v57  ;;  %4482 = vmatmul.f32.gmra.mxu2 %v7478_v10  ;;  %v4442_v20 = vadd.f32 %v4441_v55, %v4377_v40 }
 0xa6e   :  { %4520 = vmatmul.f32.gmra.mxu3 %v7443_v18 }
 0xa6f   :  { %4352 = vmatmul.f32.gmra.mxu0 %v7476_v12 }
 0xa71   :  { %v4180_v21 = vpop.f32.mrf.mxu3 }
 0xa72   :  { %v11840_v27 = vadd.f32 %v4180_v21, %v11585_v52  ;;  %v7475_v21 = vld [vmem:[%s14008_s3 + $0x11b8] sm:$0xff] }
 0xa75   :  { %4417 = vmatmul.f32.gmra.mxu1 %v7477_v54  ;;  %4485 = vmatmul.f32.gmra.mxu2 %v7482_v41 }
 0xa76   :  { %4523 = vmatmul.f32.gmra.mxu3 %v7447_v0  ;;  %v4379_v0 = vpop.f32.mrf.mxu1 }
 0xa77   :  { %4355 = vmatmul.f32.gmra.mxu0 %v7480_v49 }
 0xa79   :  { %v4183_v52 = vpop.f32.mrf.mxu3 }
 0xa7a   :  { %v11855_v37 = vadd.f32 %v4183_v52, %v11602_v32  ;;  %v7479_v52 = vld [vmem:[%s14008_s3 + $0x11d8] sm:$0xff] }
 0xa7d   :  { %4420 = vmatmul.f32.gmra.mxu1 %v7481_v51 }
 0xa7e   :  { %4526 = vmatmul.f32.gmra.mxu3 %v7451_v31 }
 0xa81   :  { %v4186_v32 = vpop.f32.mrf.mxu3 }
 0xa82   :  { %v11870_v53 = vadd.f32 %v4186_v32, %v11619_v50  ;;  %v4314_v62 = vpop.f32.mrf.mxu0  ;;  %v4444_v35 = vpop.f32.mrf.mxu2  ;;  %v7483_v32 = vld [vmem:[%s14008_s3 + $0x11f8] sm:$0xff] }
 0xa86   :  { %4529 = vmatmul.f32.gmra.mxu3 %v7455_v1 }
 0xa89   :  { %v11884_v50 = vpop.f32.mrf.mxu3 }
 0xa8a   :  { %v4317_v26 = vpop.f32.mrf.mxu0  ;;  %v4447_v38 = vpop.f32.mrf.mxu2 }
 0xa8e   :  { %4532 = vmatmul.f32.gmra.mxu3 %v7459_v8 }
 0xa91   :  { %v11901_v9 = vpop.f32.mrf.mxu3 }
 0xa92   :  { %v4382_v31 = vpop.f32.mrf.mxu1 }
 0xa93   :  { %v4320_v44 = vpop.f32.mrf.mxu0  ;;  %v4383_v49 = vadd.f32 %v4382_v31, %v4317_v26 }
 0xa96   :  { %4535 = vmatmul.f32.gmra.mxu3 %v7463_v16  ;;  %v4380_v16 = vadd.f32 %v4379_v0, %v4314_v62 }
 0xa98   :  { %v4450_v24 = vpop.f32.mrf.mxu2  ;;  %v4445_v54 = vadd.f32 %v4444_v35, %v4380_v16 }
 0xa99   :  { %v11915_v39 = vpop.f32.mrf.mxu3 }
 0xa9a   :  { %v4385_v1 = vpop.f32.mrf.mxu1 }
 0xa9b   :  { %v4386_v7 = vadd.f32 %v4385_v1, %v4320_v44 }
 0xa9c   :  { %v4323_v8 = vpop.f32.mrf.mxu0 }
 0xa9d   :  { %v4451_v62 = vadd.f32 %v4450_v24, %v4386_v7 }
 0xa9e   :  { %4538 = vmatmul.f32.gmra.mxu3 %v7467_v56 }
 0xaa0   :  { %v4453_v12 = vpop.f32.mrf.mxu2 }
 0xaa1   :  { %v11929_v11 = vpop.f32.mrf.mxu3 }
 0xaa2   :  { %v4388_v57 = vpop.f32.mrf.mxu1 }
 0xaa4   :  { %v4326_v51 = vpop.f32.mrf.mxu0 }
 0xaa6   :  { %4541 = vmatmul.f32.gmra.mxu3 %v7471_v45  ;;  %v4448_v45 = vadd.f32 %v4447_v38, %v4383_v49 }
 0xaa8   :  { %v4456_v47 = vpop.f32.mrf.mxu2 }
 0xaa9   :  { %v11937_v18 = vpop.f32.mrf.mxu3 }
 0xaaa   :  { %v4391_v43 = vpop.f32.mrf.mxu1 }
 0xaac   :  { %v4329_v23 = vpop.f32.mrf.mxu0 }
 0xaae   :  { %4544 = vmatmul.f32.gmra.mxu3 %v7475_v21 }
 0xab1   :  { %v11948_v36 = vpop.f32.mrf.mxu3 }
 0xab2   :  { %v4394_v21 = vpop.f32.mrf.mxu1 }
 0xab4   :  { %v4332_v31 = vpop.f32.mrf.mxu0 }
 0xab6   :  { %4547 = vmatmul.f32.gmra.mxu3 %v7479_v52  ;;  %v4459_v52 = vpop.f32.mrf.mxu2 }
 0xab9   :  { %v11953_v61 = vpop.f32.mrf.mxu3 }
 0xaba   :  { %v4397_v40 = vpop.f32.mrf.mxu1 }
 0xabb   :  { %v4398_v49 = vadd.f32 %v4397_v40, %v4332_v31 }
 0xabc   :  { %v4335_v1 = vpop.f32.mrf.mxu0 }
 0xabe   :  { %4550 = vmatmul.f32.gmra.mxu3 %v7483_v32  ;;  %v4389_v32 = vadd.f32 %v4388_v57, %v4323_v8 }
 0xac0   :  { %v4454_v26 = vadd.f32 %v4453_v12, %v4389_v32 }
 0xac1   :  { %v11958_v25 = vpop.f32.mrf.mxu3 }
 0xac9   :  { %v4506_v29 = vpop.f32.mrf.mxu3 }
 0xaca   :  { %v4507_v10 = vadd.f32 %v4506_v29, %v4442_v20  ;;  %v4392_v29 = vadd.f32 %v4391_v43, %v4326_v51 }
 0xacc   :  { %7488 = vmatmul.msk.f32.vlgmr.msrb.gmra.mxu0 %vm1248_vm2, %v4507_v10  ;;  %v4462_v10 = vpop.f32.mrf.mxu2  ;;  %v4457_v44 = vadd.f32 %v4456_v47, %v4392_v29 }
 0xacd   :  { %v4463_v51 = vadd.f32 %v4462_v10, %v4398_v49 }
 0xad1   :  { %v4509_v41 = vpop.f32.mrf.mxu3 }
 0xad2   :  { %v4510_v56 = vadd.f32 %v4509_v41, %v4445_v54  ;;  %v4400_v54 = vpop.f32.mrf.mxu1  ;;  %v4395_v41 = vadd.f32 %v4394_v21, %v4329_v23 }
 0xad3   :  { %v4401_v7 = vadd.f32 %v4400_v54, %v4335_v1 }
 0xad4   :  { %7489 = vmatmul.msk.f32.gmra.mxu0 %vm1248_vm2, %v4510_v56  ;;  %v4465_v8 = vpop.f32.mrf.mxu2  ;;  %v4460_v57 = vadd.f32 %v4459_v52, %v4395_v41 }
 0xad5   :  { %v4466_v21 = vadd.f32 %v4465_v8, %v4401_v7 }
 0xad9   :  { %v4512_v33 = vpop.f32.mrf.mxu3 }
 0xada   :  { %v4513_v55 = vadd.f32 %v4512_v33, %v4448_v45  ;;  %v4338_v45 = vpop.f32.mrf.mxu0  ;;  %v4403_v33 = vpop.f32.mrf.mxu1 }
 0xadb   :  { %v4404_v32 = vadd.f32 %v4403_v33, %v4338_v45 }
 0xadc   :  { %7490 = vmatmul.msk.f32.gmra.mxu0 %vm1248_vm2, %v4513_v55  ;;  %v4468_v43 = vpop.f32.mrf.mxu2 }
 0xae1   :  { %v4515_v0 = vpop.f32.mrf.mxu3 }
 0xae2   :  { %v4516_v35 = vadd.f32 %v4515_v0, %v4451_v62  ;;  %v4341_v62 = vpop.f32.mrf.mxu0  ;;  %v4406_v23 = vpop.f32.mrf.mxu1 }
 0xae3   :  { %v4407_v29 = vadd.f32 %v4406_v23, %v4341_v62 }
 0xae4   :  { %7491 = vmatmul.msk.f32.gmra.mxu0 %vm1248_vm2, %v4516_v35  ;;  %v4471_v35 = vpop.f32.mrf.mxu2 }
 0xae9   :  { %v4518_v20 = vpop.f32.mrf.mxu3 }
 0xaea   :  { %v4519_v38 = vadd.f32 %v4518_v20, %v4454_v26  ;;  %v4469_v26 = vadd.f32 %v4468_v43, %v4404_v32  ;;  %v4344_v31 = vpop.f32.mrf.mxu0  ;;  %v4409_v40 = vpop.f32.mrf.mxu1 }
 0xaeb   :  { %v4410_v41 = vadd.f32 %v4409_v40, %v4344_v31 }
 0xaec   :  { %7492 = vmatmul.msk.f32.gmra.mxu0 %vm1248_vm2, %v4519_v38  ;;  %v4474_v10 = vpop.f32.mrf.mxu2 }
 0xaf1   :  { %v4521_v16 = vpop.f32.mrf.mxu3 }
 0xaf2   :  { %v4522_v24 = vadd.f32 %v4521_v16, %v4457_v44  ;;  %v4472_v44 = vadd.f32 %v4471_v35, %v4407_v29  ;;  %v4347_v1 = vpop.f32.mrf.mxu0  ;;  %v4412_v54 = vpop.f32.mrf.mxu1 }
 0xaf3   :  { %v4413_v49 = vadd.f32 %v4412_v54, %v4347_v1 }
 0xaf4   :  { %7493 = vmatmul.msk.f32.gmra.mxu0 %vm1248_vm2, %v4522_v24  ;;  %v4477_v8 = vpop.f32.mrf.mxu2 }
 0xaf9   :  { %v4524_v56 = vpop.f32.mrf.mxu3 }
 0xafa   :  { %v4525_v12 = vadd.f32 %v4524_v56, %v4460_v57  ;;  %v4475_v57 = vadd.f32 %v4474_v10, %v4410_v41  ;;  %v4350_v45 = vpop.f32.mrf.mxu0  ;;  %v4415_v33 = vpop.f32.mrf.mxu1 }
 0xafb   :  { %v4416_v7 = vadd.f32 %v4415_v33, %v4350_v45 }
 0xafc   :  { %7494 = vmatmul.msk.f32.gmra.mxu0 %vm1248_vm2, %v4525_v12  ;;  %v4480_v43 = vpop.f32.mrf.mxu2 }
 0xb01   :  { %v4527_v55 = vpop.f32.mrf.mxu3 }
 0xb02   :  { %v4528_v47 = vadd.f32 %v4527_v55, %v4463_v51  ;;  %v4478_v51 = vadd.f32 %v4477_v8, %v4413_v49  ;;  %v4353_v62 = vpop.f32.mrf.mxu0  ;;  %v4418_v23 = vpop.f32.mrf.mxu1 }
 0xb03   :  { %v4419_v32 = vadd.f32 %v4418_v23, %v4353_v62  ;;  %v14564_v62 = vld [vmem:[#allocation96_spill] sm:$0xff] }
 0xb04   :  { %7495 = vmatmul.msk.f32.gmra.mxu0 %vm1248_vm2, %v4528_v47  ;;  %v4483_v35 = vpop.f32.mrf.mxu2 }
 0xb09   :  { %v4530_v0 = vpop.f32.mrf.mxu3 }
 0xb0a   :  { %v4531_v52 = vadd.f32 %v4530_v0, %v4466_v21  ;;  %v4481_v21 = vadd.f32 %v4480_v43, %v4416_v7  ;;  %v4356_v31 = vpop.f32.mrf.mxu0  ;;  %v4421_v40 = vpop.f32.mrf.mxu1  ;;  %v14563_v7 = vld [vmem:[#allocation110_spill] sm:$0xff] }
 0xb0b   :  { %v4422_v29 = vadd.f32 %v4421_v40, %v4356_v31  ;;  %v2850_v23 = vadd.f32 %v14564_v62, %v14563_v7  ;;  %v14572_v7 = vld [vmem:[#allocation95_spill] sm:$0xff] }
 0xb0c   :  { %7496 = vmatmul.msk.f32.gmra.mxu0 %vm1248_vm2, %v4531_v52  ;;  %v4486_v10 = vpop.f32.mrf.mxu2 }
 0xb0d   :  { %v3309_v40 = vadd.f32 %v11413_v19, %v2850_v23  ;;  %v14573_v23 = vld [vmem:[#allocation69_spill] sm:$0xff] }
 0xb11   :  { %v4533_v20 = vpop.f32.mrf.mxu3 }
 0xb12   :  { %v4534_v38 = vadd.f32 %v4533_v20, %v4469_v26  ;;  %v4484_v26 = vadd.f32 %v4483_v35, %v4419_v32  ;;  %v14566_v35 = vld [vmem:[#allocation62_spill] sm:$0xff] }
 0xb13   :  { %v14567_v32 = vld [vmem:[#allocation70_spill] sm:$0xff] }
 0xb14   :  { %7497 = vmatmul.msk.f32.gmra.mxu0 %vm1248_vm2, %v4534_v38 }
 0xb19   :  { %v4536_v16 = vpop.f32.mrf.mxu3 }
 0xb1a   :  { %v4537_v24 = vadd.f32 %v4536_v16, %v4472_v44  ;;  %v4487_v44 = vadd.f32 %v4486_v10, %v4422_v29 }
 0xb1c   :  { %7498 = vmatmul.msk.f32.gmra.mxu0 %vm1248_vm2, %v4537_v24 }
 0xb21   :  { %v4539_v56 = vpop.f32.mrf.mxu3 }
 0xb22   :  { %v4540_v12 = vadd.f32 %v4539_v56, %v4475_v57 }
 0xb24   :  { %7499 = vmatmul.msk.f32.gmra.mxu0 %vm1248_vm2, %v4540_v12 }
 0xb29   :  { %v4542_v55 = vpop.f32.mrf.mxu3 }
 0xb2a   :  { %v4543_v47 = vadd.f32 %v4542_v55, %v4478_v51 }
 0xb2c   :  { %7500 = vmatmul.msk.f32.gmra.mxu0 %vm1248_vm2, %v4543_v47 }
 0xb31   :  { %v4545_v0 = vpop.f32.mrf.mxu3 }
 0xb32   :  { %v4546_v52 = vadd.f32 %v4545_v0, %v4481_v21  ;;  %v14565_v0 = vld [vmem:[#allocation97_spill] sm:$0xff] }
 0xb34   :  { %7501 = vmatmul.msk.f32.gmra.mxu0 %vm1248_vm2, %v4546_v52  ;;  %v2849_v52 = vadd.f32 %v14566_v35, %v14565_v0 }
 0xb36   :  { %v3308_v10 = vadd.f32 %v11408_v42, %v2849_v52 }
 0xb38   :  { %v3767_v0 = vadd.f32 %v11688_v48, %v3308_v10 }
 0xb39   :  { %v4548_v20 = vpop.f32.mrf.mxu3 }
 0xb3a   :  { %v4549_v38 = vadd.f32 %v4548_v20, %v4484_v26  ;;  %v14568_v26 = vld [vmem:[#allocation118_spill] sm:$0xff]  ;;  %v14569_v20 = vld [vmem:[#allocation85_spill] sm:$0xff] }
 0xb3b   :  { %v2851_v31 = vadd.f32 %v14568_v26, %v14567_v32  ;;  %v14574_v32 = vld [vmem:[#allocation59_spill] sm:$0xff] }
 0xb3c   :  { %7502 = vmatmul.msk.f32.gmra.mxu0 %vm1248_vm2, %v4549_v38  ;;  %v14570_v38 = vld [vmem:[#allocation116_spill] sm:$0xff]  ;;  %v2846_v26 = vadd.f32 %v14574_v32, %v14573_v23 }
 0xb3d   :  { %v2848_v29 = vadd.f32 %v14570_v38, %v14569_v20 }
 0xb3e   :  { %v3305_v48 = vadd.f32 %v11384_v59, %v2846_v26 }
 0xb40   :  { %v3764_v10 = vadd.f32 %v11661_v2, %v3305_v48 }
 0xb41   :  { %v4551_v1 = vpop.f32.mrf.mxu3 }
 0xb42   :  { %v4552_v16 = vadd.f32 %v4551_v1, %v4487_v44  ;;  %v3310_v44 = vadd.f32 %v11418_v34, %v2851_v31  ;;  %v3768_v1 = vadd.f32 %v11693_v13, %v3309_v40  ;;  %v4226_v13 = vadd.f32 %v11948_v36, %v3767_v0  ;;  %v14575_v40 = vld [vmem:[#allocation124_spill] sm:$0xff] }
 0xb44   :  { %7503 = vmatmul.msk.f32.gmra.mxu0 %vm1248_vm2, %v4552_v16  ;;  %v14571_v16 = vld [vmem:[#allocation47_spill] sm:$0xff]  ;;  %v3769_v35 = vadd.f32 %v11698_v22, %v3310_v44  ;;  %v4227_v19 = vadd.f32 %v11953_v61, %v3768_v1 }
 0xb45   :  { %v2847_v62 = vadd.f32 %v14572_v7, %v14571_v16 }
 0xb46   :  { %v4228_v52 = vadd.f32 %v11958_v25, %v3769_v35  ;;  %v14578_v25 = vld [vmem:[#allocation113_spill] sm:$0xff] }
 0xb47   :  { %v3306_v42 = vadd.f32 %v11395_v3, %v2847_v62  ;;  %v12024_v3 = vld [vmem:[%s14010_s5] ss:$0 sm:$0xff] }
 0xb49   :  { %v11976_v54 = vpop.f32.mrf.mxu0  ;;  %v3765_v61 = vadd.f32 %v11675_v14, %v3306_v42 }
 0xb4a   :  { %14562 = vst [vmem:[#allocation83_spill] sm:$0xff] %v11976_v54  ;;  %v3307_v54 = vadd.f32 %v11403_v6, %v2848_v29  ;;  %v14576_v6 = vld [vmem:[#allocation75_spill] sm:$0xff] }
 0xb4b   :  { %v2845_v20 = vadd.f32 %v14576_v6, %v14575_v40  ;;  %v4224_v59 = vadd.f32 %v11929_v11, %v3765_v61  ;;  %v7504_v61 = vld [vmem:[%s14011_s6 + $0x20] sm:$0xff] }
 0xb4c   :  { %v3766_v34 = vadd.f32 %v11683_v28, %v3307_v54  ;;  %v14577_v54 = vld [vmem:[#allocation108_spill] sm:$0xff] }
 0xb4d   :  { %v3304_v29 = vadd.f32 %v11373_v15, %v2845_v20 }
 0xb4e   :  { %v4225_v38 = vadd.f32 %v11937_v18, %v3766_v34 }
 0xb4f   :  { %v3763_v16 = vadd.f32 %v11647_v17, %v3304_v29  ;;  %v4759_v29 = vld [vmem:[%s14012_s7 + $0x10] sm:$0xff] }
 0xb51   :  { %v11978_v24 = vpop.f32.mrf.mxu0  ;;  %v4222_v2 = vadd.f32 %v11901_v9, %v3763_v16  ;;  %v7551_v16 = vld [vmem:[%s14012_s7 + $0xf8] sm:$0xff] }
 0xb59   :  { %v11980_v41 = vpop.f32.mrf.mxu0 }
 0xb61   :  { %v11982_v8 = vpop.f32.mrf.mxu0 }
 0xb69   :  { %v11984_v57 = vpop.f32.mrf.mxu0 }
 0xb71   :  { %v11986_v56 = vpop.f32.mrf.mxu0 }
 0xb79   :  { %v11988_v12 = vpop.f32.mrf.mxu0 }
 0xb81   :  { %v11990_v49 = vpop.f32.mrf.mxu0 }
 0xb89   :  { %v4648_v45 = vpop.f32.mrf.mxu0 }
 0xb91   :  { %v4651_v33 = vpop.f32.mrf.mxu0 }
 0xb92   :  { %v4681_v17 = vadd.f32 %v4651_v33, %v4222_v2  ;;  %v7547_v2 = vld [vmem:[%s14012_s7 + $0xd8] sm:$0xff] }
 0xb94   :  { %v4701_v33 = vadd.f32 %v12024_v3, %v4681_v17  ;;  %v7544_v17 = vld [vmem:[%s14012_s7 + $0xc0] sm:$0xff] }
 0xb96   :  { %v12079_v26 = vmax.f32 %v4701_v33, 0.0  ;;  %v7512_v33 = vld [vmem:[%s14012_s7 + $0x60] sm:$0xff] }
 0xb99   :  { %v4654_v51 = vpop.f32.mrf.mxu0 }
 0xba1   :  { %v4657_v43 = vpop.f32.mrf.mxu0 }
 0xba2   :  { %v4683_v7 = vadd.f32 %v4657_v43, %v4224_v59  ;;  %v4757_v59 = vld [vmem:[%s14012_s7] sm:$0xff] }
 0xba9   :  { %v4660_v55 = vpop.f32.mrf.mxu0 }
 0xbaa   :  { %v4684_v44 = vadd.f32 %v4660_v55, %v4225_v38  ;;  %v4764_v38 = vld [vmem:[%s14012_s7 + $0x38] sm:$0xff] }
 0xbac   :  { %v4704_v55 = vadd.f32 %v12024_v3, %v4684_v44  ;;  %v4726_v44 = vld [vmem:[%s14011_s6 + $0x10] sm:$0xff] }
 0xbb1   :  { %v4663_v47 = vpop.f32.mrf.mxu0 }
 0xbb2   :  { %v4685_v28 = vadd.f32 %v4663_v47, %v4226_v13  ;;  %v4223_v47 = vadd.f32 %v11915_v39, %v3764_v10  ;;  %v4703_v39 = vadd.f32 %v12024_v3, %v4683_v7  ;;  %v4758_v10 = vld [vmem:[%s14012_s7 + $0x8] sm:$0xff]  ;;  %v7550_v7 = vld [vmem:[%s14012_s7 + $0xf0] sm:$0xff] }
 0xbb4   :  { %v4705_v62 = vadd.f32 %v12024_v3, %v4685_v28  ;;  %v4682_v11 = vadd.f32 %v4654_v51, %v4223_v47  ;;  %v12055_v51 = vmax.f32 %v4704_v55, 0.0  ;;  %v4762_v28 = vld [vmem:[%s14012_s7 + $0x28] sm:$0xff]  ;;  %v7524_v47 = vld [vmem:[%s14011_s6 + $0x40] sm:$0xff]  ;;  %v7546_v55 = vld [vmem:[%s14012_s7 + $0xd0] sm:$0xff] }
 0xbb6   :  { %v12049_v43 = vmax.f32 %v4705_v62, 0.0  ;;  %v4702_v9 = vadd.f32 %v12024_v3, %v4682_v11  ;;  %v7549_v62 = vld [vmem:[%s14012_s7 + $0xe8] sm:$0xff] }
 0xbb7   :  { %v7525_v11 = vld [vmem:[%s14011_s6 + $0x48] sm:$0xff] }
 0xbb8   :  { %v12071_v32 = vmax.f32 %v4702_v9, 0.0  ;;  %v7514_v9 = vld [vmem:[%s14012_s7 + $0x70] sm:$0xff] }
 0xbb9   :  { %v4666_v21 = vpop.f32.mrf.mxu0 }
 0xbba   :  { %v4686_v31 = vadd.f32 %v4666_v21, %v4227_v19  ;;  %v2844_v21 = vadd.f32 %v14578_v25, %v14577_v54  ;;  %v12063_v19 = vmax.f32 %v4703_v39, 0.0  ;;  %v4725_v54 = vld [vmem:[%s14011_s6 + $0x8] sm:$0xff]  ;;  %v7526_v39 = vld [vmem:[%s14011_s6 + $0x50] sm:$0xff] }
 0xbbb   :  { %v7505_v25 = vld [vmem:[%s14011_s6 + $0x28] sm:$0xff] }
 0xbbc   :  { %v4706_v14 = vadd.f32 %v12024_v3, %v4686_v31  ;;  %v3303_v1 = vadd.f32 %v11362_v5, %v2844_v21  ;;  %v4760_v21 = vld [vmem:[%s14012_s7 + $0x18] sm:$0xff] }
 0xbbe   :  { %v3762_v15 = vadd.f32 %v11633_v63, %v3303_v1  ;;  %v12042_v35 = vmax.f32 %v4706_v14, 0.0  ;;  %v7506_v14 = vld [vmem:[%s14011_s6 + $0x30] sm:$0xff]  ;;  %v4727_v1 = vld [vmem:[%s14011_s6 + $0x18] sm:$0xff] }
 0xbc0   :  { %v4221_v5 = vadd.f32 %v11884_v50, %v3762_v15  ;;  %v4679_v50 = vadd.f32 %v11990_v49, %v11870_v53  ;;  %v4677_v53 = vadd.f32 %v11986_v56, %v11840_v27  ;;  %v4675_v27 = vadd.f32 %v11982_v8, %v11810_v4  ;;  %v7548_v15 = vld [vmem:[%s14012_s7 + $0xe0] sm:$0xff] }
 0xbc1   :  { %v4669_v22 = vpop.f32.mrf.mxu0  ;;  %v4673_v4 = vadd.f32 %v11978_v24, %v11780_v60 }
 0xbc2   :  { %v4687_v36 = vadd.f32 %v4669_v22, %v4228_v52  ;;  %v4680_v63 = vadd.f32 %v4648_v45, %v4221_v5  ;;  %v4678_v45 = vadd.f32 %v11988_v12, %v11855_v37  ;;  %v4699_v49 = vadd.f32 %v12024_v3, %v4679_v50  ;;  %v4724_v22 = vld [vmem:[%s14011_s6] sm:$0xff]  ;;  %v7545_v5 = vld [vmem:[%s14012_s7 + $0xc8] sm:$0xff] }
 0xbc3   :  { %v4676_v37 = vadd.f32 %v11984_v57, %v11825_v58  ;;  %v4697_v56 = vadd.f32 %v12024_v3, %v4677_v53  ;;  %v4674_v58 = vadd.f32 %v11980_v41, %v11795_v46  ;;  %v4695_v8 = vadd.f32 %v12024_v3, %v4675_v27  ;;  %v14579_v46 = vld [vmem:[#allocation83_spill] sm:$0xff]  ;;  %v7513_v50 = vld [vmem:[%s14012_s7 + $0x68] sm:$0xff] }
 0xbc4   :  { %v4707_v18 = vadd.f32 %v12024_v3, %v4687_v36  ;;  %v4700_v23 = vadd.f32 %v12024_v3, %v4680_v63  ;;  %v4698_v12 = vadd.f32 %v12024_v3, %v4678_v45  ;;  %v12095_v34 = vmax.f32 %v4699_v49, 0.0  ;;  %v4761_v36 = vld [vmem:[%s14012_s7 + $0x20] sm:$0xff]  ;;  %v7515_v63 = vld [vmem:[%s14012_s7 + $0x78] sm:$0xff]  ;;  %v7510_v53 = vld [vmem:[%s14012_s7 + $0x50] sm:$0xff] }
 0xbc5   :  { %v4696_v57 = vadd.f32 %v12024_v3, %v4676_v37  ;;  %v12111_v52 = vmax.f32 %v4697_v56, 0.0  ;;  %v4672_v41 = vadd.f32 %v14579_v46, %v11765_v30  ;;  %v4694_v31 = vadd.f32 %v12024_v3, %v4674_v58  ;;  %4829 = vmatpush.msrb.mxu3 %v7515_v63  ;;  %v7511_v45 = vld [vmem:[%s14012_s7 + $0x58] sm:$0xff]  ;;  %v7509_v49 = vld [vmem:[%s14012_s7 + $0x48] sm:$0xff]  ;;  %v7508_v37 = vld [vmem:[%s14012_s7 + $0x40] sm:$0xff] }
 0xbc6   :  { %v12037_v0 = vmax.f32 %v4707_v18, 0.0  ;;  %v12087_v42 = vmax.f32 %v4700_v23, 0.0  ;;  %v12103_v13 = vmax.f32 %v4698_v12, 0.0  ;;  %v4693_v60 = vadd.f32 %v12024_v3, %v4673_v4  ;;  %v7507_v18 = vld [vmem:[%s14011_s6 + $0x38] sm:$0xff]  ;;  %v7534_v27 = vld [vmem:[%s14012_s7 + $0xb0] sm:$0xff]  ;;  %v7533_v56 = vld [vmem:[%s14012_s7 + $0xa8] sm:$0xff] }
 0xbc7   :  { %v12119_v40 = vmax.f32 %v4696_v57, 0.0  ;;  %v12125_v24 = vmax.f32 %v4695_v8, 0.0  ;;  %v4692_v30 = vadd.f32 %v12024_v3, %v4672_v41  ;;  %v12131_v6 = vmax.f32 %v4694_v31, 0.0  ;;  %v4763_v3 = vld [vmem:[%s14012_s7 + $0x30] sm:$0xff]  ;;  %4830 = vmatpush.msrb.mxu3 %v7514_v9  ;;  %v7527_v23 = vld [vmem:[%s14011_s6 + $0x58] sm:$0xff]  ;;  %v7532_v58 = vld [vmem:[%s14012_s7 + $0xa0] sm:$0xff] }
 0xbc8   :  { %4728 = vmatpush.msra.mxu1 %v12037_v0  ;;  %4770 = vmatpush.msrb.mxu2 %v12037_v0  ;;  %v12136_v20 = vmax.f32 %v4693_v60, 0.0  ;;  %v7535_v12 = vld [vmem:[%s14012_s7 + $0xb8] sm:$0xff]  ;;  %v7530_v4 = vld [vmem:[%s14012_s7 + $0x90] sm:$0xff]  ;;  %v7529_v8 = vld [vmem:[%s14012_s7 + $0x88] sm:$0xff] }
 0xbc9   :  { %5248 = vmatpush.msra.mxu0 %v12037_v0  ;;  %v12141_v48 = vmax.f32 %v4692_v30, 0.0  ;;  %4831 = vmatpush.msrb.mxu3 %v7513_v50  ;;  %v7531_v57 = vld [vmem:[%s14012_s7 + $0x98] sm:$0xff]  ;;  %v7528_v46 = vld [vmem:[%s14012_s7 + $0x80] sm:$0xff] }
 0xbca   :  { %4729 = vmatpush.msra.mxu1 %v12042_v35  ;;  %4771 = vmatpush.msrb.mxu2 %v12042_v35  ;;  %v7564_v9 = vld [vmem:[%s14012_s7 + $0x120] sm:$0xff]  ;;  %v7563_v50 = vld [vmem:[%s14012_s7 + $0x118] sm:$0xff] }
 0xbcb   :  { %5249 = vmatpush.msra.mxu0 %v12042_v35  ;;  %4832 = vmatpush.msrb.mxu3 %v7512_v33  ;;  %v7562_v33 = vld [vmem:[%s14012_s7 + $0x110] sm:$0xff] }
 0xbcc   :  { %4730 = vmatpush.msra.mxu1 %v12049_v43  ;;  %4772 = vmatpush.msrb.mxu2 %v12049_v43 }
 0xbcd   :  { %5250 = vmatpush.msra.mxu0 %v12049_v43  ;;  %4833 = vmatpush.msrb.mxu3 %v7511_v45  ;;  %v7588_v45 = vld [vmem:[%s14011_s6 + $0xc0] sm:$0xff] }
 0xbce   :  { %4731 = vmatpush.msra.mxu1 %v12055_v51  ;;  %4773 = vmatpush.msrb.mxu2 %v12055_v51 }
 0xbcf   :  { %5251 = vmatpush.msra.mxu0 %v12055_v51  ;;  %4834 = vmatpush.msrb.mxu3 %v7510_v53  ;;  %v7620_v53 = vld [vmem:[%s14011_s6 + $0x100] sm:$0xff] }
 0xbd0   :  { %4732 = vmatpush.msra.mxu1 %v12063_v19  ;;  %4774 = vmatpush.msrb.mxu2 %v12063_v19 }
 0xbd1   :  { %5252 = vmatpush.msra.mxu0 %v12063_v19  ;;  %4835 = vmatpush.msrb.mxu3 %v7509_v49  ;;  %v7574_v49 = vld [vmem:[%s14011_s6 + $0xb0] sm:$0xff] }
 0xbd2   :  { %4733 = vmatpush.msra.mxu1 %v12071_v32  ;;  %4775 = vmatpush.msrb.mxu2 %v12071_v32 }
 0xbd3   :  { %5253 = vmatpush.msra.mxu0 %v12071_v32  ;;  %4836 = vmatpush.msrb.mxu3 %v7508_v37  ;;  %v7621_v37 = vld [vmem:[%s14011_s6 + $0x108] sm:$0xff] }
 0xbd4   :  { %4734 = vmatpush.msra.mxu1 %v12079_v26  ;;  %4776 = vmatpush.msrb.mxu2 %v12079_v26 }
 0xbd5   :  { %5254 = vmatpush.msra.mxu0 %v12079_v26  ;;  %4954 = vmatpush.msra.mxu3 %v7535_v12 }
 0xbd6   :  { %4735 = vmatpush.msra.mxu1 %v12087_v42  ;;  %4777 = vmatpush.msrb.mxu2 %v12087_v42 }
 0xbd7   :  { %5255 = vmatpush.msra.mxu0 %v12087_v42  ;;  %4955 = vmatpush.msra.mxu3 %v7534_v27  ;;  %v7575_v27 = vld [vmem:[%s14011_s6 + $0xb8] sm:$0xff] }
 0xbd8   :  { %4736 = vmatpush.msra.mxu1 %v12095_v34  ;;  %4778 = vmatpush.msrb.mxu2 %v12095_v34 }
 0xbd9   :  { %5256 = vmatpush.msra.mxu0 %v12095_v34  ;;  %4956 = vmatpush.msra.mxu3 %v7533_v56  ;;  %v7622_v56 = vld [vmem:[%s14011_s6 + $0x110] sm:$0xff] }
 0xbda   :  { %4737 = vmatpush.msra.mxu1 %v12103_v13  ;;  %4779 = vmatpush.msrb.mxu2 %v12103_v13 }
 0xbdb   :  { %5257 = vmatpush.msra.mxu0 %v12103_v13  ;;  %4957 = vmatpush.msra.mxu3 %v7532_v58 }
 0xbdc   :  { %4738 = vmatpush.msra.mxu1 %v12111_v52  ;;  %4780 = vmatpush.msrb.mxu2 %v12111_v52 }
 0xbdd   :  { %5258 = vmatpush.msra.mxu0 %v12111_v52  ;;  %4958 = vmatpush.msra.mxu3 %v7531_v57  ;;  %v7604_v57 = vld [vmem:[%s14011_s6 + $0xe0] sm:$0xff] }
 0xbde   :  { %4739 = vmatpush.msra.mxu1 %v12119_v40  ;;  %4781 = vmatpush.msrb.mxu2 %v12119_v40 }
 0xbdf   :  { %5259 = vmatpush.msra.mxu0 %v12119_v40  ;;  %4959 = vmatpush.msra.mxu3 %v7530_v4  ;;  %v7623_v4 = vld [vmem:[%s14011_s6 + $0x118] sm:$0xff] }
 0xbe0   :  { %4740 = vmatpush.msra.mxu1 %v12125_v24  ;;  %4782 = vmatpush.msrb.mxu2 %v12125_v24 }
 0xbe1   :  { %5260 = vmatpush.msra.mxu0 %v12125_v24  ;;  %4960 = vmatpush.msra.mxu3 %v7529_v8 }
 0xbe2   :  { %4741 = vmatpush.msra.mxu1 %v12131_v6  ;;  %4783 = vmatpush.msrb.mxu2 %v12131_v6 }
 0xbe3   :  { %5261 = vmatpush.msra.mxu0 %v12131_v6  ;;  %4961 = vmatpush.msra.mxu3 %v7528_v46  ;;  %v7605_v46 = vld [vmem:[%s14011_s6 + $0xe8] sm:$0xff] }
 0xbe4   :  { %4742 = vmatpush.msra.mxu1 %v12136_v20  ;;  %4784 = vmatpush.msrb.mxu2 %v12136_v20 }
 0xbe5   :  { %5262 = vmatpush.msra.mxu0 %v12136_v20 }
 0xbe6   :  { %4743 = vmatpush.msra.mxu1 %v12141_v48  ;;  %4785 = vmatpush.msrb.mxu2 %v12141_v48 }
 0xbe7   :  { %5263 = vmatpush.msra.mxu0 %v12141_v48  ;;  %4744 = vmatmul.f32.vlgmr.msra.gmra.mxu1 %v4724_v22 }
 0xbe8   :  { %4786 = vmatmul.f32.vlgmr.msrb.gmra.mxu2 %v7504_v61  ;;  %4870 = vmatpush.msrb.mxu1 %v4764_v38 }
 0xbe9   :  { %4896 = vmatpush.msra.mxu2 %v12037_v0  ;;  %5424 = vmatpush.msrb.mxu0 %v12037_v0 }
 0xbea   :  { %4871 = vmatpush.msrb.mxu1 %v4763_v3  ;;  %5264 = vmatmul.f32.vlgmr.msra.gmra.mxu0 %v7588_v45  ;;  %v7611_v45 = vld [vmem:[%s14012_s7 + $0x1d8] sm:$0xff] }
 0xbeb   :  { %4897 = vmatpush.msra.mxu2 %v12042_v35  ;;  %5425 = vmatpush.msrb.mxu0 %v12042_v35 }
 0xbec   :  { %4872 = vmatpush.msrb.mxu1 %v4762_v28  ;;  %v7540_v28 = vld [vmem:[%s14011_s6 + $0x60] sm:$0xff] }
 0xbed   :  { %4898 = vmatpush.msra.mxu2 %v12049_v43  ;;  %5426 = vmatpush.msrb.mxu0 %v12049_v43 }
 0xbee   :  { %4873 = vmatpush.msrb.mxu1 %v4761_v36  ;;  %v7541_v36 = vld [vmem:[%s14011_s6 + $0x68] sm:$0xff] }
 0xbef   :  { %4899 = vmatpush.msra.mxu2 %v12055_v51  ;;  %5427 = vmatpush.msrb.mxu0 %v12055_v51 }
 0xbf0   :  { %4747 = vmatmul.f32.gmra.mxu1 %v4725_v54  ;;  %4789 = vmatmul.f32.gmra.mxu2 %v7505_v25  ;;  %v7542_v25 = vld [vmem:[%s14011_s6 + $0x70] sm:$0xff] }
 0xbf1   :  { %4874 = vmatpush.msrb.mxu1 %v4760_v21  ;;  %4900 = vmatpush.msra.mxu2 %v12063_v19 }
 0xbf2   :  { %5428 = vmatpush.msrb.mxu0 %v12063_v19 }
 0xbf3   :  { %4875 = vmatpush.msrb.mxu1 %v4759_v29  ;;  %4901 = vmatpush.msra.mxu2 %v12071_v32  ;;  %v7543_v29 = vld [vmem:[%s14011_s6 + $0x78] sm:$0xff] }
 0xbf4   :  { %5429 = vmatpush.msrb.mxu0 %v12071_v32 }
 0xbf5   :  { %4876 = vmatpush.msrb.mxu1 %v4758_v10  ;;  %4902 = vmatpush.msra.mxu2 %v12079_v26 }
 0xbf6   :  { %5430 = vmatpush.msrb.mxu0 %v12079_v26 }
 0xbf7   :  { %4877 = vmatpush.msrb.mxu1 %v4757_v59  ;;  %4903 = vmatpush.msra.mxu2 %v12087_v42 }
 0xbf8   :  { %5431 = vmatpush.msrb.mxu0 %v12087_v42  ;;  %4750 = vmatmul.f32.gmra.mxu1 %v4726_v44  ;;  %v7556_v44 = vld [vmem:[%s14011_s6 + $0x80] sm:$0xff] }
 0xbf9   :  { %4984 = vmatpush.msra.mxu1 %v12037_v0  ;;  %4792 = vmatmul.f32.gmra.mxu2 %v7506_v14  ;;  %v7557_v14 = vld [vmem:[%s14011_s6 + $0x88] sm:$0xff] }
 0xbfa   :  { %4904 = vmatpush.msra.mxu2 %v12095_v34  ;;  %5432 = vmatpush.msrb.mxu0 %v12095_v34 }
 0xbfb   :  { %4985 = vmatpush.msra.mxu1 %v12042_v35 }
 0xbfc   :  { %4905 = vmatpush.msra.mxu2 %v12103_v13  ;;  %5433 = vmatpush.msrb.mxu0 %v12103_v13 }
 0xbfd   :  { %4986 = vmatpush.msra.mxu1 %v12049_v43 }
 0xbfe   :  { %4906 = vmatpush.msra.mxu2 %v12111_v52  ;;  %5434 = vmatpush.msrb.mxu0 %v12111_v52 }
 0xbff   :  { %4987 = vmatpush.msra.mxu1 %v12055_v51 }
 0xc00   :  { %4907 = vmatpush.msra.mxu2 %v12119_v40  ;;  %5435 = vmatpush.msrb.mxu0 %v12119_v40 }
 0xc01   :  { %4988 = vmatpush.msra.mxu1 %v12063_v19  ;;  %4795 = vmatmul.f32.gmra.mxu2 %v7507_v18  ;;  %v7558_v18 = vld [vmem:[%s14011_s6 + $0x90] sm:$0xff] }
 0xc02   :  { %4753 = vmatmul.f32.gmra.mxu1 %v4727_v1  ;;  %4908 = vmatpush.msra.mxu2 %v12125_v24  ;;  %v7559_v1 = vld [vmem:[%s14011_s6 + $0x98] sm:$0xff] }
 0xc03   :  { %5436 = vmatpush.msrb.mxu0 %v12125_v24  ;;  %4989 = vmatpush.msra.mxu1 %v12071_v32 }
 0xc04   :  { %4909 = vmatpush.msra.mxu2 %v12131_v6 }
 0xc05   :  { %5437 = vmatpush.msrb.mxu0 %v12131_v6  ;;  %4990 = vmatpush.msra.mxu1 %v12079_v26 }
 0xc06   :  { %4910 = vmatpush.msra.mxu2 %v12136_v20 }
 0xc07   :  { %5438 = vmatpush.msrb.mxu0 %v12136_v20  ;;  %4991 = vmatpush.msra.mxu1 %v12087_v42 }
 0xc08   :  { %4911 = vmatpush.msra.mxu2 %v12141_v48 }
 0xc09   :  { %5439 = vmatpush.msrb.mxu0 %v12141_v48  ;;  %4992 = vmatpush.msra.mxu1 %v12095_v34 }
 0xc0a   :  { %5042 = vmatpush.msrb.mxu2 %v7551_v16 }
 0xc0b   :  { %4912 = vmatmul.f32.vlgmr.msra.gmra.mxu2 %v7524_v47  ;;  %4993 = vmatpush.msra.mxu1 %v12103_v13 }
 0xc0c   :  { %5043 = vmatpush.msrb.mxu2 %v7550_v7 }
 0xc0d   :  { %4994 = vmatpush.msra.mxu1 %v12111_v52 }
 0xc0e   :  { %5044 = vmatpush.msrb.mxu2 %v7549_v62 }
 0xc0f   :  { %4995 = vmatpush.msra.mxu1 %v12119_v40 }
 0xc10   :  { %5045 = vmatpush.msrb.mxu2 %v7548_v15 }
 0xc11   :  { %4996 = vmatpush.msra.mxu1 %v12125_v24 }
 0xc12   :  { %5046 = vmatpush.msrb.mxu2 %v7547_v2 }
 0xc13   :  { %4915 = vmatmul.f32.gmra.mxu2 %v7525_v11  ;;  %4997 = vmatpush.msra.mxu1 %v12131_v6 }
 0xc14   :  { %5047 = vmatpush.msrb.mxu2 %v7546_v55  ;;  %v7567_v55 = vld [vmem:[%s14012_s7 + $0x138] sm:$0xff] }
 0xc15   :  { %4998 = vmatpush.msra.mxu1 %v12136_v20 }
 0xc16   :  { %5048 = vmatpush.msrb.mxu2 %v7545_v5 }
 0xc17   :  { %4999 = vmatpush.msra.mxu1 %v12141_v48 }
 0xc18   :  { %5049 = vmatpush.msrb.mxu2 %v7544_v17  ;;  %v7566_v17 = vld [vmem:[%s14012_s7 + $0x130] sm:$0xff] }
 0xc1a   :  { %5160 = vmatpush.msra.mxu2 %v12037_v0 }
 0xc1b   :  { %4918 = vmatmul.f32.gmra.mxu2 %v7526_v39  ;;  %v7565_v39 = vld [vmem:[%s14012_s7 + $0x128] sm:$0xff] }
 0xc1c   :  { %5161 = vmatpush.msra.mxu2 %v12042_v35 }
 0xc1e   :  { %5162 = vmatpush.msra.mxu2 %v12049_v43 }
 0xc20   :  { %5163 = vmatpush.msra.mxu2 %v12055_v51 }
 0xc22   :  { %5164 = vmatpush.msra.mxu2 %v12063_v19 }
 0xc23   :  { %4921 = vmatmul.f32.gmra.mxu2 %v7527_v23 }
 0xc24   :  { %5165 = vmatpush.msra.mxu2 %v12071_v32 }
 0xc26   :  { %5166 = vmatpush.msra.mxu2 %v12079_v26 }
 0xc28   :  { %5167 = vmatpush.msra.mxu2 %v12087_v42 }
 0xc2a   :  { %5168 = vmatpush.msra.mxu2 %v12095_v34 }
 0xc2c   :  { %5169 = vmatpush.msra.mxu2 %v12103_v13 }
 0xc2e   :  { %5170 = vmatpush.msra.mxu2 %v12111_v52 }
 0xc30   :  { %5171 = vmatpush.msra.mxu2 %v12119_v40 }
 0xc32   :  { %5172 = vmatpush.msra.mxu2 %v12125_v24 }
 0xc34   :  { %5173 = vmatpush.msra.mxu2 %v12131_v6 }
 0xc36   :  { %5174 = vmatpush.msra.mxu2 %v12136_v20 }
 0xc38   :  { %5175 = vmatpush.msra.mxu2 %v12141_v48 }
 0xc64   :  { %v4745_v41 = vpop.f32.mrf.mxu1 }
 0xc65   :  { %7520 = vmatmul.msk.f32.vlgmr.msrb.gmra.mxu1 %vm4808_vm3, %v4745_v41  ;;  %v7606_v41 = vld [vmem:[%s14011_s6 + $0xf0] sm:$0xff] }
 0xc66   :  { %5130 = vmatpush.msrb.mxu1 %v7567_v55 }
 0xc68   :  { %5131 = vmatpush.msrb.mxu1 %v7566_v17  ;;  %v7592_v17 = vld [vmem:[%s14012_s7 + $0x180] sm:$0xff] }
 0xc6a   :  { %5132 = vmatpush.msrb.mxu1 %v7565_v39 }
 0xc6b   :  { %v4787_v31 = vpop.f32.mrf.mxu2 }
 0xc6c   :  { %7516 = vmatmul.msk.f32.vlgmr.msrb.gmra.mxu3 %vm4808_vm3, %v4787_v31  ;;  %5133 = vmatpush.msrb.mxu1 %v7564_v9  ;;  %v7607_v31 = vld [vmem:[%s14011_s6 + $0xf8] sm:$0xff] }
 0xc6d   :  { %5072 = vmatpush.msrb.mxu3 %v12037_v0  ;;  %v4748_v60 = vpop.f32.mrf.mxu1 }
 0xc6e   :  { %7521 = vmatmul.msk.f32.gmra.mxu1 %vm4808_vm3, %v4748_v60  ;;  %v7583_v60 = vld [vmem:[%s14012_s7 + $0x178] sm:$0xff] }
 0xc6f   :  { %5073 = vmatpush.msrb.mxu3 %v12042_v35  ;;  %5134 = vmatpush.msrb.mxu1 %v7563_v50 }
 0xc71   :  { %5074 = vmatpush.msrb.mxu3 %v12049_v43  ;;  %5135 = vmatpush.msrb.mxu1 %v7562_v33  ;;  %v7615_v33 = vld [vmem:[%s14012_s7 + $0x1f8] sm:$0xff] }
 0xc73   :  { %5075 = vmatpush.msrb.mxu3 %v12055_v51  ;;  %v4790_v30 = vpop.f32.mrf.mxu2 }
 0xc74   :  { %7517 = vmatmul.msk.f32.gmra.mxu3 %vm4808_vm3, %v4790_v30  ;;  %v7582_v30 = vld [vmem:[%s14012_s7 + $0x170] sm:$0xff] }
 0xc75   :  { %5076 = vmatpush.msrb.mxu3 %v12063_v19  ;;  %v4751_v22 = vpop.f32.mrf.mxu1 }
 0xc76   :  { %7522 = vmatmul.msk.f32.gmra.mxu1 %vm4808_vm3, %v4751_v22  ;;  %v7581_v22 = vld [vmem:[%s14012_s7 + $0x168] sm:$0xff] }
 0xc77   :  { %5077 = vmatpush.msrb.mxu3 %v12071_v32 }
 0xc79   :  { %5078 = vmatpush.msrb.mxu3 %v12079_v26 }
 0xc7b   :  { %5079 = vmatpush.msrb.mxu3 %v12087_v42 }
 0xc7c   :  { %v4793_v61 = vpop.f32.mrf.mxu2 }
 0xc7d   :  { %7518 = vmatmul.msk.f32.gmra.mxu3 %vm4808_vm3, %v4793_v61  ;;  %v7580_v61 = vld [vmem:[%s14012_s7 + $0x160] sm:$0xff] }
 0xc7e   :  { %5080 = vmatpush.msrb.mxu3 %v12095_v34 }
 0xc7f   :  { %v4754_v38 = vpop.f32.mrf.mxu1 }
 0xc80   :  { %7523 = vmatmul.msk.f32.gmra.mxu1 %vm4808_vm3, %v4754_v38  ;;  %5081 = vmatpush.msrb.mxu3 %v12103_v13  ;;  %v7579_v38 = vld [vmem:[%s14012_s7 + $0x158] sm:$0xff] }
 0xc82   :  { %5082 = vmatpush.msrb.mxu3 %v12111_v52 }
 0xc84   :  { %5083 = vmatpush.msrb.mxu3 %v12119_v40  ;;  %v4796_v3 = vpop.f32.mrf.mxu2 }
 0xc85   :  { %7519 = vmatmul.msk.f32.gmra.mxu3 %vm4808_vm3, %v4796_v3  ;;  %v7599_v3 = vld [vmem:[%s14012_s7 + $0x1b8] sm:$0xff] }
 0xc86   :  { %5084 = vmatpush.msrb.mxu3 %v12125_v24 }
 0xc88   :  { %5000 = vmatmul.f32.vlgmr.msra.gmra.mxu1 %v7540_v28  ;;  %5085 = vmatpush.msrb.mxu3 %v12131_v6  ;;  %v7598_v28 = vld [vmem:[%s14012_s7 + $0x1b0] sm:$0xff] }
 0xc8a   :  { %5086 = vmatpush.msrb.mxu3 %v12136_v20 }
 0xc8c   :  { %5087 = vmatpush.msrb.mxu3 %v12141_v48 }
 0xc8e   :  { %v4913_v54 = vpop.f32.mrf.mxu2 }
 0xc8f   :  { %7536 = vmatmul.msk.f32.vlgmr.msra.gmra.mxu3 %vm4808_vm3, %v4913_v54  ;;  %v7597_v54 = vld [vmem:[%s14012_s7 + $0x1a8] sm:$0xff] }
 0xc90   :  { %5003 = vmatmul.f32.gmra.mxu1 %v7541_v36  ;;  %5218 = vmatpush.msra.mxu3 %v7583_v60  ;;  %v7578_v36 = vld [vmem:[%s14012_s7 + $0x150] sm:$0xff] }
 0xc92   :  { %5219 = vmatpush.msra.mxu3 %v7582_v30 }
 0xc94   :  { %5220 = vmatpush.msra.mxu3 %v7581_v22 }
 0xc96   :  { %v4916_v21 = vpop.f32.mrf.mxu2  ;;  %5221 = vmatpush.msra.mxu3 %v7580_v61 }
 0xc97   :  { %7537 = vmatmul.msk.f32.gmra.mxu3 %vm4808_vm3, %v4916_v21  ;;  %v7577_v21 = vld [vmem:[%s14012_s7 + $0x148] sm:$0xff] }
 0xc98   :  { %5006 = vmatmul.f32.gmra.mxu1 %v7542_v25  ;;  %5222 = vmatpush.msra.mxu3 %v7579_v38 }
 0xc9a   :  { %5223 = vmatpush.msra.mxu3 %v7578_v36 }
 0xc9c   :  { %5224 = vmatpush.msra.mxu3 %v7577_v21 }
 0xc9e   :  { %v4919_v10 = vpop.f32.mrf.mxu2 }
 0xc9f   :  { %7538 = vmatmul.msk.f32.gmra.mxu3 %vm4808_vm3, %v4919_v10 }
 0xca0   :  { %5009 = vmatmul.f32.gmra.mxu1 %v7543_v29 }
 0xca6   :  { %v4922_v59 = vpop.f32.mrf.mxu2 }
 0xca7   :  { %7539 = vmatmul.msk.f32.gmra.mxu3 %vm4808_vm3, %v4922_v59  ;;  %v7576_v59 = vld [vmem:[%s14012_s7 + $0x140] sm:$0xff] }
 0xca8   :  { %5225 = vmatpush.msra.mxu3 %v7576_v59  ;;  %v7663_v59 = vld [vmem:[%s14015_s10 + $0x1c0] sm:$0xff] }
 0xcaf   :  { %5088 = vmatmul.f32.vlgmr.msrb.gmra.mxu3 %v7556_v44  ;;  %v7596_v44 = vld [vmem:[%s14012_s7 + $0x1a0] sm:$0xff] }
 0xcb0   :  { %5394 = vmatpush.msrb.mxu3 %v7615_v33 }
 0xcb7   :  { %5091 = vmatmul.f32.gmra.mxu3 %v7557_v14 }
 0xcbf   :  { %5094 = vmatmul.f32.gmra.mxu3 %v7558_v18  ;;  %v7595_v18 = vld [vmem:[%s14012_s7 + $0x198] sm:$0xff] }
 0xcc7   :  { %5097 = vmatmul.f32.gmra.mxu3 %v7559_v1  ;;  %v7594_v1 = vld [vmem:[%s14012_s7 + $0x190] sm:$0xff] }
 0xce2   :  { %v12397_v16 = vpop.f32.mrf.mxu1 }
 0xceb   :  { %v12399_v47 = vpop.f32.mrf.mxu1 }
 0xcef   :  { %v12401_v7 = vpop.f32.mrf.mxu3 }
 0xcf0   :  { %v4880_v25 = vadd.f32 %v12397_v16, %v12401_v7 }
 0xcf3   :  { %v12403_v62 = vpop.f32.mrf.mxu1 }
 0xcf7   :  { %v12405_v15 = vpop.f32.mrf.mxu3 }
 0xcf8   :  { %v4883_v16 = vadd.f32 %v12399_v47, %v12405_v15 }
 0xcfd   :  { %v4888_v2 = vpop.f32.mrf.mxu1 }
 0xd00   :  { %v12407_v11 = vpop.f32.mrf.mxu3 }
 0xd01   :  { %v4886_v47 = vadd.f32 %v12403_v62, %v12407_v11  ;;  %v7613_v62 = vld [vmem:[%s14012_s7 + $0x1e8] sm:$0xff] }
 0xd05   :  { %v5001_v5 = vpop.f32.mrf.mxu1 }
 0xd06   :  { %7552 = vmatmul.msk.f32.vlgmr.msrb.gmra.mxu2 %vm4808_vm3, %v5001_v5  ;;  %v5265_v5 = vpop.f32.mrf.mxu0 }
 0xd07   :  { %5336 = vmatpush.msrb.mxu2 %v12037_v0 }
 0xd08   :  { %v4847_v63 = vpop.f32.mrf.mxu3 }
 0xd09   :  { %5337 = vmatpush.msrb.mxu2 %v12042_v35  ;;  %v7561_v35 = vld [vmem:[%s14012_s7 + $0x108] sm:$0xff] }
 0xd0a   :  { %5136 = vmatpush.msrb.mxu1 %v7561_v35 }
 0xd0b   :  { %5338 = vmatpush.msrb.mxu2 %v12049_v43 }
 0xd0d   :  { %5339 = vmatpush.msrb.mxu2 %v12055_v51  ;;  %v5004_v0 = vpop.f32.mrf.mxu1  ;;  %v7560_v51 = vld [vmem:[%s14012_s7 + $0x100] sm:$0xff] }
 0xd0e   :  { %7553 = vmatmul.msk.f32.gmra.mxu2 %vm4808_vm3, %v5004_v0  ;;  %5137 = vmatpush.msrb.mxu1 %v7560_v51  ;;  %v7614_v0 = vld [vmem:[%s14012_s7 + $0x1f0] sm:$0xff] }
 0xd0f   :  { %5340 = vmatpush.msrb.mxu2 %v12063_v19  ;;  %5395 = vmatpush.msrb.mxu3 %v7614_v0 }
 0xd10   :  { %5306 = vmatpush.msra.mxu1 %v7599_v3 }
 0xd11   :  { %5341 = vmatpush.msrb.mxu2 %v12071_v32  ;;  %5396 = vmatpush.msrb.mxu3 %v7613_v62 }
 0xd12   :  { %v12438_v43 = vpop.f32.mrf.mxu3  ;;  %5307 = vmatpush.msra.mxu1 %v7598_v28 }
 0xd13   :  { %5342 = vmatpush.msrb.mxu2 %v12079_v26  ;;  %v7589_v26 = vld [vmem:[%s14011_s6 + $0xc8] sm:$0xff]  ;;  %v4975_v29 = vadd.f32 %v12438_v43, %v4880_v25  ;;  %v7612_v43 = vld [vmem:[%s14012_s7 + $0x1e0] sm:$0xff] }
 0xd14   :  { %5267 = vmatmul.f32.gmra.mxu0 %v7589_v26  ;;  %5308 = vmatpush.msra.mxu1 %v7597_v54  ;;  %v7610_v26 = vld [vmem:[%s14012_s7 + $0x1d0] sm:$0xff]  ;;  %v7667_v25 = vld [vmem:[%s14015_s10 + $0x1e0] sm:$0xff] }
 0xd15   :  { %5343 = vmatpush.msrb.mxu2 %v12087_v42  ;;  %v5007_v19 = vpop.f32.mrf.mxu1  ;;  %5397 = vmatpush.msrb.mxu3 %v7612_v43  ;;  %v7669_v54 = vld [vmem:[%s14015_s10 + $0x1f0] sm:$0xff] }
 0xd16   :  { %7554 = vmatmul.msk.f32.gmra.mxu2 %vm4808_vm3, %v5007_v19  ;;  %5309 = vmatpush.msra.mxu1 %v7596_v44  ;;  %v7631_v19 = vld [vmem:[%s14012_s7 + $0x238] sm:$0xff]  ;;  %v7661_v44 = vld [vmem:[%s14015_s10 + $0x1b0] sm:$0xff] }
 0xd17   :  { %5344 = vmatpush.msrb.mxu2 %v12095_v34  ;;  %v7572_v34 = vld [vmem:[%s14011_s6 + $0xa0] sm:$0xff]  ;;  %5398 = vmatpush.msrb.mxu3 %v7611_v45 }
 0xd18   :  { %5310 = vmatpush.msra.mxu1 %v7595_v18  ;;  %5633 = vmatpush.msra.mxu0 %v7669_v54  ;;  %v7657_v18 = vld [vmem:[%s14015_s10 + $0x190] sm:$0xff]  ;;  %v5563_v54 = vld [vmem:[%s14015_s10 + $0xa0] sm:$0xff] }
 0xd19   :  { %5345 = vmatpush.msrb.mxu2 %v12103_v13  ;;  %v7590_v13 = vld [vmem:[%s14011_s6 + $0xd0] sm:$0xff]  ;;  %5399 = vmatpush.msrb.mxu3 %v7610_v26 }
 0xd1a   :  { %v12451_v32 = vpop.f32.mrf.mxu3  ;;  %5311 = vmatpush.msra.mxu1 %v7594_v1  ;;  %5634 = vmatpush.msra.mxu0 %v7667_v25  ;;  %v5570_v25 = vld [vmem:[%s14015_s10 + $0xd8] sm:$0xff] }
 0xd1b   :  { %5346 = vmatpush.msrb.mxu2 %v12111_v52  ;;  %v4889_v52 = vadd.f32 %v4888_v2, %v4847_v63  ;;  %v4976_v7 = vadd.f32 %v12451_v32, %v4883_v16  ;;  %v7593_v2 = vld [vmem:[%s14012_s7 + $0x188] sm:$0xff]  ;;  %v7630_v32 = vld [vmem:[%s14012_s7 + $0x230] sm:$0xff] }
 0xd1c   :  { %5270 = vmatmul.f32.gmra.mxu0 %v7590_v13  ;;  %5312 = vmatpush.msra.mxu1 %v7593_v2  ;;  %v7653_v2 = vld [vmem:[%s14015_s10 + $0x170] sm:$0xff] }
 0xd1d   :  { %5347 = vmatpush.msrb.mxu2 %v12119_v40  ;;  %v5010_v23 = vpop.f32.mrf.mxu1 }
 0xd1e   :  { %7555 = vmatmul.msk.f32.gmra.mxu2 %vm4808_vm3, %v5010_v23  ;;  %5313 = vmatpush.msra.mxu1 %v7592_v17  ;;  %v7609_v23 = vld [vmem:[%s14012_s7 + $0x1c8] sm:$0xff] }
 0xd1f   :  { %5348 = vmatpush.msrb.mxu2 %v12125_v24  ;;  %5400 = vmatpush.msrb.mxu3 %v7609_v23 }
 0xd21   :  { %5349 = vmatpush.msrb.mxu2 %v12131_v6  ;;  %v7573_v6 = vld [vmem:[%s14011_s6 + $0xa8] sm:$0xff] }
 0xd22   :  { %v12461_v42 = vpop.f32.mrf.mxu3 }
 0xd23   :  { %5350 = vmatpush.msrb.mxu2 %v12136_v20  ;;  %v7591_v20 = vld [vmem:[%s14011_s6 + $0xd8] sm:$0xff]  ;;  %v4977_v15 = vadd.f32 %v12461_v42, %v4886_v47  ;;  %v7629_v42 = vld [vmem:[%s14012_s7 + $0x228] sm:$0xff] }
 0xd24   :  { %5273 = vmatmul.f32.gmra.mxu0 %v7591_v20  ;;  %v7625_v20 = vld [vmem:[%s14012_s7 + $0x208] sm:$0xff] }
 0xd25   :  { %5351 = vmatpush.msrb.mxu2 %v12141_v48 }
 0xd26   :  { %5176 = vmatmul.f32.vlgmr.msra.gmra.mxu2 %v7572_v34 }
 0xd2a   :  { %v4972_v40 = vpop.f32.mrf.mxu3 }
 0xd2b   :  { %v12471_v24 = vadd.f32 %v4972_v40, %v4889_v52  ;;  %v7608_v52 = vld [vmem:[%s14012_s7 + $0x1c0] sm:$0xff] }
 0xd2c   :  { %5440 = vmatmul.f32.vlgmr.msrb.gmra.mxu0 %v7620_v53  ;;  %v7628_v40 = vld [vmem:[%s14012_s7 + $0x220] sm:$0xff]  ;;  %5401 = vmatpush.msrb.mxu3 %v7608_v52 }
 0xd2e   :  { %5179 = vmatmul.f32.gmra.mxu2 %v7573_v6  ;;  %v7626_v6 = vld [vmem:[%s14012_s7 + $0x210] sm:$0xff] }
 0xd32   :  { %v5089_v48 = vpop.f32.mrf.mxu3 }
 0xd33   :  { %7568 = vmatmul.msk.f32.vlgmr.msrb.gmra.mxu1 %vm4808_vm3, %v5089_v48 }
 0xd34   :  { %5443 = vmatmul.f32.gmra.mxu0 %v7621_v37  ;;  %5482 = vmatpush.msrb.mxu1 %v7631_v19 }
 0xd36   :  { %5182 = vmatmul.f32.gmra.mxu2 %v7574_v49  ;;  %5483 = vmatpush.msrb.mxu1 %v7630_v32 }
 0xd38   :  { %5484 = vmatpush.msrb.mxu1 %v7629_v42 }
 0xd3a   :  { %v5092_v12 = vpop.f32.mrf.mxu3  ;;  %5485 = vmatpush.msrb.mxu1 %v7628_v40 }
 0xd3b   :  { %7569 = vmatmul.msk.f32.gmra.mxu1 %vm4808_vm3, %v5092_v12  ;;  %v7624_v12 = vld [vmem:[%s14012_s7 + $0x200] sm:$0xff] }
 0xd3c   :  { %5446 = vmatmul.f32.gmra.mxu0 %v7622_v56 }
 0xd3e   :  { %5185 = vmatmul.f32.gmra.mxu2 %v7575_v27 }
 0xd42   :  { %v5095_v58 = vpop.f32.mrf.mxu3 }
 0xd43   :  { %7570 = vmatmul.msk.f32.gmra.mxu1 %vm4808_vm3, %v5095_v58 }
 0xd44   :  { %5449 = vmatmul.f32.gmra.mxu0 %v7623_v4 }
 0xd46   :  { %5352 = vmatmul.f32.vlgmr.msrb.gmra.mxu2 %v7604_v57 }
 0xd4a   :  { %v5098_v8 = vpop.f32.mrf.mxu3 }
 0xd4b   :  { %7571 = vmatmul.msk.f32.gmra.mxu1 %vm4808_vm3, %v5098_v8 }
 0xd4e   :  { %5355 = vmatmul.f32.gmra.mxu2 %v7605_v46 }
 0xd53   :  { %7600 = vmatmul.msk.f32.vlgmr.msra.gmra.mxu1 %vm4808_vm3, %v5265_v5  ;;  %v7649_v5 = vld [vmem:[%s14015_s10 + $0x150] sm:$0xff] }
 0xd56   :  { %5358 = vmatmul.f32.gmra.mxu2 %v7606_v41 }
 0xd5e   :  { %5361 = vmatmul.f32.gmra.mxu2 %v7607_v31 }
 0xd89   :  { %v5051_v10 = vpop.f32.mrf.mxu2 }
 0xd8a   :  { %v5063_v14 = vadd.f32 %v5051_v10, %v4975_v29  ;;  %v7665_v29 = vld [vmem:[%s14015_s10 + $0x1d0] sm:$0xff] }
 0xd8b   :  { %5635 = vmatpush.msra.mxu0 %v7665_v29  ;;  %v5568_v29 = vld [vmem:[%s14015_s10 + $0xc8] sm:$0xff] }
 0xd8d   :  { %5636 = vmatpush.msra.mxu0 %v7663_v59  ;;  %v5566_v59 = vld [vmem:[%s14015_s10 + $0xb8] sm:$0xff] }
 0xd8f   :  { %5637 = vmatpush.msra.mxu0 %v7661_v44  ;;  %v5557_v44 = vld [vmem:[%s14015_s10 + $0x70] sm:$0xff] }
 0xd91   :  { %v5054_v55 = vpop.f32.mrf.mxu2  ;;  %v5268_v9 = vpop.f32.mrf.mxu0 }
 0xd92   :  { %v5064_v39 = vadd.f32 %v5054_v55, %v4976_v7  ;;  %7601 = vmatmul.msk.f32.gmra.mxu1 %vm4808_vm3, %v5268_v9  ;;  %v7655_v7 = vld [vmem:[%s14015_s10 + $0x180] sm:$0xff]  ;;  %v7641_v9 = vld [vmem:[%s14015_s10 + $0x110] sm:$0xff] }
 0xd93   :  { %v7651_v55 = vld [vmem:[%s14015_s10 + $0x160] sm:$0xff] }
 0xd99   :  { %v5057_v63 = vpop.f32.mrf.mxu2  ;;  %v5271_v35 = vpop.f32.mrf.mxu0 }
 0xd9a   :  { %v5065_v50 = vadd.f32 %v5057_v63, %v4977_v15  ;;  %7602 = vmatmul.msk.f32.gmra.mxu1 %vm4808_vm3, %v5271_v35  ;;  %v7645_v15 = vld [vmem:[%s14015_s10 + $0x130] sm:$0xff]  ;;  %v7643_v63 = vld [vmem:[%s14015_s10 + $0x120] sm:$0xff] }
 0xda1   :  { %v5060_v11 = vpop.f32.mrf.mxu2  ;;  %v5274_v13 = vpop.f32.mrf.mxu0 }
 0xda2   :  { %v12585_v51 = vadd.f32 %v5060_v11, %v12471_v24  ;;  %v7627_v24 = vld [vmem:[%s14012_s7 + $0x218] sm:$0xff]  ;;  %7603 = vmatmul.msk.f32.gmra.mxu1 %vm4808_vm3, %v5274_v13 }
 0xda3   :  { %5486 = vmatpush.msrb.mxu1 %v7627_v24 }
 0xda5   :  { %5487 = vmatpush.msrb.mxu1 %v7626_v6 }
 0xda7   :  { %5488 = vmatpush.msrb.mxu1 %v7625_v20 }
 0xda9   :  { %v5177_v34 = vpop.f32.mrf.mxu2  ;;  %v5441_v37 = vpop.f32.mrf.mxu0  ;;  %5489 = vmatpush.msrb.mxu1 %v7624_v12 }
 0xdaa   :  { %7584 = vmatmul.msk.f32.vlgmr.msra.gmra.mxu3 %vm4808_vm3, %v5177_v34  ;;  %7632 = vmatmul.msk.f32.vlgmr.msrb.gmra.mxu1 %vm4808_vm3, %v5441_v37 }
 0xdb0   :  { %v5139_v53 = vpop.f32.mrf.mxu1 }
 0xdb1   :  { %v12623_v48 = vadd.f32 %v5139_v53, %v5063_v14  ;;  %v5180_v49 = vpop.f32.mrf.mxu2  ;;  %v5444_v57 = vpop.f32.mrf.mxu0  ;;  %v7659_v14 = vld [vmem:[%s14015_s10 + $0x1a0] sm:$0xff] }
 0xdb2   :  { %7585 = vmatmul.msk.f32.gmra.mxu3 %vm4808_vm3, %v5180_v49  ;;  %7633 = vmatmul.msk.f32.gmra.mxu1 %vm4808_vm3, %v5444_v57 }
 0xdb3   :  { %5638 = vmatpush.msra.mxu0 %v7659_v14  ;;  %v5564_v14 = vld [vmem:[%s14015_s10 + $0xa8] sm:$0xff] }
 0xdb5   :  { %5639 = vmatpush.msra.mxu0 %v7657_v18  ;;  %v5555_v18 = vld [vmem:[%s14015_s10 + $0x60] sm:$0xff] }
 0xdb7   :  { %5640 = vmatpush.msra.mxu0 %v7655_v7  ;;  %v5560_v7 = vld [vmem:[%s14015_s10 + $0x88] sm:$0xff] }
 0xdb8   :  { %v5142_v27 = vpop.f32.mrf.mxu1 }
 0xdb9   :  { %v12630_v56 = vadd.f32 %v5142_v27, %v5064_v39  ;;  %v5183_v58 = vpop.f32.mrf.mxu2  ;;  %v5447_v41 = vpop.f32.mrf.mxu0  ;;  %5641 = vmatpush.msra.mxu0 %v7653_v2  ;;  %v7647_v39 = vld [vmem:[%s14015_s10 + $0x140] sm:$0xff] }
 0xdba   :  { %7586 = vmatmul.msk.f32.gmra.mxu3 %vm4808_vm3, %v5183_v58  ;;  %7634 = vmatmul.msk.f32.gmra.mxu1 %vm4808_vm3, %v5447_v41  ;;  %v5551_v2 = vld [vmem:[%s14015_s10 + $0x40] sm:$0xff] }
 0xdbb   :  { %5642 = vmatpush.msra.mxu0 %v7651_v55  ;;  %v5558_v55 = vld [vmem:[%s14015_s10 + $0x78] sm:$0xff] }
 0xdbd   :  { %5643 = vmatpush.msra.mxu0 %v7649_v5  ;;  %v5549_v5 = vld [vmem:[%s14015_s10 + $0x30] sm:$0xff] }
 0xdbf   :  { %5644 = vmatpush.msra.mxu0 %v7647_v39  ;;  %v5547_v39 = vld [vmem:[%s14015_s10 + $0x20] sm:$0xff] }
 0xdc0   :  { %v5145_v4 = vpop.f32.mrf.mxu1 }
 0xdc1   :  { %v5153_v8 = vadd.f32 %v5145_v4, %v5065_v50  ;;  %v5186_v46 = vpop.f32.mrf.mxu2  ;;  %v5450_v60 = vpop.f32.mrf.mxu0  ;;  %5645 = vmatpush.msra.mxu0 %v7645_v15  ;;  %v7639_v50 = vld [vmem:[%s14015_s10 + $0x100] sm:$0xff]  ;;  %v5545_v15 = vld [vmem:[%s14015_s10 + $0x10] sm:$0xff] }
 0xdc2   :  { %7587 = vmatmul.msk.f32.gmra.mxu3 %vm4808_vm3, %v5186_v46  ;;  %7635 = vmatmul.msk.f32.gmra.mxu1 %vm4808_vm3, %v5450_v60  ;;  %v7637_v60 = vld [vmem:[%s14014_s9 + $0x8] sm:$0xff] }
 0xdc3   :  { %5646 = vmatpush.msra.mxu0 %v7643_v63  ;;  %v5552_v63 = vld [vmem:[%s14015_s10 + $0x48] sm:$0xff] }
 0xdc5   :  { %5647 = vmatpush.msra.mxu0 %v7641_v9  ;;  %v5543_v9 = vld [vmem:[%s14015_s10] sm:$0xff] }
 0xdc7   :  { %5648 = vmatpush.msra.mxu0 %v7639_v50  ;;  %v5550_v50 = vld [vmem:[%s14015_s10 + $0x38] sm:$0xff] }
 0xdc8   :  { %v5148_v38 = vpop.f32.mrf.mxu1 }
 0xdc9   :  { %v5353_v31 = vpop.f32.mrf.mxu2  ;;  %v5154_v45 = vadd.f32 %v5148_v38, %v12585_v51  ;;  %v8040_v51 = vld [vmem:[%s14013_s8] ss:$0 sm:$0xff]  ;;  %s6740_s8 = sshll.u32 %s8069_s15, 4  ;;  %s6741_s8 = int_to_ptr.vmem [resolvable:$true] %s6740_s8 }
 0xdca   :  { %7616 = vmatmul.msk.f32.vlgmr.msrb.gmra.mxu3 %vm4808_vm3, %v5353_v31  ;;  %v5519_v31 = vld [vmem:[%s14014_s9] sm:$0xff] }
 0xdcb   :  { %v5567_v38 = vld [vmem:[%s14015_s10 + $0xc0] sm:$0xff] }
 0xdd0   :  { %v5315_v3 = vpop.f32.mrf.mxu1 }
 0xdd1   :  { %v5356_v30 = vpop.f32.mrf.mxu2 }
 0xdd2   :  { %7617 = vmatmul.msk.f32.gmra.mxu3 %vm4808_vm3, %v5356_v30  ;;  %v5573_v30 = vld [vmem:[%s14015_s10 + $0xf0] sm:$0xff] }
 0xdd9   :  { %v5359_v22 = vpop.f32.mrf.mxu2 }
 0xdda   :  { %7618 = vmatmul.msk.f32.gmra.mxu3 %vm4808_vm3, %v5359_v22  ;;  %v5571_v22 = vld [vmem:[%s14015_s10 + $0xe0] sm:$0xff] }
 0xde1   :  { %v5362_v61 = vpop.f32.mrf.mxu2 }
 0xde2   :  { %7619 = vmatmul.msk.f32.gmra.mxu3 %vm4808_vm3, %v5362_v61  ;;  %v5569_v61 = vld [vmem:[%s14015_s10 + $0xd0] sm:$0xff] }
 0xe0f   :  { %v5318_v28 = vpop.f32.mrf.mxu1 }
 0xe17   :  { %v5321_v21 = vpop.f32.mrf.mxu1 }
 0xe1f   :  { %v5324_v16 = vpop.f32.mrf.mxu1 }
 0xe27   :  { %v5491_v47 = vpop.f32.mrf.mxu1 }
 0xe2d   :  { %v5227_v36 = vpop.f32.mrf.mxu3 }
 0xe2e   :  { %v5239_v32 = vadd.f32 %v5227_v36, %v12623_v48  ;;  %v5572_v36 = vld [vmem:[%s14015_s10 + $0xe8] sm:$0xff] }
 0xe2f   :  { %v5494_v0 = vpop.f32.mrf.mxu1 }
 0xe30   :  { %v5327_v13 = vadd.f32 %v5315_v3, %v5239_v32  ;;  %v5565_v3 = vld [vmem:[%s14015_s10 + $0xb0] sm:$0xff]  ;;  %v7727_v32 = vld [vmem:[%s14015_s10 + $0x3a0] sm:$0xff] }
 0xe35   :  { %v5230_v10 = vpop.f32.mrf.mxu3 }
 0xe36   :  { %v5240_v19 = vadd.f32 %v5230_v10, %v12630_v56  ;;  %v5559_v10 = vld [vmem:[%s14015_s10 + $0x80] sm:$0xff] }
 0xe37   :  { %v5497_v11 = vpop.f32.mrf.mxu1 }
 0xe38   :  { %v5328_v42 = vadd.f32 %v5318_v28, %v5240_v19  ;;  %v5574_v28 = vld [vmem:[%s14015_s10 + $0xf8] sm:$0xff]  ;;  %v7729_v19 = vld [vmem:[%s14015_s10 + $0x3b0] sm:$0xff] }
 0xe3d   :  { %v5233_v1 = vpop.f32.mrf.mxu3 }
 0xe3e   :  { %v5241_v35 = vadd.f32 %v5233_v1, %v5153_v8  ;;  %v5562_v1 = vld [vmem:[%s14015_s10 + $0x98] sm:$0xff] }
 0xe3f   :  { %v5500_v6 = vpop.f32.mrf.mxu1 }
 0xe40   :  { %v5329_v26 = vadd.f32 %v5321_v21, %v5241_v35  ;;  %v5561_v21 = vld [vmem:[%s14015_s10 + $0x90] sm:$0xff]  ;;  %v7735_v35 = vld [vmem:[%s14015_s10 + $0x3e0] sm:$0xff] }
 0xe45   :  { %v5236_v17 = vpop.f32.mrf.mxu3 }
 0xe46   :  { %v5242_v23 = vadd.f32 %v5236_v17, %v5154_v45  ;;  %v5556_v17 = vld [vmem:[%s14015_s10 + $0x68] sm:$0xff]  ;;  %v7731_v45 = vld [vmem:[%s14015_s10 + $0x3c0] sm:$0xff] }
 0xe48   :  { %v5330_v52 = vadd.f32 %v5324_v16, %v5242_v23  ;;  %v5553_v16 = vld [vmem:[%s14015_s10 + $0x50] sm:$0xff]  ;;  %v7723_v23 = vld [vmem:[%s14015_s10 + $0x380] sm:$0xff] }
 0xe4d   :  { %v5403_v33 = vpop.f32.mrf.mxu3 }
 0xe4e   :  { %v5415_v20 = vadd.f32 %v5403_v33, %v5327_v13  ;;  %v5548_v33 = vld [vmem:[%s14015_s10 + $0x28] sm:$0xff]  ;;  %v7717_v13 = vld [vmem:[%s14015_s10 + $0x350] sm:$0xff] }
 0xe50   :  { %v5503_v27 = vadd.f32 %v5491_v47, %v5415_v20  ;;  %v5554_v47 = vld [vmem:[%s14015_s10 + $0x58] sm:$0xff] }
 0xe51   :  { %v7670_v20 = vld [vmem:[%s14015_s10 + $0x1f8] sm:$0xff] }
 0xe52   :  { %v5511_v4 = vadd.f32 %v8040_v51, %v5503_v27  ;;  %5653 = vmatpush.msra.mxu1 %v7670_v20  ;;  %v7658_v27 = vld [vmem:[%s14015_s10 + $0x198] sm:$0xff] }
 0xe53   :  { %v7714_v20 = vld [vmem:[%s14015_s10 + $0x338] sm:$0xff] }
 0xe54   :  { %v12707_v41 = vmax.f32 %v5511_v4, 0.0  ;;  %v7650_v4 = vld [vmem:[%s14015_s10 + $0x158] sm:$0xff] }
 0xe55   :  { %v5406_v62 = vpop.f32.mrf.mxu3 }
 0xe56   :  { %v5416_v40 = vadd.f32 %v5406_v62, %v5328_v42  ;;  %v5544_v62 = vld [vmem:[%s14015_s10 + $0x8] sm:$0xff]  ;;  %v7721_v42 = vld [vmem:[%s14015_s10 + $0x370] sm:$0xff] }
 0xe58   :  { %v5504_v37 = vadd.f32 %v5494_v0, %v5416_v40  ;;  %v5546_v0 = vld [vmem:[%s14015_s10 + $0x18] sm:$0xff]  ;;  %v7713_v40 = vld [vmem:[%s14015_s10 + $0x330] sm:$0xff] }
 0xe5a   :  { %v5512_v58 = vadd.f32 %v8040_v51, %v5504_v37  ;;  %v7662_v37 = vld [vmem:[%s14015_s10 + $0x1b8] sm:$0xff] }
 0xe5c   :  { %v12702_v46 = vmax.f32 %v5512_v58, 0.0  ;;  %v7652_v58 = vld [vmem:[%s14015_s10 + $0x168] sm:$0xff] }
 0xe5d   :  { %v5409_v43 = vpop.f32.mrf.mxu3 }
 0xe5e   :  { %v5417_v34 = vadd.f32 %v5409_v43, %v5329_v26  ;;  %v7733_v43 = vld [vmem:[%s14015_s10 + $0x3d0] sm:$0xff] }
 0xe5f   :  { %v7725_v26 = vld [vmem:[%s14015_s10 + $0x390] sm:$0xff] }
 0xe60   :  { %v5505_v53 = vadd.f32 %v5497_v11, %v5417_v34  ;;  %v7737_v11 = vld [vmem:[%s14015_s10 + $0x3f0] sm:$0xff]  ;;  %v7719_v34 = vld [vmem:[%s14015_s10 + $0x360] sm:$0xff] }
 0xe62   :  { %v5513_v48 = vadd.f32 %v8040_v51, %v5505_v53  ;;  %v7668_v53 = vld [vmem:[%s14015_s10 + $0x1e8] sm:$0xff] }
 0xe63   :  { %5654 = vmatpush.msra.mxu1 %v7668_v53  ;;  %v7712_v53 = vld [vmem:[%s14015_s10 + $0x328] sm:$0xff] }
 0xe64   :  { %v12697_v8 = vmax.f32 %v5513_v48, 0.0  ;;  %v7656_v48 = vld [vmem:[%s14015_s10 + $0x188] sm:$0xff] }
 0xe65   :  { %v5412_v24 = vpop.f32.mrf.mxu3 }
 0xe66   :  { %v5418_v49 = vadd.f32 %v5412_v24, %v5330_v52  ;;  %v7715_v52 = vld [vmem:[%s14015_s10 + $0x340] sm:$0xff] }
 0xe67   :  { %v7711_v24 = vld [vmem:[%s14015_s10 + $0x320] sm:$0xff] }
 0xe68   :  { %v5506_v12 = vadd.f32 %v5500_v6, %v5418_v49  ;;  %v7709_v6 = vld [vmem:[%s14015_s10 + $0x310] sm:$0xff]  ;;  %v7666_v49 = vld [vmem:[%s14015_s10 + $0x1d8] sm:$0xff] }
 0xe69   :  { %5655 = vmatpush.msra.mxu1 %v7666_v49  ;;  %v7710_v49 = vld [vmem:[%s14015_s10 + $0x318] sm:$0xff] }
 0xe6a   :  { %v5514_v56 = vadd.f32 %v8040_v51, %v5506_v12  ;;  %v7664_v51 = vld [vmem:[%s14015_s10 + $0x1c8] sm:$0xff] }
 0xe6b   :  { %5656 = vmatpush.msra.mxu1 %v7664_v51  ;;  %v7660_v12 = vld [vmem:[%s14015_s10 + $0x1a8] sm:$0xff] }
 0xe6c   :  { %v12695_v57 = vmax.f32 %v5514_v56, 0.0  ;;  %v7654_v56 = vld [vmem:[%s14015_s10 + $0x178] sm:$0xff]  ;;  %v7708_v51 = vld [vmem:[%s14015_s10 + $0x308] sm:$0xff] }
 0xe6d   :  { %5657 = vmatpush.msra.mxu1 %v7662_v37  ;;  %v7805_v37 = vld [vmem:[%s14015_s10 + $0x5f0] sm:$0xff] }
 0xe6e   :  { %5535 = vmatpush.msra.mxu2 %v12695_v57  ;;  %5592 = vmatpush.msra.mxu3 %v12695_v57 }
 0xe6f   :  { %5730 = vmatpush.msrb.mxu0 %v12695_v57  ;;  %5658 = vmatpush.msra.mxu1 %v7660_v12  ;;  %v7803_v12 = vld [vmem:[%s14015_s10 + $0x5e0] sm:$0xff] }
 0xe70   :  { %5536 = vmatpush.msra.mxu2 %v12697_v8  ;;  %5593 = vmatpush.msra.mxu3 %v12697_v8 }
 0xe71   :  { %5731 = vmatpush.msrb.mxu0 %v12697_v8  ;;  %5659 = vmatpush.msra.mxu1 %v7658_v27  ;;  %v7801_v27 = vld [vmem:[%s14015_s10 + $0x5d0] sm:$0xff] }
 0xe72   :  { %5537 = vmatpush.msra.mxu2 %v12702_v46  ;;  %5594 = vmatpush.msra.mxu3 %v12702_v46 }
 0xe73   :  { %5732 = vmatpush.msrb.mxu0 %v12702_v46  ;;  %5660 = vmatpush.msra.mxu1 %v7656_v48  ;;  %v7799_v48 = vld [vmem:[%s14015_s10 + $0x5c0] sm:$0xff] }
 0xe74   :  { %5538 = vmatpush.msra.mxu2 %v12707_v41  ;;  %5595 = vmatpush.msra.mxu3 %v12707_v41 }
 0xe75   :  { %5733 = vmatpush.msrb.mxu0 %v12707_v41  ;;  %7636 = vmatmul.msk.f32.vlgmr.msra.gmra.mxu2 %vm1248_vm2, %v5519_v31  ;;  %v7648_v31 = vld [vmem:[%s14015_s10 + $0x148] sm:$0xff] }
 0xe76   :  { %7638 = vmatmul.msk.f32.vlgmr.msra.gmra.mxu3 %vm1248_vm2, %v7637_v60  ;;  %5673 = vmatpush.msrb.mxu2 %v5573_v30  ;;  %v7646_v60 = vld [vmem:[%s14015_s10 + $0x138] sm:$0xff]  ;;  %v7644_v30 = vld [vmem:[%s14015_s10 + $0x128] sm:$0xff] }
 0xe77   :  { %5693 = vmatpush.msrb.mxu3 %v5574_v28  ;;  %5661 = vmatpush.msra.mxu1 %v7654_v56  ;;  %v7703_v28 = vld [vmem:[%s14015_s10 + $0x2f0] sm:$0xff] }
 0xe78   :  { %5674 = vmatpush.msrb.mxu2 %v5571_v22  ;;  %v7642_v22 = vld [vmem:[%s14015_s10 + $0x118] sm:$0xff]  ;;  %v7797_v56 = vld [vmem:[%s14015_s10 + $0x5b0] sm:$0xff] }
 0xe79   :  { %5694 = vmatpush.msrb.mxu3 %v5572_v36  ;;  %5662 = vmatpush.msra.mxu1 %v7652_v58  ;;  %v7795_v58 = vld [vmem:[%s14015_s10 + $0x5a0] sm:$0xff] }
 0xe7a   :  { %5675 = vmatpush.msrb.mxu2 %v5569_v61  ;;  %v7707_v61 = vld [vmem:[%s14015_s10 + $0x300] sm:$0xff] }
 0xe7b   :  { %5695 = vmatpush.msrb.mxu3 %v5570_v25  ;;  %5663 = vmatpush.msra.mxu1 %v7650_v4  ;;  %v7699_v25 = vld [vmem:[%s14015_s10 + $0x2d0] sm:$0xff] }
 0xe7c   :  { %5676 = vmatpush.msrb.mxu2 %v5567_v38  ;;  %v7640_v38 = vld [vmem:[%s14015_s10 + $0x108] sm:$0xff]  ;;  %v7793_v4 = vld [vmem:[%s14015_s10 + $0x590] sm:$0xff] }
 0xe7d   :  { %5696 = vmatpush.msrb.mxu3 %v5568_v29  ;;  %5664 = vmatpush.msra.mxu1 %v7648_v31  ;;  %v7705_v29 = vld [vmem:[%s14014_s9 + $0x18] sm:$0xff]  ;;  %v7791_v31 = vld [vmem:[%s14015_s10 + $0x580] sm:$0xff] }
 0xe7e   :  { %5677 = vmatpush.msrb.mxu2 %v5565_v3 }
 0xe7f   :  { %5697 = vmatpush.msrb.mxu3 %v5566_v59  ;;  %5665 = vmatpush.msra.mxu1 %v7646_v60  ;;  %v7695_v59 = vld [vmem:[%s14015_s10 + $0x2b0] sm:$0xff]  ;;  %v7682_v60 = vld [vmem:[%s14015_s10 + $0x248] sm:$0xff] }
 0xe80   :  { %5678 = vmatpush.msrb.mxu2 %v5563_v54  ;;  %v7701_v54 = vld [vmem:[%s14015_s10 + $0x2e0] sm:$0xff] }
 0xe81   :  { %5698 = vmatpush.msrb.mxu3 %v5564_v14  ;;  %5666 = vmatpush.msra.mxu1 %v7644_v30  ;;  %v7736_v14 = vld [vmem:[%s14015_s10 + $0x3e8] sm:$0xff]  ;;  %v7789_v30 = vld [vmem:[%s14015_s10 + $0x570] sm:$0xff] }
 0xe82   :  { %5679 = vmatpush.msrb.mxu2 %v5561_v21  ;;  %v7697_v21 = vld [vmem:[%s14015_s10 + $0x2c0] sm:$0xff] }
 0xe83   :  { %5699 = vmatpush.msrb.mxu3 %v5562_v1  ;;  %5667 = vmatpush.msra.mxu1 %v7642_v22  ;;  %v7734_v1 = vld [vmem:[%s14015_s10 + $0x3d8] sm:$0xff] }
 0xe84   :  { %5680 = vmatpush.msrb.mxu2 %v5559_v10  ;;  %v7671_v10 = vld [vmem:[%s14014_s9 + $0x10] sm:$0xff]  ;;  %v7680_v22 = vld [vmem:[%s14015_s10 + $0x238] sm:$0xff] }
 0xe85   :  { %5700 = vmatpush.msrb.mxu3 %v5560_v7  ;;  %5668 = vmatpush.msra.mxu1 %v7640_v38  ;;  %v7704_v7 = vld [vmem:[%s14015_s10 + $0x2f8] sm:$0xff]  ;;  %v7678_v38 = vld [vmem:[%s14015_s10 + $0x228] sm:$0xff] }
 0xe86   :  { %5681 = vmatpush.msrb.mxu2 %v5557_v44  ;;  %v7738_v44 = vld [vmem:[%s14015_s10 + $0x3f8] sm:$0xff] }
 0xe87   :  { %5701 = vmatpush.msrb.mxu3 %v5558_v55  ;;  %5791 = vmatpush.msrb.mxu1 %v7704_v7  ;;  %v7702_v55 = vld [vmem:[%s14015_s10 + $0x2e8] sm:$0xff]  ;;  %v7767_v7 = vld [vmem:[%s14015_s10 + $0x4d0] sm:$0xff] }
 0xe88   :  { %5682 = vmatpush.msrb.mxu2 %v5555_v18  ;;  %v7693_v18 = vld [vmem:[%s14015_s10 + $0x2a0] sm:$0xff] }
 0xe89   :  { %5702 = vmatpush.msrb.mxu3 %v5556_v17  ;;  %v7700_v17 = vld [vmem:[%s14015_s10 + $0x2d8] sm:$0xff]  ;;  %5792 = vmatpush.msrb.mxu1 %v7702_v55  ;;  %v7765_v55 = vld [vmem:[%s14015_s10 + $0x4c0] sm:$0xff] }
 0xe8a   :  { %5683 = vmatpush.msrb.mxu2 %v5553_v16  ;;  %v7691_v16 = vld [vmem:[%s14015_s10 + $0x290] sm:$0xff] }
 0xe8b   :  { %5703 = vmatpush.msrb.mxu3 %v5554_v47  ;;  %v7687_v47 = vld [vmem:[%s14015_s10 + $0x270] sm:$0xff]  ;;  %5793 = vmatpush.msrb.mxu1 %v7700_v17 }
 0xe8c   :  { %5684 = vmatpush.msrb.mxu2 %v5551_v2  ;;  %v7732_v2 = vld [vmem:[%s14015_s10 + $0x3c8] sm:$0xff]  ;;  %v7763_v17 = vld [vmem:[%s14015_s10 + $0x4b0] sm:$0xff] }
 0xe8d   :  { %5704 = vmatpush.msrb.mxu3 %v5552_v63  ;;  %v7728_v63 = vld [vmem:[%s14015_s10 + $0x3a8] sm:$0xff] }
 0xe8e   :  { %5685 = vmatpush.msrb.mxu2 %v5549_v5  ;;  %v7689_v5 = vld [vmem:[%s14015_s10 + $0x280] sm:$0xff] }
 0xe8f   :  { %5705 = vmatpush.msrb.mxu3 %v5550_v50  ;;  %v7696_v50 = vld [vmem:[%s14015_s10 + $0x2b8] sm:$0xff] }
 0xe90   :  { %5686 = vmatpush.msrb.mxu2 %v5547_v39  ;;  %v7730_v39 = vld [vmem:[%s14015_s10 + $0x3b8] sm:$0xff] }
 0xe91   :  { %5706 = vmatpush.msrb.mxu3 %v5548_v33  ;;  %v7726_v33 = vld [vmem:[%s14015_s10 + $0x398] sm:$0xff] }
 0xe92   :  { %5687 = vmatpush.msrb.mxu2 %v5545_v15  ;;  %v7698_v15 = vld [vmem:[%s14015_s10 + $0x2c8] sm:$0xff] }
 0xe93   :  { %5707 = vmatpush.msrb.mxu3 %v5546_v0  ;;  %5794 = vmatpush.msrb.mxu1 %v7698_v15  ;;  %v7683_v0 = vld [vmem:[%s14015_s10 + $0x250] sm:$0xff]  ;;  %v7761_v15 = vld [vmem:[%s14015_s10 + $0x4a0] sm:$0xff] }
 0xe94   :  { %5688 = vmatpush.msrb.mxu2 %v5543_v9  ;;  %v7685_v9 = vld [vmem:[%s14015_s10 + $0x260] sm:$0xff] }
 0xe95   :  { %5708 = vmatpush.msrb.mxu3 %v5544_v62  ;;  %v7694_v62 = vld [vmem:[%s14015_s10 + $0x2a8] sm:$0xff]  ;;  %5795 = vmatpush.msrb.mxu1 %v7696_v50 }
 0xe96   :  { %5830 = vmatpush.msra.mxu2 %v12695_v57  ;;  %v7804_v50 = vld [vmem:[%s14015_s10 + $0x5e8] sm:$0xff] }
 0xe97   :  { %5871 = vmatpush.msra.mxu3 %v7737_v11  ;;  %v7724_v11 = vld [vmem:[%s14015_s10 + $0x388] sm:$0xff]  ;;  %5796 = vmatpush.msrb.mxu1 %v7694_v62 }
 0xe98   :  { %5831 = vmatpush.msra.mxu2 %v12697_v8  ;;  %v7766_v62 = vld [vmem:[%s14015_s10 + $0x4c8] sm:$0xff] }
 0xe99   :  { %5872 = vmatpush.msra.mxu3 %v7735_v35  ;;  %v7681_v35 = vld [vmem:[%s14015_s10 + $0x240] sm:$0xff] }
 0xe9a   :  { %5832 = vmatpush.msra.mxu2 %v12702_v46 }
 0xe9b   :  { %5873 = vmatpush.msra.mxu3 %v7733_v43  ;;  %v7692_v43 = vld [vmem:[%s14015_s10 + $0x298] sm:$0xff] }
 0xe9c   :  { %5833 = vmatpush.msra.mxu2 %v12707_v41  ;;  %5797 = vmatpush.msrb.mxu1 %v7692_v43  ;;  %v7764_v43 = vld [vmem:[%s14015_s10 + $0x4b8] sm:$0xff] }
 0xe9d   :  { %5874 = vmatpush.msra.mxu3 %v7731_v45  ;;  %v7722_v45 = vld [vmem:[%s14015_s10 + $0x378] sm:$0xff] }
 0xe9f   :  { %5875 = vmatpush.msra.mxu3 %v7729_v19  ;;  %v7679_v19 = vld [vmem:[%s14015_s10 + $0x230] sm:$0xff] }
 0xea1   :  { %5876 = vmatpush.msra.mxu3 %v7727_v32  ;;  %v7690_v32 = vld [vmem:[%s14015_s10 + $0x288] sm:$0xff] }
 0xea2   :  { %5798 = vmatpush.msrb.mxu1 %v7690_v32  ;;  %v7762_v32 = vld [vmem:[%s14015_s10 + $0x4a8] sm:$0xff] }
 0xea3   :  { %5877 = vmatpush.msra.mxu3 %v7725_v26  ;;  %v7720_v26 = vld [vmem:[%s14015_s10 + $0x368] sm:$0xff] }
 0xea5   :  { %5878 = vmatpush.msra.mxu3 %v7723_v23  ;;  %v7677_v23 = vld [vmem:[%s14015_s10 + $0x220] sm:$0xff] }
 0xea7   :  { %5879 = vmatpush.msra.mxu3 %v7721_v42  ;;  %v7688_v42 = vld [vmem:[%s14015_s10 + $0x278] sm:$0xff] }
 0xea8   :  { %5799 = vmatpush.msrb.mxu1 %v7688_v42  ;;  %v7760_v42 = vld [vmem:[%s14015_s10 + $0x498] sm:$0xff] }
 0xea9   :  { %5880 = vmatpush.msra.mxu3 %v7719_v34  ;;  %v7718_v34 = vld [vmem:[%s14015_s10 + $0x358] sm:$0xff] }
 0xeab   :  { %5881 = vmatpush.msra.mxu3 %v7717_v13  ;;  %v7675_v13 = vld [vmem:[%s14015_s10 + $0x210] sm:$0xff] }
 0xead   :  { %5882 = vmatpush.msra.mxu3 %v7715_v52  ;;  %v7686_v52 = vld [vmem:[%s14015_s10 + $0x268] sm:$0xff] }
 0xeae   :  { %5800 = vmatpush.msrb.mxu1 %v7686_v52  ;;  %v7749_v52 = vld [vmem:[%s14015_s10 + $0x440] sm:$0xff] }
 0xeaf   :  { %5883 = vmatpush.msra.mxu3 %v7713_v40  ;;  %v7716_v40 = vld [vmem:[%s14015_s10 + $0x348] sm:$0xff] }
 0xeb1   :  { %5884 = vmatpush.msra.mxu3 %v7711_v24  ;;  %v7673_v24 = vld [vmem:[%s14015_s10 + $0x200] sm:$0xff] }
 0xeb3   :  { %5885 = vmatpush.msra.mxu3 %v7709_v6  ;;  %v7684_v6 = vld [vmem:[%s14015_s10 + $0x258] sm:$0xff] }
 0xeb4   :  { %5801 = vmatpush.msrb.mxu1 %v7684_v6  ;;  %v7754_v6 = vld [vmem:[%s14015_s10 + $0x468] sm:$0xff] }
 0xeb5   :  { %5886 = vmatpush.msra.mxu3 %v7707_v61  ;;  %v7787_v61 = vld [vmem:[%s14015_s10 + $0x560] sm:$0xff] }
 0xeb6   :  { %5802 = vmatpush.msrb.mxu1 %v7682_v60  ;;  %v7742_v60 = vld [vmem:[%s14015_s10 + $0x408] sm:$0xff] }
 0xeb8   :  { %5803 = vmatpush.msrb.mxu1 %v7680_v22  ;;  %v7786_v22 = vld [vmem:[%s14015_s10 + $0x558] sm:$0xff] }
 0xeba   :  { %5804 = vmatpush.msrb.mxu1 %v7678_v38  ;;  %v7782_v38 = vld [vmem:[%s14015_s10 + $0x538] sm:$0xff] }
 0xef8   :  { %v5540_v3 = vpop.f32.mrf.mxu2 }
 0xef9   :  { %v5597_v36 = vpop.f32.mrf.mxu3  ;;  %5689 = vmatmul.f32.vlgmr.msrb.gmra.mxu2 %v5540_v3  ;;  %5709 = vmatmul.f32.vlgmr.msrb.gmra.mxu3 %v5540_v3  ;;  %v7785_v3 = vld [vmem:[%s14015_s10 + $0x550] sm:$0xff] }
 0xefa   :  { %5649 = vmatmul.f32.vlgmr.msra.gmra.mxu0 %v5597_v36  ;;  %6030 = vmatpush.msrb.mxu3 %v12695_v57 }
 0xefb   :  { %5771 = vmatpush.msra.mxu0 %v7703_v28  ;;  %5669 = vmatmul.f32.vlgmr.msra.gmra.mxu1 %v5597_v36  ;;  %v7676_v28 = vld [vmem:[%s14015_s10 + $0x218] sm:$0xff]  ;;  %v7783_v36 = vld [vmem:[%s14015_s10 + $0x540] sm:$0xff] }
 0xefc   :  { %6031 = vmatpush.msrb.mxu3 %v12697_v8  ;;  %5891 = vmatpush.msrb.mxu2 %v7738_v44 }
 0xefd   :  { %5772 = vmatpush.msra.mxu0 %v7701_v54  ;;  %5805 = vmatpush.msrb.mxu1 %v7676_v28  ;;  %v7674_v54 = vld [vmem:[%s14015_s10 + $0x208] sm:$0xff]  ;;  %v7778_v28 = vld [vmem:[%s14015_s10 + $0x518] sm:$0xff] }
 0xefe   :  { %6032 = vmatpush.msrb.mxu3 %v12702_v46  ;;  %5892 = vmatpush.msrb.mxu2 %v7736_v14 }
 0xeff   :  { %5773 = vmatpush.msra.mxu0 %v7699_v25  ;;  %v7781_v25 = vld [vmem:[%s14015_s10 + $0x530] sm:$0xff]  ;;  %5806 = vmatpush.msrb.mxu1 %v7674_v54 }
 0xf00   :  { %6033 = vmatpush.msrb.mxu3 %v12707_v41  ;;  %5893 = vmatpush.msrb.mxu2 %v7734_v1 }
 0xf01   :  { %5774 = vmatpush.msra.mxu0 %v7697_v21  ;;  %7706 = vmatmul.msk.f32.vlgmr.msra.gmra.mxu2 %vm1248_vm2, %v7705_v29  ;;  %v7779_v21 = vld [vmem:[%s14015_s10 + $0x520] sm:$0xff]  ;;  %v7777_v29 = vld [vmem:[%s14015_s10 + $0x510] sm:$0xff] }
 0xf02   :  { %7672 = vmatmul.msk.f32.vlgmr.msrb.gmra.mxu0 %vm1248_vm2, %v7671_v10  ;;  %5894 = vmatpush.msrb.mxu2 %v7732_v2  ;;  %v7775_v10 = vld [vmem:[%s14015_s10 + $0x500] sm:$0xff] }
 0xf03   :  { %5775 = vmatpush.msra.mxu0 %v7695_v59 }
 0xf04   :  { %5895 = vmatpush.msrb.mxu2 %v7730_v39  ;;  %v7772_v39 = vld [vmem:[%s14015_s10 + $0x4f8] sm:$0xff] }
 0xf05   :  { %5776 = vmatpush.msra.mxu0 %v7693_v18  ;;  %v7771_v18 = vld [vmem:[%s14015_s10 + $0x4f0] sm:$0xff]  ;;  %5991 = vmatpush.msra.mxu1 %v7772_v39 }
 0xf06   :  { %5896 = vmatpush.msrb.mxu2 %v7728_v63  ;;  %v7806_v63 = vld [vmem:[%s14015_s10 + $0x5f8] sm:$0xff]  ;;  %v7873_v39 = vld [vmem:[%s14015_s10 + $0x7f0] sm:$0xff] }
 0xf07   :  { %5777 = vmatpush.msra.mxu0 %v7691_v16  ;;  %v7769_v16 = vld [vmem:[%s14015_s10 + $0x4e0] sm:$0xff] }
 0xf08   :  { %5897 = vmatpush.msrb.mxu2 %v7726_v33  ;;  %v7759_v33 = vld [vmem:[%s14015_s10 + $0x490] sm:$0xff] }
 0xf09   :  { %5778 = vmatpush.msra.mxu0 %v7689_v5  ;;  %v7739_v5 = vld [vmem:[%s14014_s9 + $0x20] sm:$0xff] }
 0xf0a   :  { %5898 = vmatpush.msrb.mxu2 %v7724_v11  ;;  %v7757_v11 = vld [vmem:[%s14015_s10 + $0x480] sm:$0xff] }
 0xf0b   :  { %5779 = vmatpush.msra.mxu0 %v7687_v47  ;;  %v7770_v47 = vld [vmem:[%s14015_s10 + $0x4e8] sm:$0xff] }
 0xf0c   :  { %5899 = vmatpush.msrb.mxu2 %v7722_v45  ;;  %5992 = vmatpush.msra.mxu1 %v7770_v47  ;;  %v7755_v45 = vld [vmem:[%s14015_s10 + $0x470] sm:$0xff] }
 0xf0d   :  { %5780 = vmatpush.msra.mxu0 %v7685_v9  ;;  %v7768_v9 = vld [vmem:[%s14015_s10 + $0x4d8] sm:$0xff]  ;;  %v7827_v47 = vld [vmem:[%s14015_s10 + $0x690] sm:$0xff] }
 0xf0e   :  { %5900 = vmatpush.msrb.mxu2 %v7720_v26  ;;  %5993 = vmatpush.msra.mxu1 %v7768_v9  ;;  %v7753_v26 = vld [vmem:[%s14015_s10 + $0x460] sm:$0xff]  ;;  %v7874_v9 = vld [vmem:[%s14015_s10 + $0x7f8] sm:$0xff] }
 0xf0f   :  { %5781 = vmatpush.msra.mxu0 %v7683_v0  ;;  %v7773_v0 = vld [vmem:[%s14014_s9 + $0x28] sm:$0xff] }
 0xf10   :  { %5901 = vmatpush.msrb.mxu2 %v7718_v34  ;;  %5994 = vmatpush.msra.mxu1 %v7766_v62  ;;  %v7751_v34 = vld [vmem:[%s14015_s10 + $0x450] sm:$0xff]  ;;  %v7872_v62 = vld [vmem:[%s14015_s10 + $0x7e8] sm:$0xff] }
 0xf11   :  { %5782 = vmatpush.msra.mxu0 %v7681_v35  ;;  %v7802_v35 = vld [vmem:[%s14015_s10 + $0x5d8] sm:$0xff] }
 0xf12   :  { %5902 = vmatpush.msrb.mxu2 %v7716_v40  ;;  %5995 = vmatpush.msra.mxu1 %v7764_v43  ;;  %v7756_v40 = vld [vmem:[%s14015_s10 + $0x478] sm:$0xff]  ;;  %v7821_v43 = vld [vmem:[%s14015_s10 + $0x660] sm:$0xff] }
 0xf13   :  { %5783 = vmatpush.msra.mxu0 %v7679_v19  ;;  %v7800_v19 = vld [vmem:[%s14015_s10 + $0x5c8] sm:$0xff] }
 0xf14   :  { %5903 = vmatpush.msrb.mxu2 %v7714_v20  ;;  %5996 = vmatpush.msra.mxu1 %v7762_v32  ;;  %v7745_v20 = vld [vmem:[%s14015_s10 + $0x420] sm:$0xff]  ;;  %v7819_v32 = vld [vmem:[%s14015_s10 + $0x650] sm:$0xff] }
 0xf15   :  { %5784 = vmatpush.msra.mxu0 %v7677_v23  ;;  %v7798_v23 = vld [vmem:[%s14015_s10 + $0x5b8] sm:$0xff] }
 0xf16   :  { %5904 = vmatpush.msrb.mxu2 %v7712_v53  ;;  %5997 = vmatpush.msra.mxu1 %v7760_v42  ;;  %v7752_v53 = vld [vmem:[%s14015_s10 + $0x458] sm:$0xff] }
 0xf17   :  { %5785 = vmatpush.msra.mxu0 %v7675_v13  ;;  %v7758_v13 = vld [vmem:[%s14015_s10 + $0x488] sm:$0xff]  ;;  %v7824_v42 = vld [vmem:[%s14015_s10 + $0x678] sm:$0xff] }
 0xf18   :  { %5905 = vmatpush.msrb.mxu2 %v7710_v49  ;;  %5998 = vmatpush.msra.mxu1 %v7758_v13  ;;  %v7743_v49 = vld [vmem:[%s14015_s10 + $0x410] sm:$0xff]  ;;  %v7822_v13 = vld [vmem:[%s14015_s10 + $0x668] sm:$0xff] }
 0xf19   :  { %5786 = vmatpush.msra.mxu0 %v7673_v24  ;;  %v7747_v24 = vld [vmem:[%s14015_s10 + $0x430] sm:$0xff] }
 0xf1a   :  { %5906 = vmatpush.msrb.mxu2 %v7708_v51  ;;  %5999 = vmatpush.msra.mxu1 %v7756_v40  ;;  %v7741_v51 = vld [vmem:[%s14015_s10 + $0x400] sm:$0xff]  ;;  %v7820_v40 = vld [vmem:[%s14015_s10 + $0x658] sm:$0xff] }
 0xf1b   :  { %5930 = vmatpush.msrb.mxu0 %v12695_v57 }
 0xf1c   :  { %6071 = vmatpush.msra.mxu2 %v7805_v37  ;;  %6000 = vmatpush.msra.mxu1 %v7754_v6  ;;  %v7750_v37 = vld [vmem:[%s14015_s10 + $0x448] sm:$0xff]  ;;  %v7809_v6 = vld [vmem:[%s14015_s10 + $0x600] sm:$0xff] }
 0xf1d   :  { %5931 = vmatpush.msrb.mxu0 %v12697_v8 }
 0xf1e   :  { %6072 = vmatpush.msra.mxu2 %v7803_v12  ;;  %6001 = vmatpush.msra.mxu1 %v7752_v53  ;;  %v7796_v12 = vld [vmem:[%s14015_s10 + $0x5a8] sm:$0xff]  ;;  %v7869_v53 = vld [vmem:[%s14015_s10 + $0x7d0] sm:$0xff] }
 0xf1f   :  { %5932 = vmatpush.msrb.mxu0 %v12702_v46 }
 0xf20   :  { %6073 = vmatpush.msra.mxu2 %v7801_v27  ;;  %6002 = vmatpush.msra.mxu1 %v7750_v37  ;;  %v7748_v27 = vld [vmem:[%s14015_s10 + $0x438] sm:$0xff] }
 0xf21   :  { %5933 = vmatpush.msrb.mxu0 %v12707_v41  ;;  %v7866_v37 = vld [vmem:[%s14015_s10 + $0x7b8] sm:$0xff] }
 0xf22   :  { %6074 = vmatpush.msra.mxu2 %v7799_v48  ;;  %v7794_v48 = vld [vmem:[%s14015_s10 + $0x598] sm:$0xff]  ;;  %6003 = vmatpush.msra.mxu1 %v7748_v27  ;;  %v7863_v27 = vld [vmem:[%s14015_s10 + $0x7a0] sm:$0xff] }
 0xf24   :  { %6075 = vmatpush.msra.mxu2 %v7797_v56  ;;  %v7746_v56 = vld [vmem:[%s14015_s10 + $0x428] sm:$0xff] }
 0xf25   :  { %6004 = vmatpush.msra.mxu1 %v7746_v56  ;;  %v7810_v56 = vld [vmem:[%s14015_s10 + $0x608] sm:$0xff] }
 0xf26   :  { %6076 = vmatpush.msra.mxu2 %v7795_v58  ;;  %v7792_v58 = vld [vmem:[%s14015_s10 + $0x588] sm:$0xff] }
 0xf28   :  { %6077 = vmatpush.msra.mxu2 %v7793_v4  ;;  %v7744_v4 = vld [vmem:[%s14015_s10 + $0x418] sm:$0xff] }
 0xf29   :  { %6005 = vmatpush.msra.mxu1 %v7744_v4  ;;  %v7862_v4 = vld [vmem:[%s14015_s10 + $0x798] sm:$0xff] }
 0xf2a   :  { %6078 = vmatpush.msra.mxu2 %v7791_v31  ;;  %v7790_v31 = vld [vmem:[%s14015_s10 + $0x578] sm:$0xff] }
 0xf2b   :  { %6006 = vmatpush.msra.mxu1 %v7742_v60  ;;  %v7860_v60 = vld [vmem:[%s14015_s10 + $0x788] sm:$0xff] }
 0xf2c   :  { %6079 = vmatpush.msra.mxu2 %v7789_v30  ;;  %v7788_v30 = vld [vmem:[%s14015_s10 + $0x568] sm:$0xff] }
 0xf2e   :  { %6080 = vmatpush.msra.mxu2 %v7787_v61  ;;  %v7784_v61 = vld [vmem:[%s14015_s10 + $0x548] sm:$0xff] }
 0xf30   :  { %6081 = vmatpush.msra.mxu2 %v7785_v3  ;;  %v7780_v3 = vld [vmem:[%s14015_s10 + $0x528] sm:$0xff] }
 0xf32   :  { %6082 = vmatpush.msra.mxu2 %v7783_v36  ;;  %v7776_v36 = vld [vmem:[%s14015_s10 + $0x508] sm:$0xff] }
 0xf34   :  { %6083 = vmatpush.msra.mxu2 %v7781_v25 }
 0xf36   :  { %6084 = vmatpush.msra.mxu2 %v7779_v21 }
 0xf38   :  { %6085 = vmatpush.msra.mxu2 %v7777_v29  ;;  %v7839_v29 = vld [vmem:[%s14015_s10 + $0x6f0] sm:$0xff] }
 0xf3a   :  { %6086 = vmatpush.msra.mxu2 %v7775_v10 }
 0xf77   :  { %v5650_v59 = vpop.f32.mrf.mxu0 }
 0xf7c   :  { %v5690_v44 = vpop.f32.mrf.mxu2  ;;  %v13290_v21 = vpop.f32.mrf.mxu3 }
 0xf7d   :  { %v13127_v14 = vadd.f32 %v5690_v44, %v5650_v59  ;;  %v7837_v59 = vld [vmem:[%s14015_s10 + $0x6e0] sm:$0xff] }
 0xf7f   :  { %v5735_v1 = vpop.f32.mrf.mxu0 }
 0xf80   :  { %5787 = vmatmul.f32.vlgmr.msra.gmra.mxu0 %v5735_v1  ;;  %5807 = vmatmul.f32.vlgmr.msrb.gmra.mxu1 %v5735_v1  ;;  %v7833_v1 = vld [vmem:[%s14015_s10 + $0x6c0] sm:$0xff] }
 0xf81   :  { %5971 = vmatpush.msra.mxu0 %v7771_v18  ;;  %v7835_v18 = vld [vmem:[%s14015_s10 + $0x6d0] sm:$0xff] }
 0xf83   :  { %5972 = vmatpush.msra.mxu0 %v7769_v16  ;;  %v7807_v16 = vld [vmem:[%s14014_s9 + $0x30] sm:$0xff] }
 0xf84   :  { %v5835_v2 = vpop.f32.mrf.mxu2 }
 0xf85   :  { %5973 = vmatpush.msra.mxu0 %v7767_v7  ;;  %5887 = vmatmul.f32.vlgmr.msra.gmra.mxu3 %v5835_v2  ;;  %v7831_v7 = vld [vmem:[%s14015_s10 + $0x6b0] sm:$0xff] }
 0xf86   :  { %5907 = vmatmul.f32.vlgmr.msrb.gmra.mxu2 %v5835_v2  ;;  %6091 = vmatpush.msra.mxu3 %v7806_v63  ;;  %v7840_v2 = vld [vmem:[%s14015_s10 + $0x6f8] sm:$0xff] }
 0xf87   :  { %5974 = vmatpush.msra.mxu0 %v7765_v55  ;;  %6230 = vmatpush.msrb.mxu2 %v12695_v57  ;;  %v7838_v55 = vld [vmem:[%s14015_s10 + $0x6e8] sm:$0xff] }
 0xf88   :  { %7740 = vmatmul.msk.f32.vlgmr.msrb.gmra.mxu0 %vm1248_vm2, %v7739_v5  ;;  %6092 = vmatpush.msra.mxu3 %v7804_v50  ;;  %v7829_v5 = vld [vmem:[%s14015_s10 + $0x6a0] sm:$0xff] }
 0xf89   :  { %5975 = vmatpush.msra.mxu0 %v7763_v17  ;;  %6231 = vmatpush.msrb.mxu2 %v12697_v8  ;;  %v7836_v17 = vld [vmem:[%s14015_s10 + $0x6d8] sm:$0xff]  ;;  %v7871_v50 = vld [vmem:[%s14015_s10 + $0x7e0] sm:$0xff] }
 0xf8a   :  { %6093 = vmatpush.msra.mxu3 %v7802_v35  ;;  %6191 = vmatpush.msrb.mxu1 %v7840_v2  ;;  %v7830_v35 = vld [vmem:[%s14015_s10 + $0x6a8] sm:$0xff]  ;;  %v7905_v2 = vld [vmem:[%s14015_s10 + $0x8e0] sm:$0xff] }
 0xf8b   :  { %5976 = vmatpush.msra.mxu0 %v7761_v15  ;;  %6232 = vmatpush.msrb.mxu2 %v12702_v46  ;;  %v7834_v15 = vld [vmem:[%s14015_s10 + $0x6c8] sm:$0xff] }
 0xf8c   :  { %6094 = vmatpush.msra.mxu3 %v7800_v19  ;;  %6192 = vmatpush.msrb.mxu1 %v7838_v55  ;;  %v7841_v19 = vld [vmem:[%s14014_s9 + $0x38] sm:$0xff]  ;;  %v7903_v55 = vld [vmem:[%s14015_s10 + $0x8d0] sm:$0xff] }
 0xf8d   :  { %5977 = vmatpush.msra.mxu0 %v7759_v33  ;;  %6233 = vmatpush.msrb.mxu2 %v12707_v41  ;;  %v7825_v33 = vld [vmem:[%s14015_s10 + $0x680] sm:$0xff] }
 0xf8e   :  { %7774 = vmatmul.msk.f32.vlgmr.msrb.gmra.mxu3 %vm1248_vm2, %v7773_v0  ;;  %6193 = vmatpush.msrb.mxu1 %v7836_v17  ;;  %v7832_v0 = vld [vmem:[%s14015_s10 + $0x6b8] sm:$0xff] }
 0xf8f   :  { %5978 = vmatpush.msra.mxu0 %v7757_v11  ;;  %6095 = vmatpush.msra.mxu3 %v7798_v23  ;;  %v7823_v11 = vld [vmem:[%s14015_s10 + $0x670] sm:$0xff]  ;;  %v7817_v23 = vld [vmem:[%s14015_s10 + $0x640] sm:$0xff] }
 0xf90   :  { %6194 = vmatpush.msrb.mxu1 %v7834_v15  ;;  %v7897_v15 = vld [vmem:[%s14015_s10 + $0x8a0] sm:$0xff] }
 0xf91   :  { %5979 = vmatpush.msra.mxu0 %v7755_v45  ;;  %6096 = vmatpush.msra.mxu3 %v7796_v12  ;;  %v7828_v45 = vld [vmem:[%s14015_s10 + $0x698] sm:$0xff] }
 0xf92   :  { %6195 = vmatpush.msrb.mxu1 %v7832_v0  ;;  %v7812_v12 = vld [vmem:[%s14015_s10 + $0x618] sm:$0xff]  ;;  %v7891_v0 = vld [vmem:[%s14015_s10 + $0x870] sm:$0xff] }
 0xf93   :  { %5980 = vmatpush.msra.mxu0 %v7753_v26  ;;  %6097 = vmatpush.msra.mxu3 %v7794_v48  ;;  %v7826_v26 = vld [vmem:[%s14015_s10 + $0x688] sm:$0xff] }
 0xf94   :  { %6196 = vmatpush.msrb.mxu1 %v7830_v35  ;;  %v7864_v48 = vld [vmem:[%s14015_s10 + $0x7a8] sm:$0xff]  ;;  %v7889_v35 = vld [vmem:[%s14015_s10 + $0x860] sm:$0xff] }
 0xf95   :  { %5981 = vmatpush.msra.mxu0 %v7751_v34  ;;  %6098 = vmatpush.msra.mxu3 %v7792_v58  ;;  %v7815_v34 = vld [vmem:[%s14015_s10 + $0x630] sm:$0xff] }
 0xf96   :  { %6197 = vmatpush.msrb.mxu1 %v7828_v45  ;;  %v7861_v58 = vld [vmem:[%s14015_s10 + $0x790] sm:$0xff] }
 0xf97   :  { %5982 = vmatpush.msra.mxu0 %v7749_v52  ;;  %6099 = vmatpush.msra.mxu3 %v7790_v31  ;;  %v7813_v52 = vld [vmem:[%s14015_s10 + $0x620] sm:$0xff]  ;;  %v7887_v45 = vld [vmem:[%s14015_s10 + $0x850] sm:$0xff] }
 0xf98   :  { %6198 = vmatpush.msrb.mxu1 %v7826_v26  ;;  %v7859_v31 = vld [vmem:[%s14015_s10 + $0x780] sm:$0xff]  ;;  %v7898_v26 = vld [vmem:[%s14015_s10 + $0x8a8] sm:$0xff] }
 0xf99   :  { %5983 = vmatpush.msra.mxu0 %v7747_v24  ;;  %6100 = vmatpush.msra.mxu3 %v7788_v30  ;;  %v7811_v24 = vld [vmem:[%s14015_s10 + $0x610] sm:$0xff] }
 0xf9a   :  { %6199 = vmatpush.msrb.mxu1 %v7824_v42  ;;  %v7857_v30 = vld [vmem:[%s14015_s10 + $0x770] sm:$0xff] }
 0xf9b   :  { %5984 = vmatpush.msra.mxu0 %v7745_v20  ;;  %6101 = vmatpush.msra.mxu3 %v7786_v22  ;;  %v7818_v20 = vld [vmem:[%s14015_s10 + $0x648] sm:$0xff]  ;;  %v7858_v22 = vld [vmem:[%s14015_s10 + $0x778] sm:$0xff] }
 0xf9c   :  { %6200 = vmatpush.msrb.mxu1 %v7822_v13  ;;  %v7894_v13 = vld [vmem:[%s14015_s10 + $0x888] sm:$0xff] }
 0xf9d   :  { %5985 = vmatpush.msra.mxu0 %v7743_v49  ;;  %6102 = vmatpush.msra.mxu3 %v7784_v61  ;;  %v7870_v49 = vld [vmem:[%s14015_s10 + $0x7d8] sm:$0xff]  ;;  %v7855_v61 = vld [vmem:[%s14015_s10 + $0x760] sm:$0xff] }
 0xf9e   :  { %6201 = vmatpush.msrb.mxu1 %v7820_v40  ;;  %v7890_v40 = vld [vmem:[%s14015_s10 + $0x868] sm:$0xff] }
 0xf9f   :  { %5986 = vmatpush.msra.mxu0 %v7741_v51  ;;  %6103 = vmatpush.msra.mxu3 %v7782_v38  ;;  %v7865_v51 = vld [vmem:[%s14015_s10 + $0x7b0] sm:$0xff]  ;;  %v7856_v38 = vld [vmem:[%s14015_s10 + $0x768] sm:$0xff] }
 0xfa0   :  { %6202 = vmatpush.msrb.mxu1 %v7818_v20  ;;  %v7885_v20 = vld [vmem:[%s14015_s10 + $0x840] sm:$0xff] }
 0xfa1   :  { %6130 = vmatpush.msrb.mxu0 %v12695_v57  ;;  %6104 = vmatpush.msra.mxu3 %v7780_v3  ;;  %v7853_v3 = vld [vmem:[%s14015_s10 + $0x750] sm:$0xff] }
 0xfa3   :  { %6131 = vmatpush.msrb.mxu0 %v12697_v8  ;;  %6105 = vmatpush.msra.mxu3 %v7778_v28  ;;  %v7854_v28 = vld [vmem:[%s14015_s10 + $0x758] sm:$0xff] }
 0xfa5   :  { %6132 = vmatpush.msrb.mxu0 %v12702_v46  ;;  %6106 = vmatpush.msra.mxu3 %v7776_v36  ;;  %v7851_v36 = vld [vmem:[%s14015_s10 + $0x740] sm:$0xff] }
 0xfa7   :  { %6133 = vmatpush.msrb.mxu0 %v12707_v41  ;;  %6271 = vmatpush.msrb.mxu3 %v7873_v39 }
 0xfa9   :  { %6272 = vmatpush.msrb.mxu3 %v7871_v50 }
 0xfab   :  { %6273 = vmatpush.msrb.mxu3 %v7869_v53  ;;  %v7886_v53 = vld [vmem:[%s14015_s10 + $0x848] sm:$0xff] }
 0xffd   :  { %v5788_v54 = vpop.f32.mrf.mxu0 }
 0xffe   :  { %v5811_v25 = vadd.f32 %v5788_v54, %v13127_v14  ;;  %v7852_v54 = vld [vmem:[%s14015_s10 + $0x748] sm:$0xff] }
0x1005   :  { %v5935_v10 = vpop.f32.mrf.mxu0 }
0x1006   :  { %5987 = vmatmul.f32.vlgmr.msra.gmra.mxu0 %v5935_v10  ;;  %6007 = vmatmul.f32.vlgmr.msra.gmra.mxu1 %v5935_v10  ;;  %v7847_v10 = vld [vmem:[%s14015_s10 + $0x720] sm:$0xff] }
0x1007   :  { %6171 = vmatpush.msra.mxu0 %v7839_v29  ;;  %v7850_v29 = vld [vmem:[%s14015_s10 + $0x738] sm:$0xff] }
0x1008   :  { %v5888_v44 = vpop.f32.mrf.mxu3 }
0x1009   :  { %6172 = vmatpush.msra.mxu0 %v7837_v59  ;;  %v13301_v14 = vadd.f32 %v5888_v44, %v5811_v25  ;;  %v7849_v25 = vld [vmem:[%s14015_s10 + $0x730] sm:$0xff]  ;;  %v7848_v59 = vld [vmem:[%s14015_s10 + $0x728] sm:$0xff] }
0x100a   :  { %v7845_v44 = vld [vmem:[%s14015_s10 + $0x710] sm:$0xff] }
0x100b   :  { %6173 = vmatpush.msra.mxu0 %v7835_v18  ;;  %v7846_v18 = vld [vmem:[%s14015_s10 + $0x718] sm:$0xff] }
0x100d   :  { %6174 = vmatpush.msra.mxu0 %v7833_v1  ;;  %v7843_v1 = vld [vmem:[%s14015_s10 + $0x700] sm:$0xff] }
0x100e   :  { %7808 = vmatmul.msk.f32.vlgmr.msrb.gmra.mxu0 %vm1248_vm2, %v7807_v16  ;;  %v7844_v16 = vld [vmem:[%s14015_s10 + $0x708] sm:$0xff] }
0x100f   :  { %6175 = vmatpush.msra.mxu0 %v7831_v7  ;;  %v7907_v7 = vld [vmem:[%s14015_s10 + $0x8f0] sm:$0xff] }
0x1011   :  { %6176 = vmatpush.msra.mxu0 %v7829_v5  ;;  %v6035_v63 = vpop.f32.mrf.mxu3  ;;  %v7901_v5 = vld [vmem:[%s14015_s10 + $0x8c0] sm:$0xff] }
0x1012   :  { %6087 = vmatmul.f32.vlgmr.msra.gmra.mxu2 %v6035_v63  ;;  %6107 = vmatmul.f32.vlgmr.msra.gmra.mxu3 %v6035_v63  ;;  %v7895_v63 = vld [vmem:[%s14015_s10 + $0x890] sm:$0xff] }
0x1013   :  { %6177 = vmatpush.msra.mxu0 %v7827_v47  ;;  %6291 = vmatpush.msra.mxu2 %v7874_v9  ;;  %v7899_v47 = vld [vmem:[%s14015_s10 + $0x8b0] sm:$0xff]  ;;  %v7908_v9 = vld [vmem:[%s14015_s10 + $0x8f8] sm:$0xff] }
0x1015   :  { %6178 = vmatpush.msra.mxu0 %v7825_v33  ;;  %6292 = vmatpush.msra.mxu2 %v7872_v62  ;;  %v7906_v33 = vld [vmem:[%s14015_s10 + $0x8e8] sm:$0xff]  ;;  %v13532_v62 = vpop.f32.mrf.mxu2 }
0x1017   :  { %6179 = vmatpush.msra.mxu0 %v7823_v11  ;;  %6293 = vmatpush.msra.mxu2 %v7870_v49  ;;  %v7904_v11 = vld [vmem:[%s14015_s10 + $0x8d8] sm:$0xff]  ;;  %v7883_v49 = vld [vmem:[%s14015_s10 + $0x830] sm:$0xff] }
0x1019   :  { %6180 = vmatpush.msra.mxu0 %v7821_v43  ;;  %v7902_v43 = vld [vmem:[%s14015_s10 + $0x8c8] sm:$0xff] }
0x101a   :  { %7842 = vmatmul.msk.f32.vlgmr.msrb.gmra.mxu2 %vm1248_vm2, %v7841_v19  ;;  %v7875_v19 = vld [vmem:[%s14014_s9 + $0x40] sm:$0xff] }
0x101b   :  { %6181 = vmatpush.msra.mxu0 %v7819_v32  ;;  %v7900_v32 = vld [vmem:[%s14015_s10 + $0x8b8] sm:$0xff] }
0x101d   :  { %6182 = vmatpush.msra.mxu0 %v7817_v23 }
0x101f   :  { %6183 = vmatpush.msra.mxu0 %v7815_v34  ;;  %v7896_v34 = vld [vmem:[%s14015_s10 + $0x898] sm:$0xff] }
0x1021   :  { %6184 = vmatpush.msra.mxu0 %v7813_v52  ;;  %v7892_v52 = vld [vmem:[%s14015_s10 + $0x878] sm:$0xff] }
0x1023   :  { %6185 = vmatpush.msra.mxu0 %v7811_v24 }
0x1025   :  { %6186 = vmatpush.msra.mxu0 %v7809_v6  ;;  %v7888_v6 = vld [vmem:[%s14015_s10 + $0x858] sm:$0xff] }
0x1027   :  { %6330 = vmatpush.msrb.mxu0 %v12695_v57  ;;  %v7816_v57 = vld [vmem:[%s14015_s10 + $0x638] sm:$0xff] }
0x1028   :  { %6203 = vmatpush.msrb.mxu1 %v7816_v57  ;;  %v7884_v57 = vld [vmem:[%s14015_s10 + $0x838] sm:$0xff] }
0x1029   :  { %6331 = vmatpush.msrb.mxu0 %v12697_v8  ;;  %v7867_v8 = vld [vmem:[%s14015_s10 + $0x7c0] sm:$0xff] }
0x102a   :  { %6274 = vmatpush.msrb.mxu3 %v7867_v8  ;;  %v7881_v8 = vld [vmem:[%s14015_s10 + $0x820] sm:$0xff] }
0x102b   :  { %6332 = vmatpush.msrb.mxu0 %v12702_v46  ;;  %v7868_v46 = vld [vmem:[%s14015_s10 + $0x7c8] sm:$0xff] }
0x102c   :  { %6294 = vmatpush.msra.mxu2 %v7868_v46  ;;  %6275 = vmatpush.msrb.mxu3 %v7865_v51  ;;  %v7882_v46 = vld [vmem:[%s14015_s10 + $0x828] sm:$0xff]  ;;  %v7880_v51 = vld [vmem:[%s14015_s10 + $0x818] sm:$0xff] }
0x102d   :  { %6333 = vmatpush.msrb.mxu0 %v12707_v41  ;;  %v7814_v41 = vld [vmem:[%s14015_s10 + $0x628] sm:$0xff] }
0x102e   :  { %6204 = vmatpush.msrb.mxu1 %v7814_v41  ;;  %6295 = vmatpush.msra.mxu2 %v7866_v37  ;;  %v7879_v41 = vld [vmem:[%s14015_s10 + $0x810] sm:$0xff]  ;;  %v7877_v37 = vld [vmem:[%s14015_s10 + $0x800] sm:$0xff] }
0x102f   :  { %6276 = vmatpush.msrb.mxu3 %v7863_v27  ;;  %v6436_v27 = vld [vmem:[%s14017_s12 + $0x78] sm:$0xff] }
0x1030   :  { %6205 = vmatpush.msrb.mxu1 %v7812_v12  ;;  %6296 = vmatpush.msra.mxu2 %v7864_v48  ;;  %v7878_v12 = vld [vmem:[%s14015_s10 + $0x808] sm:$0xff]  ;;  %v6452_v48 = vld [vmem:[%s14017_s12 + $0xf8] sm:$0xff] }
0x1031   :  { %6277 = vmatpush.msrb.mxu3 %v7861_v58  ;;  %v7940_v58 = vld [vmem:[%s14017_s12 + $0x1f8] sm:$0xff] }
0x1032   :  { %6206 = vmatpush.msrb.mxu1 %v7810_v56  ;;  %6297 = vmatpush.msra.mxu2 %v7862_v4  ;;  %v7924_v56 = vld [vmem:[%s14017_s12 + $0x178] sm:$0xff]  ;;  %v6435_v4 = vld [vmem:[%s14017_s12 + $0x70] sm:$0xff] }
0x1033   :  { %6278 = vmatpush.msrb.mxu3 %v7859_v31  ;;  %v6451_v31 = vld [vmem:[%s14017_s12 + $0xf0] sm:$0xff] }
0x1034   :  { %6298 = vmatpush.msra.mxu2 %v7860_v60  ;;  %6371 = vmatpush.msra.mxu1 %v7907_v7  ;;  %v7923_v60 = vld [vmem:[%s14017_s12 + $0x170] sm:$0xff] }
0x1035   :  { %6279 = vmatpush.msrb.mxu3 %v7857_v30  ;;  %v7939_v30 = vld [vmem:[%s14017_s12 + $0x1f0] sm:$0xff] }
0x1036   :  { %6299 = vmatpush.msra.mxu2 %v7858_v22  ;;  %6372 = vmatpush.msra.mxu1 %v7905_v2  ;;  %v6434_v22 = vld [vmem:[%s14017_s12 + $0x68] sm:$0xff]  ;;  %v6447_v7 = vld [vmem:[%s14017_s12 + $0xd0] sm:$0xff] }
0x1037   :  { %6280 = vmatpush.msrb.mxu3 %v7855_v61  ;;  %v6450_v61 = vld [vmem:[%s14017_s12 + $0xe8] sm:$0xff]  ;;  %v7919_v2 = vld [vmem:[%s14017_s12 + $0x150] sm:$0xff] }
0x1038   :  { %6300 = vmatpush.msra.mxu2 %v7856_v38  ;;  %6373 = vmatpush.msra.mxu1 %v7903_v55  ;;  %v7922_v38 = vld [vmem:[%s14017_s12 + $0x168] sm:$0xff]  ;;  %v7935_v55 = vld [vmem:[%s14017_s12 + $0x1d0] sm:$0xff] }
0x1039   :  { %6281 = vmatpush.msrb.mxu3 %v7853_v3  ;;  %v7938_v3 = vld [vmem:[%s14017_s12 + $0x1e8] sm:$0xff] }
0x103a   :  { %6301 = vmatpush.msra.mxu2 %v7854_v28  ;;  %6374 = vmatpush.msra.mxu1 %v7901_v5  ;;  %v6433_v28 = vld [vmem:[%s14017_s12 + $0x60] sm:$0xff]  ;;  %v6430_v5 = vld [vmem:[%s14017_s12 + $0x48] sm:$0xff] }
0x103b   :  { %6282 = vmatpush.msrb.mxu3 %v7851_v36  ;;  %v6449_v36 = vld [vmem:[%s14017_s12 + $0xe0] sm:$0xff] }
0x103c   :  { %6302 = vmatpush.msra.mxu2 %v7852_v54  ;;  %6375 = vmatpush.msra.mxu1 %v7899_v47  ;;  %v7921_v54 = vld [vmem:[%s14017_s12 + $0x160] sm:$0xff]  ;;  %v7934_v47 = vld [vmem:[%s14017_s12 + $0x1c8] sm:$0xff] }
0x103d   :  { %6283 = vmatpush.msrb.mxu3 %v7849_v25  ;;  %v7937_v25 = vld [vmem:[%s14017_s12 + $0x1e0] sm:$0xff] }
0x103e   :  { %6303 = vmatpush.msra.mxu2 %v7850_v29  ;;  %6376 = vmatpush.msra.mxu1 %v7897_v15  ;;  %v6432_v29 = vld [vmem:[%s14017_s12 + $0x58] sm:$0xff]  ;;  %v6429_v15 = vld [vmem:[%s14017_s12 + $0x40] sm:$0xff] }
0x103f   :  { %6284 = vmatpush.msrb.mxu3 %v7847_v10  ;;  %v6448_v10 = vld [vmem:[%s14017_s12 + $0xd8] sm:$0xff] }
0x1040   :  { %6304 = vmatpush.msra.mxu2 %v7848_v59  ;;  %6377 = vmatpush.msra.mxu1 %v7895_v63  ;;  %v6445_v63 = vld [vmem:[%s14017_s12 + $0xc0] sm:$0xff] }
0x1041   :  { %6285 = vmatpush.msrb.mxu3 %v7845_v44  ;;  %v7920_v44 = vld [vmem:[%s14017_s12 + $0x158] sm:$0xff] }
0x1042   :  { %6305 = vmatpush.msra.mxu2 %v7846_v18  ;;  %v7936_v18 = vld [vmem:[%s14017_s12 + $0x1d8] sm:$0xff] }
0x1043   :  { %6286 = vmatpush.msrb.mxu3 %v7843_v1 }
0x1044   :  { %6306 = vmatpush.msra.mxu2 %v7844_v16  ;;  %v6431_v16 = vld [vmem:[%s14017_s12 + $0x50] sm:$0xff] }
0x1045   :  { %6492 = vmatpush.msra.mxu3 %v7924_v56  ;;  %v6437_v56 = vld [vmem:[%s14017_s12 + $0x80] sm:$0xff] }
0x1046   :  { %6512 = vmatpush.msrb.mxu2 %v7940_v58  ;;  %v7988_v58 = vld [vmem:[%s14017_s12 + $0x378] sm:$0xff] }
0x1047   :  { %6493 = vmatpush.msra.mxu3 %v7923_v60  ;;  %v7925_v60 = vld [vmem:[%s14017_s12 + $0x180] sm:$0xff] }
0x1048   :  { %6513 = vmatpush.msrb.mxu2 %v7939_v30  ;;  %v7956_v30 = vld [vmem:[%s14017_s12 + $0x278] sm:$0xff] }
0x1049   :  { %6494 = vmatpush.msra.mxu3 %v7922_v38  ;;  %v8003_v38 = vld [vmem:[%s14017_s12 + $0x3f0] sm:$0xff] }
0x104a   :  { %6514 = vmatpush.msrb.mxu2 %v7938_v3  ;;  %v7955_v3 = vld [vmem:[%s14017_s12 + $0x270] sm:$0xff] }
0x104b   :  { %6495 = vmatpush.msra.mxu3 %v7921_v54  ;;  %v8002_v54 = vld [vmem:[%s14017_s12 + $0x3e8] sm:$0xff] }
0x104c   :  { %6515 = vmatpush.msrb.mxu2 %v7937_v25  ;;  %v7954_v25 = vld [vmem:[%s14017_s12 + $0x268] sm:$0xff] }
0x104d   :  { %6496 = vmatpush.msra.mxu3 %v7920_v44  ;;  %v7953_v44 = vld [vmem:[%s14017_s12 + $0x260] sm:$0xff] }
0x104e   :  { %6516 = vmatpush.msrb.mxu2 %v7936_v18  ;;  %v7969_v18 = vld [vmem:[%s14017_s12 + $0x2e0] sm:$0xff] }
0x104f   :  { %6497 = vmatpush.msra.mxu3 %v7919_v2  ;;  %v7952_v2 = vld [vmem:[%s14017_s12 + $0x258] sm:$0xff] }
0x1050   :  { %6517 = vmatpush.msrb.mxu2 %v7935_v55  ;;  %v7968_v55 = vld [vmem:[%s14017_s12 + $0x2d8] sm:$0xff] }
0x1052   :  { %6518 = vmatpush.msrb.mxu2 %v7934_v47  ;;  %v7967_v47 = vld [vmem:[%s14017_s12 + $0x2d0] sm:$0xff] }
0x1083   :  { %v5988_v17 = vpop.f32.mrf.mxu0 }
0x1084   :  { %v6011_v39 = vadd.f32 %v5988_v17, %v13301_v14  ;;  %v7893_v14 = vld [vmem:[%s14015_s10 + $0x880] sm:$0xff]  ;;  %v6446_v17 = vld [vmem:[%s14017_s12 + $0xc8] sm:$0xff] }
0x1085   :  { %6378 = vmatpush.msra.mxu1 %v7893_v14  ;;  %v7933_v14 = vld [vmem:[%s14017_s12 + $0x1c0] sm:$0xff] }
0x1086   :  { %6519 = vmatpush.msrb.mxu2 %v7933_v14  ;;  %v7966_v14 = vld [vmem:[%s14017_s12 + $0x2c8] sm:$0xff] }
0x1087   :  { %6379 = vmatpush.msra.mxu1 %v7891_v0  ;;  %v6444_v0 = vld [vmem:[%s14017_s12 + $0xb8] sm:$0xff] }
0x1089   :  { %6380 = vmatpush.msra.mxu1 %v7889_v35  ;;  %v7932_v35 = vld [vmem:[%s14017_s12 + $0x1b8] sm:$0xff] }
0x108a   :  { %6520 = vmatpush.msrb.mxu2 %v7932_v35  ;;  %v7980_v35 = vld [vmem:[%s14017_s12 + $0x338] sm:$0xff] }
0x108b   :  { %v6135_v50 = vpop.f32.mrf.mxu0  ;;  %6381 = vmatpush.msra.mxu1 %v7887_v45  ;;  %v6443_v45 = vld [vmem:[%s14017_s12 + $0xb0] sm:$0xff] }
0x108c   :  { %6187 = vmatmul.f32.vlgmr.msra.gmra.mxu0 %v6135_v50  ;;  %6207 = vmatmul.f32.vlgmr.msrb.gmra.mxu1 %v6135_v50 }
0x108d   :  { %6391 = vmatpush.msra.mxu0 %v7908_v9  ;;  %6382 = vmatpush.msra.mxu1 %v7885_v20  ;;  %v7917_v9 = vld [vmem:[%s14017_s12 + $0x140] sm:$0xff]  ;;  %v6440_v20 = vld [vmem:[%s14017_s12 + $0x98] sm:$0xff] }
0x108f   :  { %6392 = vmatpush.msra.mxu0 %v7906_v33  ;;  %6383 = vmatpush.msra.mxu1 %v7883_v49  ;;  %v6428_v33 = vld [vmem:[%s14017_s12 + $0x38] sm:$0xff] }
0x1090   :  { %v7928_v49 = vld [vmem:[%s14017_s12 + $0x198] sm:$0xff] }
0x1091   :  { %6393 = vmatpush.msra.mxu0 %v7904_v11  ;;  %6384 = vmatpush.msra.mxu1 %v7881_v8  ;;  %v7916_v11 = vld [vmem:[%s14017_s12 + $0x138] sm:$0xff]  ;;  %v6439_v8 = vld [vmem:[%s14017_s12 + $0x90] sm:$0xff] }
0x1093   :  { %6394 = vmatpush.msra.mxu0 %v7902_v43  ;;  %6385 = vmatpush.msra.mxu1 %v7879_v41  ;;  %v6427_v43 = vld [vmem:[%s14017_s12 + $0x30] sm:$0xff] }
0x1094   :  { %7876 = vmatmul.msk.f32.vlgmr.msrb.gmra.mxu0 %vm1248_vm2, %v7875_v19  ;;  %v7915_v19 = vld [vmem:[%s14017_s12 + $0x130] sm:$0xff] }
0x1095   :  { %v6088_v23 = vpop.f32.mrf.mxu2  ;;  %6395 = vmatpush.msra.mxu0 %v7900_v32  ;;  %6386 = vmatpush.msra.mxu1 %v7877_v37  ;;  %v7931_v32 = vld [vmem:[%s14017_s12 + $0x1b0] sm:$0xff]  ;;  %v6438_v37 = vld [vmem:[%s14017_s12 + $0x88] sm:$0xff] }
0x1096   :  { %v13556_v42 = vadd.f32 %v6088_v23, %v6011_v39  ;;  %v7918_v39 = vld [vmem:[%s14017_s12 + $0x148] sm:$0xff]  ;;  %6521 = vmatpush.msrb.mxu2 %v7931_v32  ;;  %v7927_v41 = vld [vmem:[%s14017_s12 + $0x190] sm:$0xff]  ;;  %v7964_v32 = vld [vmem:[%s14017_s12 + $0x2b8] sm:$0xff] }
0x1097   :  { %6396 = vmatpush.msra.mxu0 %v7898_v26  ;;  %6532 = vmatpush.msrb.mxu1 %v6436_v27  ;;  %v6426_v26 = vld [vmem:[%s14017_s12 + $0x28] sm:$0xff] }
0x1098   :  { %6498 = vmatpush.msra.mxu3 %v7918_v39  ;;  %v6442_v23 = vld [vmem:[%s14017_s12 + $0xa8] sm:$0xff]  ;;  %v7951_v39 = vld [vmem:[%s14017_s12 + $0x250] sm:$0xff] }
0x1099   :  { %6397 = vmatpush.msra.mxu0 %v7896_v34  ;;  %6533 = vmatpush.msrb.mxu1 %v6435_v4  ;;  %v7930_v34 = vld [vmem:[%s14017_s12 + $0x1a8] sm:$0xff]  ;;  %v8004_v4 = vld [vmem:[%s14017_s12 + $0x3f8] sm:$0xff] }
0x109a   :  { %6499 = vmatpush.msra.mxu3 %v7917_v9  ;;  %6522 = vmatpush.msrb.mxu2 %v7930_v34  ;;  %v7926_v27 = vld [vmem:[%s14017_s12 + $0x188] sm:$0xff]  ;;  %v7963_v34 = vld [vmem:[%s14017_s12 + $0x2b0] sm:$0xff] }
0x109b   :  { %6398 = vmatpush.msra.mxu0 %v7894_v13  ;;  %6534 = vmatpush.msrb.mxu1 %v6434_v22  ;;  %v6425_v13 = vld [vmem:[%s14017_s12 + $0x20] sm:$0xff]  ;;  %v7972_v22 = vld [vmem:[%s14017_s12 + $0x2f8] sm:$0xff]  ;;  %v7950_v9 = vld [vmem:[%s14017_s12 + $0x248] sm:$0xff] }
0x109c   :  { %6500 = vmatpush.msra.mxu3 %v7916_v11  ;;  %v7965_v11 = vld [vmem:[%s14017_s12 + $0x2c0] sm:$0xff] }
0x109d   :  { %v6235_v24 = vpop.f32.mrf.mxu2  ;;  %6399 = vmatpush.msra.mxu0 %v7892_v52  ;;  %6535 = vmatpush.msrb.mxu1 %v6433_v28  ;;  %v6441_v52 = vld [vmem:[%s14017_s12 + $0xa0] sm:$0xff]  ;;  %v7971_v28 = vld [vmem:[%s14017_s12 + $0x2f0] sm:$0xff] }
0x109e   :  { %6287 = vmatmul.f32.vlgmr.msrb.gmra.mxu3 %v6235_v24  ;;  %6307 = vmatmul.f32.vlgmr.msra.gmra.mxu2 %v6235_v24  ;;  %v7929_v24 = vld [vmem:[%s14017_s12 + $0x1a0] sm:$0xff] }
0x109f   :  { %6400 = vmatpush.msra.mxu0 %v7890_v40  ;;  %6536 = vmatpush.msrb.mxu1 %v6432_v29  ;;  %v7913_v40 = vld [vmem:[%s14017_s12 + $0x120] sm:$0xff]  ;;  %v7970_v29 = vld [vmem:[%s14017_s12 + $0x2e8] sm:$0xff] }
0x10a0   :  { %6501 = vmatpush.msra.mxu3 %v7915_v19  ;;  %6523 = vmatpush.msrb.mxu2 %v7929_v24  ;;  %v7948_v19 = vld [vmem:[%s14017_s12 + $0x238] sm:$0xff]  ;;  %v7962_v24 = vld [vmem:[%s14017_s12 + $0x2a8] sm:$0xff] }
0x10a1   :  { %6401 = vmatpush.msra.mxu0 %v7888_v6  ;;  %6537 = vmatpush.msrb.mxu1 %v6431_v16  ;;  %v6424_v6 = vld [vmem:[%s14017_s12 + $0x18] sm:$0xff] }
0x10a2   :  { %6524 = vmatpush.msrb.mxu2 %v7928_v49  ;;  %v7984_v16 = vld [vmem:[%s14017_s12 + $0x358] sm:$0xff]  ;;  %v7961_v49 = vld [vmem:[%s14017_s12 + $0x2a0] sm:$0xff] }
0x10a3   :  { %6402 = vmatpush.msra.mxu0 %v7886_v53  ;;  %6538 = vmatpush.msrb.mxu1 %v6430_v5  ;;  %v7912_v53 = vld [vmem:[%s14017_s12 + $0x118] sm:$0xff]  ;;  %v7983_v5 = vld [vmem:[%s14017_s12 + $0x350] sm:$0xff] }
0x10a4   :  { %6525 = vmatpush.msrb.mxu2 %v7927_v41  ;;  %v7960_v41 = vld [vmem:[%s14017_s12 + $0x298] sm:$0xff] }
0x10a5   :  { %6403 = vmatpush.msra.mxu0 %v7884_v57  ;;  %6539 = vmatpush.msrb.mxu1 %v6429_v15  ;;  %v6423_v57 = vld [vmem:[%s14017_s12 + $0x10] sm:$0xff]  ;;  %v7982_v15 = vld [vmem:[%s14017_s12 + $0x348] sm:$0xff] }
0x10a6   :  { %6526 = vmatpush.msrb.mxu2 %v7926_v27  ;;  %v7943_v27 = vld [vmem:[%s14017_s12 + $0x210] sm:$0xff] }
0x10a7   :  { %6404 = vmatpush.msra.mxu0 %v7882_v46  ;;  %6540 = vmatpush.msrb.mxu1 %v6428_v33  ;;  %v7911_v46 = vld [vmem:[%s14017_s12 + $0x110] sm:$0xff]  ;;  %v7997_v33 = vld [vmem:[%s14017_s12 + $0x3c0] sm:$0xff] }
0x10a8   :  { %6527 = vmatpush.msrb.mxu2 %v7925_v60  ;;  %v7973_v60 = vld [vmem:[%s14017_s12 + $0x300] sm:$0xff] }
0x10a9   :  { %6405 = vmatpush.msra.mxu0 %v7880_v51  ;;  %6541 = vmatpush.msrb.mxu1 %v6427_v43  ;;  %v6422_v51 = vld [vmem:[%s14017_s12 + $0x8] sm:$0xff]  ;;  %v7996_v43 = vld [vmem:[%s14017_s12 + $0x3b8] sm:$0xff] }
0x10aa   :  { %6629 = vmatpush.msra.mxu2 %v7972_v22  ;;  %v7941_v22 = vld [vmem:[%s14017_s12 + $0x200] sm:$0xff] }
0x10ab   :  { %6406 = vmatpush.msra.mxu0 %v7878_v12  ;;  %6542 = vmatpush.msrb.mxu1 %v6426_v26  ;;  %v7910_v12 = vld [vmem:[%s14017_s12 + $0x108] sm:$0xff]  ;;  %v7979_v26 = vld [vmem:[%s14017_s12 + $0x330] sm:$0xff] }
0x10ac   :  { %6630 = vmatpush.msra.mxu2 %v7971_v28  ;;  %v6108_v28 = vpop.f32.mrf.mxu3 }
0x10ad   :  { %6552 = vmatpush.msrb.mxu0 %v6452_v48  ;;  %6543 = vmatpush.msrb.mxu1 %v6425_v13  ;;  %v6421_v48 = vld [vmem:[%s14017_s12] sm:$0xff]  ;;  %v7978_v13 = vld [vmem:[%s14017_s12 + $0x328] sm:$0xff] }
0x10ae   :  { %6631 = vmatpush.msra.mxu2 %v7970_v29 }
0x10af   :  { %6553 = vmatpush.msrb.mxu0 %v6451_v31  ;;  %6544 = vmatpush.msrb.mxu1 %v6424_v6  ;;  %v7909_v31 = vld [vmem:[%s14017_s12 + $0x100] sm:$0xff] }
0x10b0   :  { %6632 = vmatpush.msra.mxu2 %v7969_v18  ;;  %v7977_v6 = vld [vmem:[%s14017_s12 + $0x320] sm:$0xff] }
0x10b1   :  { %6554 = vmatpush.msrb.mxu0 %v6450_v61  ;;  %6545 = vmatpush.msrb.mxu1 %v6423_v57  ;;  %v7987_v61 = vld [vmem:[%s14017_s12 + $0x370] sm:$0xff]  ;;  %v7976_v57 = vld [vmem:[%s14017_s12 + $0x318] sm:$0xff]  ;;  %v6413_v18 = vld [vmem:[%s14016_s11] sm:$0x3] }
0x10b2   :  { %6633 = vmatpush.msra.mxu2 %v7968_v55  ;;  %v6415_v55 = vperm.slane %v6413_v18, 0 }
0x10b3   :  { %6555 = vmatpush.msrb.mxu0 %v6449_v36  ;;  %6546 = vmatpush.msrb.mxu1 %v6422_v51  ;;  %v7986_v36 = vld [vmem:[%s14017_s12 + $0x368] sm:$0xff] }
0x10b4   :  { %6634 = vmatpush.msra.mxu2 %v7967_v47 }
0x10b5   :  { %6556 = vmatpush.msrb.mxu0 %v6448_v10  ;;  %6547 = vmatpush.msrb.mxu1 %v6421_v48  ;;  %v7985_v10 = vld [vmem:[%s14017_s12 + $0x360] sm:$0xff]  ;;  %v7959_v48 = vld [vmem:[%s14017_s12 + $0x290] sm:$0xff] }
0x10b6   :  { %6635 = vmatpush.msra.mxu2 %v7966_v14 }
0x10b7   :  { %6557 = vmatpush.msrb.mxu0 %v6447_v7  ;;  %v8000_v7 = vld [vmem:[%s14017_s12 + $0x3d8] sm:$0xff] }
0x10b8   :  { %6636 = vmatpush.msra.mxu2 %v7965_v11 }
0x10b9   :  { %6558 = vmatpush.msrb.mxu0 %v6446_v17  ;;  %v7999_v17 = vld [vmem:[%s14017_s12 + $0x3d0] sm:$0xff] }
0x10ba   :  { %6637 = vmatpush.msra.mxu2 %v7964_v32 }
0x10bb   :  { %6559 = vmatpush.msrb.mxu0 %v6445_v63  ;;  %v7998_v63 = vld [vmem:[%s14017_s12 + $0x3c8] sm:$0xff] }
0x10bc   :  { %6638 = vmatpush.msra.mxu2 %v7963_v34 }
0x10bd   :  { %6560 = vmatpush.msrb.mxu0 %v6444_v0  ;;  %v7949_v0 = vld [vmem:[%s14017_s12 + $0x240] sm:$0xff] }
0x10be   :  { %6639 = vmatpush.msra.mxu2 %v7962_v24  ;;  %v8041_v24 = vld [vmem:[%s14018_s13] ss:$0 sm:$0xff] }
0x10bf   :  { %6561 = vmatpush.msrb.mxu0 %v6443_v45  ;;  %v13900_v45 = vpop.f32.mrf.mxu1 }
0x10c0   :  { %6640 = vmatpush.msra.mxu2 %v7961_v49 }
0x10c1   :  { %6562 = vmatpush.msrb.mxu0 %v6442_v23  ;;  %v7995_v23 = vld [vmem:[%s14017_s12 + $0x3b0] sm:$0xff] }
0x10c2   :  { %6641 = vmatpush.msra.mxu2 %v7960_v41 }
0x10c3   :  { %6563 = vmatpush.msrb.mxu0 %v6441_v52  ;;  %v7994_v52 = vld [vmem:[%s14017_s12 + $0x3a8] sm:$0xff] }
0x10c4   :  { %6642 = vmatpush.msra.mxu2 %v7959_v48 }
0x10c5   :  { %6564 = vmatpush.msrb.mxu0 %v6440_v20  ;;  %v7993_v20 = vld [vmem:[%s14017_s12 + $0x3a0] sm:$0xff] }
0x10c7   :  { %6565 = vmatpush.msrb.mxu0 %v6439_v8  ;;  %v7992_v8 = vld [vmem:[%s14017_s12 + $0x398] sm:$0xff]  ;;  %v5808_v51 = vpop.f32.mrf.mxu1 }
0x10c9   :  { %6566 = vmatpush.msrb.mxu0 %v6438_v37  ;;  %v7975_v37 = vld [vmem:[%s14017_s12 + $0x310] sm:$0xff] }
0x10cb   :  { %6567 = vmatpush.msrb.mxu0 %v6437_v56  ;;  %v7974_v56 = vld [vmem:[%s14017_s12 + $0x308] sm:$0xff] }
0x1109   :  { %v6188_v59 = vpop.f32.mrf.mxu0 }
0x110a   :  { %v13664_v1 = vadd.f32 %v6188_v59, %v13556_v42  ;;  %v7914_v42 = vld [vmem:[%s14017_s12 + $0x128] sm:$0xff]  ;;  %v8001_v59 = vld [vmem:[%s14017_s12 + $0x3e0] sm:$0xff] }
0x110b   :  { %6502 = vmatpush.msra.mxu3 %v7914_v42  ;;  %v7947_v42 = vld [vmem:[%s14017_s12 + $0x230] sm:$0xff] }
0x110d   :  { %6503 = vmatpush.msra.mxu3 %v7913_v40  ;;  %v7946_v40 = vld [vmem:[%s14017_s12 + $0x228] sm:$0xff] }
0x110f   :  { %6504 = vmatpush.msra.mxu3 %v7912_v53  ;;  %v7945_v53 = vld [vmem:[%s14017_s12 + $0x220] sm:$0xff] }
0x1111   :  { %v6335_v50 = vpop.f32.mrf.mxu0  ;;  %6505 = vmatpush.msra.mxu3 %v7911_v46  ;;  %v7944_v46 = vld [vmem:[%s14017_s12 + $0x218] sm:$0xff] }
0x1112   :  { %6387 = vmatmul.f32.vlgmr.msra.gmra.mxu1 %v6335_v50  ;;  %6407 = vmatmul.f32.vlgmr.msra.gmra.mxu0 %v6335_v50  ;;  %v7981_v50 = vld [vmem:[%s14017_s12 + $0x340] sm:$0xff] }
0x1113   :  { %6506 = vmatpush.msra.mxu3 %v7910_v12  ;;  %6687 = vmatpush.msra.mxu1 %v7988_v58  ;;  %v7991_v12 = vld [vmem:[%s14017_s12 + $0x390] sm:$0xff]  ;;  %v7990_v58 = vld [vmem:[%s14017_s12 + $0x388] sm:$0xff] }
0x1114   :  { %6707 = vmatpush.msra.mxu0 %v8004_v4  ;;  %v7942_v4 = vld [vmem:[%s14017_s12 + $0x208] sm:$0xff] }
0x1115   :  { %6507 = vmatpush.msra.mxu3 %v7909_v31  ;;  %6688 = vmatpush.msra.mxu1 %v7987_v61  ;;  %v7958_v31 = vld [vmem:[%s14017_s12 + $0x288] sm:$0xff]  ;;  %v7957_v61 = vld [vmem:[%s14017_s12 + $0x280] sm:$0xff] }
0x1116   :  { %6708 = vmatpush.msra.mxu0 %v8003_v38  ;;  %6643 = vmatpush.msra.mxu2 %v7958_v31  ;;  %v6008_v38 = vpop.f32.mrf.mxu1 }
0x1117   :  { %6609 = vmatpush.msrb.mxu3 %v7956_v30  ;;  %6689 = vmatpush.msra.mxu1 %v7986_v36  ;;  %v7989_v30 = vld [vmem:[%s14017_s12 + $0x380] sm:$0xff] }
0x1118   :  { %6709 = vmatpush.msra.mxu0 %v8002_v54  ;;  %6644 = vmatpush.msra.mxu2 %v7957_v61 }
0x1119   :  { %6610 = vmatpush.msrb.mxu3 %v7955_v3  ;;  %6690 = vmatpush.msra.mxu1 %v7985_v10  ;;  %v5711_v3 = vadd.f32 %v13290_v21, %v13900_v45 }
0x111a   :  { %6710 = vmatpush.msra.mxu0 %v8001_v59 }
0x111b   :  { %6611 = vmatpush.msrb.mxu3 %v7954_v25  ;;  %6691 = vmatpush.msra.mxu1 %v7984_v16  ;;  %v5812_v36 = vadd.f32 %v5808_v51, %v5711_v3 }
0x111c   :  { %6711 = vmatpush.msra.mxu0 %v8000_v7 }
0x111d   :  { %6612 = vmatpush.msrb.mxu3 %v7953_v44  ;;  %6692 = vmatpush.msra.mxu1 %v7983_v5  ;;  %v5912_v54 = vadd.f32 %v13532_v62, %v5812_v36  ;;  %v6416_v5 = vperm.slane %v6413_v18, 1 }
0x111e   :  { %6712 = vmatpush.msra.mxu0 %v7999_v17  ;;  %v6208_v25 = vpop.f32.mrf.mxu1 }
0x111f   :  { %6613 = vmatpush.msrb.mxu3 %v7952_v2  ;;  %6693 = vmatpush.msra.mxu1 %v7982_v15  ;;  %v6012_v29 = vadd.f32 %v6008_v38, %v5912_v54 }
0x1120   :  { %6713 = vmatpush.msra.mxu0 %v7998_v63 }
0x1121   :  { %6614 = vmatpush.msrb.mxu3 %v7951_v39  ;;  %6694 = vmatpush.msra.mxu1 %v7981_v50  ;;  %v6112_v10 = vadd.f32 %v6108_v28, %v6012_v29  ;;  %v6288_v59 = vpop.f32.mrf.mxu3  ;;  %v6308_v44 = vpop.f32.mrf.mxu2 }
0x1122   :  { %6714 = vmatpush.msra.mxu0 %v7997_v33  ;;  %v6311_v7 = vadd.f32 %v6288_v59, %v13664_v1 }
0x1123   :  { %6615 = vmatpush.msrb.mxu3 %v7950_v9  ;;  %6695 = vmatpush.msra.mxu1 %v7980_v35  ;;  %v6212_v16 = vadd.f32 %v6208_v25, %v6112_v10 }
0x1124   :  { %6715 = vmatpush.msra.mxu0 %v7996_v43 }
0x1125   :  { %6616 = vmatpush.msrb.mxu3 %v7949_v0  ;;  %6696 = vmatpush.msra.mxu1 %v7979_v26  ;;  %v6312_v2 = vadd.f32 %v6308_v44, %v6212_v16 }
0x1126   :  { %6716 = vmatpush.msra.mxu0 %v7995_v23 }
0x1127   :  { %6617 = vmatpush.msrb.mxu3 %v7948_v19  ;;  %6697 = vmatpush.msra.mxu1 %v7978_v13 }
0x1128   :  { %6717 = vmatpush.msra.mxu0 %v7994_v52 }
0x1129   :  { %6618 = vmatpush.msrb.mxu3 %v7947_v42  ;;  %6698 = vmatpush.msra.mxu1 %v7977_v6 }
0x112a   :  { %6718 = vmatpush.msra.mxu0 %v7993_v20 }
0x112b   :  { %6619 = vmatpush.msrb.mxu3 %v7946_v40  ;;  %6699 = vmatpush.msra.mxu1 %v7976_v57 }
0x112c   :  { %6719 = vmatpush.msra.mxu0 %v7992_v8 }
0x112d   :  { %6620 = vmatpush.msrb.mxu3 %v7945_v53  ;;  %6700 = vmatpush.msra.mxu1 %v7975_v37 }
0x112e   :  { %6720 = vmatpush.msra.mxu0 %v7991_v12 }
0x112f   :  { %6621 = vmatpush.msrb.mxu3 %v7944_v46  ;;  %6701 = vmatpush.msra.mxu1 %v7974_v56 }
0x1130   :  { %6721 = vmatpush.msra.mxu0 %v7990_v58 }
0x1131   :  { %6622 = vmatpush.msrb.mxu3 %v7943_v27  ;;  %6702 = vmatpush.msra.mxu1 %v7973_v60 }
0x1132   :  { %6722 = vmatpush.msra.mxu0 %v7989_v30 }
0x1133   :  { %6623 = vmatpush.msrb.mxu3 %v7942_v4 }
0x1135   :  { %6624 = vmatpush.msrb.mxu3 %v7941_v22 }
0x118f   :  { %v6388_v21 = vpop.f32.mrf.mxu1  ;;  %v6408_v17 = vpop.f32.mrf.mxu0 }
0x1190   :  { %v6411_v39 = vadd.f32 %v6388_v21, %v6311_v7  ;;  %v6412_v47 = vadd.f32 %v6408_v17, %v6312_v2 }
0x1192   :  { %v6419_v62 = vadd.f32 %v6415_v55, %v6411_v39  ;;  %v6420_v15 = vadd.f32 %v6416_v5, %v6412_v47 }
0x1194   :  { %v6488_v63 = vrot.slane %v6419_v62, 2  ;;  %v6489_v9 = vrot.slane %v6420_v15, 2  ;;  %6548 = vmatmul.f32.vlgmr.msrb.gmra.mxu1 %v6419_v62  ;;  %6568 = vmatmul.f32.vlgmr.msrb.gmra.mxu0 %v6420_v15  ;;  %v6683_v14 = vrot.slane %v6419_v62, 6  ;;  %v6684_v50 = vrot.slane %v6420_v15, 6 }
0x1195   :  { %v6605_v33 = vrot.slane %v6419_v62, 4  ;;  %v6606_v0 = vrot.slane %v6420_v15, 4 }
0x1196   :  { %6508 = vmatmul.f32.vlgmr.msra.gmra.mxu3 %v6488_v63  ;;  %6528 = vmatmul.f32.vlgmr.msrb.gmra.mxu2 %v6489_v9 }
0x119c   :  { %6703 = vmatmul.f32.vlgmr.msra.gmra.mxu1 %v6683_v14  ;;  %6723 = vmatmul.f32.vlgmr.msra.gmra.mxu0 %v6684_v50 }
0x119e   :  { %6625 = vmatmul.f32.vlgmr.msrb.gmra.mxu3 %v6605_v33  ;;  %6645 = vmatmul.f32.vlgmr.msra.gmra.mxu2 %v6606_v0 }
0x1211   :  { %v6549_v1 = vpop.f32.mrf.mxu1  ;;  %v6569_v11 = vpop.f32.mrf.mxu0 }
0x1219   :  { %v6509_v35 = vpop.f32.mrf.mxu3  ;;  %v6529_v43 = vpop.f32.mrf.mxu2 }
0x121a   :  { %v6530_v45 = vadd.f32 %v6529_v43, %v6509_v35  ;;  %v6704_v32 = vpop.f32.mrf.mxu1  ;;  %v6724_v26 = vpop.f32.mrf.mxu0 }
0x121b   :  { %v6725_v52 = vadd.f32 %v6724_v26, %v6704_v32 }
0x121c   :  { %v6550_v19 = vadd.f32 %v6549_v1, %v6530_v45 }
0x121e   :  { %v6570_v34 = vadd.f32 %v6569_v11, %v6550_v19 }
0x1221   :  { %v6626_v23 = vpop.f32.mrf.mxu3  ;;  %v6646_v42 = vpop.f32.mrf.mxu2 }
0x1222   :  { %v6647_v13 = vadd.f32 %v6646_v42, %v6626_v23 }
0x1224   :  { %v6649_v40 = vadd.f32 %v6647_v13, %v6570_v34 }
0x1226   :  { %v6727_v6 = vadd.f32 %v6725_v52, %v6649_v40 }
0x1228   :  { %v6732_v20 = vadd.f32 %v8041_v24, %v6727_v6 }
0x122a   :  { %6734 = vst.msk [vmem:[#allocation2] sm:$0x3] %vm6733_vm4, %v6732_v20 }
0x122b   :  { %6745 = dma.vmem_to_hbm [thread:$0]  %s6741_s8, 32, %s6743_s18, [#allocation3]  }
0x122c   :  { %8067 = dma.done.wait [#allocation3], 32  }
0x122d   :  { %8068 = vsyncadd [#allocation3], 4294967264 }
0x122e   :  { %6750 = vsyncpa [#allocation3], 1 }

</bundles_post_ra>
